<compile_context>
chip_gen: v5e
topology: v5e:2x2
jax: 0.10.0
libtpu: 0.0.40
codegen_flags: <defaults>
</compile_context>

<pallas_src>
import functools

import jax
import jax.numpy as jnp
from jax.experimental import pallas as pl
from jax.experimental.pallas import tpu as pltpu

# Logical sizes of the torch module.
D_IN = 32 * 32 * 3          # 3072 (already a multiple of 128)
H1, H2, D_OUT = 1000, 100, 10
# Lane-dense padded sizes used inside the kernel.
H1_P, H2_P, OUT_P = 1024, 128, 128


def mlp_kernel(x_ref, w1_ref, b1_ref, w2_ref, b2_ref, w3_ref, b3_ref, o_ref):
    # x: (TM, 3072) f32; weights: bf16 (in, out); biases: f32 (1, out).
    x = x_ref[...]
    h1 = jnp.dot(x.astype(jnp.bfloat16), w1_ref[...],
                 preferred_element_type=jnp.float32) + b1_ref[...]
    h1 = jnp.maximum(h1, 0.0)                                      # F.relu (f32 VPU path)
    h2 = jnp.dot(h1.astype(jnp.bfloat16), w2_ref[...],
                 preferred_element_type=jnp.float32) + b2_ref[...]
    h2 = jnp.maximum(h2, 0.0)                                      # F.relu
    out = jnp.dot(h2.astype(jnp.bfloat16), w3_ref[...],
                  preferred_element_type=jnp.float32) + b3_ref[...]
    o_ref[...] = out.astype(o_ref.dtype)                           # lane-dense (TM, 128) store


def _round_up(n, m):
    return ((n + m - 1) // m) * m


@functools.partial(jax.jit, static_argnames=("tm",))
def _mlp_pallas(x_flat, w1, b1, w2, b2, w3, b3, *, tm):
    b_pad = x_flat.shape[0]
    grid = (b_pad // tm,)

    def resident(shape):
        # Same block for every batch tile -> weights stay resident in VMEM.
        return pl.BlockSpec(shape, lambda i: (0, 0))

    return pl.pallas_call(
        mlp_kernel,
        out_shape=jax.ShapeDtypeStruct((b_pad, OUT_P), jnp.float32),
        grid=grid,
        in_specs=[
            pl.BlockSpec((tm, D_IN), lambda i: (i, 0)),   # x tile, pipelined over batch
            resident((D_IN, H1_P)), resident((1, H1_P)),
            resident((H1_P, H2_P)), resident((1, H2_P)),
            resident((H2_P, OUT_P)), resident((1, OUT_P)),
        ],
        out_specs=pl.BlockSpec((tm, OUT_P), lambda i: (i, 0)),
        compiler_params=pltpu.CompilerParams(
            dimension_semantics=("parallel",),            # megacore-shard batch tiles on v7x
            vmem_limit_bytes=48 << 20,                    # fits v7x's 64 MiB physical VMEM
        ),
    )(x_flat, w1, b1, w2, b2, w3, b3)


def my_ass1net_forward(x_nchw, params, *, tm=128):
    """Forward pass of My_ass1net. x_nchw: (B, 3, 32, 32) f32 -> logits (B, 10) f32."""
    B = x_nchw.shape[0]
    x_flat = x_nchw.reshape(B, D_IN)        # same as torch x.view(-1, 32*32*3)
    if B < tm:                              # tiny batches: one tile, sublane-aligned
        tm = max(8, _round_up(B, 8))
    b_pad = _round_up(B, tm)
    if b_pad != B:
        x_flat = jnp.pad(x_flat, ((0, b_pad - B), (0, 0)))
    out = _mlp_pallas(x_flat, params["w1"], params["b1"], params["w2"],
                      params["b2"], params["w3"], params["b3"], tm=tm)
    return out[:B, :D_OUT]


def init_params(key):
    """nn.Linear-style init U(-1/sqrt(fan_in), 1/sqrt(fan_in)); weights pre-transposed to
    (in, out), zero-padded to lane-dense shapes, and stored as bf16. Biases stay f32."""
    dims = [(D_IN, H1, D_IN, H1_P), (H1, H2, H1_P, H2_P), (H2, D_OUT, H2_P, OUT_P)]
    params = {}
    keys = jax.random.split(key, 2 * len(dims))
    for i, (fi, fo, fi_p, fo_p) in enumerate(dims):
        bound = 1.0 / jnp.sqrt(float(fi))
        w = jax.random.uniform(keys[2 * i], (fi, fo), jnp.float32, -bound, bound)
        b = jax.random.uniform(keys[2 * i + 1], (fo,), jnp.float32, -bound, bound)
        w_pad = jnp.zeros((fi_p, fo_p), jnp.float32).at[:fi, :fo].set(w)
        b_pad = jnp.zeros((1, fo_p), jnp.float32).at[0, :fo].set(b)
        params[f"w{i + 1}"] = w_pad.astype(jnp.bfloat16)
        params[f"b{i + 1}"] = b_pad
    return params


if __name__ == "__main__":
    key = jax.random.PRNGKey(0)
    pkey, xkey = jax.random.split(key)

    params = init_params(pkey)
    # CIFAR-shaped NCHW input, as the module's view(-1, 32*32*3) implies.
    x = jax.random.normal(xkey, (2, 3, 32, 32), dtype=jnp.float32)

    logits = my_ass1net_forward(x, params)
    logits = jax.block_until_ready(logits)
    assert logits.shape == (2, 10)

    # Plain-JAX reference with the identical bf16-weight / f32-accumulate math.
    x_flat = x.reshape(x.shape[0], -1)
    h1 = jnp.maximum(jnp.dot(x_flat.astype(jnp.bfloat16), params["w1"],
                             preferred_element_type=jnp.float32) + params["b1"], 0.0)
    h2 = jnp.maximum(jnp.dot(h1.astype(jnp.bfloat16), params["w2"],
                             preferred_element_type=jnp.float32) + params["b2"], 0.0)
    ref = (jnp.dot(h2.astype(jnp.bfloat16), params["w3"],
                   preferred_element_type=jnp.float32) + params["b3"])[:, :D_OUT]
    assert jnp.allclose(logits, ref, atol=2e-3, rtol=2e-3), \
        float(jnp.max(jnp.abs(logits - ref)))

    print("KERNEL_OK")
</pallas_src>

<mosaic_0001>
module attributes {stable_mosaic.version = 11 : i64} {
  func.func @mlp_kernel(%arg0: i32, %arg1: memref<8x3072xf32, #tpu.memory_space<vmem>>, %arg2: memref<3072x1024xbf16, #tpu.memory_space<vmem>>, %arg3: memref<1x1024xf32, #tpu.memory_space<vmem>>, %arg4: memref<1024x128xbf16, #tpu.memory_space<vmem>>, %arg5: memref<1x128xf32, #tpu.memory_space<vmem>>, %arg6: memref<128x128xbf16, #tpu.memory_space<vmem>>, %arg7: memref<1x128xf32, #tpu.memory_space<vmem>>, %arg8: memref<8x128xf32, #tpu.memory_space<vmem>>) attributes {dimension_semantics = [#tpu.dimension_semantics<parallel>], iteration_bounds = array<i64: 1>, scalar_prefetch = 0 : i64, scratch_operands = 0 : i64, tpu.core_type = #tpu.core_type<tc>, window_params = [{transform_indices = @transform_0, window_bounds = array<i64: 8, 3072>}, {pipeline_mode = #tpu.pipeline_mode<synchronous>, transform_indices = @transform_1, window_bounds = array<i64: 3072, 1024>}, {pipeline_mode = #tpu.pipeline_mode<synchronous>, transform_indices = @transform_2, window_bounds = array<i64: 1, 1024>}, {pipeline_mode = #tpu.pipeline_mode<synchronous>, transform_indices = @transform_3, window_bounds = array<i64: 1024, 128>}, {pipeline_mode = #tpu.pipeline_mode<synchronous>, transform_indices = @transform_4, window_bounds = array<i64: 1, 128>}, {pipeline_mode = #tpu.pipeline_mode<synchronous>, transform_indices = @transform_5, window_bounds = array<i64: 128, 128>}, {pipeline_mode = #tpu.pipeline_mode<synchronous>, transform_indices = @transform_6, window_bounds = array<i64: 1, 128>}, {transform_indices = @transform_7, window_bounds = array<i64: 8, 128>}]} {
    %c0 = arith.constant 0 : index
    %c0_0 = arith.constant 0 : index
    %0 = vector.load %arg1[%c0, %c0_0] : memref<8x3072xf32, #tpu.memory_space<vmem>>, vector<8x3072xf32>
    %1 = arith.truncf %0 : vector<8x3072xf32> to vector<8x3072xbf16>
    %c0_1 = arith.constant 0 : index
    %c0_2 = arith.constant 0 : index
    %2 = vector.load %arg2[%c0_1, %c0_2] : memref<3072x1024xbf16, #tpu.memory_space<vmem>>, vector<3072x1024xbf16>
    %cst = arith.constant dense<0.000000e+00> : vector<8x1024xf32>
    %3 = tpu.matmul %1, %2, %cst {dimension_numbers = #tpu.dot_dimension_numbers<[1], [0], [0], [1], [0, 0, 1, 1], [], []>} : vector<8x3072xbf16>, vector<3072x1024xbf16>, vector<8x1024xf32> -> vector<8x1024xf32>
    %c0_3 = arith.constant 0 : index
    %c0_4 = arith.constant 0 : index
    %4 = vector.load %arg3[%c0_3, %c0_4] : memref<1x1024xf32, #tpu.memory_space<vmem>>, vector<1x1024xf32>
    %5 = vector.broadcast %4 : vector<1x1024xf32> to vector<8x1024xf32>
    %6 = arith.addf %3, %5 : vector<8x1024xf32>
    %cst_5 = arith.constant 0.000000e+00 : f32
    %7 = vector.broadcast %cst_5 : f32 to vector<8x1024xf32>
    %8 = arith.maximumf %6, %7 : vector<8x1024xf32>
    %9 = arith.truncf %8 : vector<8x1024xf32> to vector<8x1024xbf16>
    %c0_6 = arith.constant 0 : index
    %c0_7 = arith.constant 0 : index
    %10 = vector.load %arg4[%c0_6, %c0_7] : memref<1024x128xbf16, #tpu.memory_space<vmem>>, vector<1024x128xbf16>
    %cst_8 = arith.constant dense<0.000000e+00> : vector<8x128xf32>
    %11 = tpu.matmul %9, %10, %cst_8 {dimension_numbers = #tpu.dot_dimension_numbers<[1], [0], [0], [1], [0, 0, 1, 1], [], []>} : vector<8x1024xbf16>, vector<1024x128xbf16>, vector<8x128xf32> -> vector<8x128xf32>
    %c0_9 = arith.constant 0 : index
    %c0_10 = arith.constant 0 : index
    %12 = vector.load %arg5[%c0_9, %c0_10] : memref<1x128xf32, #tpu.memory_space<vmem>>, vector<1x128xf32>
    %13 = vector.broadcast %12 : vector<1x128xf32> to vector<8x128xf32>
    %14 = arith.addf %11, %13 : vector<8x128xf32>
    %cst_11 = arith.constant 0.000000e+00 : f32
    %15 = vector.broadcast %cst_11 : f32 to vector<8x128xf32>
    %16 = arith.maximumf %14, %15 : vector<8x128xf32>
    %17 = arith.truncf %16 : vector<8x128xf32> to vector<8x128xbf16>
    %c0_12 = arith.constant 0 : index
    %c0_13 = arith.constant 0 : index
    %18 = vector.load %arg6[%c0_12, %c0_13] : memref<128x128xbf16, #tpu.memory_space<vmem>>, vector<128x128xbf16>
    %cst_14 = arith.constant dense<0.000000e+00> : vector<8x128xf32>
    %19 = tpu.matmul %17, %18, %cst_14 {dimension_numbers = #tpu.dot_dimension_numbers<[1], [0], [0], [1], [0, 0, 1, 1], [], []>} : vector<8x128xbf16>, vector<128x128xbf16>, vector<8x128xf32> -> vector<8x128xf32>
    %c0_15 = arith.constant 0 : index
    %c0_16 = arith.constant 0 : index
    %20 = vector.load %arg7[%c0_15, %c0_16] : memref<1x128xf32, #tpu.memory_space<vmem>>, vector<1x128xf32>
    %21 = vector.broadcast %20 : vector<1x128xf32> to vector<8x128xf32>
    %22 = arith.addf %19, %21 : vector<8x128xf32>
    %c0_17 = arith.constant 0 : index
    %c0_18 = arith.constant 0 : index
    %23 = vector.load %arg8[%c0_17, %c0_18] : memref<8x128xf32, #tpu.memory_space<vmem>>, vector<8x128xf32>
    tpu.vector_store %arg8[%c0_17, %c0_18], %22 {strides = array<i32>} : memref<8x128xf32, #tpu.memory_space<vmem>>, vector<8x128xf32>,
    return
  }
  func.func @transform_0(%arg0: i32) -> (i32, i32) {
    %c0_i32 = arith.constant 0 : i32
    %c0_i32_0 = arith.constant 0 : i32
    return %arg0, %c0_i32 : i32, i32
  }
  func.func @transform_1(%arg0: i32) -> (i32, i32) {
    %c0_i32 = arith.constant 0 : i32
    %c0_i32_0 = arith.constant 0 : i32
    %c0_i32_1 = arith.constant 0 : i32
    return %c0_i32, %c0_i32_0 : i32, i32
  }
  func.func @transform_2(%arg0: i32) -> (i32, i32) {
    %c0_i32 = arith.constant 0 : i32
    %c0_i32_0 = arith.constant 0 : i32
    %c0_i32_1 = arith.constant 0 : i32
    return %c0_i32, %c0_i32_0 : i32, i32
  }
  func.func @transform_3(%arg0: i32) -> (i32, i32) {
    %c0_i32 = arith.constant 0 : i32
    %c0_i32_0 = arith.constant 0 : i32
    %c0_i32_1 = arith.constant 0 : i32
    return %c0_i32, %c0_i32_0 : i32, i32
  }
  func.func @transform_4(%arg0: i32) -> (i32, i32) {
    %c0_i32 = arith.constant 0 : i32
    %c0_i32_0 = arith.constant 0 : i32
    %c0_i32_1 = arith.constant 0 : i32
    return %c0_i32, %c0_i32_0 : i32, i32
  }
  func.func @transform_5(%arg0: i32) -> (i32, i32) {
    %c0_i32 = arith.constant 0 : i32
    %c0_i32_0 = arith.constant 0 : i32
    %c0_i32_1 = arith.constant 0 : i32
    return %c0_i32, %c0_i32_0 : i32, i32
  }
  func.func @transform_6(%arg0: i32) -> (i32, i32) {
    %c0_i32 = arith.constant 0 : i32
    %c0_i32_0 = arith.constant 0 : i32
    %c0_i32_1 = arith.constant 0 : i32
    return %c0_i32, %c0_i32_0 : i32, i32
  }
  func.func @transform_7(%arg0: i32) -> (i32, i32) {
    %c0_i32 = arith.constant 0 : i32
    %c0_i32_0 = arith.constant 0 : i32
    return %arg0, %c0_i32 : i32, i32
  }
}

</mosaic_0001>

<bundles_post_ra>
// kernel: _mlp_pallas.1
= control target key start
LH: loop header
LB: loop body
LE: loop exit
PB: predicated region body
PF: predicated region fallthrough
CT: control target
= control target key end

     0   :  { %12 = vsyncpa [#allocation3], 0  ;;  %s21354_s0 = inlined_call_operand.hbm [shape: f32[8,3072], index: 0, kind: input, shape index: {}]   ;;  %s21355_s1 = inlined_call_operand.hbm [shape: bf16[3072,1024], index: 1, kind: input, shape index: {}]   ;;  %s21356_s2 = inlined_call_operand.hbm [shape: f32[1,1024], index: 2, kind: input, shape index: {}]   ;;  %s21357_s3 = inlined_call_operand.hbm [shape: bf16[1024,128], index: 3, kind: input, shape index: {}]   ;;  %s21358_s4 = inlined_call_operand.hbm [shape: f32[1,128], index: 4, kind: input, shape index: {}]   ;;  %s21359_s5 = inlined_call_operand.hbm [shape: bf16[128,128], index: 5, kind: input, shape index: {}]   ;;  %s21360_s6 = inlined_call_operand.hbm [shape: f32[1,128], index: 6, kind: input, shape index: {}]   ;;  %s21361_s7 = inlined_call_operand.hbm [shape: f32[8,128], index: 7, kind: output, shape index: {}]  }
   0x1   :  { %13 = vsyncpa [#allocation6], 0 }
   0x2   :  { %14 = vsyncpa [#allocation9], 0 }
   0x3   :  { %15 = vsyncpa [#allocation12], 0  ;;  %s32_s26 = sshll.u32 %s21355_s1, 4  ;;  %s33_s26 = int_to_ptr.hbm [resolvable:$true] %s32_s26 }
   0x4   :  { %16 = vsyncpa [#allocation4], 0  ;;  %s20909_s27 = smov [#allocation5]   ;;  %s56_s8 = sshll.u32 %s21357_s3, 4  ;;  %s57_s8 = int_to_ptr.hbm [resolvable:$true] %s56_s8 }
   0x5   :  { %s34_s28 = sshll.u32 %s20909_s27, 4  ;;  %s20910_s9 = smov 512   ;;  %s35_s28 = int_to_ptr.vmem [resolvable:$true] %s34_s28 }
   0x6   :  { %s20911_s10 = smov 32   ;;  %s20912_s11 = smov [#allocation8]  }
   0x7   :  { %40 = dma.hbm_to_vmem [thread:$0]  %s33_s26, 196608, %s35_s28, [#allocation6], %s20910_s9, %s20910_s9, %s20911_s10  }
   0x8   :  { %s58_s12 = sshll.u32 %s20912_s11, 4  ;;  %s20913_s13 = smov 64   ;;  %s59_s12 = int_to_ptr.vmem [resolvable:$true] %s58_s12 }
   0x9   :  { %s20914_s14 = smov 4   ;;  %s80_s16 = sshll.u32 %s21359_s5, 4  ;;  %s81_s16 = int_to_ptr.hbm [resolvable:$true] %s80_s16 }
   0xa   :  { %64 = dma.hbm_to_vmem [thread:$0]  %s57_s8, 8192, %s59_s12, [#allocation9], %s20913_s13, %s20913_s13, %s20914_s14  }
   0xb   :  { %s20915_s17 = smov [#allocation11]   ;;  %s22_s20 = sshll.u32 %s21354_s0, 4  ;;  %s23_s20 = int_to_ptr.hbm [resolvable:$true] %s22_s20 }
   0xc   :  { %s82_s18 = sshll.u32 %s20915_s17, 4  ;;  %s20916_s21 = smov [#allocation2]   ;;  %s83_s18 = int_to_ptr.vmem [resolvable:$true] %s82_s18 }
   0xd   :  { %88 = dma.hbm_to_vmem [thread:$0]  %s81_s16, 1024, %s83_s18, [#allocation12], %s20913_s13, %s20913_s13, %s20914_s14  }
   0xe   :  { %s24_s22 = sshll.u32 %s20916_s21, 4  ;;  %s46_s25 = sshll.u32 %s21356_s2, 4  ;;  %s25_s22 = int_to_ptr.vmem [resolvable:$true] %s24_s22  ;;  %s47_s25 = int_to_ptr.hbm [resolvable:$true] %s46_s25 }
   0xf   :  { %27 = dma.hbm_to_vmem [thread:$0]  %s23_s20, 3072, %s25_s22, [#allocation3]  }
  0x10   :  { %s70_s27 = sshll.u32 %s21358_s4, 4  ;;  %s20917_s28 = smov [#allocation7]   ;;  %s71_s27 = int_to_ptr.hbm [resolvable:$true] %s70_s27 }
  0x11   :  { %s48_s29 = sshll.u32 %s20917_s28, 4  ;;  %s20918_s0 = smov [#allocation10]   ;;  %s49_s29 = int_to_ptr.vmem [resolvable:$true] %s48_s29 }
  0x12   :  { %51 = dma.hbm_to_vmem [thread:$0]  %s47_s25, 128, %s49_s29, [#allocation6]  }
  0x13   :  { %s72_s30 = sshll.u32 %s20918_s0, 4  ;;  %s94_s10 = sshll.u32 %s21360_s6, 4  ;;  %s73_s30 = int_to_ptr.vmem [resolvable:$true] %s72_s30  ;;  %s95_s10 = int_to_ptr.hbm [resolvable:$true] %s94_s10 }
  0x14   :  { %75 = dma.hbm_to_vmem [thread:$0]  %s71_s27, 16, %s73_s30, [#allocation9]  }
  0x15   :  { %s20919_s2 = smov [#allocation13]  }
  0x16   :  { %s96_s11 = sshll.u32 %s20919_s2, 4  ;;  %s97_s11 = int_to_ptr.vmem [resolvable:$true] %s96_s11 }
  0x17   :  { %99 = dma.hbm_to_vmem [thread:$0]  %s95_s10, 16, %s97_s11, [#allocation12]  }
  0x18   :  { %20899 = dma.done.wait [#allocation3], 3072  }
  0x19   :  { %20900 = vsyncadd [#allocation3], 4294964224 }
  0x1a   :  { %20901 = dma.done.wait [#allocation6], 196736  }
  0x1b   :  { %20902 = vsyncadd [#allocation6], 4294770560 }
  0x1c   :  { %20903 = dma.done.wait [#allocation9], 8208  }
  0x1d   :  { %20904 = vsyncadd [#allocation9], 4294959088 }
  0x1e   :  { %20905 = dma.done.wait [#allocation12], 1040  }
  0x1f   :  { %20906 = vsyncadd [#allocation12], 4294966256  ;;  %v12872_v0 = vld [vmem:[#allocation5 + $0x1c0] sm:$0xf]  ;;  %s20920_s4 = smov [#allocation14]   ;;  %s12633_s14 = sshll.u32 %s21361_s7, 4  ;;  %s12634_s14 = int_to_ptr.hbm [resolvable:$true] %s12633_s14 }
  0x20   :  { %v19138_v1 = vld [vmem:[#allocation5 + $0x1dc] sm:$0xf0]  ;;  %s12631_s6 = sshll.u32 %s20920_s4, 4  ;;  %s12632_s6 = int_to_ptr.vmem [resolvable:$true] %s12631_s6 }
  0x21   :  { %v13128_v2 = vld [vmem:[#allocation5 + $0x3c0] sm:$0xf]  ;;  %v12873_v3 = vor.u32 %v19138_v1, %v12872_v0 }
  0x22   :  { %v19202_v4 = vld [vmem:[#allocation5 + $0x3dc] sm:$0xf0] }
  0x23   :  { %v13384_v5 = vld [vmem:[#allocation5 + $0x5c0] sm:$0xf]  ;;  %v13129_v7 = vor.u32 %v19202_v4, %v13128_v2  ;;  %9410 = vmatpush.bf16.msra.mxu0 %v12873_v3 }
  0x24   :  { %v19266_v6 = vld [vmem:[#allocation5 + $0x5dc] sm:$0xf0] }
  0x25   :  { %v13385_v8 = vor.u32 %v19266_v6, %v13384_v5  ;;  %v13640_v9 = vld [vmem:[#allocation5 + $0x7c0] sm:$0xf]  ;;  %9423 = vmatpush.bf16.msra.mxu1 %v13129_v7 }
  0x26   :  { %v19330_v10 = vld [vmem:[#allocation5 + $0x7dc] sm:$0xf0] }
  0x27   :  { %v12840_v11 = vld [vmem:[#allocation5 + $0x180] sm:$0xf]  ;;  %v13641_v12 = vor.u32 %v19330_v10, %v13640_v9  ;;  %9436 = vmatpush.bf16.msra.mxu2 %v13385_v8 }
  0x28   :  { %v19130_v13 = vld [vmem:[#allocation5 + $0x19c] sm:$0xf0] }
  0x29   :  { %v13096_v14 = vld [vmem:[#allocation5 + $0x380] sm:$0xf]  ;;  %v12841_v16 = vor.u32 %v19130_v13, %v12840_v11  ;;  %9449 = vmatpush.bf16.msra.mxu3 %v13641_v12 }
  0x2a   :  { %v19194_v15 = vld [vmem:[#allocation5 + $0x39c] sm:$0xf0] }
  0x2b   :  { %v13097_v17 = vor.u32 %v19194_v15, %v13096_v14  ;;  %v13352_v18 = vld [vmem:[#allocation5 + $0x580] sm:$0xf]  ;;  %9411 = vmatpush.bf16.msra.mxu0 %v12841_v16 }
  0x2c   :  { %v19258_v19 = vld [vmem:[#allocation5 + $0x59c] sm:$0xf0] }
  0x2d   :  { %v13608_v20 = vld [vmem:[#allocation5 + $0x780] sm:$0xf]  ;;  %v13353_v21 = vor.u32 %v19258_v19, %v13352_v18  ;;  %9424 = vmatpush.bf16.msra.mxu1 %v13097_v17 }
  0x2e   :  { %v19322_v22 = vld [vmem:[#allocation5 + $0x79c] sm:$0xf0] }
  0x2f   :  { %v12808_v23 = vld [vmem:[#allocation5 + $0x140] sm:$0xf]  ;;  %v13609_v25 = vor.u32 %v19322_v22, %v13608_v20  ;;  %9437 = vmatpush.bf16.msra.mxu2 %v13353_v21 }
  0x30   :  { %v19122_v24 = vld [vmem:[#allocation5 + $0x15c] sm:$0xf0] }
  0x31   :  { %v13064_v26 = vld [vmem:[#allocation5 + $0x340] sm:$0xf]  ;;  %v12809_v29 = vor.u32 %v19122_v24, %v12808_v23  ;;  %9450 = vmatpush.bf16.msra.mxu3 %v13609_v25 }
  0x32   :  { %v19186_v27 = vld [vmem:[#allocation5 + $0x35c] sm:$0xf0] }
  0x33   :  { %v13320_v28 = vld [vmem:[#allocation5 + $0x540] sm:$0xf]  ;;  %v13065_v33 = vor.u32 %v19186_v27, %v13064_v26  ;;  %9412 = vmatpush.bf16.msra.mxu0 %v12809_v29 }
  0x34   :  { %v19250_v30 = vld [vmem:[#allocation5 + $0x55c] sm:$0xf0] }
  0x35   :  { %v13576_v31 = vld [vmem:[#allocation5 + $0x740] sm:$0xf]  ;;  %v13321_v34 = vor.u32 %v19250_v30, %v13320_v28  ;;  %9425 = vmatpush.bf16.msra.mxu1 %v13065_v33 }
  0x36   :  { %v19314_v32 = vld [vmem:[#allocation5 + $0x75c] sm:$0xf0] }
  0x37   :  { %v12776_v35 = vld [vmem:[#allocation5 + $0x100] sm:$0xf]  ;;  %v13577_v38 = vor.u32 %v19314_v32, %v13576_v31  ;;  %9438 = vmatpush.bf16.msra.mxu2 %v13321_v34 }
  0x38   :  { %v19114_v36 = vld [vmem:[#allocation5 + $0x11c] sm:$0xf0] }
  0x39   :  { %v13032_v37 = vld [vmem:[#allocation5 + $0x300] sm:$0xf]  ;;  %v12777_v44 = vor.u32 %v19114_v36, %v12776_v35  ;;  %9451 = vmatpush.bf16.msra.mxu3 %v13577_v38 }
  0x3a   :  { %v19178_v39 = vld [vmem:[#allocation5 + $0x31c] sm:$0xf0] }
  0x3b   :  { %v13288_v40 = vld [vmem:[#allocation5 + $0x500] sm:$0xf]  ;;  %v13033_v45 = vor.u32 %v19178_v39, %v13032_v37  ;;  %9413 = vmatpush.bf16.msra.mxu0 %v12777_v44 }
  0x3c   :  { %v19242_v41 = vld [vmem:[#allocation5 + $0x51c] sm:$0xf0] }
  0x3d   :  { %v13544_v42 = vld [vmem:[#allocation5 + $0x700] sm:$0xf]  ;;  %v13289_v46 = vor.u32 %v19242_v41, %v13288_v40  ;;  %9426 = vmatpush.bf16.msra.mxu1 %v13033_v45 }
  0x3e   :  { %v19306_v43 = vld [vmem:[#allocation5 + $0x71c] sm:$0xf0] }
  0x3f   :  { %v12744_v47 = vld [vmem:[#allocation5 + $0xc0] sm:$0xf]  ;;  %v13545_v50 = vor.u32 %v19306_v43, %v13544_v42  ;;  %9439 = vmatpush.bf16.msra.mxu2 %v13289_v46 }
  0x40   :  { %v19106_v48 = vld [vmem:[#allocation5 + $0xdc] sm:$0xf0] }
  0x41   :  { %v13000_v49 = vld [vmem:[#allocation5 + $0x2c0] sm:$0xf]  ;;  %v12745_v56 = vor.u32 %v19106_v48, %v12744_v47  ;;  %9452 = vmatpush.bf16.msra.mxu3 %v13545_v50 }
  0x42   :  { %v19170_v51 = vld [vmem:[#allocation5 + $0x2dc] sm:$0xf0] }
  0x43   :  { %v13256_v52 = vld [vmem:[#allocation5 + $0x4c0] sm:$0xf]  ;;  %v13001_v57 = vor.u32 %v19170_v51, %v13000_v49  ;;  %9414 = vmatpush.bf16.msra.mxu0 %v12745_v56 }
  0x44   :  { %v19234_v53 = vld [vmem:[#allocation5 + $0x4dc] sm:$0xf0] }
  0x45   :  { %v13512_v54 = vld [vmem:[#allocation5 + $0x6c0] sm:$0xf]  ;;  %v13257_v58 = vor.u32 %v19234_v53, %v13256_v52  ;;  %9427 = vmatpush.bf16.msra.mxu1 %v13001_v57 }
  0x46   :  { %v19298_v55 = vld [vmem:[#allocation5 + $0x6dc] sm:$0xf0] }
  0x47   :  { %v12712_v59 = vld [vmem:[#allocation5 + $0x80] sm:$0xf]  ;;  %v13513_v62 = vor.u32 %v19298_v55, %v13512_v54  ;;  %9440 = vmatpush.bf16.msra.mxu2 %v13257_v58 }
  0x48   :  { %v19098_v60 = vld [vmem:[#allocation5 + $0x9c] sm:$0xf0] }
  0x49   :  { %v12968_v61 = vld [vmem:[#allocation5 + $0x280] sm:$0xf]  ;;  %v12713_v4 = vor.u32 %v19098_v60, %v12712_v59  ;;  %9453 = vmatpush.bf16.msra.mxu3 %v13513_v62 }
  0x4a   :  { %v19162_v63 = vld [vmem:[#allocation5 + $0x29c] sm:$0xf0] }
  0x4b   :  { %v13224_v0 = vld [vmem:[#allocation5 + $0x480] sm:$0xf]  ;;  %v12969_v5 = vor.u32 %v19162_v63, %v12968_v61  ;;  %9415 = vmatpush.bf16.msra.mxu0 %v12713_v4 }
  0x4c   :  { %v19226_v1 = vld [vmem:[#allocation5 + $0x49c] sm:$0xf0] }
  0x4d   :  { %v13480_v2 = vld [vmem:[#allocation5 + $0x680] sm:$0xf]  ;;  %v13225_v6 = vor.u32 %v19226_v1, %v13224_v0  ;;  %9428 = vmatpush.bf16.msra.mxu1 %v12969_v5 }
  0x4e   :  { %v19290_v3 = vld [vmem:[#allocation5 + $0x69c] sm:$0xf0] }
  0x4f   :  { %v12680_v7 = vld [vmem:[#allocation5 + $0x40] sm:$0xf]  ;;  %v13481_v10 = vor.u32 %v19290_v3, %v13480_v2  ;;  %9441 = vmatpush.bf16.msra.mxu2 %v13225_v6  ;;  %v130_v3 = vld [vmem:[#allocation2 + $0x10] sm:$0xff] }
  0x50   :  { %v19090_v8 = vld [vmem:[#allocation5 + $0x5c] sm:$0xf0] }
  0x51   :  { %v12936_v9 = vld [vmem:[#allocation5 + $0x240] sm:$0xf]  ;;  %v12681_v16 = vor.u32 %v19090_v8, %v12680_v7  ;;  %9454 = vmatpush.bf16.msra.mxu3 %v13481_v10  ;;  %v20982_v8 = vpack.c.bf16 %v130_v3, %v130_v3  ;;  %v131_v10 = vld [vmem:[#allocation2 + $0x18] sm:$0xff] }
  0x52   :  { %v19154_v11 = vld [vmem:[#allocation5 + $0x25c] sm:$0xf0] }
  0x53   :  { %v13192_v12 = vld [vmem:[#allocation5 + $0x440] sm:$0xf]  ;;  %v12937_v19 = vor.u32 %v19154_v11, %v12936_v9  ;;  %9416 = vmatpush.bf16.msra.mxu0 %v12681_v16 }
  0x54   :  { %v19218_v13 = vld [vmem:[#allocation5 + $0x45c] sm:$0xf0] }
  0x55   :  { %v13448_v14 = vld [vmem:[#allocation5 + $0x640] sm:$0xf]  ;;  %v13193_v20 = vor.u32 %v19218_v13, %v13192_v12  ;;  %9429 = vmatpush.bf16.msra.mxu1 %v12937_v19  ;;  %v129_v19 = vld [vmem:[#allocation2 + $0x8] sm:$0xff] }
  0x56   :  { %v19282_v15 = vld [vmem:[#allocation5 + $0x65c] sm:$0xf0] }
  0x57   :  { %v12648_v17 = vld [vmem:[#allocation5] sm:$0xf]  ;;  %v13449_v24 = vor.u32 %v19282_v15, %v13448_v14  ;;  %9442 = vmatpush.bf16.msra.mxu2 %v13193_v20  ;;  %v20986_v15 = vpack.c.bf16 %v131_v10, %v131_v10 }
  0x58   :  { %v19082_v18 = vld [vmem:[#allocation5 + $0x1c] sm:$0xf0] }
  0x59   :  { %v12904_v21 = vld [vmem:[#allocation5 + $0x200] sm:$0xf]  ;;  %v12649_v31 = vor.u32 %v19082_v18, %v12648_v17  ;;  %9455 = vmatpush.bf16.msra.mxu3 %v13449_v24 }
  0x5a   :  { %v19146_v22 = vld [vmem:[#allocation5 + $0x21c] sm:$0xf0] }
  0x5b   :  { %v13160_v23 = vld [vmem:[#allocation5 + $0x400] sm:$0xf]  ;;  %v12905_v35 = vor.u32 %v19146_v22, %v12904_v21  ;;  %9417 = vmatpush.bf16.msra.mxu0 %v12649_v31 }
  0x5c   :  { %v19210_v25 = vld [vmem:[#allocation5 + $0x41c] sm:$0xf0] }
  0x5d   :  { %v13416_v26 = vld [vmem:[#allocation5 + $0x600] sm:$0xf]  ;;  %v13161_v36 = vor.u32 %v19210_v25, %v13160_v23  ;;  %9430 = vmatpush.bf16.msra.mxu1 %v12905_v35  ;;  %v20991_v25 = vpack.c.bf16 %v129_v19, %v129_v19 }
  0x5e   :  { %v19274_v27 = vld [vmem:[#allocation5 + $0x61c] sm:$0xf0] }
  0x5f   :  { %v13896_v28 = vld [vmem:[#allocation5 + $0x9c0] sm:$0xf]  ;;  %v13417_v39 = vor.u32 %v19274_v27, %v13416_v26  ;;  %9443 = vmatpush.bf16.msra.mxu2 %v13161_v36 }
  0x60   :  { %v19394_v29 = vld [vmem:[#allocation5 + $0x9dc] sm:$0xf0]  ;;  %9431 = vmatmul.bf16.vlgmr.msra.gmra.mxu1 %v20991_v25 }
  0x61   :  { %v14152_v30 = vld [vmem:[#allocation5 + $0xbc0] sm:$0xf]  ;;  %v13897_v40 = vor.u32 %v19394_v29, %v13896_v28  ;;  %9456 = vmatpush.bf16.msra.mxu3 %v13417_v39 }
  0x62   :  { %v19458_v32 = vld [vmem:[#allocation5 + $0xbdc] sm:$0xf0]  ;;  %9444 = vmatmul.bf16.vlgmr.msra.gmra.mxu2 %v20982_v8 }
  0x63   :  { %v14408_v33 = vld [vmem:[#allocation5 + $0xdc0] sm:$0xf]  ;;  %v14153_v41 = vor.u32 %v19458_v32, %v14152_v30  ;;  %9462 = vmatpush.bf16.msrb.mxu0 %v13897_v40 }
  0x64   :  { %v19522_v34 = vld [vmem:[#allocation5 + $0xddc] sm:$0xf0]  ;;  %9457 = vmatmul.bf16.vlgmr.msra.gmra.mxu3 %v20986_v15 }
  0x65   :  { %v14664_v37 = vld [vmem:[#allocation5 + $0xfc0] sm:$0xf]  ;;  %v14409_v42 = vor.u32 %v19522_v34, %v14408_v33  ;;  %9475 = vmatpush.bf16.msrb.mxu1 %v14153_v41 }
  0x66   :  { %v19586_v38 = vld [vmem:[#allocation5 + $0xfdc] sm:$0xf0] }
  0x67   :  { %v13864_v43 = vld [vmem:[#allocation5 + $0x980] sm:$0xf]  ;;  %v14665_v46 = vor.u32 %v19586_v38, %v14664_v37  ;;  %9488 = vmatpush.bf16.msrb.mxu2 %v14409_v42 }
  0x68   :  { %v19386_v44 = vld [vmem:[#allocation5 + $0x99c] sm:$0xf0] }
  0x69   :  { %v14120_v45 = vld [vmem:[#allocation5 + $0xb80] sm:$0xf]  ;;  %v13865_v52 = vor.u32 %v19386_v44, %v13864_v43  ;;  %9501 = vmatpush.bf16.msrb.mxu3 %v14665_v46 }
  0x6a   :  { %v19450_v47 = vld [vmem:[#allocation5 + $0xb9c] sm:$0xf0] }
  0x6b   :  { %v14376_v48 = vld [vmem:[#allocation5 + $0xd80] sm:$0xf]  ;;  %v14121_v54 = vor.u32 %v19450_v47, %v14120_v45  ;;  %9463 = vmatpush.bf16.msrb.mxu0 %v13865_v52 }
  0x6c   :  { %v19514_v49 = vld [vmem:[#allocation5 + $0xd9c] sm:$0xf0] }
  0x6d   :  { %v14632_v50 = vld [vmem:[#allocation5 + $0xf80] sm:$0xf]  ;;  %v14377_v55 = vor.u32 %v19514_v49, %v14376_v48  ;;  %9476 = vmatpush.bf16.msrb.mxu1 %v14121_v54 }
  0x6e   :  { %v19578_v51 = vld [vmem:[#allocation5 + $0xf9c] sm:$0xf0] }
  0x6f   :  { %v13832_v53 = vld [vmem:[#allocation5 + $0x940] sm:$0xf]  ;;  %v14633_v59 = vor.u32 %v19578_v51, %v14632_v50  ;;  %9489 = vmatpush.bf16.msrb.mxu2 %v14377_v55 }
  0x70   :  { %v19378_v56 = vld [vmem:[#allocation5 + $0x95c] sm:$0xf0] }
  0x71   :  { %v14088_v57 = vld [vmem:[#allocation5 + $0xb40] sm:$0xf]  ;;  %v13833_v0 = vor.u32 %v19378_v56, %v13832_v53  ;;  %9502 = vmatpush.bf16.msrb.mxu3 %v14633_v59 }
  0x72   :  { %v19442_v58 = vld [vmem:[#allocation5 + $0xb5c] sm:$0xf0] }
  0x73   :  { %v14344_v60 = vld [vmem:[#allocation5 + $0xd40] sm:$0xf]  ;;  %v14089_v1 = vor.u32 %v19442_v58, %v14088_v57  ;;  %9464 = vmatpush.bf16.msrb.mxu0 %v13833_v0 }
  0x74   :  { %v19506_v61 = vld [vmem:[#allocation5 + $0xd5c] sm:$0xf0] }
  0x75   :  { %v14600_v62 = vld [vmem:[#allocation5 + $0xf40] sm:$0xf]  ;;  %v14345_v5 = vor.u32 %v19506_v61, %v14344_v60  ;;  %9477 = vmatpush.bf16.msrb.mxu1 %v14089_v1 }
  0x76   :  { %v19570_v63 = vld [vmem:[#allocation5 + $0xf5c] sm:$0xf0] }
  0x77   :  { %v13800_v2 = vld [vmem:[#allocation5 + $0x900] sm:$0xf]  ;;  %v14601_v11 = vor.u32 %v19570_v63, %v14600_v62  ;;  %9490 = vmatpush.bf16.msrb.mxu2 %v14345_v5 }
  0x78   :  { %v128_v4 = vld [vmem:[#allocation2] sm:$0xff] }
  0x79   :  { %v19370_v6 = vld [vmem:[#allocation5 + $0x91c] sm:$0xf0]  ;;  %v20984_v9 = vpack.c.bf16 %v128_v4, %v128_v4  ;;  %9503 = vmatpush.bf16.msrb.mxu3 %v14601_v11 }
  0x7a   :  { %v14056_v7 = vld [vmem:[#allocation5 + $0xb00] sm:$0xf]  ;;  %v13801_v18 = vor.u32 %v19370_v6, %v13800_v2 }
  0x7b   :  { %v19434_v12 = vld [vmem:[#allocation5 + $0xb1c] sm:$0xf0]  ;;  %9418 = vmatmul.bf16.vlgmr.msra.gmra.mxu0 %v20984_v9 }
  0x7c   :  { %v14312_v13 = vld [vmem:[#allocation5 + $0xd00] sm:$0xf]  ;;  %v14057_v20 = vor.u32 %v19434_v12, %v14056_v7  ;;  %9465 = vmatpush.bf16.msrb.mxu0 %v13801_v18  ;;  %v134_v18 = vld [vmem:[#allocation2 + $0x30] sm:$0xff] }
  0x7d   :  { %v19498_v14 = vld [vmem:[#allocation5 + $0xd1c] sm:$0xf0] }
  0x7e   :  { %v14568_v16 = vld [vmem:[#allocation5 + $0xf00] sm:$0xf]  ;;  %v14313_v21 = vor.u32 %v19498_v14, %v14312_v13  ;;  %9478 = vmatpush.bf16.msrb.mxu1 %v14057_v20 }
  0x7f   :  { %v19562_v17 = vld [vmem:[#allocation5 + $0xf1c] sm:$0xf0] }
  0x80   :  { %v13768_v22 = vld [vmem:[#allocation5 + $0x8c0] sm:$0xf]  ;;  %v14569_v26 = vor.u32 %v19562_v17, %v14568_v16  ;;  %9491 = vmatpush.bf16.msrb.mxu2 %v14313_v21 }
  0x81   :  { %v19362_v23 = vld [vmem:[#allocation5 + $0x8dc] sm:$0xf0] }
  0x82   :  { %v14024_v24 = vld [vmem:[#allocation5 + $0xac0] sm:$0xf]  ;;  %v13769_v32 = vor.u32 %v19362_v23, %v13768_v22  ;;  %9504 = vmatpush.bf16.msrb.mxu3 %v14569_v26  ;;  %v135_v23 = vld [vmem:[#allocation2 + $0x38] sm:$0xff] }
  0x83   :  { %v19426_v27 = vld [vmem:[#allocation5 + $0xadc] sm:$0xf0] }
  0x84   :  { %v14280_v28 = vld [vmem:[#allocation5 + $0xcc0] sm:$0xf]  ;;  %v14025_v33 = vor.u32 %v19426_v27, %v14024_v24  ;;  %9466 = vmatpush.bf16.msrb.mxu0 %v13769_v32 }
  0x85   :  { %v19490_v29 = vld [vmem:[#allocation5 + $0xcdc] sm:$0xf0] }
  0x86   :  { %v14536_v30 = vld [vmem:[#allocation5 + $0xec0] sm:$0xf]  ;;  %v14281_v34 = vor.u32 %v19490_v29, %v14280_v28  ;;  %9479 = vmatpush.bf16.msrb.mxu1 %v14025_v33  ;;  %v133_v29 = vld [vmem:[#allocation2 + $0x28] sm:$0xff] }
  0x87   :  { %v19554_v31 = vld [vmem:[#allocation5 + $0xedc] sm:$0xf0] }
  0x88   :  { %v13736_v35 = vld [vmem:[#allocation5 + $0x880] sm:$0xf]  ;;  %v14537_v38 = vor.u32 %v19554_v31, %v14536_v30  ;;  %9492 = vmatpush.bf16.msrb.mxu2 %v14281_v34  ;;  %v20994_v34 = vpack.c.bf16 %v134_v18, %v134_v18 }
  0x89   :  { %v19354_v36 = vld [vmem:[#allocation5 + $0x89c] sm:$0xf0] }
  0x8a   :  { %v13992_v37 = vld [vmem:[#allocation5 + $0xa80] sm:$0xf]  ;;  %v13737_v44 = vor.u32 %v19354_v36, %v13736_v35  ;;  %9505 = vmatpush.bf16.msrb.mxu3 %v14537_v38  ;;  %v20998_v38 = vpack.c.bf16 %v135_v23, %v135_v23 }
  0x8b   :  { %v19418_v39 = vld [vmem:[#allocation5 + $0xa9c] sm:$0xf0] }
  0x8c   :  { %v14248_v40 = vld [vmem:[#allocation5 + $0xc80] sm:$0xf]  ;;  %v13993_v45 = vor.u32 %v19418_v39, %v13992_v37  ;;  %9467 = vmatpush.bf16.msrb.mxu0 %v13737_v44 }
  0x8d   :  { %v19482_v41 = vld [vmem:[#allocation5 + $0xc9c] sm:$0xf0] }
  0x8e   :  { %v14504_v42 = vld [vmem:[#allocation5 + $0xe80] sm:$0xf]  ;;  %v14249_v46 = vor.u32 %v19482_v41, %v14248_v40  ;;  %9480 = vmatpush.bf16.msrb.mxu1 %v13993_v45  ;;  %v21000_v40 = vpack.c.bf16 %v133_v29, %v133_v29 }
  0x8f   :  { %v19546_v43 = vld [vmem:[#allocation5 + $0xe9c] sm:$0xf0] }
  0x90   :  { %v13704_v47 = vld [vmem:[#allocation5 + $0x840] sm:$0xf]  ;;  %v14505_v50 = vor.u32 %v19546_v43, %v14504_v42  ;;  %9493 = vmatpush.bf16.msrb.mxu2 %v14249_v46 }
  0x91   :  { %v19346_v48 = vld [vmem:[#allocation5 + $0x85c] sm:$0xf0] }
  0x92   :  { %v13960_v49 = vld [vmem:[#allocation5 + $0xa40] sm:$0xf]  ;;  %v13705_v56 = vor.u32 %v19346_v48, %v13704_v47  ;;  %9506 = vmatpush.bf16.msrb.mxu3 %v14505_v50 }
  0x93   :  { %v19410_v51 = vld [vmem:[#allocation5 + $0xa5c] sm:$0xf0] }
  0x94   :  { %v14216_v52 = vld [vmem:[#allocation5 + $0xc40] sm:$0xf]  ;;  %v13961_v59 = vor.u32 %v19410_v51, %v13960_v49  ;;  %9468 = vmatpush.bf16.msrb.mxu0 %v13705_v56 }
  0x95   :  { %v19474_v53 = vld [vmem:[#allocation5 + $0xc5c] sm:$0xf0] }
  0x96   :  { %v14472_v54 = vld [vmem:[#allocation5 + $0xe40] sm:$0xf]  ;;  %v14217_v60 = vor.u32 %v19474_v53, %v14216_v52  ;;  %9481 = vmatpush.bf16.msrb.mxu1 %v13961_v59 }
  0x97   :  { %v19538_v55 = vld [vmem:[#allocation5 + $0xe5c] sm:$0xf0] }
  0x98   :  { %v13672_v57 = vld [vmem:[#allocation5 + $0x800] sm:$0xf]  ;;  %v14473_v0 = vor.u32 %v19538_v55, %v14472_v54  ;;  %9494 = vmatpush.bf16.msrb.mxu2 %v14217_v60 }
  0x99   :  { %v19338_v58 = vld [vmem:[#allocation5 + $0x81c] sm:$0xf0] }
  0x9a   :  { %v13928_v61 = vld [vmem:[#allocation5 + $0xa00] sm:$0xf]  ;;  %v13673_v7 = vor.u32 %v19338_v58, %v13672_v57  ;;  %9507 = vmatpush.bf16.msrb.mxu3 %v14473_v0 }
  0x9b   :  { %v19402_v62 = vld [vmem:[#allocation5 + $0xa1c] sm:$0xf0] }
  0x9c   :  { %v14184_v63 = vld [vmem:[#allocation5 + $0xc00] sm:$0xf]  ;;  %v13929_v13 = vor.u32 %v19402_v62, %v13928_v61  ;;  %9469 = vmatpush.bf16.msrb.mxu0 %v13673_v7 }
  0x9d   :  { %v19466_v1 = vld [vmem:[#allocation5 + $0xc1c] sm:$0xf0] }
  0x9e   :  { %v14440_v2 = vld [vmem:[#allocation5 + $0xe00] sm:$0xf]  ;;  %v14185_v14 = vor.u32 %v19466_v1, %v14184_v63  ;;  %9482 = vmatpush.bf16.msrb.mxu1 %v13929_v13 }
  0x9f   :  { %v19530_v3 = vld [vmem:[#allocation5 + $0xe1c] sm:$0xf0] }
  0xa0   :  { %v14920_v4 = vld [vmem:[#allocation5 + $0x11c0] sm:$0xf]  ;;  %v14441_v19 = vor.u32 %v19530_v3, %v14440_v2  ;;  %9495 = vmatpush.bf16.msrb.mxu2 %v14185_v14 }
  0xa1   :  { %v19650_v5 = vld [vmem:[#allocation5 + $0x11dc] sm:$0xf0]  ;;  %9483 = vmatmul.bf16.vlgmr.msrb.gmra.mxu1 %v21000_v40 }
  0xa2   :  { %v15176_v6 = vld [vmem:[#allocation5 + $0x13c0] sm:$0xf]  ;;  %v14921_v20 = vor.u32 %v19650_v5, %v14920_v4  ;;  %9508 = vmatpush.bf16.msrb.mxu3 %v14441_v19 }
  0xa3   :  { %v19714_v10 = vld [vmem:[#allocation5 + $0x13dc] sm:$0xf0]  ;;  %9496 = vmatmul.bf16.vlgmr.msrb.gmra.mxu2 %v20994_v34 }
  0xa4   :  { %v15432_v11 = vld [vmem:[#allocation5 + $0x15c0] sm:$0xf]  ;;  %v15177_v24 = vor.u32 %v19714_v10, %v15176_v6  ;;  %9514 = vmatpush.bf16.msra.mxu0 %v14921_v20 }
  0xa5   :  { %v19778_v12 = vld [vmem:[#allocation5 + $0x15dc] sm:$0xf0]  ;;  %9509 = vmatmul.bf16.vlgmr.msrb.gmra.mxu3 %v20998_v38 }
  0xa6   :  { %v15688_v16 = vld [vmem:[#allocation5 + $0x17c0] sm:$0xf]  ;;  %v15433_v26 = vor.u32 %v19778_v12, %v15432_v11  ;;  %9527 = vmatpush.bf16.msra.mxu1 %v15177_v24 }
  0xa7   :  { %v19842_v17 = vld [vmem:[#allocation5 + $0x17dc] sm:$0xf0] }
  0xa8   :  { %v14888_v21 = vld [vmem:[#allocation5 + $0x1180] sm:$0xf]  ;;  %v15689_v30 = vor.u32 %v19842_v17, %v15688_v16  ;;  %9540 = vmatpush.bf16.msra.mxu2 %v15433_v26 }
  0xa9   :  { %v132_v22 = vld [vmem:[#allocation2 + $0x20] sm:$0xff] }
  0xaa   :  { %v19642_v27 = vld [vmem:[#allocation5 + $0x119c] sm:$0xf0]  ;;  %v20996_v37 = vpack.c.bf16 %v132_v22, %v132_v22  ;;  %9553 = vmatpush.bf16.msra.mxu3 %v15689_v30 }
  0xab   :  { %v15144_v28 = vld [vmem:[#allocation5 + $0x1380] sm:$0xf]  ;;  %v14889_v39 = vor.u32 %v19642_v27, %v14888_v21 }
  0xac   :  { %v19706_v31 = vld [vmem:[#allocation5 + $0x139c] sm:$0xf0]  ;;  %9470 = vmatmul.bf16.vlgmr.msrb.gmra.mxu0 %v20996_v37 }
  0xad   :  { %v15400_v32 = vld [vmem:[#allocation5 + $0x1580] sm:$0xf]  ;;  %v15145_v41 = vor.u32 %v19706_v31, %v15144_v28  ;;  %9515 = vmatpush.bf16.msra.mxu0 %v14889_v39 }
  0xae   :  { %v19770_v33 = vld [vmem:[#allocation5 + $0x159c] sm:$0xf0] }
  0xaf   :  { %v15656_v35 = vld [vmem:[#allocation5 + $0x1780] sm:$0xf]  ;;  %v15401_v42 = vor.u32 %v19770_v33, %v15400_v32  ;;  %9528 = vmatpush.bf16.msra.mxu1 %v15145_v41 }
  0xb0   :  { %v19834_v36 = vld [vmem:[#allocation5 + $0x179c] sm:$0xf0] }
  0xb1   :  { %v14856_v43 = vld [vmem:[#allocation5 + $0x1140] sm:$0xf]  ;;  %v15657_v46 = vor.u32 %v19834_v36, %v15656_v35  ;;  %9541 = vmatpush.bf16.msra.mxu2 %v15401_v42 }
  0xb2   :  { %v19634_v44 = vld [vmem:[#allocation5 + $0x115c] sm:$0xf0] }
  0xb3   :  { %v15112_v45 = vld [vmem:[#allocation5 + $0x1340] sm:$0xf]  ;;  %v14857_v52 = vor.u32 %v19634_v44, %v14856_v43  ;;  %9554 = vmatpush.bf16.msra.mxu3 %v15657_v46 }
  0xb4   :  { %v19698_v47 = vld [vmem:[#allocation5 + $0x135c] sm:$0xf0] }
  0xb5   :  { %v15368_v48 = vld [vmem:[#allocation5 + $0x1540] sm:$0xf]  ;;  %v15113_v53 = vor.u32 %v19698_v47, %v15112_v45  ;;  %9516 = vmatpush.bf16.msra.mxu0 %v14857_v52 }
  0xb6   :  { %v19762_v49 = vld [vmem:[#allocation5 + $0x155c] sm:$0xf0] }
  0xb7   :  { %v15624_v50 = vld [vmem:[#allocation5 + $0x1740] sm:$0xf]  ;;  %v15369_v54 = vor.u32 %v19762_v49, %v15368_v48  ;;  %9529 = vmatpush.bf16.msra.mxu1 %v15113_v53 }
  0xb8   :  { %v19826_v51 = vld [vmem:[#allocation5 + $0x175c] sm:$0xf0] }
  0xb9   :  { %v14824_v55 = vld [vmem:[#allocation5 + $0x1100] sm:$0xf]  ;;  %v15625_v58 = vor.u32 %v19826_v51, %v15624_v50  ;;  %9542 = vmatpush.bf16.msra.mxu2 %v15369_v54 }
  0xba   :  { %v19626_v56 = vld [vmem:[#allocation5 + $0x111c] sm:$0xf0] }
  0xbb   :  { %v15080_v57 = vld [vmem:[#allocation5 + $0x1300] sm:$0xf]  ;;  %v14825_v0 = vor.u32 %v19626_v56, %v14824_v55  ;;  %9555 = vmatpush.bf16.msra.mxu3 %v15625_v58 }
  0xbc   :  { %v19690_v59 = vld [vmem:[#allocation5 + $0x131c] sm:$0xf0] }
  0xbd   :  { %v15336_v60 = vld [vmem:[#allocation5 + $0x1500] sm:$0xf]  ;;  %v15081_v1 = vor.u32 %v19690_v59, %v15080_v57  ;;  %9517 = vmatpush.bf16.msra.mxu0 %v14825_v0 }
  0xbe   :  { %v19754_v61 = vld [vmem:[#allocation5 + $0x151c] sm:$0xf0] }
  0xbf   :  { %v15592_v62 = vld [vmem:[#allocation5 + $0x1700] sm:$0xf]  ;;  %v15337_v2 = vor.u32 %v19754_v61, %v15336_v60  ;;  %9530 = vmatpush.bf16.msra.mxu1 %v15081_v1 }
  0xc0   :  { %v19818_v63 = vld [vmem:[#allocation5 + $0x171c] sm:$0xf0] }
  0xc1   :  { %v14792_v3 = vld [vmem:[#allocation5 + $0x10c0] sm:$0xf]  ;;  %v15593_v6 = vor.u32 %v19818_v63, %v15592_v62  ;;  %9543 = vmatpush.bf16.msra.mxu2 %v15337_v2 }
  0xc2   :  { %v19618_v4 = vld [vmem:[#allocation5 + $0x10dc] sm:$0xf0] }
  0xc3   :  { %v15048_v5 = vld [vmem:[#allocation5 + $0x12c0] sm:$0xf]  ;;  %v14793_v14 = vor.u32 %v19618_v4, %v14792_v3  ;;  %9556 = vmatpush.bf16.msra.mxu3 %v15593_v6  ;;  %v138_v6 = vld [vmem:[#allocation2 + $0x50] sm:$0xff] }
  0xc4   :  { %v19682_v7 = vld [vmem:[#allocation5 + $0x12dc] sm:$0xf0] }
  0xc5   :  { %v15304_v10 = vld [vmem:[#allocation5 + $0x14c0] sm:$0xf]  ;;  %v15049_v16 = vor.u32 %v19682_v7, %v15048_v5  ;;  %9518 = vmatpush.bf16.msra.mxu0 %v14793_v14  ;;  %v137_v7 = vld [vmem:[#allocation2 + $0x48] sm:$0xff] }
  0xc6   :  { %v19746_v11 = vld [vmem:[#allocation5 + $0x14dc] sm:$0xf0] }
  0xc7   :  { %v15560_v12 = vld [vmem:[#allocation5 + $0x16c0] sm:$0xf]  ;;  %v15305_v17 = vor.u32 %v19746_v11, %v15304_v10  ;;  %9531 = vmatpush.bf16.msra.mxu1 %v15049_v16  ;;  %v139_v10 = vld [vmem:[#allocation2 + $0x58] sm:$0xff] }
  0xc8   :  { %v19810_v13 = vld [vmem:[#allocation5 + $0x16dc] sm:$0xf0] }
  0xc9   :  { %v14760_v18 = vld [vmem:[#allocation5 + $0x1080] sm:$0xf]  ;;  %v15561_v21 = vor.u32 %v19810_v13, %v15560_v12  ;;  %9544 = vmatpush.bf16.msra.mxu2 %v15305_v17 }
  0xca   :  { %v19610_v19 = vld [vmem:[#allocation5 + $0x109c] sm:$0xf0] }
  0xcb   :  { %v15016_v20 = vld [vmem:[#allocation5 + $0x1280] sm:$0xf]  ;;  %v14761_v28 = vor.u32 %v19610_v19, %v14760_v18  ;;  %9557 = vmatpush.bf16.msra.mxu3 %v15561_v21 }
  0xcc   :  { %v19674_v22 = vld [vmem:[#allocation5 + $0x129c] sm:$0xf0] }
  0xcd   :  { %v15272_v23 = vld [vmem:[#allocation5 + $0x1480] sm:$0xf]  ;;  %v15017_v29 = vor.u32 %v19674_v22, %v15016_v20  ;;  %9519 = vmatpush.bf16.msra.mxu0 %v14761_v28  ;;  %v21008_v22 = vpack.c.bf16 %v138_v6, %v138_v6 }
  0xce   :  { %v19738_v24 = vld [vmem:[#allocation5 + $0x149c] sm:$0xf0] }
  0xcf   :  { %v15528_v26 = vld [vmem:[#allocation5 + $0x1680] sm:$0xf]  ;;  %v15273_v30 = vor.u32 %v19738_v24, %v15272_v23  ;;  %9532 = vmatpush.bf16.msra.mxu1 %v15017_v29  ;;  %v21010_v23 = vpack.c.bf16 %v137_v7, %v137_v7 }
  0xd0   :  { %v19802_v27 = vld [vmem:[#allocation5 + $0x169c] sm:$0xf0] }
  0xd1   :  { %v14728_v31 = vld [vmem:[#allocation5 + $0x1040] sm:$0xf]  ;;  %v15529_v35 = vor.u32 %v19802_v27, %v15528_v26  ;;  %9545 = vmatpush.bf16.msra.mxu2 %v15273_v30  ;;  %v21012_v27 = vpack.c.bf16 %v139_v10, %v139_v10 }
  0xd2   :  { %v19602_v32 = vld [vmem:[#allocation5 + $0x105c] sm:$0xf0] }
  0xd3   :  { %v14984_v33 = vld [vmem:[#allocation5 + $0x1240] sm:$0xf]  ;;  %v14729_v45 = vor.u32 %v19602_v32, %v14728_v31  ;;  %9558 = vmatpush.bf16.msra.mxu3 %v15529_v35 }
  0xd4   :  { %v19666_v36 = vld [vmem:[#allocation5 + $0x125c] sm:$0xf0] }
  0xd5   :  { %v15240_v39 = vld [vmem:[#allocation5 + $0x1440] sm:$0xf]  ;;  %v14985_v49 = vor.u32 %v19666_v36, %v14984_v33  ;;  %9520 = vmatpush.bf16.msra.mxu0 %v14729_v45 }
  0xd6   :  { %v19730_v41 = vld [vmem:[#allocation5 + $0x145c] sm:$0xf0] }
  0xd7   :  { %v15496_v42 = vld [vmem:[#allocation5 + $0x1640] sm:$0xf]  ;;  %v15241_v50 = vor.u32 %v19730_v41, %v15240_v39  ;;  %9533 = vmatpush.bf16.msra.mxu1 %v14985_v49 }
  0xd8   :  { %v19794_v43 = vld [vmem:[#allocation5 + $0x165c] sm:$0xf0] }
  0xd9   :  { %v14696_v44 = vld [vmem:[#allocation5 + $0x1000] sm:$0xf]  ;;  %v15497_v54 = vor.u32 %v19794_v43, %v15496_v42  ;;  %9546 = vmatpush.bf16.msra.mxu2 %v15241_v50 }
  0xda   :  { %v19594_v46 = vld [vmem:[#allocation5 + $0x101c] sm:$0xf0] }
  0xdb   :  { %v14952_v47 = vld [vmem:[#allocation5 + $0x1200] sm:$0xf]  ;;  %v14697_v60 = vor.u32 %v19594_v46, %v14696_v44  ;;  %9559 = vmatpush.bf16.msra.mxu3 %v15497_v54 }
  0xdc   :  { %v19658_v48 = vld [vmem:[#allocation5 + $0x121c] sm:$0xf0] }
  0xdd   :  { %v15208_v51 = vld [vmem:[#allocation5 + $0x1400] sm:$0xf]  ;;  %v14953_v63 = vor.u32 %v19658_v48, %v14952_v47  ;;  %9521 = vmatpush.bf16.msra.mxu0 %v14697_v60 }
  0xde   :  { %v19722_v52 = vld [vmem:[#allocation5 + $0x141c] sm:$0xf0] }
  0xdf   :  { %v15464_v53 = vld [vmem:[#allocation5 + $0x1600] sm:$0xf]  ;;  %v15209_v0 = vor.u32 %v19722_v52, %v15208_v51  ;;  %9534 = vmatpush.bf16.msra.mxu1 %v14953_v63 }
  0xe0   :  { %v19786_v55 = vld [vmem:[#allocation5 + $0x161c] sm:$0xf0] }
  0xe1   :  { %v15944_v56 = vld [vmem:[#allocation5 + $0x19c0] sm:$0xf]  ;;  %v15465_v4 = vor.u32 %v19786_v55, %v15464_v53  ;;  %9547 = vmatpush.bf16.msra.mxu2 %v15209_v0 }
  0xe2   :  { %v19906_v57 = vld [vmem:[#allocation5 + $0x19dc] sm:$0xf0]  ;;  %9535 = vmatmul.bf16.vlgmr.msra.gmra.mxu1 %v21010_v23 }
  0xe3   :  { %v16200_v58 = vld [vmem:[#allocation5 + $0x1bc0] sm:$0xf]  ;;  %v15945_v5 = vor.u32 %v19906_v57, %v15944_v56  ;;  %9560 = vmatpush.bf16.msra.mxu3 %v15465_v4 }
  0xe4   :  { %v19970_v59 = vld [vmem:[#allocation5 + $0x1bdc] sm:$0xf0]  ;;  %9548 = vmatmul.bf16.vlgmr.msra.gmra.mxu2 %v21008_v22 }
  0xe5   :  { %v16456_v61 = vld [vmem:[#allocation5 + $0x1dc0] sm:$0xf]  ;;  %v16201_v11 = vor.u32 %v19970_v59, %v16200_v58  ;;  %9566 = vmatpush.bf16.msrb.mxu0 %v15945_v5 }
  0xe6   :  { %v20034_v62 = vld [vmem:[#allocation5 + $0x1ddc] sm:$0xf0]  ;;  %9561 = vmatmul.bf16.vlgmr.msra.gmra.mxu3 %v21012_v27 }
  0xe7   :  { %v16712_v1 = vld [vmem:[#allocation5 + $0x1fc0] sm:$0xf]  ;;  %v16457_v12 = vor.u32 %v20034_v62, %v16456_v61  ;;  %9579 = vmatpush.bf16.msrb.mxu1 %v16201_v11 }
  0xe8   :  { %v20098_v2 = vld [vmem:[#allocation5 + $0x1fdc] sm:$0xf0] }
  0xe9   :  { %v136_v3 = vld [vmem:[#allocation2 + $0x40] sm:$0xff]  ;;  %v16713_v17 = vor.u32 %v20098_v2, %v16712_v1  ;;  %9592 = vmatpush.bf16.msrb.mxu2 %v16457_v12 }
  0xea   :  { %v15912_v13 = vld [vmem:[#allocation5 + $0x1980] sm:$0xf]  ;;  %v21006_v18 = vpack.c.bf16 %v136_v3, %v136_v3 }
  0xeb   :  { %v19898_v14 = vld [vmem:[#allocation5 + $0x199c] sm:$0xf0]  ;;  %9605 = vmatpush.bf16.msrb.mxu3 %v16713_v17 }
  0xec   :  { %v16168_v16 = vld [vmem:[#allocation5 + $0x1b80] sm:$0xf]  ;;  %v15913_v28 = vor.u32 %v19898_v14, %v15912_v13  ;;  %9522 = vmatmul.bf16.vlgmr.msra.gmra.mxu0 %v21006_v18 }
  0xed   :  { %v19962_v19 = vld [vmem:[#allocation5 + $0x1b9c] sm:$0xf0] }
  0xee   :  { %v16424_v20 = vld [vmem:[#allocation5 + $0x1d80] sm:$0xf]  ;;  %v16169_v29 = vor.u32 %v19962_v19, %v16168_v16  ;;  %9567 = vmatpush.bf16.msrb.mxu0 %v15913_v28 }
  0xef   :  { %v20026_v21 = vld [vmem:[#allocation5 + $0x1d9c] sm:$0xf0] }
  0xf0   :  { %v16680_v24 = vld [vmem:[#allocation5 + $0x1f80] sm:$0xf]  ;;  %v16425_v30 = vor.u32 %v20026_v21, %v16424_v20  ;;  %9580 = vmatpush.bf16.msrb.mxu1 %v16169_v29 }
  0xf1   :  { %v20090_v26 = vld [vmem:[#allocation5 + $0x1f9c] sm:$0xf0] }
  0xf2   :  { %v15880_v31 = vld [vmem:[#allocation5 + $0x1940] sm:$0xf]  ;;  %v16681_v35 = vor.u32 %v20090_v26, %v16680_v24  ;;  %9593 = vmatpush.bf16.msrb.mxu2 %v16425_v30 }
  0xf3   :  { %v19890_v32 = vld [vmem:[#allocation5 + $0x195c] sm:$0xf0] }
  0xf4   :  { %v16136_v33 = vld [vmem:[#allocation5 + $0x1b40] sm:$0xf]  ;;  %v15881_v44 = vor.u32 %v19890_v32, %v15880_v31  ;;  %9606 = vmatpush.bf16.msrb.mxu3 %v16681_v35 }
  0xf5   :  { %v19954_v36 = vld [vmem:[#allocation5 + $0x1b5c] sm:$0xf0] }
  0xf6   :  { %v16392_v39 = vld [vmem:[#allocation5 + $0x1d40] sm:$0xf]  ;;  %v16137_v45 = vor.u32 %v19954_v36, %v16136_v33  ;;  %9568 = vmatpush.bf16.msrb.mxu0 %v15881_v44 }
  0xf7   :  { %v20018_v41 = vld [vmem:[#allocation5 + $0x1d5c] sm:$0xf0] }
  0xf8   :  { %v16648_v42 = vld [vmem:[#allocation5 + $0x1f40] sm:$0xf]  ;;  %v16393_v46 = vor.u32 %v20018_v41, %v16392_v39  ;;  %9581 = vmatpush.bf16.msrb.mxu1 %v16137_v45 }
  0xf9   :  { %v20082_v43 = vld [vmem:[#allocation5 + $0x1f5c] sm:$0xf0] }
  0xfa   :  { %v15848_v47 = vld [vmem:[#allocation5 + $0x1900] sm:$0xf]  ;;  %v16649_v50 = vor.u32 %v20082_v43, %v16648_v42  ;;  %9594 = vmatpush.bf16.msrb.mxu2 %v16393_v46 }
  0xfb   :  { %v19882_v48 = vld [vmem:[#allocation5 + $0x191c] sm:$0xf0] }
  0xfc   :  { %v16104_v49 = vld [vmem:[#allocation5 + $0x1b00] sm:$0xf]  ;;  %v15849_v56 = vor.u32 %v19882_v48, %v15848_v47  ;;  %9607 = vmatpush.bf16.msrb.mxu3 %v16649_v50 }
  0xfd   :  { %v19946_v51 = vld [vmem:[#allocation5 + $0x1b1c] sm:$0xf0] }
  0xfe   :  { %v16360_v52 = vld [vmem:[#allocation5 + $0x1d00] sm:$0xf]  ;;  %v16105_v57 = vor.u32 %v19946_v51, %v16104_v49  ;;  %9569 = vmatpush.bf16.msrb.mxu0 %v15849_v56 }
  0xff   :  { %v20010_v53 = vld [vmem:[#allocation5 + $0x1d1c] sm:$0xf0] }
 0x100   :  { %v16616_v54 = vld [vmem:[#allocation5 + $0x1f00] sm:$0xf]  ;;  %v16361_v58 = vor.u32 %v20010_v53, %v16360_v52  ;;  %9582 = vmatpush.bf16.msrb.mxu1 %v16105_v57 }
 0x101   :  { %v20074_v55 = vld [vmem:[#allocation5 + $0x1f1c] sm:$0xf0] }
 0x102   :  { %v15816_v59 = vld [vmem:[#allocation5 + $0x18c0] sm:$0xf]  ;;  %v16617_v62 = vor.u32 %v20074_v55, %v16616_v54  ;;  %9595 = vmatpush.bf16.msrb.mxu2 %v16361_v58 }
 0x103   :  { %v19874_v60 = vld [vmem:[#allocation5 + $0x18dc] sm:$0xf0] }
 0x104   :  { %v16072_v61 = vld [vmem:[#allocation5 + $0x1ac0] sm:$0xf]  ;;  %v15817_v4 = vor.u32 %v19874_v60, %v15816_v59  ;;  %9608 = vmatpush.bf16.msrb.mxu3 %v16617_v62 }
 0x105   :  { %v19938_v63 = vld [vmem:[#allocation5 + $0x1adc] sm:$0xf0] }
 0x106   :  { %v16328_v0 = vld [vmem:[#allocation5 + $0x1cc0] sm:$0xf]  ;;  %v16073_v5 = vor.u32 %v19938_v63, %v16072_v61  ;;  %9570 = vmatpush.bf16.msrb.mxu0 %v15817_v4  ;;  %v143_v4 = vld [vmem:[#allocation2 + $0x78] sm:$0xff] }
 0x107   :  { %v20002_v1 = vld [vmem:[#allocation5 + $0x1cdc] sm:$0xf0] }
 0x108   :  { %v16584_v2 = vld [vmem:[#allocation5 + $0x1ec0] sm:$0xf]  ;;  %v16329_v6 = vor.u32 %v20002_v1, %v16328_v0  ;;  %9583 = vmatpush.bf16.msrb.mxu1 %v16073_v5 }
 0x109   :  { %v20066_v3 = vld [vmem:[#allocation5 + $0x1edc] sm:$0xf0] }
 0x10a   :  { %v15784_v7 = vld [vmem:[#allocation5 + $0x1880] sm:$0xf]  ;;  %v16585_v12 = vor.u32 %v20066_v3, %v16584_v2  ;;  %9596 = vmatpush.bf16.msrb.mxu2 %v16329_v6  ;;  %v142_v2 = vld [vmem:[#allocation2 + $0x70] sm:$0xff]  ;;  %v141_v3 = vld [vmem:[#allocation2 + $0x68] sm:$0xff] }
 0x10b   :  { %v19866_v10 = vld [vmem:[#allocation5 + $0x189c] sm:$0xf0] }
 0x10c   :  { %v16040_v11 = vld [vmem:[#allocation5 + $0x1a80] sm:$0xf]  ;;  %v15785_v20 = vor.u32 %v19866_v10, %v15784_v7  ;;  %9609 = vmatpush.bf16.msrb.mxu3 %v16585_v12 }
 0x10d   :  { %v19930_v13 = vld [vmem:[#allocation5 + $0x1a9c] sm:$0xf0] }
 0x10e   :  { %v16296_v14 = vld [vmem:[#allocation5 + $0x1c80] sm:$0xf]  ;;  %v16041_v21 = vor.u32 %v19930_v13, %v16040_v11  ;;  %9571 = vmatpush.bf16.msrb.mxu0 %v15785_v20  ;;  %v21022_v20 = vpack.c.bf16 %v141_v3, %v141_v3 }
 0x10f   :  { %v19994_v16 = vld [vmem:[#allocation5 + $0x1c9c] sm:$0xf0] }
 0x110   :  { %v16552_v17 = vld [vmem:[#allocation5 + $0x1e80] sm:$0xf]  ;;  %v16297_v24 = vor.u32 %v19994_v16, %v16296_v14  ;;  %9584 = vmatpush.bf16.msrb.mxu1 %v16041_v21 }
 0x111   :  { %v20058_v19 = vld [vmem:[#allocation5 + $0x1e9c] sm:$0xf0] }
 0x112   :  { %v15752_v26 = vld [vmem:[#allocation5 + $0x1840] sm:$0xf]  ;;  %v16553_v30 = vor.u32 %v20058_v19, %v16552_v17  ;;  %9597 = vmatpush.bf16.msrb.mxu2 %v16297_v24  ;;  %v21020_v19 = vpack.c.bf16 %v142_v2, %v142_v2 }
 0x113   :  { %v19858_v28 = vld [vmem:[#allocation5 + $0x185c] sm:$0xf0] }
 0x114   :  { %v16008_v29 = vld [vmem:[#allocation5 + $0x1a40] sm:$0xf]  ;;  %v15753_v39 = vor.u32 %v19858_v28, %v15752_v26  ;;  %9610 = vmatpush.bf16.msrb.mxu3 %v16553_v30  ;;  %v21024_v26 = vpack.c.bf16 %v143_v4, %v143_v4 }
 0x115   :  { %v19922_v31 = vld [vmem:[#allocation5 + $0x1a5c] sm:$0xf0] }
 0x116   :  { %v16264_v32 = vld [vmem:[#allocation5 + $0x1c40] sm:$0xf]  ;;  %v16009_v43 = vor.u32 %v19922_v31, %v16008_v29  ;;  %9572 = vmatpush.bf16.msrb.mxu0 %v15753_v39 }
 0x117   :  { %v19986_v33 = vld [vmem:[#allocation5 + $0x1c5c] sm:$0xf0] }
 0x118   :  { %v16520_v35 = vld [vmem:[#allocation5 + $0x1e40] sm:$0xf]  ;;  %v16265_v44 = vor.u32 %v19986_v33, %v16264_v32  ;;  %9585 = vmatpush.bf16.msrb.mxu1 %v16009_v43 }
 0x119   :  { %v20050_v36 = vld [vmem:[#allocation5 + $0x1e5c] sm:$0xf0] }
 0x11a   :  { %v15720_v41 = vld [vmem:[#allocation5 + $0x1800] sm:$0xf]  ;;  %v16521_v48 = vor.u32 %v20050_v36, %v16520_v35  ;;  %9598 = vmatpush.bf16.msrb.mxu2 %v16265_v44 }
 0x11b   :  { %v19850_v42 = vld [vmem:[#allocation5 + $0x181c] sm:$0xf0] }
 0x11c   :  { %v15976_v45 = vld [vmem:[#allocation5 + $0x1a00] sm:$0xf]  ;;  %v15721_v55 = vor.u32 %v19850_v42, %v15720_v41  ;;  %9611 = vmatpush.bf16.msrb.mxu3 %v16521_v48 }
 0x11d   :  { %v19914_v46 = vld [vmem:[#allocation5 + $0x1a1c] sm:$0xf0] }
 0x11e   :  { %v16232_v47 = vld [vmem:[#allocation5 + $0x1c00] sm:$0xf]  ;;  %v15977_v59 = vor.u32 %v19914_v46, %v15976_v45  ;;  %9573 = vmatpush.bf16.msrb.mxu0 %v15721_v55 }
 0x11f   :  { %v19978_v49 = vld [vmem:[#allocation5 + $0x1c1c] sm:$0xf0] }
 0x120   :  { %v16488_v50 = vld [vmem:[#allocation5 + $0x1e00] sm:$0xf]  ;;  %v16233_v60 = vor.u32 %v19978_v49, %v16232_v47  ;;  %9586 = vmatpush.bf16.msrb.mxu1 %v15977_v59 }
 0x121   :  { %v20042_v51 = vld [vmem:[#allocation5 + $0x1e1c] sm:$0xf0] }
 0x122   :  { %v16968_v52 = vld [vmem:[#allocation5 + $0x21c0] sm:$0xf]  ;;  %v16489_v0 = vor.u32 %v20042_v51, %v16488_v50  ;;  %9599 = vmatpush.bf16.msrb.mxu2 %v16233_v60 }
 0x123   :  { %v20162_v53 = vld [vmem:[#allocation5 + $0x21dc] sm:$0xf0]  ;;  %9587 = vmatmul.bf16.vlgmr.msrb.gmra.mxu1 %v21022_v20 }
 0x124   :  { %v17224_v54 = vld [vmem:[#allocation5 + $0x23c0] sm:$0xf]  ;;  %v16969_v1 = vor.u32 %v20162_v53, %v16968_v52  ;;  %9612 = vmatpush.bf16.msrb.mxu3 %v16489_v0 }
 0x125   :  { %v20226_v56 = vld [vmem:[#allocation5 + $0x23dc] sm:$0xf0]  ;;  %9600 = vmatmul.bf16.vlgmr.msrb.gmra.mxu2 %v21020_v19 }
 0x126   :  { %v17480_v57 = vld [vmem:[#allocation5 + $0x25c0] sm:$0xf]  ;;  %v17225_v5 = vor.u32 %v20226_v56, %v17224_v54  ;;  %9618 = vmatpush.bf16.msra.mxu0 %v16969_v1 }
 0x127   :  { %v20290_v58 = vld [vmem:[#allocation5 + $0x25dc] sm:$0xf0]  ;;  %9613 = vmatmul.bf16.vlgmr.msrb.gmra.mxu3 %v21024_v26 }
 0x128   :  { %v17736_v61 = vld [vmem:[#allocation5 + $0x27c0] sm:$0xf]  ;;  %v17481_v6 = vor.u32 %v20290_v58, %v17480_v57  ;;  %9631 = vmatpush.bf16.msra.mxu1 %v17225_v5 }
 0x129   :  { %v20354_v62 = vld [vmem:[#allocation5 + $0x27dc] sm:$0xf0] }
 0x12a   :  { %v140_v63 = vld [vmem:[#allocation2 + $0x60] sm:$0xff]  ;;  %v17737_v12 = vor.u32 %v20354_v62, %v17736_v61  ;;  %9644 = vmatpush.bf16.msra.mxu2 %v17481_v6 }
 0x12b   :  { %v16936_v7 = vld [vmem:[#allocation5 + $0x2180] sm:$0xf]  ;;  %v21018_v13 = vpack.c.bf16 %v140_v63, %v140_v63 }
 0x12c   :  { %v20154_v10 = vld [vmem:[#allocation5 + $0x219c] sm:$0xf0]  ;;  %9657 = vmatpush.bf16.msra.mxu3 %v17737_v12 }
 0x12d   :  { %v17192_v11 = vld [vmem:[#allocation5 + $0x2380] sm:$0xf]  ;;  %v16937_v28 = vor.u32 %v20154_v10, %v16936_v7  ;;  %9574 = vmatmul.bf16.vlgmr.msrb.gmra.mxu0 %v21018_v13 }
 0x12e   :  { %v20218_v14 = vld [vmem:[#allocation5 + $0x239c] sm:$0xf0] }
 0x12f   :  { %v17448_v16 = vld [vmem:[#allocation5 + $0x2580] sm:$0xf]  ;;  %v17193_v29 = vor.u32 %v20218_v14, %v17192_v11  ;;  %9619 = vmatpush.bf16.msra.mxu0 %v16937_v28 }
 0x130   :  { %v20282_v17 = vld [vmem:[#allocation5 + $0x259c] sm:$0xf0] }
 0x131   :  { %v17704_v21 = vld [vmem:[#allocation5 + $0x2780] sm:$0xf]  ;;  %v17449_v30 = vor.u32 %v20282_v17, %v17448_v16  ;;  %9632 = vmatpush.bf16.msra.mxu1 %v17193_v29 }
 0x132   :  { %v20346_v24 = vld [vmem:[#allocation5 + $0x279c] sm:$0xf0] }
 0x133   :  { %v16904_v31 = vld [vmem:[#allocation5 + $0x2140] sm:$0xf]  ;;  %v17705_v35 = vor.u32 %v20346_v24, %v17704_v21  ;;  %9645 = vmatpush.bf16.msra.mxu2 %v17449_v30 }
 0x134   :  { %v20146_v32 = vld [vmem:[#allocation5 + $0x215c] sm:$0xf0] }
 0x135   :  { %v17160_v33 = vld [vmem:[#allocation5 + $0x2340] sm:$0xf]  ;;  %v16905_v44 = vor.u32 %v20146_v32, %v16904_v31  ;;  %9658 = vmatpush.bf16.msra.mxu3 %v17705_v35 }
 0x136   :  { %v20210_v36 = vld [vmem:[#allocation5 + $0x235c] sm:$0xf0] }
 0x137   :  { %v17416_v39 = vld [vmem:[#allocation5 + $0x2540] sm:$0xf]  ;;  %v17161_v45 = vor.u32 %v20210_v36, %v17160_v33  ;;  %9620 = vmatpush.bf16.msra.mxu0 %v16905_v44 }
 0x138   :  { %v20274_v41 = vld [vmem:[#allocation5 + $0x255c] sm:$0xf0] }
 0x139   :  { %v17672_v42 = vld [vmem:[#allocation5 + $0x2740] sm:$0xf]  ;;  %v17417_v46 = vor.u32 %v20274_v41, %v17416_v39  ;;  %9633 = vmatpush.bf16.msra.mxu1 %v17161_v45 }
 0x13a   :  { %v20338_v43 = vld [vmem:[#allocation5 + $0x275c] sm:$0xf0] }
 0x13b   :  { %v16872_v47 = vld [vmem:[#allocation5 + $0x2100] sm:$0xf]  ;;  %v17673_v50 = vor.u32 %v20338_v43, %v17672_v42  ;;  %9646 = vmatpush.bf16.msra.mxu2 %v17417_v46 }
 0x13c   :  { %v20138_v48 = vld [vmem:[#allocation5 + $0x211c] sm:$0xf0] }
 0x13d   :  { %v17128_v49 = vld [vmem:[#allocation5 + $0x2300] sm:$0xf]  ;;  %v16873_v56 = vor.u32 %v20138_v48, %v16872_v47  ;;  %9659 = vmatpush.bf16.msra.mxu3 %v17673_v50 }
 0x13e   :  { %v20202_v51 = vld [vmem:[#allocation5 + $0x231c] sm:$0xf0] }
 0x13f   :  { %v17384_v52 = vld [vmem:[#allocation5 + $0x2500] sm:$0xf]  ;;  %v17129_v57 = vor.u32 %v20202_v51, %v17128_v49  ;;  %9621 = vmatpush.bf16.msra.mxu0 %v16873_v56 }
 0x140   :  { %v20266_v53 = vld [vmem:[#allocation5 + $0x251c] sm:$0xf0] }
 0x141   :  { %v17640_v54 = vld [vmem:[#allocation5 + $0x2700] sm:$0xf]  ;;  %v17385_v58 = vor.u32 %v20266_v53, %v17384_v52  ;;  %9634 = vmatpush.bf16.msra.mxu1 %v17129_v57 }
 0x142   :  { %v20330_v55 = vld [vmem:[#allocation5 + $0x271c] sm:$0xf0] }
 0x143   :  { %v16840_v59 = vld [vmem:[#allocation5 + $0x20c0] sm:$0xf]  ;;  %v17641_v62 = vor.u32 %v20330_v55, %v17640_v54  ;;  %9647 = vmatpush.bf16.msra.mxu2 %v17385_v58 }
 0x144   :  { %v20130_v60 = vld [vmem:[#allocation5 + $0x20dc] sm:$0xf0] }
 0x145   :  { %v17096_v61 = vld [vmem:[#allocation5 + $0x22c0] sm:$0xf]  ;;  %v16841_v4 = vor.u32 %v20130_v60, %v16840_v59  ;;  %9660 = vmatpush.bf16.msra.mxu3 %v17641_v62 }
 0x146   :  { %v20194_v63 = vld [vmem:[#allocation5 + $0x22dc] sm:$0xf0] }
 0x147   :  { %v17352_v0 = vld [vmem:[#allocation5 + $0x24c0] sm:$0xf]  ;;  %v17097_v5 = vor.u32 %v20194_v63, %v17096_v61  ;;  %9622 = vmatpush.bf16.msra.mxu0 %v16841_v4 }
 0x148   :  { %v20258_v1 = vld [vmem:[#allocation5 + $0x24dc] sm:$0xf0] }
 0x149   :  { %v17608_v2 = vld [vmem:[#allocation5 + $0x26c0] sm:$0xf]  ;;  %v17353_v6 = vor.u32 %v20258_v1, %v17352_v0  ;;  %9635 = vmatpush.bf16.msra.mxu1 %v17097_v5 }
 0x14a   :  { %v20322_v3 = vld [vmem:[#allocation5 + $0x26dc] sm:$0xf0] }
 0x14b   :  { %v16808_v7 = vld [vmem:[#allocation5 + $0x2080] sm:$0xf]  ;;  %v17609_v12 = vor.u32 %v20322_v3, %v17608_v2  ;;  %9648 = vmatpush.bf16.msra.mxu2 %v17353_v6  ;;  %v146_v6 = vld [vmem:[#allocation2 + $0x90] sm:$0xff] }
 0x14c   :  { %v20122_v10 = vld [vmem:[#allocation5 + $0x209c] sm:$0xf0] }
 0x14d   :  { %v17064_v11 = vld [vmem:[#allocation5 + $0x2280] sm:$0xf]  ;;  %v16809_v28 = vor.u32 %v20122_v10, %v16808_v7  ;;  %9661 = vmatpush.bf16.msra.mxu3 %v17609_v12  ;;  %v145_v7 = vld [vmem:[#allocation2 + $0x88] sm:$0xff]  ;;  %v147_v10 = vld [vmem:[#allocation2 + $0x98] sm:$0xff] }
 0x14e   :  { %v20186_v14 = vld [vmem:[#allocation5 + $0x229c] sm:$0xf0] }
 0x14f   :  { %v17320_v16 = vld [vmem:[#allocation5 + $0x2480] sm:$0xf]  ;;  %v17065_v29 = vor.u32 %v20186_v14, %v17064_v11  ;;  %9623 = vmatpush.bf16.msra.mxu0 %v16809_v28 }
 0x150   :  { %v20250_v17 = vld [vmem:[#allocation5 + $0x249c] sm:$0xf0] }
 0x151   :  { %v17576_v21 = vld [vmem:[#allocation5 + $0x2680] sm:$0xf]  ;;  %v17321_v30 = vor.u32 %v20250_v17, %v17320_v16  ;;  %9636 = vmatpush.bf16.msra.mxu1 %v17065_v29 }
 0x152   :  { %v20314_v24 = vld [vmem:[#allocation5 + $0x269c] sm:$0xf0] }
 0x153   :  { %v16776_v31 = vld [vmem:[#allocation5 + $0x2040] sm:$0xf]  ;;  %v17577_v35 = vor.u32 %v20314_v24, %v17576_v21  ;;  %9649 = vmatpush.bf16.msra.mxu2 %v17321_v30 }
 0x154   :  { %v20114_v32 = vld [vmem:[#allocation5 + $0x205c] sm:$0xf0] }
 0x155   :  { %v17032_v33 = vld [vmem:[#allocation5 + $0x2240] sm:$0xf]  ;;  %v16777_v44 = vor.u32 %v20114_v32, %v16776_v31  ;;  %9662 = vmatpush.bf16.msra.mxu3 %v17577_v35  ;;  %v21032_v31 = vpack.c.bf16 %v146_v6, %v146_v6  ;;  %v21034_v32 = vpack.c.bf16 %v145_v7, %v145_v7 }
 0x156   :  { %v20178_v36 = vld [vmem:[#allocation5 + $0x225c] sm:$0xf0] }
 0x157   :  { %v17288_v39 = vld [vmem:[#allocation5 + $0x2440] sm:$0xf]  ;;  %v17033_v47 = vor.u32 %v20178_v36, %v17032_v33  ;;  %9624 = vmatpush.bf16.msra.mxu0 %v16777_v44  ;;  %v21036_v36 = vpack.c.bf16 %v147_v10, %v147_v10 }
 0x158   :  { %v20242_v41 = vld [vmem:[#allocation5 + $0x245c] sm:$0xf0] }
 0x159   :  { %v17544_v42 = vld [vmem:[#allocation5 + $0x2640] sm:$0xf]  ;;  %v17289_v48 = vor.u32 %v20242_v41, %v17288_v39  ;;  %9637 = vmatpush.bf16.msra.mxu1 %v17033_v47 }
 0x15a   :  { %v20306_v43 = vld [vmem:[#allocation5 + $0x265c] sm:$0xf0] }
 0x15b   :  { %v16744_v45 = vld [vmem:[#allocation5 + $0x2000] sm:$0xf]  ;;  %v17545_v52 = vor.u32 %v20306_v43, %v17544_v42  ;;  %9650 = vmatpush.bf16.msra.mxu2 %v17289_v48 }
 0x15c   :  { %v20106_v46 = vld [vmem:[#allocation5 + $0x201c] sm:$0xf0] }
 0x15d   :  { %v17000_v49 = vld [vmem:[#allocation5 + $0x2200] sm:$0xf]  ;;  %v16745_v59 = vor.u32 %v20106_v46, %v16744_v45  ;;  %9663 = vmatpush.bf16.msra.mxu3 %v17545_v52 }
 0x15e   :  { %v20170_v50 = vld [vmem:[#allocation5 + $0x221c] sm:$0xf0] }
 0x15f   :  { %v17256_v51 = vld [vmem:[#allocation5 + $0x2400] sm:$0xf]  ;;  %v17001_v63 = vor.u32 %v20170_v50, %v17000_v49  ;;  %9625 = vmatpush.bf16.msra.mxu0 %v16745_v59 }
 0x160   :  { %v20234_v53 = vld [vmem:[#allocation5 + $0x241c] sm:$0xf0] }
 0x161   :  { %v17512_v54 = vld [vmem:[#allocation5 + $0x2600] sm:$0xf]  ;;  %v17257_v0 = vor.u32 %v20234_v53, %v17256_v51  ;;  %9638 = vmatpush.bf16.msra.mxu1 %v17001_v63 }
 0x162   :  { %v20298_v55 = vld [vmem:[#allocation5 + $0x261c] sm:$0xf0] }
 0x163   :  { %v17992_v56 = vld [vmem:[#allocation5 + $0x29c0] sm:$0xf]  ;;  %v17513_v4 = vor.u32 %v20298_v55, %v17512_v54  ;;  %9651 = vmatpush.bf16.msra.mxu2 %v17257_v0 }
 0x164   :  { %v20418_v57 = vld [vmem:[#allocation5 + $0x29dc] sm:$0xf0]  ;;  %9639 = vmatmul.bf16.vlgmr.msra.gmra.mxu1 %v21034_v32 }
 0x165   :  { %v18248_v58 = vld [vmem:[#allocation5 + $0x2bc0] sm:$0xf]  ;;  %v17993_v5 = vor.u32 %v20418_v57, %v17992_v56  ;;  %9664 = vmatpush.bf16.msra.mxu3 %v17513_v4 }
 0x166   :  { %v20482_v60 = vld [vmem:[#allocation5 + $0x2bdc] sm:$0xf0]  ;;  %9652 = vmatmul.bf16.vlgmr.msra.gmra.mxu2 %v21032_v31 }
 0x167   :  { %v18504_v61 = vld [vmem:[#allocation5 + $0x2dc0] sm:$0xf]  ;;  %v18249_v11 = vor.u32 %v20482_v60, %v18248_v58  ;;  %9670 = vmatpush.bf16.msrb.mxu0 %v17993_v5 }
 0x168   :  { %v20546_v62 = vld [vmem:[#allocation5 + $0x2ddc] sm:$0xf0]  ;;  %9665 = vmatmul.bf16.vlgmr.msra.gmra.mxu3 %v21036_v36 }
 0x169   :  { %v18760_v1 = vld [vmem:[#allocation5 + $0x2fc0] sm:$0xf]  ;;  %v18505_v12 = vor.u32 %v20546_v62, %v18504_v61  ;;  %9683 = vmatpush.bf16.msrb.mxu1 %v18249_v11 }
 0x16a   :  { %v20610_v2 = vld [vmem:[#allocation5 + $0x2fdc] sm:$0xf0] }
 0x16b   :  { %v144_v3 = vld [vmem:[#allocation2 + $0x80] sm:$0xff]  ;;  %v18761_v21 = vor.u32 %v20610_v2, %v18760_v1  ;;  %9696 = vmatpush.bf16.msrb.mxu2 %v18505_v12 }
 0x16c   :  { %v17960_v14 = vld [vmem:[#allocation5 + $0x2980] sm:$0xf]  ;;  %v21030_v24 = vpack.c.bf16 %v144_v3, %v144_v3 }
 0x16d   :  { %v20410_v16 = vld [vmem:[#allocation5 + $0x299c] sm:$0xf0]  ;;  %9709 = vmatpush.bf16.msrb.mxu3 %v18761_v21 }
 0x16e   :  { %v18216_v17 = vld [vmem:[#allocation5 + $0x2b80] sm:$0xf]  ;;  %v17961_v39 = vor.u32 %v20410_v16, %v17960_v14  ;;  %9626 = vmatmul.bf16.vlgmr.msra.gmra.mxu0 %v21030_v24 }
 0x16f   :  { %v20474_v28 = vld [vmem:[#allocation5 + $0x2b9c] sm:$0xf0] }
 0x170   :  { %v18472_v29 = vld [vmem:[#allocation5 + $0x2d80] sm:$0xf]  ;;  %v18217_v41 = vor.u32 %v20474_v28, %v18216_v17  ;;  %9671 = vmatpush.bf16.msrb.mxu0 %v17961_v39  ;;  %v9419_v28 = vpop.f32.mrf.mxu0 }
 0x171   :  { %v20538_v30 = vld [vmem:[#allocation5 + $0x2d9c] sm:$0xf0] }
 0x172   :  { %v18728_v33 = vld [vmem:[#allocation5 + $0x2f80] sm:$0xf]  ;;  %v18473_v42 = vor.u32 %v20538_v30, %v18472_v29  ;;  %9684 = vmatpush.bf16.msrb.mxu1 %v18217_v41 }
 0x173   :  { %v20602_v35 = vld [vmem:[#allocation5 + $0x2f9c] sm:$0xf0] }
 0x174   :  { %v17928_v43 = vld [vmem:[#allocation5 + $0x2940] sm:$0xf]  ;;  %v18729_v46 = vor.u32 %v20602_v35, %v18728_v33  ;;  %9697 = vmatpush.bf16.msrb.mxu2 %v18473_v42 }
 0x175   :  { %v20402_v44 = vld [vmem:[#allocation5 + $0x295c] sm:$0xf0] }
 0x176   :  { %v18184_v45 = vld [vmem:[#allocation5 + $0x2b40] sm:$0xf]  ;;  %v17929_v52 = vor.u32 %v20402_v44, %v17928_v43  ;;  %9710 = vmatpush.bf16.msrb.mxu3 %v18729_v46 }
 0x177   :  { %v20466_v47 = vld [vmem:[#allocation5 + $0x2b5c] sm:$0xf0] }
 0x178   :  { %v18440_v48 = vld [vmem:[#allocation5 + $0x2d40] sm:$0xf]  ;;  %v18185_v54 = vor.u32 %v20466_v47, %v18184_v45  ;;  %9672 = vmatpush.bf16.msrb.mxu0 %v17929_v52 }
 0x179   :  { %v20530_v49 = vld [vmem:[#allocation5 + $0x2d5c] sm:$0xf0] }
 0x17a   :  { %v18696_v50 = vld [vmem:[#allocation5 + $0x2f40] sm:$0xf]  ;;  %v18441_v55 = vor.u32 %v20530_v49, %v18440_v48  ;;  %9685 = vmatpush.bf16.msrb.mxu1 %v18185_v54  ;;  %v9432_v49 = vpop.f32.mrf.mxu1 }
 0x17b   :  { %v20594_v51 = vld [vmem:[#allocation5 + $0x2f5c] sm:$0xf0] }
 0x17c   :  { %v17896_v53 = vld [vmem:[#allocation5 + $0x2900] sm:$0xf]  ;;  %v18697_v59 = vor.u32 %v20594_v51, %v18696_v50  ;;  %9698 = vmatpush.bf16.msrb.mxu2 %v18441_v55 }
 0x17d   :  { %v20394_v56 = vld [vmem:[#allocation5 + $0x291c] sm:$0xf0] }
 0x17e   :  { %v18152_v57 = vld [vmem:[#allocation5 + $0x2b00] sm:$0xf]  ;;  %v17897_v1 = vor.u32 %v20394_v56, %v17896_v53  ;;  %9711 = vmatpush.bf16.msrb.mxu3 %v18697_v59 }
 0x17f   :  { %v20458_v58 = vld [vmem:[#allocation5 + $0x2b1c] sm:$0xf0] }
 0x180   :  { %v18408_v60 = vld [vmem:[#allocation5 + $0x2d00] sm:$0xf]  ;;  %v18153_v3 = vor.u32 %v20458_v58, %v18152_v57  ;;  %9673 = vmatpush.bf16.msrb.mxu0 %v17897_v1 }
 0x181   :  { %v20522_v61 = vld [vmem:[#allocation5 + $0x2d1c] sm:$0xf0] }
 0x182   :  { %v1712_v62 = vld [vmem:[#allocation7] sm:$0xff]  ;;  %v18409_v4 = vor.u32 %v20522_v61, %v18408_v60  ;;  %9686 = vmatpush.bf16.msrb.mxu1 %v18153_v3  ;;  %v9445_v60 = vpop.f32.mrf.mxu2 }
 0x183   :  { %v18664_v63 = vld [vmem:[#allocation5 + $0x2f00] sm:$0xf]  ;;  %v1714_v7 = vperm.slane %v1712_v62, 0 }
 0x184   :  { %v20586_v0 = vld [vmem:[#allocation5 + $0x2f1c] sm:$0xf0]  ;;  %9699 = vmatpush.bf16.msrb.mxu2 %v18409_v4  ;;  %v9421_v4 = vpop.f32.mrf.mxu0 }
 0x185   :  { %v17864_v2 = vld [vmem:[#allocation5 + $0x28c0] sm:$0xf]  ;;  %v18665_v10 = vor.u32 %v20586_v0, %v18664_v63  ;;  %v9420_v41 = vadd.f32 %v9419_v28, %v1714_v7  ;;  %v9458_v0 = vpop.f32.mrf.mxu3  ;;  %v19134_v28 = vld [vmem:[#allocation5 + $0x1c4] sm:$0xf] }
 0x186   :  { %v20386_v5 = vld [vmem:[#allocation5 + $0x28dc] sm:$0xf0]  ;;  %v13610_v4 = vld [vmem:[#allocation5 + $0x7a0] sm:$0xf0] }
 0x187   :  { %v18120_v6 = vld [vmem:[#allocation5 + $0x2ac0] sm:$0xf]  ;;  %v17865_v21 = vor.u32 %v20386_v5, %v17864_v2  ;;  %9712 = vmatpush.bf16.msrb.mxu3 %v18665_v10  ;;  %v9433_v55 = vadd.f32 %v9432_v49, %v9420_v41  ;;  %v13386_v41 = vld [vmem:[#allocation5 + $0x5e0] sm:$0xf0] }
 0x188   :  { %v20450_v11 = vld [vmem:[#allocation5 + $0x2adc] sm:$0xf0] }
 0x189   :  { %v18376_v12 = vld [vmem:[#allocation5 + $0x2cc0] sm:$0xf]  ;;  %v18121_v29 = vor.u32 %v20450_v11, %v18120_v6  ;;  %9674 = vmatpush.bf16.msrb.mxu0 %v17865_v21  ;;  %v9446_v63 = vadd.f32 %v9445_v60, %v9433_v55 }
 0x18a   :  { %v20514_v14 = vld [vmem:[#allocation5 + $0x2cdc] sm:$0xf0] }
 0x18b   :  { %v18632_v16 = vld [vmem:[#allocation5 + $0x2ec0] sm:$0xf]  ;;  %v18377_v30 = vor.u32 %v20514_v14, %v18376_v12  ;;  %9687 = vmatpush.bf16.msrb.mxu1 %v18121_v29  ;;  %v21042_v12 = vadd.f32 %v9458_v0, %v9446_v63  ;;  %v12874_v29 = vld [vmem:[#allocation5 + $0x1e0] sm:$0xf0] }
 0x18c   :  { %v20578_v17 = vld [vmem:[#allocation5 + $0x2edc] sm:$0xf0]  ;;  %v12877_v49 = vor.u32 %v19134_v28, %v12874_v29  ;;  %v19254_v63 = vld [vmem:[#allocation5 + $0x584] sm:$0xf] }
 0x18d   :  { %v17832_v33 = vld [vmem:[#allocation5 + $0x2880] sm:$0xf]  ;;  %v18633_v42 = vor.u32 %v20578_v17, %v18632_v16  ;;  %9700 = vmatpush.bf16.msrb.mxu2 %v18377_v30  ;;  %v19198_v30 = vld [vmem:[#allocation5 + $0x3c4] sm:$0xf] }
 0x18e   :  { %v20378_v35 = vld [vmem:[#allocation5 + $0x289c] sm:$0xf0]  ;;  %v13354_v0 = vld [vmem:[#allocation5 + $0x5a0] sm:$0xf0] }
 0x18f   :  { %v18088_v39 = vld [vmem:[#allocation5 + $0x2a80] sm:$0xf]  ;;  %v17833_v48 = vor.u32 %v20378_v35, %v17832_v33  ;;  %9713 = vmatpush.bf16.msrb.mxu3 %v18633_v42  ;;  %v13130_v35 = vld [vmem:[#allocation5 + $0x3e0] sm:$0xf0]  ;;  %v9434_v42 = vpop.f32.mrf.mxu1 }
 0x190   :  { %v20442_v43 = vld [vmem:[#allocation5 + $0x2a9c] sm:$0xf0]  ;;  %v19246_v28 = vld [vmem:[#allocation5 + $0x544] sm:$0xf] }
 0x191   :  { %v18344_v44 = vld [vmem:[#allocation5 + $0x2c80] sm:$0xf]  ;;  %v18089_v50 = vor.u32 %v20442_v43, %v18088_v39  ;;  %9675 = vmatpush.bf16.msrb.mxu0 %v17833_v48  ;;  %v19262_v39 = vld [vmem:[#allocation5 + $0x5c4] sm:$0xf] }
 0x192   :  { %v20506_v45 = vld [vmem:[#allocation5 + $0x2c9c] sm:$0xf0]  ;;  %v13389_v55 = vor.u32 %v19262_v39, %v13386_v41  ;;  %v13322_v29 = vld [vmem:[#allocation5 + $0x560] sm:$0xf0] }
 0x193   :  { %v18600_v46 = vld [vmem:[#allocation5 + $0x2e80] sm:$0xf]  ;;  %v18345_v51 = vor.u32 %v20506_v45, %v18344_v44  ;;  %9688 = vmatpush.bf16.msrb.mxu1 %v18089_v50  ;;  %v19326_v45 = vld [vmem:[#allocation5 + $0x7c4] sm:$0xf]  ;;  %v150_v50 = vld [vmem:[#allocation2 + $0xb0] sm:$0xff]  ;;  %v13325_v41 = vor.u32 %v19246_v28, %v13322_v29 }
 0x194   :  { %v20570_v47 = vld [vmem:[#allocation5 + $0x2e9c] sm:$0xf0]  ;;  %v19110_v42 = vld [vmem:[#allocation5 + $0x104] sm:$0xf] }
 0x195   :  { %v17800_v52 = vld [vmem:[#allocation5 + $0x2840] sm:$0xf]  ;;  %v18601_v56 = vor.u32 %v20570_v47, %v18600_v46  ;;  %9701 = vmatpush.bf16.msrb.mxu2 %v18345_v51  ;;  %v13642_v46 = vld [vmem:[#allocation5 + $0x7e0] sm:$0xf0]  ;;  %v149_v51 = vld [vmem:[#allocation2 + $0xa8] sm:$0xff] }
 0x196   :  { %v20370_v53 = vld [vmem:[#allocation5 + $0x285c] sm:$0xf0]  ;;  %v13645_v60 = vor.u32 %v19326_v45, %v13642_v46  ;;  %v13034_v46 = vld [vmem:[#allocation5 + $0x320] sm:$0xf0] }
 0x197   :  { %v18056_v54 = vld [vmem:[#allocation5 + $0x2a40] sm:$0xf]  ;;  %v17801_v1 = vor.u32 %v20370_v53, %v17800_v52  ;;  %9714 = vmatpush.bf16.msrb.mxu3 %v18601_v56  ;;  %v151_v52 = vld [vmem:[#allocation2 + $0xb8] sm:$0xff]  ;;  %v9447_v53 = vpop.f32.mrf.mxu2  ;;  %v19126_v56 = vld [vmem:[#allocation5 + $0x184] sm:$0xf] }
 0x198   :  { %v20434_v57 = vld [vmem:[#allocation5 + $0x2a5c] sm:$0xf0]  ;;  %v12970_v28 = vld [vmem:[#allocation5 + $0x2a0] sm:$0xf0] }
 0x199   :  { %v18312_v58 = vld [vmem:[#allocation5 + $0x2c40] sm:$0xf]  ;;  %v18057_v5 = vor.u32 %v20434_v57, %v18056_v54  ;;  %9676 = vmatpush.bf16.msrb.mxu0 %v17801_v1  ;;  %v13133_v54 = vor.u32 %v19198_v30, %v13130_v35  ;;  %v12842_v57 = vld [vmem:[#allocation5 + $0x1a0] sm:$0xf0]  ;;  %v21046_v1 = vpack.c.bf16 %v150_v50, %v150_v50 }
 0x19a   :  { %v20498_v59 = vld [vmem:[#allocation5 + $0x2c5c] sm:$0xf0]  ;;  %v19310_v30 = vld [vmem:[#allocation5 + $0x744] sm:$0xf] }
 0x19b   :  { %v18568_v61 = vld [vmem:[#allocation5 + $0x2e40] sm:$0xf]  ;;  %v18313_v6 = vor.u32 %v20498_v59, %v18312_v58  ;;  %9689 = vmatpush.bf16.msrb.mxu1 %v18057_v5  ;;  %v19190_v58 = vld [vmem:[#allocation5 + $0x384] sm:$0xf]  ;;  %v9460_v59 = vpop.f32.mrf.mxu3  ;;  %v21050_v5 = vpack.c.bf16 %v151_v52, %v151_v52  ;;  %v9471_v52 = vpop.f32.mrf.mxu0 }
 0x19c   :  { %v20562_v62 = vld [vmem:[#allocation5 + $0x2e5c] sm:$0xf0]  ;;  %v13546_v50 = vld [vmem:[#allocation5 + $0x720] sm:$0xf0]  ;;  %v9484_v59 = vpop.f32.mrf.mxu1 }
 0x19d   :  { %v17768_v2 = vld [vmem:[#allocation5 + $0x2800] sm:$0xf]  ;;  %v18569_v14 = vor.u32 %v20562_v62, %v18568_v61  ;;  %9702 = vmatpush.bf16.msrb.mxu2 %v18313_v6  ;;  %v13098_v62 = vld [vmem:[#allocation5 + $0x3a0] sm:$0xf0]  ;;  %v12845_v6 = vor.u32 %v19126_v56, %v12842_v57 }
 0x19e   :  { %v20362_v3 = vld [vmem:[#allocation5 + $0x281c] sm:$0xf0]  ;;  %v12746_v56 = vld [vmem:[#allocation5 + $0xe0] sm:$0xf0] }
 0x19f   :  { %v18024_v7 = vld [vmem:[#allocation5 + $0x2a00] sm:$0xf]  ;;  %v17769_v33 = vor.u32 %v20362_v3, %v17768_v2  ;;  %9715 = vmatpush.bf16.msrb.mxu3 %v18569_v14  ;;  %v21048_v2 = vpack.c.bf16 %v149_v51, %v149_v51  ;;  %v19318_v3 = vld [vmem:[#allocation5 + $0x784] sm:$0xf] }
 0x1a0   :  { %v20426_v10 = vld [vmem:[#allocation5 + $0x2a1c] sm:$0xf0]  ;;  %v12810_v14 = vld [vmem:[#allocation5 + $0x160] sm:$0xf0] }
 0x1a1   :  { %v18280_v11 = vld [vmem:[#allocation5 + $0x2c00] sm:$0xf]  ;;  %v18025_v43 = vor.u32 %v20426_v10, %v18024_v7  ;;  %9677 = vmatpush.bf16.msrb.mxu0 %v17769_v33  ;;  %v13101_v7 = vor.u32 %v19190_v58, %v13098_v62  ;;  %v13357_v10 = vor.u32 %v19254_v63, %v13354_v0  ;;  %v13578_v33 = vld [vmem:[#allocation5 + $0x760] sm:$0xf0]  ;;  %v9472_v58 = vadd.f32 %v9471_v52, %v21042_v12 }
 0x1a2   :  { %v20490_v16 = vld [vmem:[#allocation5 + $0x2c1c] sm:$0xf0]  ;;  %v13581_v45 = vor.u32 %v19310_v30, %v13578_v33  ;;  %v19166_v57 = vld [vmem:[#allocation5 + $0x2c4] sm:$0xf] }
 0x1a3   :  { %v18536_v17 = vld [vmem:[#allocation5 + $0x2e00] sm:$0xf]  ;;  %v18281_v44 = vor.u32 %v20490_v16, %v18280_v11  ;;  %9690 = vmatpush.bf16.msrb.mxu1 %v18025_v43  ;;  %v19118_v11 = vld [vmem:[#allocation5 + $0x144] sm:$0xf] }
 0x1a4   :  { %v20554_v21 = vld [vmem:[#allocation5 + $0x2e1c] sm:$0xf0]  ;;  %v19182_v16 = vld [vmem:[#allocation5 + $0x344] sm:$0xf]  ;;  %v12813_v35 = vor.u32 %v19118_v11, %v12810_v14 }
 0x1a5   :  { %v148_v47 = vld [vmem:[#allocation2 + $0xa0] sm:$0xff]  ;;  %v18537_v48 = vor.u32 %v20554_v21, %v18536_v17  ;;  %9703 = vmatpush.bf16.msrb.mxu2 %v18281_v44  ;;  %9722 = vmatpush.bf16.msra.mxu0 %v12877_v49  ;;  %v13613_v17 = vor.u32 %v19318_v3, %v13610_v4 }
 0x1a6   :  { %v21044_v61 = vpack.c.bf16 %v148_v47, %v148_v47  ;;  %v13066_v21 = vld [vmem:[#allocation5 + $0x360] sm:$0xf0]  ;;  %9691 = vmatmul.bf16.vlgmr.msrb.gmra.mxu1 %v21048_v2 }
 0x1a7   :  { %9716 = vmatpush.bf16.msrb.mxu3 %v18537_v48  ;;  %9735 = vmatpush.bf16.msra.mxu1 %v13133_v54  ;;  %v13069_v39 = vor.u32 %v19182_v16, %v13066_v21  ;;  %v12778_v43 = vld [vmem:[#allocation5 + $0x120] sm:$0xf0]  ;;  %v9497_v21 = vpop.f32.mrf.mxu2 }
 0x1a8   :  { %9678 = vmatmul.bf16.vlgmr.msrb.gmra.mxu0 %v21044_v61  ;;  %9704 = vmatmul.bf16.vlgmr.msrb.gmra.mxu2 %v21046_v1  ;;  %v19174_v44 = vld [vmem:[#allocation5 + $0x304] sm:$0xf]  ;;  %v12781_v51 = vor.u32 %v19110_v42, %v12778_v43 }
 0x1a9   :  { %9748 = vmatpush.bf16.msra.mxu2 %v13389_v55  ;;  %9723 = vmatpush.bf16.msra.mxu0 %v12845_v6  ;;  %v19238_v47 = vld [vmem:[#allocation5 + $0x504] sm:$0xf]  ;;  %v13037_v53 = vor.u32 %v19174_v44, %v13034_v46  ;;  %v9485_v6 = vadd.f32 %v9484_v59, %v9472_v58  ;;  %v9473_v44 = vpop.f32.mrf.mxu0 }
 0x1aa   :  { %9717 = vmatmul.bf16.vlgmr.msrb.gmra.mxu3 %v21050_v5  ;;  %v13290_v48 = vld [vmem:[#allocation5 + $0x520] sm:$0xf0] }
 0x1ab   :  { %9761 = vmatpush.bf16.msra.mxu3 %v13645_v60  ;;  %9736 = vmatpush.bf16.msra.mxu1 %v13101_v7  ;;  %v19302_v49 = vld [vmem:[#allocation5 + $0x704] sm:$0xf]  ;;  %v13293_v54 = vor.u32 %v19238_v47, %v13290_v48  ;;  %v9498_v33 = vadd.f32 %v9497_v21, %v9485_v6 }
 0x1ac   :  { %v19102_v55 = vld [vmem:[#allocation5 + $0xc4] sm:$0xf]  ;;  %v13549_v60 = vor.u32 %v19302_v49, %v13546_v50  ;;  %v9486_v50 = vpop.f32.mrf.mxu1 }
 0x1ad   :  { %9749 = vmatpush.bf16.msra.mxu2 %v13357_v10  ;;  %9724 = vmatpush.bf16.msra.mxu0 %v12813_v35  ;;  %v13002_v62 = vld [vmem:[#allocation5 + $0x2e0] sm:$0xf0]  ;;  %v12749_v7 = vor.u32 %v19102_v55, %v12746_v56  ;;  %v9510_v35 = vpop.f32.mrf.mxu3 }
 0x1ae   :  { %v19230_v63 = vld [vmem:[#allocation5 + $0x4c4] sm:$0xf]  ;;  %v13005_v10 = vor.u32 %v19166_v57, %v13002_v62  ;;  %v21057_v43 = vadd.f32 %v9510_v35, %v9498_v33 }
 0x1af   :  { %9762 = vmatpush.bf16.msra.mxu3 %v13613_v17  ;;  %9737 = vmatpush.bf16.msra.mxu1 %v13069_v39  ;;  %v13258_v0 = vld [vmem:[#allocation5 + $0x4e0] sm:$0xf0] }
 0x1b0   :  { %v19294_v3 = vld [vmem:[#allocation5 + $0x6c4] sm:$0xf]  ;;  %v13261_v11 = vor.u32 %v19230_v63, %v13258_v0 }
 0x1b1   :  { %9750 = vmatpush.bf16.msra.mxu2 %v13325_v41  ;;  %v13514_v4 = vld [vmem:[#allocation5 + $0x6e0] sm:$0xf0]  ;;  %9725 = vmatpush.bf16.msra.mxu0 %v12781_v51 }
 0x1b2   :  { %v19094_v14 = vld [vmem:[#allocation5 + $0x84] sm:$0xf]  ;;  %v13517_v12 = vor.u32 %v19294_v3, %v13514_v4  ;;  %v9499_v4 = vpop.f32.mrf.mxu2 }
 0x1b3   :  { %9763 = vmatpush.bf16.msra.mxu3 %v13581_v45  ;;  %9738 = vmatpush.bf16.msra.mxu1 %v13037_v53  ;;  %v12714_v16 = vld [vmem:[#allocation5 + $0xa0] sm:$0xf0] }
 0x1b4   :  { %v19158_v17 = vld [vmem:[#allocation5 + $0x284] sm:$0xf]  ;;  %v12717_v42 = vor.u32 %v19094_v14, %v12714_v16 }
 0x1b5   :  { %9751 = vmatpush.bf16.msra.mxu2 %v13293_v54  ;;  %v19222_v29 = vld [vmem:[#allocation5 + $0x484] sm:$0xf]  ;;  %9726 = vmatpush.bf16.msra.mxu0 %v12749_v7  ;;  %v12973_v45 = vor.u32 %v19158_v17, %v12970_v28  ;;  %v9512_v14 = vpop.f32.mrf.mxu3 }
 0x1b6   :  { %v13226_v30 = vld [vmem:[#allocation5 + $0x4a0] sm:$0xf0] }
 0x1b7   :  { %9764 = vmatpush.bf16.msra.mxu3 %v13549_v60  ;;  %v19286_v39 = vld [vmem:[#allocation5 + $0x684] sm:$0xf]  ;;  %9739 = vmatpush.bf16.msra.mxu1 %v13005_v10  ;;  %v13229_v46 = vor.u32 %v19222_v29, %v13226_v30 }
 0x1b8   :  { %v13482_v41 = vld [vmem:[#allocation5 + $0x6a0] sm:$0xf0] }
 0x1b9   :  { %9752 = vmatpush.bf16.msra.mxu2 %v13261_v11  ;;  %v19086_v47 = vld [vmem:[#allocation5 + $0x44] sm:$0xf]  ;;  %v13485_v51 = vor.u32 %v19286_v39, %v13482_v41  ;;  %9727 = vmatpush.bf16.msra.mxu0 %v12717_v42 }
 0x1ba   :  { %v12682_v48 = vld [vmem:[#allocation5 + $0x60] sm:$0xf0] }
 0x1bb   :  { %v19150_v49 = vld [vmem:[#allocation5 + $0x244] sm:$0xf]  ;;  %9765 = vmatpush.bf16.msra.mxu3 %v13517_v12  ;;  %v12685_v57 = vor.u32 %v19086_v47, %v12682_v48  ;;  %9740 = vmatpush.bf16.msra.mxu1 %v12973_v45 }
 0x1bc   :  { %v12938_v52 = vld [vmem:[#allocation5 + $0x260] sm:$0xf0] }
 0x1bd   :  { %v19214_v53 = vld [vmem:[#allocation5 + $0x444] sm:$0xf]  ;;  %9753 = vmatpush.bf16.msra.mxu2 %v13229_v46  ;;  %v12941_v60 = vor.u32 %v19150_v49, %v12938_v52  ;;  %9728 = vmatpush.bf16.msra.mxu0 %v12685_v57 }
 0x1be   :  { %v13194_v54 = vld [vmem:[#allocation5 + $0x460] sm:$0xf0] }
 0x1bf   :  { %v19278_v55 = vld [vmem:[#allocation5 + $0x644] sm:$0xf]  ;;  %v13197_v62 = vor.u32 %v19214_v53, %v13194_v54  ;;  %9766 = vmatpush.bf16.msra.mxu3 %v13485_v51  ;;  %9741 = vmatpush.bf16.msra.mxu1 %v12941_v60 }
 0x1c0   :  { %v13450_v56 = vld [vmem:[#allocation5 + $0x660] sm:$0xf0] }
 0x1c1   :  { %v19078_v58 = vld [vmem:[#allocation5 + $0x4] sm:$0xf]  ;;  %v13453_v6 = vor.u32 %v19278_v55, %v13450_v56  ;;  %9754 = vmatpush.bf16.msra.mxu2 %v13197_v62 }
 0x1c2   :  { %v12650_v59 = vld [vmem:[#allocation5 + $0x20] sm:$0xf0] }
 0x1c3   :  { %v19142_v63 = vld [vmem:[#allocation5 + $0x204] sm:$0xf]  ;;  %v12653_v12 = vor.u32 %v19078_v58, %v12650_v59  ;;  %9767 = vmatpush.bf16.msra.mxu3 %v13453_v6 }
 0x1c4   :  { %v12906_v0 = vld [vmem:[#allocation5 + $0x220] sm:$0xf0] }
 0x1c5   :  { %v19206_v3 = vld [vmem:[#allocation5 + $0x404] sm:$0xf]  ;;  %v12909_v33 = vor.u32 %v19142_v63, %v12906_v0  ;;  %9729 = vmatpush.bf16.msra.mxu0 %v12653_v12 }
 0x1c6   :  { %v13162_v7 = vld [vmem:[#allocation5 + $0x420] sm:$0xf0] }
 0x1c7   :  { %v19270_v10 = vld [vmem:[#allocation5 + $0x604] sm:$0xf]  ;;  %v13165_v35 = vor.u32 %v19206_v3, %v13162_v7  ;;  %9742 = vmatpush.bf16.msra.mxu1 %v12909_v33  ;;  %v9523_v33 = vpop.f32.mrf.mxu0 }
 0x1c8   :  { %v13418_v11 = vld [vmem:[#allocation5 + $0x620] sm:$0xf0]  ;;  %9730 = vmatmul.bf16.vlgmr.msra.gmra.mxu0 %v20984_v9 }
 0x1c9   :  { %v19390_v16 = vld [vmem:[#allocation5 + $0x9c4] sm:$0xf]  ;;  %v13421_v42 = vor.u32 %v19270_v10, %v13418_v11  ;;  %9755 = vmatpush.bf16.msra.mxu2 %v13165_v35 }
 0x1ca   :  { %v13898_v17 = vld [vmem:[#allocation5 + $0x9e0] sm:$0xf0]  ;;  %9743 = vmatmul.bf16.vlgmr.msra.gmra.mxu1 %v20991_v25 }
 0x1cb   :  { %v19454_v21 = vld [vmem:[#allocation5 + $0xbc4] sm:$0xf]  ;;  %v13901_v44 = vor.u32 %v19390_v16, %v13898_v17  ;;  %9768 = vmatpush.bf16.msra.mxu3 %v13421_v42 }
 0x1cc   :  { %v14154_v28 = vld [vmem:[#allocation5 + $0xbe0] sm:$0xf0]  ;;  %9756 = vmatmul.bf16.vlgmr.msra.gmra.mxu2 %v20982_v8 }
 0x1cd   :  { %v19518_v29 = vld [vmem:[#allocation5 + $0xdc4] sm:$0xf]  ;;  %v14157_v45 = vor.u32 %v19454_v21, %v14154_v28  ;;  %9774 = vmatpush.bf16.msrb.mxu0 %v13901_v44  ;;  %v9536_v44 = vpop.f32.mrf.mxu1 }
 0x1ce   :  { %v14410_v30 = vld [vmem:[#allocation5 + $0xde0] sm:$0xf0]  ;;  %9769 = vmatmul.bf16.vlgmr.msra.gmra.mxu3 %v20986_v15 }
 0x1cf   :  { %v19582_v39 = vld [vmem:[#allocation5 + $0xfc4] sm:$0xf]  ;;  %v14413_v46 = vor.u32 %v19518_v29, %v14410_v30  ;;  %9787 = vmatpush.bf16.msrb.mxu1 %v14157_v45 }
 0x1d0   :  { %v14666_v41 = vld [vmem:[#allocation5 + $0xfe0] sm:$0xf0] }
 0x1d1   :  { %v19382_v47 = vld [vmem:[#allocation5 + $0x984] sm:$0xf]  ;;  %v14669_v50 = vor.u32 %v19582_v39, %v14666_v41  ;;  %9800 = vmatpush.bf16.msrb.mxu2 %v14413_v46  ;;  %v9524_v41 = vadd.f32 %v9523_v33, %v21057_v43 }
 0x1d2   :  { %v13866_v48 = vld [vmem:[#allocation5 + $0x9a0] sm:$0xf0] }
 0x1d3   :  { %v19446_v49 = vld [vmem:[#allocation5 + $0xb84] sm:$0xf]  ;;  %v13869_v56 = vor.u32 %v19382_v47, %v13866_v48  ;;  %9813 = vmatpush.bf16.msrb.mxu3 %v14669_v50 }
 0x1d4   :  { %v14122_v51 = vld [vmem:[#allocation5 + $0xba0] sm:$0xf0] }
 0x1d5   :  { %v19510_v52 = vld [vmem:[#allocation5 + $0xd84] sm:$0xf]  ;;  %v14125_v57 = vor.u32 %v19446_v49, %v14122_v51  ;;  %9775 = vmatpush.bf16.msrb.mxu0 %v13869_v56  ;;  %v9537_v51 = vadd.f32 %v9536_v44, %v9524_v41 }
 0x1d6   :  { %v14378_v53 = vld [vmem:[#allocation5 + $0xda0] sm:$0xf0] }
 0x1d7   :  { %v19574_v54 = vld [vmem:[#allocation5 + $0xf84] sm:$0xf]  ;;  %v14381_v58 = vor.u32 %v19510_v52, %v14378_v53  ;;  %9788 = vmatpush.bf16.msrb.mxu1 %v14125_v57 }
 0x1d8   :  { %v14634_v55 = vld [vmem:[#allocation5 + $0xfa0] sm:$0xf0] }
 0x1d9   :  { %v19374_v59 = vld [vmem:[#allocation5 + $0x944] sm:$0xf]  ;;  %v14637_v63 = vor.u32 %v19574_v54, %v14634_v55  ;;  %9801 = vmatpush.bf16.msrb.mxu2 %v14381_v58 }
 0x1da   :  { %v13834_v60 = vld [vmem:[#allocation5 + $0x960] sm:$0xf0] }
 0x1db   :  { %v19438_v62 = vld [vmem:[#allocation5 + $0xb44] sm:$0xf]  ;;  %v13837_v10 = vor.u32 %v19374_v59, %v13834_v60  ;;  %9814 = vmatpush.bf16.msrb.mxu3 %v14637_v63 }
 0x1dc   :  { %v14090_v0 = vld [vmem:[#allocation5 + $0xb60] sm:$0xf0] }
 0x1dd   :  { %v19502_v3 = vld [vmem:[#allocation5 + $0xd44] sm:$0xf]  ;;  %v14093_v11 = vor.u32 %v19438_v62, %v14090_v0  ;;  %9776 = vmatpush.bf16.msrb.mxu0 %v13837_v10  ;;  %v9549_v0 = vpop.f32.mrf.mxu2  ;;  %v9562_v10 = vpop.f32.mrf.mxu3 }
 0x1de   :  { %v14346_v4 = vld [vmem:[#allocation5 + $0xd60] sm:$0xf0] }
 0x1df   :  { %v19566_v6 = vld [vmem:[#allocation5 + $0xf44] sm:$0xf]  ;;  %v14349_v14 = vor.u32 %v19502_v3, %v14346_v4  ;;  %9789 = vmatpush.bf16.msrb.mxu1 %v14093_v11 }
 0x1e0   :  { %v14602_v7 = vld [vmem:[#allocation5 + $0xf60] sm:$0xf0] }
 0x1e1   :  { %v19366_v16 = vld [vmem:[#allocation5 + $0x904] sm:$0xf]  ;;  %v14605_v12 = vor.u32 %v19566_v6, %v14602_v7  ;;  %9802 = vmatpush.bf16.msrb.mxu2 %v14349_v14  ;;  %v9550_v7 = vadd.f32 %v9549_v0, %v9537_v51 }
 0x1e2   :  { %v13802_v17 = vld [vmem:[#allocation5 + $0x920] sm:$0xf0] }
 0x1e3   :  { %v19430_v21 = vld [vmem:[#allocation5 + $0xb04] sm:$0xf]  ;;  %v13805_v42 = vor.u32 %v19366_v16, %v13802_v17  ;;  %9815 = vmatpush.bf16.msrb.mxu3 %v14605_v12  ;;  %v9525_v16 = vpop.f32.mrf.mxu0  ;;  %v21064_v12 = vadd.f32 %v9562_v10, %v9550_v7 }
 0x1e4   :  { %v14058_v28 = vld [vmem:[#allocation5 + $0xb20] sm:$0xf0] }
 0x1e5   :  { %v19494_v29 = vld [vmem:[#allocation5 + $0xd04] sm:$0xf]  ;;  %v14061_v45 = vor.u32 %v19430_v21, %v14058_v28  ;;  %9777 = vmatpush.bf16.msrb.mxu0 %v13805_v42  ;;  %v9538_v21 = vpop.f32.mrf.mxu1 }
 0x1e6   :  { %v14314_v30 = vld [vmem:[#allocation5 + $0xd20] sm:$0xf0] }
 0x1e7   :  { %v19558_v35 = vld [vmem:[#allocation5 + $0xf04] sm:$0xf]  ;;  %v14317_v46 = vor.u32 %v19494_v29, %v14314_v30  ;;  %9790 = vmatpush.bf16.msrb.mxu1 %v14061_v45 }
 0x1e8   :  { %v14570_v39 = vld [vmem:[#allocation5 + $0xf20] sm:$0xf0] }
 0x1e9   :  { %v19358_v47 = vld [vmem:[#allocation5 + $0x8c4] sm:$0xf]  ;;  %v14573_v50 = vor.u32 %v19558_v35, %v14570_v39  ;;  %9803 = vmatpush.bf16.msrb.mxu2 %v14317_v46 }
 0x1ea   :  { %v13770_v48 = vld [vmem:[#allocation5 + $0x8e0] sm:$0xf0] }
 0x1eb   :  { %v19422_v49 = vld [vmem:[#allocation5 + $0xac4] sm:$0xf]  ;;  %v13773_v57 = vor.u32 %v19358_v47, %v13770_v48  ;;  %9816 = vmatpush.bf16.msrb.mxu3 %v14573_v50 }
 0x1ec   :  { %v14026_v52 = vld [vmem:[#allocation5 + $0xae0] sm:$0xf0] }
 0x1ed   :  { %v19486_v53 = vld [vmem:[#allocation5 + $0xcc4] sm:$0xf]  ;;  %v14029_v43 = vor.u32 %v19422_v49, %v14026_v52  ;;  %9778 = vmatpush.bf16.msrb.mxu0 %v13773_v57 }
 0x1ee   :  { %v14282_v54 = vld [vmem:[#allocation5 + $0xce0] sm:$0xf0] }
 0x1ef   :  { %v19550_v55 = vld [vmem:[#allocation5 + $0xec4] sm:$0xf]  ;;  %v14285_v58 = vor.u32 %v19486_v53, %v14282_v54  ;;  %9791 = vmatpush.bf16.msrb.mxu1 %v14029_v43 }
 0x1f0   :  { %v14538_v56 = vld [vmem:[#allocation5 + $0xee0] sm:$0xf0] }
 0x1f1   :  { %v19350_v59 = vld [vmem:[#allocation5 + $0x884] sm:$0xf]  ;;  %v14541_v63 = vor.u32 %v19550_v55, %v14538_v56  ;;  %9804 = vmatpush.bf16.msrb.mxu2 %v14285_v58  ;;  %v9551_v58 = vpop.f32.mrf.mxu2 }
 0x1f2   :  { %v13738_v60 = vld [vmem:[#allocation5 + $0x8a0] sm:$0xf0] }
 0x1f3   :  { %v19414_v62 = vld [vmem:[#allocation5 + $0xa84] sm:$0xf]  ;;  %v13741_v17 = vor.u32 %v19350_v59, %v13738_v60  ;;  %9817 = vmatpush.bf16.msrb.mxu3 %v14541_v63  ;;  %v9564_v63 = vpop.f32.mrf.mxu3 }
 0x1f4   :  { %v13994_v3 = vld [vmem:[#allocation5 + $0xaa0] sm:$0xf0] }
 0x1f5   :  { %v19478_v4 = vld [vmem:[#allocation5 + $0xc84] sm:$0xf]  ;;  %v13997_v28 = vor.u32 %v19414_v62, %v13994_v3  ;;  %9779 = vmatpush.bf16.msrb.mxu0 %v13741_v17 }
 0x1f6   :  { %v14250_v6 = vld [vmem:[#allocation5 + $0xca0] sm:$0xf0] }
 0x1f7   :  { %v19542_v11 = vld [vmem:[#allocation5 + $0xe84] sm:$0xf]  ;;  %v14253_v29 = vor.u32 %v19478_v4, %v14250_v6  ;;  %9792 = vmatpush.bf16.msrb.mxu1 %v13997_v28 }
 0x1f8   :  { %v14506_v14 = vld [vmem:[#allocation5 + $0xea0] sm:$0xf0] }
 0x1f9   :  { %v19342_v30 = vld [vmem:[#allocation5 + $0x844] sm:$0xf]  ;;  %v14509_v39 = vor.u32 %v19542_v11, %v14506_v14  ;;  %9805 = vmatpush.bf16.msrb.mxu2 %v14253_v29 }
 0x1fa   :  { %v13706_v33 = vld [vmem:[#allocation5 + $0x860] sm:$0xf0] }
 0x1fb   :  { %v19406_v35 = vld [vmem:[#allocation5 + $0xa44] sm:$0xf]  ;;  %v13709_v47 = vor.u32 %v19342_v30, %v13706_v33  ;;  %9818 = vmatpush.bf16.msrb.mxu3 %v14509_v39 }
 0x1fc   :  { %v13962_v41 = vld [vmem:[#allocation5 + $0xa60] sm:$0xf0] }
 0x1fd   :  { %v19470_v42 = vld [vmem:[#allocation5 + $0xc44] sm:$0xf]  ;;  %v13965_v50 = vor.u32 %v19406_v35, %v13962_v41  ;;  %9780 = vmatpush.bf16.msrb.mxu0 %v13709_v47 }
 0x1fe   :  { %v14218_v44 = vld [vmem:[#allocation5 + $0xc60] sm:$0xf0] }
 0x1ff   :  { %v19534_v45 = vld [vmem:[#allocation5 + $0xe44] sm:$0xf]  ;;  %v14221_v51 = vor.u32 %v19470_v42, %v14218_v44  ;;  %9793 = vmatpush.bf16.msrb.mxu1 %v13965_v50 }
 0x200   :  { %v14474_v46 = vld [vmem:[#allocation5 + $0xe60] sm:$0xf0] }
 0x201   :  { %v19334_v48 = vld [vmem:[#allocation5 + $0x804] sm:$0xf]  ;;  %v14477_v55 = vor.u32 %v19534_v45, %v14474_v46  ;;  %9806 = vmatpush.bf16.msrb.mxu2 %v14221_v51 }
 0x202   :  { %v13674_v49 = vld [vmem:[#allocation5 + $0x820] sm:$0xf0] }
 0x203   :  { %v19398_v52 = vld [vmem:[#allocation5 + $0xa04] sm:$0xf]  ;;  %v13677_v0 = vor.u32 %v19334_v48, %v13674_v49  ;;  %9819 = vmatpush.bf16.msrb.mxu3 %v14477_v55 }
 0x204   :  { %v13930_v53 = vld [vmem:[#allocation5 + $0xa20] sm:$0xf0] }
 0x205   :  { %v19462_v54 = vld [vmem:[#allocation5 + $0xc04] sm:$0xf]  ;;  %v13933_v7 = vor.u32 %v19398_v52, %v13930_v53  ;;  %9781 = vmatpush.bf16.msrb.mxu0 %v13677_v0 }
 0x206   :  { %v14186_v56 = vld [vmem:[#allocation5 + $0xc20] sm:$0xf0] }
 0x207   :  { %v19526_v57 = vld [vmem:[#allocation5 + $0xe04] sm:$0xf]  ;;  %v14189_v10 = vor.u32 %v19462_v54, %v14186_v56  ;;  %9794 = vmatpush.bf16.msrb.mxu1 %v13933_v7  ;;  %v9575_v7 = vpop.f32.mrf.mxu0 }
 0x208   :  { %v14442_v43 = vld [vmem:[#allocation5 + $0xe20] sm:$0xf0]  ;;  %9782 = vmatmul.bf16.vlgmr.msrb.gmra.mxu0 %v20996_v37 }
 0x209   :  { %v19646_v59 = vld [vmem:[#allocation5 + $0x11c4] sm:$0xf]  ;;  %v14445_v16 = vor.u32 %v19526_v57, %v14442_v43  ;;  %9807 = vmatpush.bf16.msrb.mxu2 %v14189_v10 }
 0x20a   :  { %v14922_v60 = vld [vmem:[#allocation5 + $0x11e0] sm:$0xf0]  ;;  %9795 = vmatmul.bf16.vlgmr.msrb.gmra.mxu1 %v21000_v40 }
 0x20b   :  { %v19710_v62 = vld [vmem:[#allocation5 + $0x13c4] sm:$0xf]  ;;  %v14925_v17 = vor.u32 %v19646_v59, %v14922_v60  ;;  %9820 = vmatpush.bf16.msrb.mxu3 %v14445_v16 }
 0x20c   :  { %v15178_v3 = vld [vmem:[#allocation5 + $0x13e0] sm:$0xf0]  ;;  %9808 = vmatmul.bf16.vlgmr.msrb.gmra.mxu2 %v20994_v34 }
 0x20d   :  { %v19774_v4 = vld [vmem:[#allocation5 + $0x15c4] sm:$0xf]  ;;  %v15181_v21 = vor.u32 %v19710_v62, %v15178_v3  ;;  %9826 = vmatpush.bf16.msra.mxu0 %v14925_v17  ;;  %v9588_v17 = vpop.f32.mrf.mxu1 }
 0x20e   :  { %v15434_v6 = vld [vmem:[#allocation5 + $0x15e0] sm:$0xf0]  ;;  %9821 = vmatmul.bf16.vlgmr.msrb.gmra.mxu3 %v20998_v38 }
 0x20f   :  { %v19838_v11 = vld [vmem:[#allocation5 + $0x17c4] sm:$0xf]  ;;  %v15437_v28 = vor.u32 %v19774_v4, %v15434_v6  ;;  %9839 = vmatpush.bf16.msra.mxu1 %v15181_v21 }
 0x210   :  { %v15690_v14 = vld [vmem:[#allocation5 + $0x17e0] sm:$0xf0] }
 0x211   :  { %v19638_v29 = vld [vmem:[#allocation5 + $0x1184] sm:$0xf]  ;;  %v15693_v35 = vor.u32 %v19838_v11, %v15690_v14  ;;  %9852 = vmatpush.bf16.msra.mxu2 %v15437_v28  ;;  %v9576_v14 = vadd.f32 %v9575_v7, %v21064_v12 }
 0x212   :  { %v14890_v30 = vld [vmem:[#allocation5 + $0x11a0] sm:$0xf0] }
 0x213   :  { %v19702_v33 = vld [vmem:[#allocation5 + $0x1384] sm:$0xf]  ;;  %v14893_v46 = vor.u32 %v19638_v29, %v14890_v30  ;;  %9865 = vmatpush.bf16.msra.mxu3 %v15693_v35 }
 0x214   :  { %v15146_v39 = vld [vmem:[#allocation5 + $0x13a0] sm:$0xf0] }
 0x215   :  { %v19766_v41 = vld [vmem:[#allocation5 + $0x1584] sm:$0xf]  ;;  %v15149_v47 = vor.u32 %v19702_v33, %v15146_v39  ;;  %9827 = vmatpush.bf16.msra.mxu0 %v14893_v46  ;;  %v9589_v39 = vadd.f32 %v9588_v17, %v9576_v14 }
 0x216   :  { %v15402_v42 = vld [vmem:[#allocation5 + $0x15a0] sm:$0xf0] }
 0x217   :  { %v19830_v44 = vld [vmem:[#allocation5 + $0x1784] sm:$0xf]  ;;  %v15405_v48 = vor.u32 %v19766_v41, %v15402_v42  ;;  %9840 = vmatpush.bf16.msra.mxu1 %v15149_v47 }
 0x218   :  { %v15658_v45 = vld [vmem:[#allocation5 + $0x17a0] sm:$0xf0] }
 0x219   :  { %v19630_v49 = vld [vmem:[#allocation5 + $0x1144] sm:$0xf]  ;;  %v15661_v52 = vor.u32 %v19830_v44, %v15658_v45  ;;  %9853 = vmatpush.bf16.msra.mxu2 %v15405_v48 }
 0x21a   :  { %v14858_v50 = vld [vmem:[#allocation5 + $0x1160] sm:$0xf0] }
 0x21b   :  { %v19694_v51 = vld [vmem:[#allocation5 + $0x1344] sm:$0xf]  ;;  %v14861_v43 = vor.u32 %v19630_v49, %v14858_v50  ;;  %9866 = vmatpush.bf16.msra.mxu3 %v15661_v52 }
 0x21c   :  { %v15114_v53 = vld [vmem:[#allocation5 + $0x1360] sm:$0xf0] }
 0x21d   :  { %v19758_v54 = vld [vmem:[#allocation5 + $0x1544] sm:$0xf]  ;;  %v15117_v58 = vor.u32 %v19694_v51, %v15114_v53  ;;  %9828 = vmatpush.bf16.msra.mxu0 %v14861_v43  ;;  %v9601_v53 = vpop.f32.mrf.mxu2  ;;  %v9614_v43 = vpop.f32.mrf.mxu3 }
 0x21e   :  { %v15370_v55 = vld [vmem:[#allocation5 + $0x1560] sm:$0xf0] }
 0x21f   :  { %v19822_v56 = vld [vmem:[#allocation5 + $0x1744] sm:$0xf]  ;;  %v15373_v59 = vor.u32 %v19758_v54, %v15370_v55  ;;  %9841 = vmatpush.bf16.msra.mxu1 %v15117_v58 }
 0x220   :  { %v15626_v57 = vld [vmem:[#allocation5 + $0x1760] sm:$0xf0] }
 0x221   :  { %v19622_v60 = vld [vmem:[#allocation5 + $0x1104] sm:$0xf]  ;;  %v15629_v0 = vor.u32 %v19822_v56, %v15626_v57  ;;  %9854 = vmatpush.bf16.msra.mxu2 %v15373_v59  ;;  %v9602_v57 = vadd.f32 %v9601_v53, %v9589_v39 }
 0x222   :  { %v14826_v62 = vld [vmem:[#allocation5 + $0x1120] sm:$0xf0] }
 0x223   :  { %v19686_v63 = vld [vmem:[#allocation5 + $0x1304] sm:$0xf]  ;;  %v14829_v16 = vor.u32 %v19622_v60, %v14826_v62  ;;  %9867 = vmatpush.bf16.msra.mxu3 %v15629_v0  ;;  %v9577_v60 = vpop.f32.mrf.mxu0  ;;  %v21071_v0 = vadd.f32 %v9614_v43, %v9602_v57 }
 0x224   :  { %v15082_v3 = vld [vmem:[#allocation5 + $0x1320] sm:$0xf0] }
 0x225   :  { %v19750_v4 = vld [vmem:[#allocation5 + $0x1504] sm:$0xf]  ;;  %v15085_v21 = vor.u32 %v19686_v63, %v15082_v3  ;;  %9829 = vmatpush.bf16.msra.mxu0 %v14829_v16  ;;  %v9590_v63 = vpop.f32.mrf.mxu1 }
 0x226   :  { %v15338_v6 = vld [vmem:[#allocation5 + $0x1520] sm:$0xf0] }
 0x227   :  { %v19814_v10 = vld [vmem:[#allocation5 + $0x1704] sm:$0xf]  ;;  %v15341_v28 = vor.u32 %v19750_v4, %v15338_v6  ;;  %9842 = vmatpush.bf16.msra.mxu1 %v15085_v21 }
 0x228   :  { %v15594_v11 = vld [vmem:[#allocation5 + $0x1720] sm:$0xf0] }
 0x229   :  { %v19614_v29 = vld [vmem:[#allocation5 + $0x10c4] sm:$0xf]  ;;  %v15597_v35 = vor.u32 %v19814_v10, %v15594_v11  ;;  %9855 = vmatpush.bf16.msra.mxu2 %v15341_v28 }
 0x22a   :  { %v14794_v30 = vld [vmem:[#allocation5 + $0x10e0] sm:$0xf0] }
 0x22b   :  { %v19678_v33 = vld [vmem:[#allocation5 + $0x12c4] sm:$0xf]  ;;  %v14797_v47 = vor.u32 %v19614_v29, %v14794_v30  ;;  %9868 = vmatpush.bf16.msra.mxu3 %v15597_v35 }
 0x22c   :  { %v15050_v41 = vld [vmem:[#allocation5 + $0x12e0] sm:$0xf0] }
 0x22d   :  { %v19742_v42 = vld [vmem:[#allocation5 + $0x14c4] sm:$0xf]  ;;  %v15053_v12 = vor.u32 %v19678_v33, %v15050_v41  ;;  %9830 = vmatpush.bf16.msra.mxu0 %v14797_v47 }
 0x22e   :  { %v15306_v44 = vld [vmem:[#allocation5 + $0x14e0] sm:$0xf0] }
 0x22f   :  { %v19806_v45 = vld [vmem:[#allocation5 + $0x16c4] sm:$0xf]  ;;  %v15309_v48 = vor.u32 %v19742_v42, %v15306_v44  ;;  %9843 = vmatpush.bf16.msra.mxu1 %v15053_v12 }
 0x230   :  { %v15562_v46 = vld [vmem:[#allocation5 + $0x16e0] sm:$0xf0] }
 0x231   :  { %v19606_v49 = vld [vmem:[#allocation5 + $0x1084] sm:$0xf]  ;;  %v15565_v52 = vor.u32 %v19806_v45, %v15562_v46  ;;  %9856 = vmatpush.bf16.msra.mxu2 %v15309_v48  ;;  %v9603_v48 = vpop.f32.mrf.mxu2 }
 0x232   :  { %v14762_v50 = vld [vmem:[#allocation5 + $0x10a0] sm:$0xf0] }
 0x233   :  { %v19670_v51 = vld [vmem:[#allocation5 + $0x1284] sm:$0xf]  ;;  %v14765_v62 = vor.u32 %v19606_v49, %v14762_v50  ;;  %9869 = vmatpush.bf16.msra.mxu3 %v15565_v52  ;;  %v9616_v52 = vpop.f32.mrf.mxu3 }
 0x234   :  { %v15018_v54 = vld [vmem:[#allocation5 + $0x12a0] sm:$0xf0] }
 0x235   :  { %v19734_v55 = vld [vmem:[#allocation5 + $0x1484] sm:$0xf]  ;;  %v15021_v3 = vor.u32 %v19670_v51, %v15018_v54  ;;  %9831 = vmatpush.bf16.msra.mxu0 %v14765_v62 }
 0x236   :  { %v15274_v56 = vld [vmem:[#allocation5 + $0x14a0] sm:$0xf0] }
 0x237   :  { %v19798_v58 = vld [vmem:[#allocation5 + $0x1684] sm:$0xf]  ;;  %v15277_v4 = vor.u32 %v19734_v55, %v15274_v56  ;;  %9844 = vmatpush.bf16.msra.mxu1 %v15021_v3 }
 0x238   :  { %v15530_v59 = vld [vmem:[#allocation5 + $0x16a0] sm:$0xf0] }
 0x239   :  { %v19598_v6 = vld [vmem:[#allocation5 + $0x1044] sm:$0xf]  ;;  %v15533_v11 = vor.u32 %v19798_v58, %v15530_v59  ;;  %9857 = vmatpush.bf16.msra.mxu2 %v15277_v4 }
 0x23a   :  { %v14730_v7 = vld [vmem:[#allocation5 + $0x1060] sm:$0xf0] }
 0x23b   :  { %v19662_v10 = vld [vmem:[#allocation5 + $0x1244] sm:$0xf]  ;;  %v14733_v29 = vor.u32 %v19598_v6, %v14730_v7  ;;  %9870 = vmatpush.bf16.msra.mxu3 %v15533_v11 }
 0x23c   :  { %v14986_v14 = vld [vmem:[#allocation5 + $0x1260] sm:$0xf0] }
 0x23d   :  { %v19726_v16 = vld [vmem:[#allocation5 + $0x1444] sm:$0xf]  ;;  %v14989_v35 = vor.u32 %v19662_v10, %v14986_v14  ;;  %9832 = vmatpush.bf16.msra.mxu0 %v14733_v29 }
 0x23e   :  { %v15242_v17 = vld [vmem:[#allocation5 + $0x1460] sm:$0xf0] }
 0x23f   :  { %v19790_v21 = vld [vmem:[#allocation5 + $0x1644] sm:$0xf]  ;;  %v15245_v39 = vor.u32 %v19726_v16, %v15242_v17  ;;  %9845 = vmatpush.bf16.msra.mxu1 %v14989_v35 }
 0x240   :  { %v15498_v28 = vld [vmem:[#allocation5 + $0x1660] sm:$0xf0] }
 0x241   :  { %v19590_v30 = vld [vmem:[#allocation5 + $0x1004] sm:$0xf]  ;;  %v15501_v45 = vor.u32 %v19790_v21, %v15498_v28  ;;  %9858 = vmatpush.bf16.msra.mxu2 %v15245_v39 }
 0x242   :  { %v14698_v33 = vld [vmem:[#allocation5 + $0x1020] sm:$0xf0] }
 0x243   :  { %v19654_v41 = vld [vmem:[#allocation5 + $0x1204] sm:$0xf]  ;;  %v14701_v53 = vor.u32 %v19590_v30, %v14698_v33  ;;  %9871 = vmatpush.bf16.msra.mxu3 %v15501_v45 }
 0x244   :  { %v14954_v42 = vld [vmem:[#allocation5 + $0x1220] sm:$0xf0] }
 0x245   :  { %v19718_v44 = vld [vmem:[#allocation5 + $0x1404] sm:$0xf]  ;;  %v14957_v57 = vor.u32 %v19654_v41, %v14954_v42  ;;  %9833 = vmatpush.bf16.msra.mxu0 %v14701_v53 }
 0x246   :  { %v15210_v46 = vld [vmem:[#allocation5 + $0x1420] sm:$0xf0] }
 0x247   :  { %v19782_v47 = vld [vmem:[#allocation5 + $0x1604] sm:$0xf]  ;;  %v15213_v43 = vor.u32 %v19718_v44, %v15210_v46  ;;  %9846 = vmatpush.bf16.msra.mxu1 %v14957_v57  ;;  %v9627_v57 = vpop.f32.mrf.mxu0 }
 0x248   :  { %v15466_v12 = vld [vmem:[#allocation5 + $0x1620] sm:$0xf0]  ;;  %9834 = vmatmul.bf16.vlgmr.msra.gmra.mxu0 %v21006_v18 }
 0x249   :  { %v19902_v49 = vld [vmem:[#allocation5 + $0x19c4] sm:$0xf]  ;;  %v15469_v60 = vor.u32 %v19782_v47, %v15466_v12  ;;  %9859 = vmatpush.bf16.msra.mxu2 %v15213_v43 }
 0x24a   :  { %v15946_v50 = vld [vmem:[#allocation5 + $0x19e0] sm:$0xf0]  ;;  %9847 = vmatmul.bf16.vlgmr.msra.gmra.mxu1 %v21010_v23 }
 0x24b   :  { %v19966_v51 = vld [vmem:[#allocation5 + $0x1bc4] sm:$0xf]  ;;  %v15949_v62 = vor.u32 %v19902_v49, %v15946_v50  ;;  %9872 = vmatpush.bf16.msra.mxu3 %v15469_v60 }
 0x24c   :  { %v16202_v54 = vld [vmem:[#allocation5 + $0x1be0] sm:$0xf0]  ;;  %9860 = vmatmul.bf16.vlgmr.msra.gmra.mxu2 %v21008_v22 }
 0x24d   :  { %v20030_v55 = vld [vmem:[#allocation5 + $0x1dc4] sm:$0xf]  ;;  %v16205_v63 = vor.u32 %v19966_v51, %v16202_v54  ;;  %9878 = vmatpush.bf16.msrb.mxu0 %v15949_v62  ;;  %v9640_v62 = vpop.f32.mrf.mxu1 }
 0x24e   :  { %v16458_v56 = vld [vmem:[#allocation5 + $0x1de0] sm:$0xf0]  ;;  %9873 = vmatmul.bf16.vlgmr.msra.gmra.mxu3 %v21012_v27 }
 0x24f   :  { %v20094_v58 = vld [vmem:[#allocation5 + $0x1fc4] sm:$0xf]  ;;  %v16461_v3 = vor.u32 %v20030_v55, %v16458_v56  ;;  %9891 = vmatpush.bf16.msrb.mxu1 %v16205_v63 }
 0x250   :  { %v16714_v59 = vld [vmem:[#allocation5 + $0x1fe0] sm:$0xf0] }
 0x251   :  { %v19894_v4 = vld [vmem:[#allocation5 + $0x1984] sm:$0xf]  ;;  %v16717_v10 = vor.u32 %v20094_v58, %v16714_v59  ;;  %9904 = vmatpush.bf16.msrb.mxu2 %v16461_v3  ;;  %v9628_v59 = vadd.f32 %v9627_v57, %v21071_v0 }
 0x252   :  { %v15914_v6 = vld [vmem:[#allocation5 + $0x19a0] sm:$0xf0] }
 0x253   :  { %v19958_v7 = vld [vmem:[#allocation5 + $0x1b84] sm:$0xf]  ;;  %v15917_v28 = vor.u32 %v19894_v4, %v15914_v6  ;;  %9917 = vmatpush.bf16.msrb.mxu3 %v16717_v10 }
 0x254   :  { %v16170_v11 = vld [vmem:[#allocation5 + $0x1ba0] sm:$0xf0] }
 0x255   :  { %v20022_v14 = vld [vmem:[#allocation5 + $0x1d84] sm:$0xf]  ;;  %v16173_v29 = vor.u32 %v19958_v7, %v16170_v11  ;;  %9879 = vmatpush.bf16.msrb.mxu0 %v15917_v28  ;;  %v9641_v11 = vadd.f32 %v9640_v62, %v9628_v59 }
 0x256   :  { %v16426_v16 = vld [vmem:[#allocation5 + $0x1da0] sm:$0xf0] }
 0x257   :  { %v20086_v17 = vld [vmem:[#allocation5 + $0x1f84] sm:$0xf]  ;;  %v16429_v30 = vor.u32 %v20022_v14, %v16426_v16  ;;  %9892 = vmatpush.bf16.msrb.mxu1 %v16173_v29 }
 0x258   :  { %v16682_v21 = vld [vmem:[#allocation5 + $0x1fa0] sm:$0xf0] }
 0x259   :  { %v19886_v33 = vld [vmem:[#allocation5 + $0x1944] sm:$0xf]  ;;  %v16685_v41 = vor.u32 %v20086_v17, %v16682_v21  ;;  %9905 = vmatpush.bf16.msrb.mxu2 %v16429_v30 }
 0x25a   :  { %v15882_v35 = vld [vmem:[#allocation5 + $0x1960] sm:$0xf0] }
 0x25b   :  { %v19950_v39 = vld [vmem:[#allocation5 + $0x1b44] sm:$0xf]  ;;  %v15885_v12 = vor.u32 %v19886_v33, %v15882_v35  ;;  %9918 = vmatpush.bf16.msrb.mxu3 %v16685_v41 }
 0x25c   :  { %v16138_v42 = vld [vmem:[#allocation5 + $0x1b60] sm:$0xf0] }
 0x25d   :  { %v20014_v44 = vld [vmem:[#allocation5 + $0x1d44] sm:$0xf]  ;;  %v16141_v48 = vor.u32 %v19950_v39, %v16138_v42  ;;  %9880 = vmatpush.bf16.msrb.mxu0 %v15885_v12  ;;  %v9653_v42 = vpop.f32.mrf.mxu2  ;;  %v9666_v12 = vpop.f32.mrf.mxu3 }
 0x25e   :  { %v16394_v45 = vld [vmem:[#allocation5 + $0x1d60] sm:$0xf0] }
 0x25f   :  { %v20078_v46 = vld [vmem:[#allocation5 + $0x1f44] sm:$0xf]  ;;  %v16397_v49 = vor.u32 %v20014_v44, %v16394_v45  ;;  %9893 = vmatpush.bf16.msrb.mxu1 %v16141_v48 }
 0x260   :  { %v16650_v47 = vld [vmem:[#allocation5 + $0x1f60] sm:$0xf0] }
 0x261   :  { %v19878_v50 = vld [vmem:[#allocation5 + $0x1904] sm:$0xf]  ;;  %v16653_v53 = vor.u32 %v20078_v46, %v16650_v47  ;;  %9906 = vmatpush.bf16.msrb.mxu2 %v16397_v49  ;;  %v9654_v47 = vadd.f32 %v9653_v42, %v9641_v11 }
 0x262   :  { %v15850_v51 = vld [vmem:[#allocation5 + $0x1920] sm:$0xf0] }
 0x263   :  { %v19942_v52 = vld [vmem:[#allocation5 + $0x1b04] sm:$0xf]  ;;  %v15853_v60 = vor.u32 %v19878_v50, %v15850_v51  ;;  %9919 = vmatpush.bf16.msrb.mxu3 %v16653_v53  ;;  %v9629_v50 = vpop.f32.mrf.mxu0  ;;  %v21078_v53 = vadd.f32 %v9666_v12, %v9654_v47 }
 0x264   :  { %v16106_v54 = vld [vmem:[#allocation5 + $0x1b20] sm:$0xf0] }
 0x265   :  { %v20006_v55 = vld [vmem:[#allocation5 + $0x1d04] sm:$0xf]  ;;  %v16109_v63 = vor.u32 %v19942_v52, %v16106_v54  ;;  %9881 = vmatpush.bf16.msrb.mxu0 %v15853_v60  ;;  %v9642_v52 = vpop.f32.mrf.mxu1 }
 0x266   :  { %v16362_v56 = vld [vmem:[#allocation5 + $0x1d20] sm:$0xf0] }
 0x267   :  { %v20070_v43 = vld [vmem:[#allocation5 + $0x1f04] sm:$0xf]  ;;  %v16365_v3 = vor.u32 %v20006_v55, %v16362_v56  ;;  %9894 = vmatpush.bf16.msrb.mxu1 %v16109_v63 }
 0x268   :  { %v16618_v58 = vld [vmem:[#allocation5 + $0x1f20] sm:$0xf0] }
 0x269   :  { %v19870_v4 = vld [vmem:[#allocation5 + $0x18c4] sm:$0xf]  ;;  %v16621_v10 = vor.u32 %v20070_v43, %v16618_v58  ;;  %9907 = vmatpush.bf16.msrb.mxu2 %v16365_v3 }
 0x26a   :  { %v15818_v6 = vld [vmem:[#allocation5 + $0x18e0] sm:$0xf0] }
 0x26b   :  { %v19934_v7 = vld [vmem:[#allocation5 + $0x1ac4] sm:$0xf]  ;;  %v15821_v29 = vor.u32 %v19870_v4, %v15818_v6  ;;  %9920 = vmatpush.bf16.msrb.mxu3 %v16621_v10 }
 0x26c   :  { %v16074_v14 = vld [vmem:[#allocation5 + $0x1ae0] sm:$0xf0] }
 0x26d   :  { %v19998_v16 = vld [vmem:[#allocation5 + $0x1cc4] sm:$0xf]  ;;  %v16077_v0 = vor.u32 %v19934_v7, %v16074_v14  ;;  %9882 = vmatpush.bf16.msrb.mxu0 %v15821_v29 }
 0x26e   :  { %v16330_v17 = vld [vmem:[#allocation5 + $0x1ce0] sm:$0xf0] }
 0x26f   :  { %v20062_v21 = vld [vmem:[#allocation5 + $0x1ec4] sm:$0xf]  ;;  %v16333_v30 = vor.u32 %v19998_v16, %v16330_v17  ;;  %9895 = vmatpush.bf16.msrb.mxu1 %v16077_v0 }
 0x270   :  { %v16586_v28 = vld [vmem:[#allocation5 + $0x1ee0] sm:$0xf0] }
 0x271   :  { %v19862_v33 = vld [vmem:[#allocation5 + $0x1884] sm:$0xf]  ;;  %v16589_v41 = vor.u32 %v20062_v21, %v16586_v28  ;;  %9908 = vmatpush.bf16.msrb.mxu2 %v16333_v30  ;;  %v9655_v30 = vpop.f32.mrf.mxu2 }
 0x272   :  { %v15786_v35 = vld [vmem:[#allocation5 + $0x18a0] sm:$0xf0] }
 0x273   :  { %v19926_v39 = vld [vmem:[#allocation5 + $0x1a84] sm:$0xf]  ;;  %v15789_v51 = vor.u32 %v19862_v33, %v15786_v35  ;;  %9921 = vmatpush.bf16.msrb.mxu3 %v16589_v41  ;;  %v9668_v41 = vpop.f32.mrf.mxu3 }
 0x274   :  { %v16042_v44 = vld [vmem:[#allocation5 + $0x1aa0] sm:$0xf0] }
 0x275   :  { %v19990_v45 = vld [vmem:[#allocation5 + $0x1c84] sm:$0xf]  ;;  %v16045_v54 = vor.u32 %v19926_v39, %v16042_v44  ;;  %9883 = vmatpush.bf16.msrb.mxu0 %v15789_v51 }
 0x276   :  { %v16298_v46 = vld [vmem:[#allocation5 + $0x1ca0] sm:$0xf0] }
 0x277   :  { %v20054_v48 = vld [vmem:[#allocation5 + $0x1e84] sm:$0xf]  ;;  %v16301_v55 = vor.u32 %v19990_v45, %v16298_v46  ;;  %9896 = vmatpush.bf16.msrb.mxu1 %v16045_v54 }
 0x278   :  { %v16554_v49 = vld [vmem:[#allocation5 + $0x1ea0] sm:$0xf0] }
 0x279   :  { %v19854_v56 = vld [vmem:[#allocation5 + $0x1844] sm:$0xf]  ;;  %v16557_v58 = vor.u32 %v20054_v48, %v16554_v49  ;;  %9909 = vmatpush.bf16.msrb.mxu2 %v16301_v55 }
 0x27a   :  { %v15754_v57 = vld [vmem:[#allocation5 + $0x1860] sm:$0xf0] }
 0x27b   :  { %v19918_v43 = vld [vmem:[#allocation5 + $0x1a44] sm:$0xf]  ;;  %v15757_v4 = vor.u32 %v19854_v56, %v15754_v57  ;;  %9922 = vmatpush.bf16.msrb.mxu3 %v16557_v58 }
 0x27c   :  { %v16010_v59 = vld [vmem:[#allocation5 + $0x1a60] sm:$0xf0] }
 0x27d   :  { %v19982_v60 = vld [vmem:[#allocation5 + $0x1c44] sm:$0xf]  ;;  %v16013_v10 = vor.u32 %v19918_v43, %v16010_v59  ;;  %9884 = vmatpush.bf16.msrb.mxu0 %v15757_v4 }
 0x27e   :  { %v16266_v62 = vld [vmem:[#allocation5 + $0x1c60] sm:$0xf0] }
 0x27f   :  { %v20046_v63 = vld [vmem:[#allocation5 + $0x1e44] sm:$0xf]  ;;  %v16269_v11 = vor.u32 %v19982_v60, %v16266_v62  ;;  %9897 = vmatpush.bf16.msrb.mxu1 %v16013_v10 }
 0x280   :  { %v16522_v3 = vld [vmem:[#allocation5 + $0x1e60] sm:$0xf0] }
 0x281   :  { %v19846_v6 = vld [vmem:[#allocation5 + $0x1804] sm:$0xf]  ;;  %v16525_v21 = vor.u32 %v20046_v63, %v16522_v3  ;;  %9910 = vmatpush.bf16.msrb.mxu2 %v16269_v11 }
 0x282   :  { %v15722_v7 = vld [vmem:[#allocation5 + $0x1820] sm:$0xf0] }
 0x283   :  { %v19910_v14 = vld [vmem:[#allocation5 + $0x1a04] sm:$0xf]  ;;  %v15725_v42 = vor.u32 %v19846_v6, %v15722_v7  ;;  %9923 = vmatpush.bf16.msrb.mxu3 %v16525_v21 }
 0x284   :  { %v15978_v16 = vld [vmem:[#allocation5 + $0x1a20] sm:$0xf0] }
 0x285   :  { %v19974_v17 = vld [vmem:[#allocation5 + $0x1c04] sm:$0xf]  ;;  %v15981_v47 = vor.u32 %v19910_v14, %v15978_v16  ;;  %9885 = vmatpush.bf16.msrb.mxu0 %v15725_v42 }
 0x286   :  { %v16234_v28 = vld [vmem:[#allocation5 + $0x1c20] sm:$0xf0] }
 0x287   :  { %v20038_v29 = vld [vmem:[#allocation5 + $0x1e04] sm:$0xf]  ;;  %v16237_v12 = vor.u32 %v19974_v17, %v16234_v28  ;;  %9898 = vmatpush.bf16.msrb.mxu1 %v15981_v47  ;;  %v9679_v47 = vpop.f32.mrf.mxu0 }
 0x288   :  { %v16490_v0 = vld [vmem:[#allocation5 + $0x1e20] sm:$0xf0]  ;;  %9886 = vmatmul.bf16.vlgmr.msrb.gmra.mxu0 %v21018_v13 }
 0x289   :  { %v20158_v33 = vld [vmem:[#allocation5 + $0x21c4] sm:$0xf]  ;;  %v16493_v50 = vor.u32 %v20038_v29, %v16490_v0  ;;  %9911 = vmatpush.bf16.msrb.mxu2 %v16237_v12 }
 0x28a   :  { %v16970_v35 = vld [vmem:[#allocation5 + $0x21e0] sm:$0xf0]  ;;  %9899 = vmatmul.bf16.vlgmr.msrb.gmra.mxu1 %v21022_v20 }
 0x28b   :  { %v20222_v39 = vld [vmem:[#allocation5 + $0x23c4] sm:$0xf]  ;;  %v16973_v51 = vor.u32 %v20158_v33, %v16970_v35  ;;  %9924 = vmatpush.bf16.msrb.mxu3 %v16493_v50 }
 0x28c   :  { %v17226_v44 = vld [vmem:[#allocation5 + $0x23e0] sm:$0xf0]  ;;  %9912 = vmatmul.bf16.vlgmr.msrb.gmra.mxu2 %v21020_v19 }
 0x28d   :  { %v20286_v45 = vld [vmem:[#allocation5 + $0x25c4] sm:$0xf]  ;;  %v17229_v52 = vor.u32 %v20222_v39, %v17226_v44  ;;  %9930 = vmatpush.bf16.msra.mxu0 %v16973_v51  ;;  %v9692_v51 = vpop.f32.mrf.mxu1 }
 0x28e   :  { %v17482_v46 = vld [vmem:[#allocation5 + $0x25e0] sm:$0xf0]  ;;  %9925 = vmatmul.bf16.vlgmr.msrb.gmra.mxu3 %v21024_v26 }
 0x28f   :  { %v20350_v48 = vld [vmem:[#allocation5 + $0x27c4] sm:$0xf]  ;;  %v17485_v54 = vor.u32 %v20286_v45, %v17482_v46  ;;  %9943 = vmatpush.bf16.msra.mxu1 %v17229_v52 }
 0x290   :  { %v17738_v49 = vld [vmem:[#allocation5 + $0x27e0] sm:$0xf0] }
 0x291   :  { %v20150_v55 = vld [vmem:[#allocation5 + $0x2184] sm:$0xf]  ;;  %v17741_v43 = vor.u32 %v20350_v48, %v17738_v49  ;;  %9956 = vmatpush.bf16.msra.mxu2 %v17485_v54  ;;  %v9680_v49 = vadd.f32 %v9679_v47, %v21078_v53 }
 0x292   :  { %v16938_v56 = vld [vmem:[#allocation5 + $0x21a0] sm:$0xf0] }
 0x293   :  { %v20214_v57 = vld [vmem:[#allocation5 + $0x2384] sm:$0xf]  ;;  %v16941_v3 = vor.u32 %v20150_v55, %v16938_v56  ;;  %9969 = vmatpush.bf16.msra.mxu3 %v17741_v43 }
 0x294   :  { %v17194_v58 = vld [vmem:[#allocation5 + $0x23a0] sm:$0xf0] }
 0x295   :  { %v20278_v59 = vld [vmem:[#allocation5 + $0x2584] sm:$0xf]  ;;  %v17197_v4 = vor.u32 %v20214_v57, %v17194_v58  ;;  %9931 = vmatpush.bf16.msra.mxu0 %v16941_v3  ;;  %v9693_v58 = vadd.f32 %v9692_v51, %v9680_v49 }
 0x296   :  { %v17450_v60 = vld [vmem:[#allocation5 + $0x25a0] sm:$0xf0] }
 0x297   :  { %v20342_v62 = vld [vmem:[#allocation5 + $0x2784] sm:$0xf]  ;;  %v17453_v6 = vor.u32 %v20278_v59, %v17450_v60  ;;  %9944 = vmatpush.bf16.msra.mxu1 %v17197_v4 }
 0x298   :  { %v17706_v63 = vld [vmem:[#allocation5 + $0x27a0] sm:$0xf0] }
 0x299   :  { %v20142_v7 = vld [vmem:[#allocation5 + $0x2144] sm:$0xf]  ;;  %v17709_v14 = vor.u32 %v20342_v62, %v17706_v63  ;;  %9957 = vmatpush.bf16.msra.mxu2 %v17453_v6 }
 0x29a   :  { %v16906_v10 = vld [vmem:[#allocation5 + $0x2160] sm:$0xf0] }
 0x29b   :  { %v20206_v11 = vld [vmem:[#allocation5 + $0x2344] sm:$0xf]  ;;  %v16909_v0 = vor.u32 %v20142_v7, %v16906_v10  ;;  %9970 = vmatpush.bf16.msra.mxu3 %v17709_v14 }
 0x29c   :  { %v17162_v16 = vld [vmem:[#allocation5 + $0x2360] sm:$0xf0] }
 0x29d   :  { %v20270_v17 = vld [vmem:[#allocation5 + $0x2544] sm:$0xf]  ;;  %v17165_v30 = vor.u32 %v20206_v11, %v17162_v16  ;;  %9932 = vmatpush.bf16.msra.mxu0 %v16909_v0  ;;  %v9705_v16 = vpop.f32.mrf.mxu2  ;;  %v9718_v0 = vpop.f32.mrf.mxu3 }
 0x29e   :  { %v17418_v21 = vld [vmem:[#allocation5 + $0x2560] sm:$0xf0] }
 0x29f   :  { %v20334_v28 = vld [vmem:[#allocation5 + $0x2744] sm:$0xf]  ;;  %v17421_v33 = vor.u32 %v20270_v17, %v17418_v21  ;;  %9945 = vmatpush.bf16.msra.mxu1 %v17165_v30 }
 0x2a0   :  { %v17674_v29 = vld [vmem:[#allocation5 + $0x2760] sm:$0xf0] }
 0x2a1   :  { %v20134_v35 = vld [vmem:[#allocation5 + $0x2104] sm:$0xf]  ;;  %v17677_v42 = vor.u32 %v20334_v28, %v17674_v29  ;;  %9958 = vmatpush.bf16.msra.mxu2 %v17421_v33  ;;  %v9706_v29 = vadd.f32 %v9705_v16, %v9693_v58 }
 0x2a2   :  { %v16874_v39 = vld [vmem:[#allocation5 + $0x2120] sm:$0xf0] }
 0x2a3   :  { %v20198_v41 = vld [vmem:[#allocation5 + $0x2304] sm:$0xf]  ;;  %v16877_v50 = vor.u32 %v20134_v35, %v16874_v39  ;;  %9971 = vmatpush.bf16.msra.mxu3 %v17677_v42  ;;  %v9681_v35 = vpop.f32.mrf.mxu0  ;;  %v21085_v42 = vadd.f32 %v9718_v0, %v9706_v29 }
 0x2a4   :  { %v17130_v44 = vld [vmem:[#allocation5 + $0x2320] sm:$0xf0] }
 0x2a5   :  { %v20262_v45 = vld [vmem:[#allocation5 + $0x2504] sm:$0xf]  ;;  %v17133_v52 = vor.u32 %v20198_v41, %v17130_v44  ;;  %9933 = vmatpush.bf16.msra.mxu0 %v16877_v50  ;;  %v9694_v41 = vpop.f32.mrf.mxu1 }
 0x2a6   :  { %v17386_v46 = vld [vmem:[#allocation5 + $0x2520] sm:$0xf0] }
 0x2a7   :  { %v20326_v12 = vld [vmem:[#allocation5 + $0x2704] sm:$0xf]  ;;  %v17389_v54 = vor.u32 %v20262_v45, %v17386_v46  ;;  %9946 = vmatpush.bf16.msra.mxu1 %v17133_v52 }
 0x2a8   :  { %v17642_v48 = vld [vmem:[#allocation5 + $0x2720] sm:$0xf0] }
 0x2a9   :  { %v20126_v55 = vld [vmem:[#allocation5 + $0x20c4] sm:$0xf]  ;;  %v17645_v43 = vor.u32 %v20326_v12, %v17642_v48  ;;  %9959 = vmatpush.bf16.msra.mxu2 %v17389_v54 }
 0x2aa   :  { %v16842_v56 = vld [vmem:[#allocation5 + $0x20e0] sm:$0xf0] }
 0x2ab   :  { %v20190_v57 = vld [vmem:[#allocation5 + $0x22c4] sm:$0xf]  ;;  %v16845_v4 = vor.u32 %v20126_v55, %v16842_v56  ;;  %9972 = vmatpush.bf16.msra.mxu3 %v17645_v43 }
 0x2ac   :  { %v17098_v59 = vld [vmem:[#allocation5 + $0x22e0] sm:$0xf0] }
 0x2ad   :  { %v20254_v60 = vld [vmem:[#allocation5 + $0x24c4] sm:$0xf]  ;;  %v17101_v53 = vor.u32 %v20190_v57, %v17098_v59  ;;  %9934 = vmatpush.bf16.msra.mxu0 %v16845_v4 }
 0x2ae   :  { %v17354_v62 = vld [vmem:[#allocation5 + $0x24e0] sm:$0xf0] }
 0x2af   :  { %v20318_v63 = vld [vmem:[#allocation5 + $0x26c4] sm:$0xf]  ;;  %v17357_v6 = vor.u32 %v20254_v60, %v17354_v62  ;;  %9947 = vmatpush.bf16.msra.mxu1 %v17101_v53 }
 0x2b0   :  { %v17610_v3 = vld [vmem:[#allocation5 + $0x26e0] sm:$0xf0] }
 0x2b1   :  { %v20118_v7 = vld [vmem:[#allocation5 + $0x2084] sm:$0xf]  ;;  %v17613_v14 = vor.u32 %v20318_v63, %v17610_v3  ;;  %9960 = vmatpush.bf16.msra.mxu2 %v17357_v6  ;;  %v9707_v6 = vpop.f32.mrf.mxu2 }
 0x2b2   :  { %v16810_v10 = vld [vmem:[#allocation5 + $0x20a0] sm:$0xf0] }
 0x2b3   :  { %v20182_v11 = vld [vmem:[#allocation5 + $0x2284] sm:$0xf]  ;;  %v16813_v39 = vor.u32 %v20118_v7, %v16810_v10  ;;  %9973 = vmatpush.bf16.msra.mxu3 %v17613_v14  ;;  %v9720_v14 = vpop.f32.mrf.mxu3 }
 0x2b4   :  { %v17066_v17 = vld [vmem:[#allocation5 + $0x22a0] sm:$0xf0] }
 0x2b5   :  { %v20246_v21 = vld [vmem:[#allocation5 + $0x2484] sm:$0xf]  ;;  %v17069_v44 = vor.u32 %v20182_v11, %v17066_v17  ;;  %9935 = vmatpush.bf16.msra.mxu0 %v16813_v39 }
 0x2b6   :  { %v17322_v28 = vld [vmem:[#allocation5 + $0x24a0] sm:$0xf0] }
 0x2b7   :  { %v20310_v30 = vld [vmem:[#allocation5 + $0x2684] sm:$0xf]  ;;  %v17325_v45 = vor.u32 %v20246_v21, %v17322_v28  ;;  %9948 = vmatpush.bf16.msra.mxu1 %v17069_v44 }
 0x2b8   :  { %v17578_v33 = vld [vmem:[#allocation5 + $0x26a0] sm:$0xf0] }
 0x2b9   :  { %v20110_v46 = vld [vmem:[#allocation5 + $0x2044] sm:$0xf]  ;;  %v17581_v48 = vor.u32 %v20310_v30, %v17578_v33  ;;  %9961 = vmatpush.bf16.msra.mxu2 %v17325_v45 }
 0x2ba   :  { %v16778_v47 = vld [vmem:[#allocation5 + $0x2060] sm:$0xf0] }
 0x2bb   :  { %v20174_v12 = vld [vmem:[#allocation5 + $0x2244] sm:$0xf]  ;;  %v16781_v55 = vor.u32 %v20110_v46, %v16778_v47  ;;  %9974 = vmatpush.bf16.msra.mxu3 %v17581_v48 }
 0x2bc   :  { %v17034_v49 = vld [vmem:[#allocation5 + $0x2260] sm:$0xf0] }
 0x2bd   :  { %v20238_v50 = vld [vmem:[#allocation5 + $0x2444] sm:$0xf]  ;;  %v17037_v43 = vor.u32 %v20174_v12, %v17034_v49  ;;  %9936 = vmatpush.bf16.msra.mxu0 %v16781_v55 }
 0x2be   :  { %v17290_v51 = vld [vmem:[#allocation5 + $0x2460] sm:$0xf0] }
 0x2bf   :  { %v20302_v52 = vld [vmem:[#allocation5 + $0x2644] sm:$0xf]  ;;  %v17293_v58 = vor.u32 %v20238_v50, %v17290_v51  ;;  %9949 = vmatpush.bf16.msra.mxu1 %v17037_v43 }
 0x2c0   :  { %v17546_v54 = vld [vmem:[#allocation5 + $0x2660] sm:$0xf0] }
 0x2c1   :  { %v20102_v56 = vld [vmem:[#allocation5 + $0x2004] sm:$0xf]  ;;  %v17549_v63 = vor.u32 %v20302_v52, %v17546_v54  ;;  %9962 = vmatpush.bf16.msra.mxu2 %v17293_v58 }
 0x2c2   :  { %v16746_v57 = vld [vmem:[#allocation5 + $0x2020] sm:$0xf0] }
 0x2c3   :  { %v20166_v59 = vld [vmem:[#allocation5 + $0x2204] sm:$0xf]  ;;  %v16749_v16 = vor.u32 %v20102_v56, %v16746_v57  ;;  %9975 = vmatpush.bf16.msra.mxu3 %v17549_v63 }
 0x2c4   :  { %v17002_v60 = vld [vmem:[#allocation5 + $0x2220] sm:$0xf0] }
 0x2c5   :  { %v20230_v62 = vld [vmem:[#allocation5 + $0x2404] sm:$0xf]  ;;  %v17005_v29 = vor.u32 %v20166_v59, %v17002_v60  ;;  %9937 = vmatpush.bf16.msra.mxu0 %v16749_v16 }
 0x2c6   :  { %v17258_v3 = vld [vmem:[#allocation5 + $0x2420] sm:$0xf0] }
 0x2c7   :  { %v20294_v4 = vld [vmem:[#allocation5 + $0x2604] sm:$0xf]  ;;  %v17261_v0 = vor.u32 %v20230_v62, %v17258_v3  ;;  %9950 = vmatpush.bf16.msra.mxu1 %v17005_v29 }
 0x2c8   :  { %v17514_v53 = vld [vmem:[#allocation5 + $0x2620] sm:$0xf0]  ;;  %9938 = vmatmul.bf16.vlgmr.msra.gmra.mxu0 %v21030_v24 }
 0x2c9   :  { %v20414_v7 = vld [vmem:[#allocation5 + $0x29c4] sm:$0xf]  ;;  %v17517_v35 = vor.u32 %v20294_v4, %v17514_v53  ;;  %9963 = vmatpush.bf16.msra.mxu2 %v17261_v0 }
 0x2ca   :  { %v17994_v10 = vld [vmem:[#allocation5 + $0x29e0] sm:$0xf0]  ;;  %9951 = vmatmul.bf16.vlgmr.msra.gmra.mxu1 %v21034_v32 }
 0x2cb   :  { %v20478_v11 = vld [vmem:[#allocation5 + $0x2bc4] sm:$0xf]  ;;  %v17997_v39 = vor.u32 %v20414_v7, %v17994_v10  ;;  %9976 = vmatpush.bf16.msra.mxu3 %v17517_v35 }
 0x2cc   :  { %v18250_v17 = vld [vmem:[#allocation5 + $0x2be0] sm:$0xf0]  ;;  %9964 = vmatmul.bf16.vlgmr.msra.gmra.mxu2 %v21032_v31 }
 0x2cd   :  { %v20542_v21 = vld [vmem:[#allocation5 + $0x2dc4] sm:$0xf]  ;;  %v18253_v41 = vor.u32 %v20478_v11, %v18250_v17  ;;  %9982 = vmatpush.bf16.msrb.mxu0 %v17997_v39  ;;  %v9731_v39 = vpop.f32.mrf.mxu0 }
 0x2ce   :  { %v18506_v28 = vld [vmem:[#allocation5 + $0x2de0] sm:$0xf0]  ;;  %9977 = vmatmul.bf16.vlgmr.msra.gmra.mxu3 %v21036_v36 }
 0x2cf   :  { %v20606_v30 = vld [vmem:[#allocation5 + $0x2fc4] sm:$0xf]  ;;  %v18509_v44 = vor.u32 %v20542_v21, %v18506_v28  ;;  %9995 = vmatpush.bf16.msrb.mxu1 %v18253_v41 }
 0x2d0   :  { %v18762_v33 = vld [vmem:[#allocation5 + $0x2fe0] sm:$0xf0] }
 0x2d1   :  { %v20406_v45 = vld [vmem:[#allocation5 + $0x2984] sm:$0xf]  ;;  %v18765_v12 = vor.u32 %v20606_v30, %v18762_v33  ;;  %10008 = vmatpush.bf16.msrb.mxu2 %v18509_v44 }
 0x2d2   :  { %v17962_v46 = vld [vmem:[#allocation5 + $0x29a0] sm:$0xf0] }
 0x2d3   :  { %v20470_v47 = vld [vmem:[#allocation5 + $0x2b84] sm:$0xf]  ;;  %v17965_v54 = vor.u32 %v20406_v45, %v17962_v46  ;;  %10021 = vmatpush.bf16.msrb.mxu3 %v18765_v12 }
 0x2d4   :  { %v18218_v48 = vld [vmem:[#allocation5 + $0x2ba0] sm:$0xf0] }
 0x2d5   :  { %v20534_v49 = vld [vmem:[#allocation5 + $0x2d84] sm:$0xf]  ;;  %v18221_v55 = vor.u32 %v20470_v47, %v18218_v48  ;;  %9983 = vmatpush.bf16.msrb.mxu0 %v17965_v54  ;;  %v9744_v48 = vpop.f32.mrf.mxu1 }
 0x2d6   :  { %v18474_v50 = vld [vmem:[#allocation5 + $0x2da0] sm:$0xf0] }
 0x2d7   :  { %v20598_v51 = vld [vmem:[#allocation5 + $0x2f84] sm:$0xf]  ;;  %v18477_v56 = vor.u32 %v20534_v49, %v18474_v50  ;;  %9996 = vmatpush.bf16.msrb.mxu1 %v18221_v55 }
 0x2d8   :  { %v18730_v52 = vld [vmem:[#allocation5 + $0x2fa0] sm:$0xf0] }
 0x2d9   :  { %v20398_v57 = vld [vmem:[#allocation5 + $0x2944] sm:$0xf]  ;;  %v18733_v59 = vor.u32 %v20598_v51, %v18730_v52  ;;  %10009 = vmatpush.bf16.msrb.mxu2 %v18477_v56 }
 0x2da   :  { %v17930_v43 = vld [vmem:[#allocation5 + $0x2960] sm:$0xf0] }
 0x2db   :  { %v20462_v58 = vld [vmem:[#allocation5 + $0x2b44] sm:$0xf]  ;;  %v17933_v53 = vor.u32 %v20398_v57, %v17930_v43  ;;  %10022 = vmatpush.bf16.msrb.mxu3 %v18733_v59 }
 0x2dc   :  { %v18186_v60 = vld [vmem:[#allocation5 + $0x2b60] sm:$0xf0] }
 0x2dd   :  { %v20526_v62 = vld [vmem:[#allocation5 + $0x2d44] sm:$0xf]  ;;  %v18189_v7 = vor.u32 %v20462_v58, %v18186_v60  ;;  %9984 = vmatpush.bf16.msrb.mxu0 %v17933_v53 }
 0x2de   :  { %v18442_v63 = vld [vmem:[#allocation5 + $0x2d60] sm:$0xf0] }
 0x2df   :  { %v20590_v3 = vld [vmem:[#allocation5 + $0x2f44] sm:$0xf]  ;;  %v18445_v10 = vor.u32 %v20526_v62, %v18442_v63  ;;  %9997 = vmatpush.bf16.msrb.mxu1 %v18189_v7  ;;  %v9757_v63 = vpop.f32.mrf.mxu2 }
 0x2e0   :  { %v18698_v4 = vld [vmem:[#allocation5 + $0x2f60] sm:$0xf0] }
 0x2e1   :  { %v20390_v6 = vld [vmem:[#allocation5 + $0x2904] sm:$0xf]  ;;  %v18701_v21 = vor.u32 %v20590_v3, %v18698_v4  ;;  %10010 = vmatpush.bf16.msrb.mxu2 %v18445_v10  ;;  %v9770_v10 = vpop.f32.mrf.mxu3 }
 0x2e2   :  { %v17898_v11 = vld [vmem:[#allocation5 + $0x2920] sm:$0xf0] }
 0x2e3   :  { %v20454_v14 = vld [vmem:[#allocation5 + $0x2b04] sm:$0xf]  ;;  %v17901_v35 = vor.u32 %v20390_v6, %v17898_v11  ;;  %10023 = vmatpush.bf16.msrb.mxu3 %v18701_v21  ;;  %v9733_v21 = vpop.f32.mrf.mxu0 }
 0x2e4   :  { %v20700_v16 = vld [vmem:[#allocation7] sm:$0xff] }
 0x2e5   :  { %v1715_v17 = vperm.slane %v20700_v16, 1  ;;  %v18154_v28 = vld [vmem:[#allocation5 + $0x2b20] sm:$0xf0]  ;;  %9985 = vmatpush.bf16.msrb.mxu0 %v17901_v35  ;;  %v9746_v35 = vpop.f32.mrf.mxu1 }
 0x2e6   :  { %v20518_v29 = vld [vmem:[#allocation5 + $0x2d04] sm:$0xf]  ;;  %v18157_v41 = vor.u32 %v20454_v14, %v18154_v28  ;;  %v13104_v35 = vld [vmem:[#allocation5 + $0x388] sm:$0xf] }
 0x2e7   :  { %v18410_v0 = vld [vmem:[#allocation5 + $0x2d20] sm:$0xf0]  ;;  %v9732_v12 = vadd.f32 %v9731_v39, %v1715_v17 }
 0x2e8   :  { %v20582_v30 = vld [vmem:[#allocation5 + $0x2f04] sm:$0xf]  ;;  %v18413_v44 = vor.u32 %v20518_v29, %v18410_v0  ;;  %9998 = vmatpush.bf16.msrb.mxu1 %v18157_v41 }
 0x2e9   :  { %v18666_v33 = vld [vmem:[#allocation5 + $0x2f20] sm:$0xf0]  ;;  %v9745_v56 = vadd.f32 %v9744_v48, %v9732_v12 }
 0x2ea   :  { %v20382_v45 = vld [vmem:[#allocation5 + $0x28c4] sm:$0xf]  ;;  %v18669_v49 = vor.u32 %v20582_v30, %v18666_v33  ;;  %10011 = vmatpush.bf16.msrb.mxu2 %v18413_v44 }
 0x2eb   :  { %v17866_v46 = vld [vmem:[#allocation5 + $0x28e0] sm:$0xf0]  ;;  %v9758_v7 = vadd.f32 %v9757_v63, %v9745_v56  ;;  %v9759_v56 = vpop.f32.mrf.mxu2  ;;  %v19139_v63 = vld [vmem:[#allocation5 + $0x1e4] sm:$0xf0] }
 0x2ec   :  { %v20446_v47 = vld [vmem:[#allocation5 + $0x2ac4] sm:$0xf]  ;;  %v17869_v57 = vor.u32 %v20382_v45, %v17866_v46  ;;  %10024 = vmatpush.bf16.msrb.mxu3 %v18669_v49  ;;  %v13328_v56 = vld [vmem:[#allocation5 + $0x548] sm:$0xf] }
 0x2ed   :  { %v18122_v50 = vld [vmem:[#allocation5 + $0x2ae0] sm:$0xf0]  ;;  %v21091_v17 = vadd.f32 %v9770_v10, %v9758_v7  ;;  %v19267_v7 = vld [vmem:[#allocation5 + $0x5e4] sm:$0xf0] }
 0x2ee   :  { %v20510_v51 = vld [vmem:[#allocation5 + $0x2cc4] sm:$0xf]  ;;  %v18125_v43 = vor.u32 %v20446_v47, %v18122_v50  ;;  %9986 = vmatpush.bf16.msrb.mxu0 %v17869_v57 }
 0x2ef   :  { %v18378_v52 = vld [vmem:[#allocation5 + $0x2ce0] sm:$0xf0] }
 0x2f0   :  { %v20574_v54 = vld [vmem:[#allocation5 + $0x2ec4] sm:$0xf]  ;;  %v18381_v58 = vor.u32 %v20510_v51, %v18378_v52  ;;  %9999 = vmatpush.bf16.msrb.mxu1 %v18125_v43 }
 0x2f1   :  { %v18634_v55 = vld [vmem:[#allocation5 + $0x2ee0] sm:$0xf0] }
 0x2f2   :  { %v20374_v59 = vld [vmem:[#allocation5 + $0x2884] sm:$0xf]  ;;  %v18637_v3 = vor.u32 %v20574_v54, %v18634_v55  ;;  %10012 = vmatpush.bf16.msrb.mxu2 %v18381_v58 }
 0x2f3   :  { %v17834_v60 = vld [vmem:[#allocation5 + $0x28a0] sm:$0xf0] }
 0x2f4   :  { %v20438_v62 = vld [vmem:[#allocation5 + $0x2a84] sm:$0xf]  ;;  %v17837_v16 = vor.u32 %v20374_v59, %v17834_v60  ;;  %10025 = vmatpush.bf16.msrb.mxu3 %v18637_v3  ;;  %v9772_v60 = vpop.f32.mrf.mxu3  ;;  %v13136_v3 = vld [vmem:[#allocation5 + $0x3c8] sm:$0xf] }
 0x2f5   :  { %v18090_v4 = vld [vmem:[#allocation5 + $0x2aa0] sm:$0xf0] }
 0x2f6   :  { %v20502_v53 = vld [vmem:[#allocation5 + $0x2c84] sm:$0xf]  ;;  %v18093_v28 = vor.u32 %v20438_v62, %v18090_v4  ;;  %9987 = vmatpush.bf16.msrb.mxu0 %v17837_v16  ;;  %v12880_v62 = vld [vmem:[#allocation5 + $0x1c8] sm:$0xf] }
 0x2f7   :  { %v18346_v6 = vld [vmem:[#allocation5 + $0x2ca0] sm:$0xf0]  ;;  %v19331_v16 = vld [vmem:[#allocation5 + $0x7e4] sm:$0xf0] }
 0x2f8   :  { %v20566_v11 = vld [vmem:[#allocation5 + $0x2e84] sm:$0xf]  ;;  %v18349_v29 = vor.u32 %v20502_v53, %v18346_v6  ;;  %10000 = vmatpush.bf16.msrb.mxu1 %v18093_v28  ;;  %v19203_v53 = vld [vmem:[#allocation5 + $0x3e4] sm:$0xf0]  ;;  %v12881_v28 = vor.u32 %v19139_v63, %v12880_v62 }
 0x2f9   :  { %v18602_v14 = vld [vmem:[#allocation5 + $0x2ea0] sm:$0xf0]  ;;  %v13392_v6 = vld [vmem:[#allocation5 + $0x5c8] sm:$0xf] }
 0x2fa   :  { %v20366_v0 = vld [vmem:[#allocation5 + $0x2844] sm:$0xf]  ;;  %v18605_v39 = vor.u32 %v20566_v11, %v18602_v14  ;;  %10013 = vmatpush.bf16.msrb.mxu2 %v18349_v29  ;;  %v13648_v14 = vld [vmem:[#allocation5 + $0x7c8] sm:$0xf]  ;;  %v13137_v29 = vor.u32 %v19203_v53, %v13136_v3 }
 0x2fb   :  { %v17802_v30 = vld [vmem:[#allocation5 + $0x2860] sm:$0xf0]  ;;  %v12784_v63 = vld [vmem:[#allocation5 + $0x108] sm:$0xf] }
 0x2fc   :  { %v20430_v33 = vld [vmem:[#allocation5 + $0x2a44] sm:$0xf]  ;;  %v17805_v12 = vor.u32 %v20366_v0, %v17802_v30  ;;  %10026 = vmatpush.bf16.msrb.mxu3 %v18605_v39  ;;  %v13393_v0 = vor.u32 %v19267_v7, %v13392_v6  ;;  %v12848_v30 = vld [vmem:[#allocation5 + $0x188] sm:$0xf]  ;;  %v13649_v39 = vor.u32 %v19331_v16, %v13648_v14 }
 0x2fd   :  { %v18058_v41 = vld [vmem:[#allocation5 + $0x2a60] sm:$0xf0]  ;;  %v19115_v3 = vld [vmem:[#allocation5 + $0x124] sm:$0xf0] }
 0x2fe   :  { %v20494_v44 = vld [vmem:[#allocation5 + $0x2c44] sm:$0xf]  ;;  %v18061_v50 = vor.u32 %v20430_v33, %v18058_v41  ;;  %9988 = vmatpush.bf16.msrb.mxu0 %v17805_v12  ;;  %v19131_v33 = vld [vmem:[#allocation5 + $0x1a4] sm:$0xf0]  ;;  %v12785_v16 = vor.u32 %v19115_v3, %v12784_v63 }
 0x2ff   :  { %v18314_v45 = vld [vmem:[#allocation5 + $0x2c60] sm:$0xf0]  ;;  %v19195_v41 = vld [vmem:[#allocation5 + $0x3a4] sm:$0xf0]  ;;  %v12849_v12 = vor.u32 %v19131_v33, %v12848_v30 }
 0x300   :  { %v20558_v46 = vld [vmem:[#allocation5 + $0x2e44] sm:$0xf]  ;;  %v18317_v51 = vor.u32 %v20494_v44, %v18314_v45  ;;  %10001 = vmatpush.bf16.msrb.mxu1 %v18061_v50  ;;  %v13360_v44 = vld [vmem:[#allocation5 + $0x588] sm:$0xf] }
 0x301   :  { %v18570_v47 = vld [vmem:[#allocation5 + $0x2e60] sm:$0xf0]  ;;  %v19259_v45 = vld [vmem:[#allocation5 + $0x5a4] sm:$0xf0] }
 0x302   :  { %v20358_v48 = vld [vmem:[#allocation5 + $0x2804] sm:$0xf]  ;;  %v18573_v57 = vor.u32 %v20558_v46, %v18570_v47  ;;  %10014 = vmatpush.bf16.msrb.mxu2 %v18317_v51  ;;  %v13616_v46 = vld [vmem:[#allocation5 + $0x788] sm:$0xf] }
 0x303   :  { %v17770_v49 = vld [vmem:[#allocation5 + $0x2820] sm:$0xf0]  ;;  %v19323_v47 = vld [vmem:[#allocation5 + $0x7a4] sm:$0xf0] }
 0x304   :  { %v20422_v52 = vld [vmem:[#allocation5 + $0x2a04] sm:$0xf]  ;;  %v17773_v4 = vor.u32 %v20358_v48, %v17770_v49  ;;  %10027 = vmatpush.bf16.msrb.mxu3 %v18573_v57  ;;  %v13105_v48 = vor.u32 %v19195_v41, %v13104_v35  ;;  %v13361_v49 = vor.u32 %v19259_v45, %v13360_v44  ;;  %v12816_v50 = vld [vmem:[#allocation5 + $0x148] sm:$0xf] }
 0x305   :  { %v18026_v54 = vld [vmem:[#allocation5 + $0x2a20] sm:$0xf0]  ;;  %v19123_v51 = vld [vmem:[#allocation5 + $0x164] sm:$0xf0] }
 0x306   :  { %v20486_v55 = vld [vmem:[#allocation5 + $0x2c04] sm:$0xf]  ;;  %v18029_v10 = vor.u32 %v20422_v52, %v18026_v54  ;;  %9989 = vmatpush.bf16.msrb.mxu0 %v17773_v4  ;;  %v13072_v52 = vld [vmem:[#allocation5 + $0x348] sm:$0xf]  ;;  %v13617_v54 = vor.u32 %v19323_v47, %v13616_v46 }
 0x307   :  { %v18282_v43 = vld [vmem:[#allocation5 + $0x2c20] sm:$0xf0]  ;;  %v19251_v57 = vld [vmem:[#allocation5 + $0x564] sm:$0xf0] }
 0x308   :  { %v20550_v58 = vld [vmem:[#allocation5 + $0x2e04] sm:$0xf]  ;;  %v18285_v11 = vor.u32 %v20486_v55, %v18282_v43  ;;  %10002 = vmatpush.bf16.msrb.mxu1 %v18029_v10  ;;  %v19187_v55 = vld [vmem:[#allocation5 + $0x364] sm:$0xf0]  ;;  %v13329_v62 = vor.u32 %v19251_v57, %v13328_v56  ;;  %v9809_v56 = vpop.f32.mrf.mxu2 }
 0x309   :  { %v18538_v59 = vld [vmem:[#allocation5 + $0x2e20] sm:$0xf0]  ;;  %9990 = vmatmul.bf16.vlgmr.msrb.gmra.mxu0 %v21044_v61  ;;  %v13584_v43 = vld [vmem:[#allocation5 + $0x748] sm:$0xf]  ;;  %v13073_v60 = vor.u32 %v19187_v55, %v13072_v52 }
 0x30a   :  { %v18541_v21 = vor.u32 %v20550_v58, %v18538_v59  ;;  %10015 = vmatpush.bf16.msrb.mxu2 %v18285_v11  ;;  %10034 = vmatpush.bf16.msra.mxu0 %v12881_v28  ;;  %v19315_v58 = vld [vmem:[#allocation5 + $0x764] sm:$0xf0]  ;;  %v12817_v59 = vor.u32 %v19123_v51, %v12816_v50 }
 0x30b   :  { %10003 = vmatmul.bf16.vlgmr.msrb.gmra.mxu1 %v21048_v2  ;;  %v13040_v4 = vld [vmem:[#allocation5 + $0x308] sm:$0xf]  ;;  %v13585_v53 = vor.u32 %v19315_v58, %v13584_v43 }
 0x30c   :  { %10028 = vmatpush.bf16.msrb.mxu3 %v18541_v21  ;;  %10047 = vmatpush.bf16.msra.mxu1 %v13137_v29  ;;  %v19179_v6 = vld [vmem:[#allocation5 + $0x324] sm:$0xf0]  ;;  %v9783_v21 = vpop.f32.mrf.mxu0 }
 0x30d   :  { %10016 = vmatmul.bf16.vlgmr.msrb.gmra.mxu2 %v21046_v1  ;;  %v13296_v7 = vld [vmem:[#allocation5 + $0x508] sm:$0xf]  ;;  %v13041_v28 = vor.u32 %v19179_v6, %v13040_v4  ;;  %v9784_v35 = vadd.f32 %v9783_v21, %v21091_v17 }
 0x30e   :  { %10060 = vmatpush.bf16.msra.mxu2 %v13393_v0  ;;  %10035 = vmatpush.bf16.msra.mxu0 %v12849_v12  ;;  %v19243_v10 = vld [vmem:[#allocation5 + $0x524] sm:$0xf0] }
 0x30f   :  { %10029 = vmatmul.bf16.vlgmr.msrb.gmra.mxu3 %v21050_v5  ;;  %v13552_v11 = vld [vmem:[#allocation5 + $0x708] sm:$0xf]  ;;  %v13297_v29 = vor.u32 %v19243_v10, %v13296_v7 }
 0x310   :  { %10073 = vmatpush.bf16.msra.mxu3 %v13649_v39  ;;  %10048 = vmatpush.bf16.msra.mxu1 %v13105_v48  ;;  %v19307_v14 = vld [vmem:[#allocation5 + $0x724] sm:$0xf0]  ;;  %v9796_v39 = vpop.f32.mrf.mxu1 }
 0x311   :  { %v12752_v0 = vld [vmem:[#allocation5 + $0xc8] sm:$0xf]  ;;  %v13553_v41 = vor.u32 %v19307_v14, %v13552_v11  ;;  %v9797_v48 = vadd.f32 %v9796_v39, %v9784_v35 }
 0x312   :  { %10061 = vmatpush.bf16.msra.mxu2 %v13361_v49  ;;  %10036 = vmatpush.bf16.msra.mxu0 %v12817_v59  ;;  %v19107_v30 = vld [vmem:[#allocation5 + $0xe4] sm:$0xf0] }
 0x313   :  { %v13008_v33 = vld [vmem:[#allocation5 + $0x2c8] sm:$0xf]  ;;  %v12753_v49 = vor.u32 %v19107_v30, %v12752_v0  ;;  %v9810_v59 = vadd.f32 %v9809_v56, %v9797_v48  ;;  %v9811_v48 = vpop.f32.mrf.mxu2 }
 0x314   :  { %10074 = vmatpush.bf16.msra.mxu3 %v13617_v54  ;;  %10049 = vmatpush.bf16.msra.mxu1 %v13073_v60  ;;  %v19171_v44 = vld [vmem:[#allocation5 + $0x2e4] sm:$0xf0]  ;;  %v9822_v60 = vpop.f32.mrf.mxu3 }
 0x315   :  { %v13264_v45 = vld [vmem:[#allocation5 + $0x4c8] sm:$0xf]  ;;  %v13009_v50 = vor.u32 %v19171_v44, %v13008_v33  ;;  %v21098_v4 = vadd.f32 %v9822_v60, %v9810_v59 }
 0x316   :  { %10062 = vmatpush.bf16.msra.mxu2 %v13329_v62  ;;  %v19235_v46 = vld [vmem:[#allocation5 + $0x4e4] sm:$0xf0]  ;;  %10037 = vmatpush.bf16.msra.mxu0 %v12785_v16 }
 0x317   :  { %v13520_v47 = vld [vmem:[#allocation5 + $0x6c8] sm:$0xf]  ;;  %v13265_v51 = vor.u32 %v19235_v46, %v13264_v45 }
 0x318   :  { %10075 = vmatpush.bf16.msra.mxu3 %v13585_v53  ;;  %v19299_v12 = vld [vmem:[#allocation5 + $0x6e4] sm:$0xf0]  ;;  %10050 = vmatpush.bf16.msra.mxu1 %v13041_v28  ;;  %v9785_v53 = vpop.f32.mrf.mxu0  ;;  %v9798_v16 = vpop.f32.mrf.mxu1 }
 0x319   :  { %v12720_v52 = vld [vmem:[#allocation5 + $0x88] sm:$0xf]  ;;  %v13521_v17 = vor.u32 %v19299_v12, %v13520_v47 }
 0x31a   :  { %10063 = vmatpush.bf16.msra.mxu2 %v13297_v29  ;;  %v19099_v54 = vld [vmem:[#allocation5 + $0xa4] sm:$0xf0]  ;;  %10038 = vmatpush.bf16.msra.mxu0 %v12753_v49 }
 0x31b   :  { %v12976_v55 = vld [vmem:[#allocation5 + $0x288] sm:$0xf]  ;;  %v12721_v3 = vor.u32 %v19099_v54, %v12720_v52 }
 0x31c   :  { %10076 = vmatpush.bf16.msra.mxu3 %v13553_v41  ;;  %v19163_v57 = vld [vmem:[#allocation5 + $0x2a4] sm:$0xf0]  ;;  %10051 = vmatpush.bf16.msra.mxu1 %v13009_v50  ;;  %v9824_v54 = vpop.f32.mrf.mxu3 }
 0x31d   :  { %v13232_v43 = vld [vmem:[#allocation5 + $0x488] sm:$0xf]  ;;  %v12977_v6 = vor.u32 %v19163_v57, %v12976_v55 }
 0x31e   :  { %v19227_v58 = vld [vmem:[#allocation5 + $0x4a4] sm:$0xf0]  ;;  %10064 = vmatpush.bf16.msra.mxu2 %v13265_v51  ;;  %10039 = vmatpush.bf16.msra.mxu0 %v12721_v3 }
 0x31f   :  { %v13488_v62 = vld [vmem:[#allocation5 + $0x688] sm:$0xf]  ;;  %v13233_v7 = vor.u32 %v19227_v58, %v13232_v43 }
 0x320   :  { %v19291_v63 = vld [vmem:[#allocation5 + $0x6a4] sm:$0xf0]  ;;  %10077 = vmatpush.bf16.msra.mxu3 %v13521_v17  ;;  %10052 = vmatpush.bf16.msra.mxu1 %v12977_v6 }
 0x321   :  { %v12688_v10 = vld [vmem:[#allocation5 + $0x48] sm:$0xf]  ;;  %v13489_v21 = vor.u32 %v19291_v63, %v13488_v62 }
 0x322   :  { %v19091_v11 = vld [vmem:[#allocation5 + $0x64] sm:$0xf0]  ;;  %10065 = vmatpush.bf16.msra.mxu2 %v13233_v7 }
 0x323   :  { %v12944_v14 = vld [vmem:[#allocation5 + $0x248] sm:$0xf]  ;;  %v12689_v35 = vor.u32 %v19091_v11, %v12688_v10 }
 0x324   :  { %v19155_v28 = vld [vmem:[#allocation5 + $0x264] sm:$0xf0]  ;;  %10078 = vmatpush.bf16.msra.mxu3 %v13489_v21 }
 0x325   :  { %v13200_v29 = vld [vmem:[#allocation5 + $0x448] sm:$0xf]  ;;  %v12945_v44 = vor.u32 %v19155_v28, %v12944_v14  ;;  %10040 = vmatpush.bf16.msra.mxu0 %v12689_v35 }
 0x326   :  { %v19219_v0 = vld [vmem:[#allocation5 + $0x464] sm:$0xf0] }
 0x327   :  { %v13456_v30 = vld [vmem:[#allocation5 + $0x648] sm:$0xf]  ;;  %v13201_v45 = vor.u32 %v19219_v0, %v13200_v29  ;;  %10053 = vmatpush.bf16.msra.mxu1 %v12945_v44 }
 0x328   :  { %v19283_v33 = vld [vmem:[#allocation5 + $0x664] sm:$0xf0] }
 0x329   :  { %v12656_v39 = vld [vmem:[#allocation5 + $0x8] sm:$0xf]  ;;  %v13457_v49 = vor.u32 %v19283_v33, %v13456_v30  ;;  %10066 = vmatpush.bf16.msra.mxu2 %v13201_v45 }
 0x32a   :  { %v19083_v41 = vld [vmem:[#allocation5 + $0x24] sm:$0xf0] }
 0x32b   :  { %v12912_v46 = vld [vmem:[#allocation5 + $0x208] sm:$0xf]  ;;  %v12657_v57 = vor.u32 %v19083_v41, %v12656_v39  ;;  %10079 = vmatpush.bf16.msra.mxu3 %v13457_v49 }
 0x32c   :  { %v19147_v47 = vld [vmem:[#allocation5 + $0x224] sm:$0xf0] }
 0x32d   :  { %v13168_v12 = vld [vmem:[#allocation5 + $0x408] sm:$0xf]  ;;  %v12913_v60 = vor.u32 %v19147_v47, %v12912_v46  ;;  %10041 = vmatpush.bf16.msra.mxu0 %v12657_v57 }
 0x32e   :  { %v19211_v50 = vld [vmem:[#allocation5 + $0x424] sm:$0xf0] }
 0x32f   :  { %v13424_v51 = vld [vmem:[#allocation5 + $0x608] sm:$0xf]  ;;  %v13169_v62 = vor.u32 %v19211_v50, %v13168_v12  ;;  %10054 = vmatpush.bf16.msra.mxu1 %v12913_v60 }
 0x330   :  { %v19275_v52 = vld [vmem:[#allocation5 + $0x624] sm:$0xf0]  ;;  %10042 = vmatmul.bf16.vlgmr.msra.gmra.mxu0 %v20984_v9 }
 0x331   :  { %v13904_v55 = vld [vmem:[#allocation5 + $0x9c8] sm:$0xf]  ;;  %v13425_v53 = vor.u32 %v19275_v52, %v13424_v51  ;;  %10067 = vmatpush.bf16.msra.mxu2 %v13169_v62  ;;  %v9835_v62 = vpop.f32.mrf.mxu0 }
 0x332   :  { %v19395_v56 = vld [vmem:[#allocation5 + $0x9e4] sm:$0xf0]  ;;  %10055 = vmatmul.bf16.vlgmr.msra.gmra.mxu1 %v20991_v25 }
 0x333   :  { %v14160_v17 = vld [vmem:[#allocation5 + $0xbc8] sm:$0xf]  ;;  %v13905_v6 = vor.u32 %v19395_v56, %v13904_v55  ;;  %10080 = vmatpush.bf16.msra.mxu3 %v13425_v53  ;;  %v9836_v53 = vadd.f32 %v9835_v62, %v21098_v4 }
 0x334   :  { %v19459_v43 = vld [vmem:[#allocation5 + $0xbe4] sm:$0xf0]  ;;  %10068 = vmatmul.bf16.vlgmr.msra.gmra.mxu2 %v20982_v8 }
 0x335   :  { %v14416_v58 = vld [vmem:[#allocation5 + $0xdc8] sm:$0xf]  ;;  %v14161_v7 = vor.u32 %v19459_v43, %v14160_v17  ;;  %10086 = vmatpush.bf16.msrb.mxu0 %v13905_v6 }
 0x336   :  { %v19523_v59 = vld [vmem:[#allocation5 + $0xde4] sm:$0xf0]  ;;  %10081 = vmatmul.bf16.vlgmr.msra.gmra.mxu3 %v20986_v15 }
 0x337   :  { %v14672_v63 = vld [vmem:[#allocation5 + $0xfc8] sm:$0xf]  ;;  %v14417_v10 = vor.u32 %v19523_v59, %v14416_v58  ;;  %10099 = vmatpush.bf16.msrb.mxu1 %v14161_v7  ;;  %v9848_v7 = vpop.f32.mrf.mxu1 }
 0x338   :  { %v19587_v3 = vld [vmem:[#allocation5 + $0xfe4] sm:$0xf0] }
 0x339   :  { %v13872_v11 = vld [vmem:[#allocation5 + $0x988] sm:$0xf]  ;;  %v14673_v21 = vor.u32 %v19587_v3, %v14672_v63  ;;  %10112 = vmatpush.bf16.msrb.mxu2 %v14417_v10 }
 0x33a   :  { %v19387_v14 = vld [vmem:[#allocation5 + $0x9a4] sm:$0xf0] }
 0x33b   :  { %v14128_v16 = vld [vmem:[#allocation5 + $0xb88] sm:$0xf]  ;;  %v13873_v35 = vor.u32 %v19387_v14, %v13872_v11  ;;  %10125 = vmatpush.bf16.msrb.mxu3 %v14673_v21 }
 0x33c   :  { %v19451_v28 = vld [vmem:[#allocation5 + $0xba4] sm:$0xf0] }
 0x33d   :  { %v14384_v29 = vld [vmem:[#allocation5 + $0xd88] sm:$0xf]  ;;  %v14129_v39 = vor.u32 %v19451_v28, %v14128_v16  ;;  %10087 = vmatpush.bf16.msrb.mxu0 %v13873_v35 }
 0x33e   :  { %v19515_v0 = vld [vmem:[#allocation5 + $0xda4] sm:$0xf0] }
 0x33f   :  { %v14640_v30 = vld [vmem:[#allocation5 + $0xf88] sm:$0xf]  ;;  %v14385_v41 = vor.u32 %v19515_v0, %v14384_v29  ;;  %10100 = vmatpush.bf16.msrb.mxu1 %v14129_v39  ;;  %v9849_v29 = vadd.f32 %v9848_v7, %v9836_v53 }
 0x340   :  { %v19579_v33 = vld [vmem:[#allocation5 + $0xfa4] sm:$0xf0] }
 0x341   :  { %v13840_v44 = vld [vmem:[#allocation5 + $0x948] sm:$0xf]  ;;  %v14641_v47 = vor.u32 %v19579_v33, %v14640_v30  ;;  %10113 = vmatpush.bf16.msrb.mxu2 %v14385_v41 }
 0x342   :  { %v19379_v45 = vld [vmem:[#allocation5 + $0x964] sm:$0xf0] }
 0x343   :  { %v14096_v46 = vld [vmem:[#allocation5 + $0xb48] sm:$0xf]  ;;  %v13841_v52 = vor.u32 %v19379_v45, %v13840_v44  ;;  %10126 = vmatpush.bf16.msrb.mxu3 %v14641_v47 }
 0x344   :  { %v19443_v12 = vld [vmem:[#allocation5 + $0xb64] sm:$0xf0] }
 0x345   :  { %v14352_v48 = vld [vmem:[#allocation5 + $0xd48] sm:$0xf]  ;;  %v14097_v54 = vor.u32 %v19443_v12, %v14096_v46  ;;  %10088 = vmatpush.bf16.msrb.mxu0 %v13841_v52 }
 0x346   :  { %v19507_v49 = vld [vmem:[#allocation5 + $0xd64] sm:$0xf0] }
 0x347   :  { %v14608_v50 = vld [vmem:[#allocation5 + $0xf48] sm:$0xf]  ;;  %v14353_v55 = vor.u32 %v19507_v49, %v14352_v48  ;;  %10101 = vmatpush.bf16.msrb.mxu1 %v14097_v54  ;;  %v9861_v48 = vpop.f32.mrf.mxu2  ;;  %v9874_v54 = vpop.f32.mrf.mxu3 }
 0x348   :  { %v19571_v51 = vld [vmem:[#allocation5 + $0xf64] sm:$0xf0]  ;;  %v9862_v52 = vadd.f32 %v9861_v48, %v9849_v29 }
 0x349   :  { %v13808_v56 = vld [vmem:[#allocation5 + $0x908] sm:$0xf]  ;;  %v14609_v43 = vor.u32 %v19571_v51, %v14608_v50  ;;  %10114 = vmatpush.bf16.msrb.mxu2 %v14353_v55 }
 0x34a   :  { %v19371_v17 = vld [vmem:[#allocation5 + $0x924] sm:$0xf0] }
 0x34b   :  { %v14064_v57 = vld [vmem:[#allocation5 + $0xb08] sm:$0xf]  ;;  %v13809_v6 = vor.u32 %v19371_v17, %v13808_v56  ;;  %10127 = vmatpush.bf16.msrb.mxu3 %v14609_v43  ;;  %v9837_v17 = vpop.f32.mrf.mxu0  ;;  %v9850_v43 = vpop.f32.mrf.mxu1 }
 0x34c   :  { %v19435_v58 = vld [vmem:[#allocation5 + $0xb24] sm:$0xf0] }
 0x34d   :  { %v14320_v59 = vld [vmem:[#allocation5 + $0xd08] sm:$0xf]  ;;  %v14065_v10 = vor.u32 %v19435_v58, %v14064_v57  ;;  %10089 = vmatpush.bf16.msrb.mxu0 %v13809_v6  ;;  %v21105_v58 = vadd.f32 %v9874_v54, %v9862_v52 }
 0x34e   :  { %v19499_v60 = vld [vmem:[#allocation5 + $0xd24] sm:$0xf0] }
 0x34f   :  { %v14576_v63 = vld [vmem:[#allocation5 + $0xf08] sm:$0xf]  ;;  %v14321_v11 = vor.u32 %v19499_v60, %v14320_v59  ;;  %10102 = vmatpush.bf16.msrb.mxu1 %v14065_v10  ;;  %v9876_v48 = vpop.f32.mrf.mxu3 }
 0x350   :  { %v19563_v3 = vld [vmem:[#allocation5 + $0xf24] sm:$0xf0] }
 0x351   :  { %v13776_v14 = vld [vmem:[#allocation5 + $0x8c8] sm:$0xf]  ;;  %v14577_v28 = vor.u32 %v19563_v3, %v14576_v63  ;;  %10115 = vmatpush.bf16.msrb.mxu2 %v14321_v11 }
 0x352   :  { %v19363_v16 = vld [vmem:[#allocation5 + $0x8e4] sm:$0xf0] }
 0x353   :  { %v14032_v21 = vld [vmem:[#allocation5 + $0xac8] sm:$0xf]  ;;  %v13777_v41 = vor.u32 %v19363_v16, %v13776_v14  ;;  %10128 = vmatpush.bf16.msrb.mxu3 %v14577_v28 }
 0x354   :  { %v19427_v0 = vld [vmem:[#allocation5 + $0xae4] sm:$0xf0] }
 0x355   :  { %v14288_v30 = vld [vmem:[#allocation5 + $0xcc8] sm:$0xf]  ;;  %v14033_v4 = vor.u32 %v19427_v0, %v14032_v21  ;;  %10090 = vmatpush.bf16.msrb.mxu0 %v13777_v41 }
 0x356   :  { %v19491_v33 = vld [vmem:[#allocation5 + $0xce4] sm:$0xf0] }
 0x357   :  { %v14544_v35 = vld [vmem:[#allocation5 + $0xec8] sm:$0xf]  ;;  %v14289_v44 = vor.u32 %v19491_v33, %v14288_v30  ;;  %10103 = vmatpush.bf16.msrb.mxu1 %v14033_v4 }
 0x358   :  { %v19555_v39 = vld [vmem:[#allocation5 + $0xee4] sm:$0xf0] }
 0x359   :  { %v13744_v45 = vld [vmem:[#allocation5 + $0x888] sm:$0xf]  ;;  %v14545_v12 = vor.u32 %v19555_v39, %v14544_v35  ;;  %10116 = vmatpush.bf16.msrb.mxu2 %v14289_v44 }
 0x35a   :  { %v19355_v46 = vld [vmem:[#allocation5 + $0x8a4] sm:$0xf0] }
 0x35b   :  { %v14000_v47 = vld [vmem:[#allocation5 + $0xa88] sm:$0xf]  ;;  %v13745_v57 = vor.u32 %v19355_v46, %v13744_v45  ;;  %10129 = vmatpush.bf16.msrb.mxu3 %v14545_v12  ;;  %v9863_v45 = vpop.f32.mrf.mxu2 }
 0x35c   :  { %v19419_v49 = vld [vmem:[#allocation5 + $0xaa4] sm:$0xf0] }
 0x35d   :  { %v14256_v50 = vld [vmem:[#allocation5 + $0xc88] sm:$0xf]  ;;  %v14001_v59 = vor.u32 %v19419_v49, %v14000_v47  ;;  %10091 = vmatpush.bf16.msrb.mxu0 %v13745_v57 }
 0x35e   :  { %v19483_v51 = vld [vmem:[#allocation5 + $0xca4] sm:$0xf0] }
 0x35f   :  { %v14512_v55 = vld [vmem:[#allocation5 + $0xe88] sm:$0xf]  ;;  %v14257_v60 = vor.u32 %v19483_v51, %v14256_v50  ;;  %10104 = vmatpush.bf16.msrb.mxu1 %v14001_v59 }
 0x360   :  { %v19547_v56 = vld [vmem:[#allocation5 + $0xea4] sm:$0xf0] }
 0x361   :  { %v13712_v62 = vld [vmem:[#allocation5 + $0x848] sm:$0xf]  ;;  %v14513_v53 = vor.u32 %v19547_v56, %v14512_v55  ;;  %10117 = vmatpush.bf16.msrb.mxu2 %v14257_v60 }
 0x362   :  { %v19347_v63 = vld [vmem:[#allocation5 + $0x864] sm:$0xf0] }
 0x363   :  { %v13968_v3 = vld [vmem:[#allocation5 + $0xa48] sm:$0xf]  ;;  %v13713_v16 = vor.u32 %v19347_v63, %v13712_v62  ;;  %10130 = vmatpush.bf16.msrb.mxu3 %v14513_v53 }
 0x364   :  { %v19411_v6 = vld [vmem:[#allocation5 + $0xa64] sm:$0xf0] }
 0x365   :  { %v14224_v7 = vld [vmem:[#allocation5 + $0xc48] sm:$0xf]  ;;  %v13969_v29 = vor.u32 %v19411_v6, %v13968_v3  ;;  %10092 = vmatpush.bf16.msrb.mxu0 %v13713_v16 }
 0x366   :  { %v19475_v10 = vld [vmem:[#allocation5 + $0xc64] sm:$0xf0] }
 0x367   :  { %v14480_v11 = vld [vmem:[#allocation5 + $0xe48] sm:$0xf]  ;;  %v14225_v0 = vor.u32 %v19475_v10, %v14224_v7  ;;  %10105 = vmatpush.bf16.msrb.mxu1 %v13969_v29 }
 0x368   :  { %v19539_v14 = vld [vmem:[#allocation5 + $0xe64] sm:$0xf0] }
 0x369   :  { %v13680_v21 = vld [vmem:[#allocation5 + $0x808] sm:$0xf]  ;;  %v14481_v39 = vor.u32 %v19539_v14, %v14480_v11  ;;  %10118 = vmatpush.bf16.msrb.mxu2 %v14225_v0 }
 0x36a   :  { %v19339_v28 = vld [vmem:[#allocation5 + $0x824] sm:$0xf0] }
 0x36b   :  { %v13936_v30 = vld [vmem:[#allocation5 + $0xa08] sm:$0xf]  ;;  %v13681_v49 = vor.u32 %v19339_v28, %v13680_v21  ;;  %10131 = vmatpush.bf16.msrb.mxu3 %v14481_v39 }
 0x36c   :  { %v19403_v33 = vld [vmem:[#allocation5 + $0xa24] sm:$0xf0] }
 0x36d   :  { %v14192_v35 = vld [vmem:[#allocation5 + $0xc08] sm:$0xf]  ;;  %v13937_v54 = vor.u32 %v19403_v33, %v13936_v30  ;;  %10093 = vmatpush.bf16.msrb.mxu0 %v13681_v49 }
 0x36e   :  { %v19467_v41 = vld [vmem:[#allocation5 + $0xc24] sm:$0xf0] }
 0x36f   :  { %v14448_v4 = vld [vmem:[#allocation5 + $0xe08] sm:$0xf]  ;;  %v14193_v55 = vor.u32 %v19467_v41, %v14192_v35  ;;  %10106 = vmatpush.bf16.msrb.mxu1 %v13937_v54 }
 0x370   :  { %v19531_v44 = vld [vmem:[#allocation5 + $0xe24] sm:$0xf0]  ;;  %10094 = vmatmul.bf16.vlgmr.msrb.gmra.mxu0 %v20996_v37 }
 0x371   :  { %v14928_v46 = vld [vmem:[#allocation5 + $0x11c8] sm:$0xf]  ;;  %v14449_v57 = vor.u32 %v19531_v44, %v14448_v4  ;;  %10119 = vmatpush.bf16.msrb.mxu2 %v14193_v55  ;;  %v9887_v55 = vpop.f32.mrf.mxu0 }
 0x372   :  { %v19651_v47 = vld [vmem:[#allocation5 + $0x11e4] sm:$0xf0]  ;;  %10107 = vmatmul.bf16.vlgmr.msrb.gmra.mxu1 %v21000_v40 }
 0x373   :  { %v15184_v12 = vld [vmem:[#allocation5 + $0x13c8] sm:$0xf]  ;;  %v14929_v43 = vor.u32 %v19651_v47, %v14928_v46  ;;  %10132 = vmatpush.bf16.msrb.mxu3 %v14449_v57  ;;  %v9888_v57 = vadd.f32 %v9887_v55, %v21105_v58 }
 0x374   :  { %v19715_v50 = vld [vmem:[#allocation5 + $0x13e4] sm:$0xf0]  ;;  %10120 = vmatmul.bf16.vlgmr.msrb.gmra.mxu2 %v20994_v34 }
 0x375   :  { %v15440_v51 = vld [vmem:[#allocation5 + $0x15c8] sm:$0xf]  ;;  %v15185_v59 = vor.u32 %v19715_v50, %v15184_v12  ;;  %10138 = vmatpush.bf16.msra.mxu0 %v14929_v43 }
 0x376   :  { %v19779_v52 = vld [vmem:[#allocation5 + $0x15e4] sm:$0xf0]  ;;  %10133 = vmatmul.bf16.vlgmr.msrb.gmra.mxu3 %v20998_v38 }
 0x377   :  { %v15696_v56 = vld [vmem:[#allocation5 + $0x17c8] sm:$0xf]  ;;  %v15441_v60 = vor.u32 %v19779_v52, %v15440_v51  ;;  %10151 = vmatpush.bf16.msra.mxu1 %v15185_v59  ;;  %v9900_v59 = vpop.f32.mrf.mxu1 }
 0x378   :  { %v19843_v17 = vld [vmem:[#allocation5 + $0x17e4] sm:$0xf0] }
 0x379   :  { %v14896_v62 = vld [vmem:[#allocation5 + $0x1188] sm:$0xf]  ;;  %v15697_v53 = vor.u32 %v19843_v17, %v15696_v56  ;;  %10164 = vmatpush.bf16.msra.mxu2 %v15441_v60 }
 0x37a   :  { %v19643_v63 = vld [vmem:[#allocation5 + $0x11a4] sm:$0xf0] }
 0x37b   :  { %v15152_v3 = vld [vmem:[#allocation5 + $0x1388] sm:$0xf]  ;;  %v14897_v16 = vor.u32 %v19643_v63, %v14896_v62  ;;  %10177 = vmatpush.bf16.msra.mxu3 %v15697_v53 }
 0x37c   :  { %v19707_v6 = vld [vmem:[#allocation5 + $0x13a4] sm:$0xf0] }
 0x37d   :  { %v15408_v7 = vld [vmem:[#allocation5 + $0x1588] sm:$0xf]  ;;  %v15153_v21 = vor.u32 %v19707_v6, %v15152_v3  ;;  %10139 = vmatpush.bf16.msra.mxu0 %v14897_v16 }
 0x37e   :  { %v19771_v10 = vld [vmem:[#allocation5 + $0x15a4] sm:$0xf0] }
 0x37f   :  { %v15664_v11 = vld [vmem:[#allocation5 + $0x1788] sm:$0xf]  ;;  %v15409_v28 = vor.u32 %v19771_v10, %v15408_v7  ;;  %10152 = vmatpush.bf16.msra.mxu1 %v15153_v21  ;;  %v9901_v7 = vadd.f32 %v9900_v59, %v9888_v57 }
 0x380   :  { %v19835_v14 = vld [vmem:[#allocation5 + $0x17a4] sm:$0xf0] }
 0x381   :  { %v14864_v29 = vld [vmem:[#allocation5 + $0x1148] sm:$0xf]  ;;  %v15665_v33 = vor.u32 %v19835_v14, %v15664_v11  ;;  %10165 = vmatpush.bf16.msra.mxu2 %v15409_v28 }
 0x382   :  { %v19635_v0 = vld [vmem:[#allocation5 + $0x1164] sm:$0xf0] }
 0x383   :  { %v15120_v30 = vld [vmem:[#allocation5 + $0x1348] sm:$0xf]  ;;  %v14865_v45 = vor.u32 %v19635_v0, %v14864_v29  ;;  %10178 = vmatpush.bf16.msra.mxu3 %v15665_v33 }
 0x384   :  { %v19699_v35 = vld [vmem:[#allocation5 + $0x1364] sm:$0xf0] }
 0x385   :  { %v15376_v39 = vld [vmem:[#allocation5 + $0x1548] sm:$0xf]  ;;  %v15121_v46 = vor.u32 %v19699_v35, %v15120_v30  ;;  %10140 = vmatpush.bf16.msra.mxu0 %v14865_v45 }
 0x386   :  { %v19763_v41 = vld [vmem:[#allocation5 + $0x1564] sm:$0xf0] }
 0x387   :  { %v15632_v4 = vld [vmem:[#allocation5 + $0x1748] sm:$0xf]  ;;  %v15377_v47 = vor.u32 %v19763_v41, %v15376_v39  ;;  %10153 = vmatpush.bf16.msra.mxu1 %v15121_v46  ;;  %v9913_v39 = vpop.f32.mrf.mxu2  ;;  %v9926_v46 = vpop.f32.mrf.mxu3 }
 0x388   :  { %v19827_v44 = vld [vmem:[#allocation5 + $0x1764] sm:$0xf0]  ;;  %v9914_v45 = vadd.f32 %v9913_v39, %v9901_v7 }
 0x389   :  { %v14832_v12 = vld [vmem:[#allocation5 + $0x1108] sm:$0xf]  ;;  %v15633_v50 = vor.u32 %v19827_v44, %v15632_v4  ;;  %10166 = vmatpush.bf16.msra.mxu2 %v15377_v47 }
 0x38a   :  { %v19627_v48 = vld [vmem:[#allocation5 + $0x1124] sm:$0xf0] }
 0x38b   :  { %v15088_v49 = vld [vmem:[#allocation5 + $0x1308] sm:$0xf]  ;;  %v14833_v43 = vor.u32 %v19627_v48, %v14832_v12  ;;  %10179 = vmatpush.bf16.msra.mxu3 %v15633_v50  ;;  %v9889_v48 = vpop.f32.mrf.mxu0  ;;  %v9902_v50 = vpop.f32.mrf.mxu1 }
 0x38c   :  { %v19691_v51 = vld [vmem:[#allocation5 + $0x1324] sm:$0xf0] }
 0x38d   :  { %v15344_v52 = vld [vmem:[#allocation5 + $0x1508] sm:$0xf]  ;;  %v15089_v60 = vor.u32 %v19691_v51, %v15088_v49  ;;  %10141 = vmatpush.bf16.msra.mxu0 %v14833_v43  ;;  %v21112_v51 = vadd.f32 %v9926_v46, %v9914_v45 }
 0x38e   :  { %v19755_v54 = vld [vmem:[#allocation5 + $0x1524] sm:$0xf0] }
 0x38f   :  { %v15600_v56 = vld [vmem:[#allocation5 + $0x1708] sm:$0xf]  ;;  %v15345_v62 = vor.u32 %v19755_v54, %v15344_v52  ;;  %10154 = vmatpush.bf16.msra.mxu1 %v15089_v60  ;;  %v9928_v39 = vpop.f32.mrf.mxu3 }
 0x390   :  { %v19819_v17 = vld [vmem:[#allocation5 + $0x1724] sm:$0xf0] }
 0x391   :  { %v14800_v63 = vld [vmem:[#allocation5 + $0x10c8] sm:$0xf]  ;;  %v15601_v6 = vor.u32 %v19819_v17, %v15600_v56  ;;  %10167 = vmatpush.bf16.msra.mxu2 %v15345_v62 }
 0x392   :  { %v19619_v3 = vld [vmem:[#allocation5 + $0x10e4] sm:$0xf0] }
 0x393   :  { %v15056_v53 = vld [vmem:[#allocation5 + $0x12c8] sm:$0xf]  ;;  %v14801_v28 = vor.u32 %v19619_v3, %v14800_v63  ;;  %10180 = vmatpush.bf16.msra.mxu3 %v15601_v6 }
 0x394   :  { %v19683_v10 = vld [vmem:[#allocation5 + $0x12e4] sm:$0xf0] }
 0x395   :  { %v15312_v11 = vld [vmem:[#allocation5 + $0x14c8] sm:$0xf]  ;;  %v15057_v58 = vor.u32 %v19683_v10, %v15056_v53  ;;  %10142 = vmatpush.bf16.msra.mxu0 %v14801_v28 }
 0x396   :  { %v19747_v14 = vld [vmem:[#allocation5 + $0x14e4] sm:$0xf0] }
 0x397   :  { %v15568_v16 = vld [vmem:[#allocation5 + $0x16c8] sm:$0xf]  ;;  %v15313_v29 = vor.u32 %v19747_v14, %v15312_v11  ;;  %10155 = vmatpush.bf16.msra.mxu1 %v15057_v58 }
 0x398   :  { %v19811_v21 = vld [vmem:[#allocation5 + $0x16e4] sm:$0xf0] }
 0x399   :  { %v14768_v0 = vld [vmem:[#allocation5 + $0x1088] sm:$0xf]  ;;  %v15569_v35 = vor.u32 %v19811_v21, %v15568_v16  ;;  %10168 = vmatpush.bf16.msra.mxu2 %v15313_v29 }
 0x39a   :  { %v19611_v30 = vld [vmem:[#allocation5 + $0x10a4] sm:$0xf0] }
 0x39b   :  { %v15024_v33 = vld [vmem:[#allocation5 + $0x1288] sm:$0xf]  ;;  %v14769_v49 = vor.u32 %v19611_v30, %v14768_v0  ;;  %10181 = vmatpush.bf16.msra.mxu3 %v15569_v35  ;;  %v9915_v0 = vpop.f32.mrf.mxu2 }
 0x39c   :  { %v19675_v41 = vld [vmem:[#allocation5 + $0x12a4] sm:$0xf0] }
 0x39d   :  { %v15280_v4 = vld [vmem:[#allocation5 + $0x1488] sm:$0xf]  ;;  %v15025_v52 = vor.u32 %v19675_v41, %v15024_v33  ;;  %10143 = vmatpush.bf16.msra.mxu0 %v14769_v49 }
 0x39e   :  { %v19739_v44 = vld [vmem:[#allocation5 + $0x14a4] sm:$0xf0] }
 0x39f   :  { %v15536_v47 = vld [vmem:[#allocation5 + $0x1688] sm:$0xf]  ;;  %v15281_v54 = vor.u32 %v19739_v44, %v15280_v4  ;;  %10156 = vmatpush.bf16.msra.mxu1 %v15025_v52 }
 0x3a0   :  { %v19803_v12 = vld [vmem:[#allocation5 + $0x16a4] sm:$0xf0] }
 0x3a1   :  { %v14736_v55 = vld [vmem:[#allocation5 + $0x1048] sm:$0xf]  ;;  %v15537_v57 = vor.u32 %v19803_v12, %v15536_v47  ;;  %10169 = vmatpush.bf16.msra.mxu2 %v15281_v54 }
 0x3a2   :  { %v19603_v56 = vld [vmem:[#allocation5 + $0x1064] sm:$0xf0] }
 0x3a3   :  { %v14992_v17 = vld [vmem:[#allocation5 + $0x1248] sm:$0xf]  ;;  %v14737_v3 = vor.u32 %v19603_v56, %v14736_v55  ;;  %10182 = vmatpush.bf16.msra.mxu3 %v15537_v57 }
 0x3a4   :  { %v19667_v43 = vld [vmem:[#allocation5 + $0x1264] sm:$0xf0] }
 0x3a5   :  { %v15248_v59 = vld [vmem:[#allocation5 + $0x1448] sm:$0xf]  ;;  %v14993_v7 = vor.u32 %v19667_v43, %v14992_v17  ;;  %10144 = vmatpush.bf16.msra.mxu0 %v14737_v3 }
 0x3a6   :  { %v19731_v60 = vld [vmem:[#allocation5 + $0x1464] sm:$0xf0] }
 0x3a7   :  { %v15504_v62 = vld [vmem:[#allocation5 + $0x1648] sm:$0xf]  ;;  %v15249_v10 = vor.u32 %v19731_v60, %v15248_v59  ;;  %10157 = vmatpush.bf16.msra.mxu1 %v14993_v7 }
 0x3a8   :  { %v19795_v63 = vld [vmem:[#allocation5 + $0x1664] sm:$0xf0] }
 0x3a9   :  { %v14704_v53 = vld [vmem:[#allocation5 + $0x1008] sm:$0xf]  ;;  %v15505_v21 = vor.u32 %v19795_v63, %v15504_v62  ;;  %10170 = vmatpush.bf16.msra.mxu2 %v15249_v10 }
 0x3aa   :  { %v19595_v6 = vld [vmem:[#allocation5 + $0x1024] sm:$0xf0] }
 0x3ab   :  { %v14960_v11 = vld [vmem:[#allocation5 + $0x1208] sm:$0xf]  ;;  %v14705_v41 = vor.u32 %v19595_v6, %v14704_v53  ;;  %10183 = vmatpush.bf16.msra.mxu3 %v15505_v21 }
 0x3ac   :  { %v19659_v14 = vld [vmem:[#allocation5 + $0x1224] sm:$0xf0] }
 0x3ad   :  { %v15216_v16 = vld [vmem:[#allocation5 + $0x1408] sm:$0xf]  ;;  %v14961_v46 = vor.u32 %v19659_v14, %v14960_v11  ;;  %10145 = vmatpush.bf16.msra.mxu0 %v14705_v41 }
 0x3ae   :  { %v19723_v28 = vld [vmem:[#allocation5 + $0x1424] sm:$0xf0] }
 0x3af   :  { %v15472_v58 = vld [vmem:[#allocation5 + $0x1608] sm:$0xf]  ;;  %v15217_v47 = vor.u32 %v19723_v28, %v15216_v16  ;;  %10158 = vmatpush.bf16.msra.mxu1 %v14961_v46 }
 0x3b0   :  { %v19787_v29 = vld [vmem:[#allocation5 + $0x1624] sm:$0xf0]  ;;  %10146 = vmatmul.bf16.vlgmr.msra.gmra.mxu0 %v21006_v18 }
 0x3b1   :  { %v15952_v30 = vld [vmem:[#allocation5 + $0x19c8] sm:$0xf]  ;;  %v15473_v49 = vor.u32 %v19787_v29, %v15472_v58  ;;  %10171 = vmatpush.bf16.msra.mxu2 %v15217_v47  ;;  %v9939_v47 = vpop.f32.mrf.mxu0 }
 0x3b2   :  { %v19907_v33 = vld [vmem:[#allocation5 + $0x19e4] sm:$0xf0]  ;;  %10159 = vmatmul.bf16.vlgmr.msra.gmra.mxu1 %v21010_v23 }
 0x3b3   :  { %v16208_v35 = vld [vmem:[#allocation5 + $0x1bc8] sm:$0xf]  ;;  %v15953_v50 = vor.u32 %v19907_v33, %v15952_v30  ;;  %10184 = vmatpush.bf16.msra.mxu3 %v15473_v49  ;;  %v9940_v49 = vadd.f32 %v9939_v47, %v21112_v51 }
 0x3b4   :  { %v19971_v4 = vld [vmem:[#allocation5 + $0x1be4] sm:$0xf0]  ;;  %10172 = vmatmul.bf16.vlgmr.msra.gmra.mxu2 %v21008_v22 }
 0x3b5   :  { %v16464_v44 = vld [vmem:[#allocation5 + $0x1dc8] sm:$0xf]  ;;  %v16209_v52 = vor.u32 %v19971_v4, %v16208_v35  ;;  %10190 = vmatpush.bf16.msrb.mxu0 %v15953_v50 }
 0x3b6   :  { %v20035_v45 = vld [vmem:[#allocation5 + $0x1de4] sm:$0xf0]  ;;  %10185 = vmatmul.bf16.vlgmr.msra.gmra.mxu3 %v21012_v27 }
 0x3b7   :  { %v16720_v12 = vld [vmem:[#allocation5 + $0x1fc8] sm:$0xf]  ;;  %v16465_v54 = vor.u32 %v20035_v45, %v16464_v44  ;;  %10203 = vmatpush.bf16.msrb.mxu1 %v16209_v52  ;;  %v9952_v52 = vpop.f32.mrf.mxu1 }
 0x3b8   :  { %v20099_v48 = vld [vmem:[#allocation5 + $0x1fe4] sm:$0xf0] }
 0x3b9   :  { %v15920_v55 = vld [vmem:[#allocation5 + $0x1988] sm:$0xf]  ;;  %v16721_v57 = vor.u32 %v20099_v48, %v16720_v12  ;;  %10216 = vmatpush.bf16.msrb.mxu2 %v16465_v54 }
 0x3ba   :  { %v19899_v56 = vld [vmem:[#allocation5 + $0x19a4] sm:$0xf0] }
 0x3bb   :  { %v16176_v17 = vld [vmem:[#allocation5 + $0x1b88] sm:$0xf]  ;;  %v15921_v3 = vor.u32 %v19899_v56, %v15920_v55  ;;  %10229 = vmatpush.bf16.msrb.mxu3 %v16721_v57 }
 0x3bc   :  { %v19963_v43 = vld [vmem:[#allocation5 + $0x1ba4] sm:$0xf0] }
 0x3bd   :  { %v16432_v59 = vld [vmem:[#allocation5 + $0x1d88] sm:$0xf]  ;;  %v16177_v53 = vor.u32 %v19963_v43, %v16176_v17  ;;  %10191 = vmatpush.bf16.msrb.mxu0 %v15921_v3 }
 0x3be   :  { %v20027_v60 = vld [vmem:[#allocation5 + $0x1da4] sm:$0xf0] }
 0x3bf   :  { %v16688_v62 = vld [vmem:[#allocation5 + $0x1f88] sm:$0xf]  ;;  %v16433_v6 = vor.u32 %v20027_v60, %v16432_v59  ;;  %10204 = vmatpush.bf16.msrb.mxu1 %v16177_v53  ;;  %v9953_v59 = vadd.f32 %v9952_v52, %v9940_v49 }
 0x3c0   :  { %v20091_v63 = vld [vmem:[#allocation5 + $0x1fa4] sm:$0xf0] }
 0x3c1   :  { %v15888_v7 = vld [vmem:[#allocation5 + $0x1948] sm:$0xf]  ;;  %v16689_v14 = vor.u32 %v20091_v63, %v16688_v62  ;;  %10217 = vmatpush.bf16.msrb.mxu2 %v16433_v6 }
 0x3c2   :  { %v19891_v10 = vld [vmem:[#allocation5 + $0x1964] sm:$0xf0] }
 0x3c3   :  { %v16144_v11 = vld [vmem:[#allocation5 + $0x1b48] sm:$0xf]  ;;  %v15889_v0 = vor.u32 %v19891_v10, %v15888_v7  ;;  %10230 = vmatpush.bf16.msrb.mxu3 %v16689_v14 }
 0x3c4   :  { %v19955_v16 = vld [vmem:[#allocation5 + $0x1b64] sm:$0xf0] }
 0x3c5   :  { %v16400_v21 = vld [vmem:[#allocation5 + $0x1d48] sm:$0xf]  ;;  %v16145_v30 = vor.u32 %v19955_v16, %v16144_v11  ;;  %10192 = vmatpush.bf16.msrb.mxu0 %v15889_v0 }
 0x3c6   :  { %v20019_v28 = vld [vmem:[#allocation5 + $0x1d64] sm:$0xf0] }
 0x3c7   :  { %v16656_v58 = vld [vmem:[#allocation5 + $0x1f48] sm:$0xf]  ;;  %v16401_v33 = vor.u32 %v20019_v28, %v16400_v21  ;;  %10205 = vmatpush.bf16.msrb.mxu1 %v16145_v30  ;;  %v9965_v21 = vpop.f32.mrf.mxu2  ;;  %v9978_v30 = vpop.f32.mrf.mxu3 }
 0x3c8   :  { %v20083_v29 = vld [vmem:[#allocation5 + $0x1f64] sm:$0xf0]  ;;  %v9966_v0 = vadd.f32 %v9965_v21, %v9953_v59 }
 0x3c9   :  { %v15856_v35 = vld [vmem:[#allocation5 + $0x1908] sm:$0xf]  ;;  %v16657_v4 = vor.u32 %v20083_v29, %v16656_v58  ;;  %10218 = vmatpush.bf16.msrb.mxu2 %v16401_v33 }
 0x3ca   :  { %v19883_v39 = vld [vmem:[#allocation5 + $0x1924] sm:$0xf0] }
 0x3cb   :  { %v16112_v41 = vld [vmem:[#allocation5 + $0x1b08] sm:$0xf]  ;;  %v15857_v50 = vor.u32 %v19883_v39, %v15856_v35  ;;  %10231 = vmatpush.bf16.msrb.mxu3 %v16657_v4  ;;  %v9941_v39 = vpop.f32.mrf.mxu0  ;;  %v9954_v4 = vpop.f32.mrf.mxu1 }
 0x3cc   :  { %v19947_v44 = vld [vmem:[#allocation5 + $0x1b24] sm:$0xf0] }
 0x3cd   :  { %v16368_v45 = vld [vmem:[#allocation5 + $0x1d08] sm:$0xf]  ;;  %v16113_v54 = vor.u32 %v19947_v44, %v16112_v41  ;;  %10193 = vmatpush.bf16.msrb.mxu0 %v15857_v50  ;;  %v21119_v44 = vadd.f32 %v9978_v30, %v9966_v0 }
 0x3ce   :  { %v20011_v46 = vld [vmem:[#allocation5 + $0x1d24] sm:$0xf0] }
 0x3cf   :  { %v16624_v12 = vld [vmem:[#allocation5 + $0x1f08] sm:$0xf]  ;;  %v16369_v55 = vor.u32 %v20011_v46, %v16368_v45  ;;  %10206 = vmatpush.bf16.msrb.mxu1 %v16113_v54  ;;  %v9980_v21 = vpop.f32.mrf.mxu3 }
 0x3d0   :  { %v20075_v48 = vld [vmem:[#allocation5 + $0x1f24] sm:$0xf0] }
 0x3d1   :  { %v15824_v56 = vld [vmem:[#allocation5 + $0x18c8] sm:$0xf]  ;;  %v16625_v43 = vor.u32 %v20075_v48, %v16624_v12  ;;  %10219 = vmatpush.bf16.msrb.mxu2 %v16369_v55 }
 0x3d2   :  { %v19875_v17 = vld [vmem:[#allocation5 + $0x18e4] sm:$0xf0] }
 0x3d3   :  { %v16080_v57 = vld [vmem:[#allocation5 + $0x1ac8] sm:$0xf]  ;;  %v15825_v6 = vor.u32 %v19875_v17, %v15824_v56  ;;  %10232 = vmatpush.bf16.msrb.mxu3 %v16625_v43 }
 0x3d4   :  { %v19939_v60 = vld [vmem:[#allocation5 + $0x1ae4] sm:$0xf0] }
 0x3d5   :  { %v16336_v62 = vld [vmem:[#allocation5 + $0x1cc8] sm:$0xf]  ;;  %v16081_v51 = vor.u32 %v19939_v60, %v16080_v57  ;;  %10194 = vmatpush.bf16.msrb.mxu0 %v15825_v6 }
 0x3d6   :  { %v20003_v63 = vld [vmem:[#allocation5 + $0x1ce4] sm:$0xf0] }
 0x3d7   :  { %v16592_v3 = vld [vmem:[#allocation5 + $0x1ec8] sm:$0xf]  ;;  %v16337_v7 = vor.u32 %v20003_v63, %v16336_v62  ;;  %10207 = vmatpush.bf16.msrb.mxu1 %v16081_v51 }
 0x3d8   :  { %v20067_v53 = vld [vmem:[#allocation5 + $0x1ee4] sm:$0xf0] }
 0x3d9   :  { %v15792_v10 = vld [vmem:[#allocation5 + $0x1888] sm:$0xf]  ;;  %v16593_v16 = vor.u32 %v20067_v53, %v16592_v3  ;;  %10220 = vmatpush.bf16.msrb.mxu2 %v16337_v7 }
 0x3da   :  { %v19867_v11 = vld [vmem:[#allocation5 + $0x18a4] sm:$0xf0] }
 0x3db   :  { %v16048_v14 = vld [vmem:[#allocation5 + $0x1a88] sm:$0xf]  ;;  %v15793_v41 = vor.u32 %v19867_v11, %v15792_v10  ;;  %10233 = vmatpush.bf16.msrb.mxu3 %v16593_v16  ;;  %v9967_v10 = vpop.f32.mrf.mxu2 }
 0x3dc   :  { %v19931_v28 = vld [vmem:[#allocation5 + $0x1aa4] sm:$0xf0] }
 0x3dd   :  { %v16304_v58 = vld [vmem:[#allocation5 + $0x1c88] sm:$0xf]  ;;  %v16049_v45 = vor.u32 %v19931_v28, %v16048_v14  ;;  %10195 = vmatpush.bf16.msrb.mxu0 %v15793_v41 }
 0x3de   :  { %v19995_v29 = vld [vmem:[#allocation5 + $0x1ca4] sm:$0xf0] }
 0x3df   :  { %v16560_v33 = vld [vmem:[#allocation5 + $0x1e88] sm:$0xf]  ;;  %v16305_v46 = vor.u32 %v19995_v29, %v16304_v58  ;;  %10208 = vmatpush.bf16.msrb.mxu1 %v16049_v45 }
 0x3e0   :  { %v20059_v35 = vld [vmem:[#allocation5 + $0x1ea4] sm:$0xf0] }
 0x3e1   :  { %v15760_v47 = vld [vmem:[#allocation5 + $0x1848] sm:$0xf]  ;;  %v16561_v49 = vor.u32 %v20059_v35, %v16560_v33  ;;  %10221 = vmatpush.bf16.msrb.mxu2 %v16305_v46 }
 0x3e2   :  { %v19859_v12 = vld [vmem:[#allocation5 + $0x1864] sm:$0xf0] }
 0x3e3   :  { %v16016_v48 = vld [vmem:[#allocation5 + $0x1a48] sm:$0xf]  ;;  %v15761_v17 = vor.u32 %v19859_v12, %v15760_v47  ;;  %10234 = vmatpush.bf16.msrb.mxu3 %v16561_v49 }
 0x3e4   :  { %v19923_v50 = vld [vmem:[#allocation5 + $0x1a64] sm:$0xf0] }
 0x3e5   :  { %v16272_v52 = vld [vmem:[#allocation5 + $0x1c48] sm:$0xf]  ;;  %v16017_v59 = vor.u32 %v19923_v50, %v16016_v48  ;;  %10196 = vmatpush.bf16.msrb.mxu0 %v15761_v17 }
 0x3e6   :  { %v19987_v54 = vld [vmem:[#allocation5 + $0x1c64] sm:$0xf0] }
 0x3e7   :  { %v16528_v55 = vld [vmem:[#allocation5 + $0x1e48] sm:$0xf]  ;;  %v16273_v60 = vor.u32 %v19987_v54, %v16272_v52  ;;  %10209 = vmatpush.bf16.msrb.mxu1 %v16017_v59 }
 0x3e8   :  { %v20051_v56 = vld [vmem:[#allocation5 + $0x1e64] sm:$0xf0] }
 0x3e9   :  { %v15728_v57 = vld [vmem:[#allocation5 + $0x1808] sm:$0xf]  ;;  %v16529_v53 = vor.u32 %v20051_v56, %v16528_v55  ;;  %10222 = vmatpush.bf16.msrb.mxu2 %v16273_v60 }
 0x3ea   :  { %v19851_v43 = vld [vmem:[#allocation5 + $0x1824] sm:$0xf0] }
 0x3eb   :  { %v15984_v62 = vld [vmem:[#allocation5 + $0x1a08] sm:$0xf]  ;;  %v15729_v28 = vor.u32 %v19851_v43, %v15728_v57  ;;  %10235 = vmatpush.bf16.msrb.mxu3 %v16529_v53 }
 0x3ec   :  { %v19915_v63 = vld [vmem:[#allocation5 + $0x1a24] sm:$0xf0] }
 0x3ed   :  { %v16240_v3 = vld [vmem:[#allocation5 + $0x1c08] sm:$0xf]  ;;  %v15985_v30 = vor.u32 %v19915_v63, %v15984_v62  ;;  %10197 = vmatpush.bf16.msrb.mxu0 %v15729_v28 }
 0x3ee   :  { %v19979_v6 = vld [vmem:[#allocation5 + $0x1c24] sm:$0xf0] }
 0x3ef   :  { %v16496_v51 = vld [vmem:[#allocation5 + $0x1e08] sm:$0xf]  ;;  %v16241_v33 = vor.u32 %v19979_v6, %v16240_v3  ;;  %10210 = vmatpush.bf16.msrb.mxu1 %v15985_v30 }
 0x3f0   :  { %v20043_v7 = vld [vmem:[#allocation5 + $0x1e24] sm:$0xf0]  ;;  %10198 = vmatmul.bf16.vlgmr.msrb.gmra.mxu0 %v21018_v13 }
 0x3f1   :  { %v16976_v11 = vld [vmem:[#allocation5 + $0x21c8] sm:$0xf]  ;;  %v16497_v41 = vor.u32 %v20043_v7, %v16496_v51  ;;  %10223 = vmatpush.bf16.msrb.mxu2 %v16241_v33  ;;  %v9991_v33 = vpop.f32.mrf.mxu0 }
 0x3f2   :  { %v20163_v14 = vld [vmem:[#allocation5 + $0x21e4] sm:$0xf0]  ;;  %10211 = vmatmul.bf16.vlgmr.msrb.gmra.mxu1 %v21022_v20 }
 0x3f3   :  { %v17232_v16 = vld [vmem:[#allocation5 + $0x23c8] sm:$0xf]  ;;  %v16977_v4 = vor.u32 %v20163_v14, %v16976_v11  ;;  %10236 = vmatpush.bf16.msrb.mxu3 %v16497_v41  ;;  %v9992_v41 = vadd.f32 %v9991_v33, %v21119_v44 }
 0x3f4   :  { %v20227_v58 = vld [vmem:[#allocation5 + $0x23e4] sm:$0xf0]  ;;  %10224 = vmatmul.bf16.vlgmr.msrb.gmra.mxu2 %v21020_v19 }
 0x3f5   :  { %v17488_v29 = vld [vmem:[#allocation5 + $0x25c8] sm:$0xf]  ;;  %v17233_v45 = vor.u32 %v20227_v58, %v17232_v16  ;;  %10242 = vmatpush.bf16.msra.mxu0 %v16977_v4 }
 0x3f6   :  { %v20291_v0 = vld [vmem:[#allocation5 + $0x25e4] sm:$0xf0]  ;;  %10237 = vmatmul.bf16.vlgmr.msrb.gmra.mxu3 %v21024_v26 }
 0x3f7   :  { %v17744_v35 = vld [vmem:[#allocation5 + $0x27c8] sm:$0xf]  ;;  %v17489_v46 = vor.u32 %v20291_v0, %v17488_v29  ;;  %10255 = vmatpush.bf16.msra.mxu1 %v17233_v45  ;;  %v10004_v45 = vpop.f32.mrf.mxu1 }
 0x3f8   :  { %v20355_v39 = vld [vmem:[#allocation5 + $0x27e4] sm:$0xf0] }
 0x3f9   :  { %v16944_v47 = vld [vmem:[#allocation5 + $0x2188] sm:$0xf]  ;;  %v17745_v49 = vor.u32 %v20355_v39, %v17744_v35  ;;  %10268 = vmatpush.bf16.msra.mxu2 %v17489_v46 }
 0x3fa   :  { %v20155_v12 = vld [vmem:[#allocation5 + $0x21a4] sm:$0xf0] }
 0x3fb   :  { %v17200_v48 = vld [vmem:[#allocation5 + $0x2388] sm:$0xf]  ;;  %v16945_v17 = vor.u32 %v20155_v12, %v16944_v47  ;;  %10281 = vmatpush.bf16.msra.mxu3 %v17745_v49 }
 0x3fc   :  { %v20219_v50 = vld [vmem:[#allocation5 + $0x23a4] sm:$0xf0] }
 0x3fd   :  { %v17456_v52 = vld [vmem:[#allocation5 + $0x2588] sm:$0xf]  ;;  %v17201_v57 = vor.u32 %v20219_v50, %v17200_v48  ;;  %10243 = vmatpush.bf16.msra.mxu0 %v16945_v17 }
 0x3fe   :  { %v20283_v54 = vld [vmem:[#allocation5 + $0x25a4] sm:$0xf0] }
 0x3ff   :  { %v17712_v55 = vld [vmem:[#allocation5 + $0x2788] sm:$0xf]  ;;  %v17457_v43 = vor.u32 %v20283_v54, %v17456_v52  ;;  %10256 = vmatpush.bf16.msra.mxu1 %v17201_v57  ;;  %v10005_v52 = vadd.f32 %v10004_v45, %v9992_v41 }
 0x400   :  { %v20347_v56 = vld [vmem:[#allocation5 + $0x27a4] sm:$0xf0] }
 0x401   :  { %v16912_v59 = vld [vmem:[#allocation5 + $0x2148] sm:$0xf]  ;;  %v17713_v63 = vor.u32 %v20347_v56, %v17712_v55  ;;  %10269 = vmatpush.bf16.msra.mxu2 %v17457_v43 }
 0x402   :  { %v20147_v60 = vld [vmem:[#allocation5 + $0x2164] sm:$0xf0] }
 0x403   :  { %v17168_v62 = vld [vmem:[#allocation5 + $0x2348] sm:$0xf]  ;;  %v16913_v10 = vor.u32 %v20147_v60, %v16912_v59  ;;  %10282 = vmatpush.bf16.msra.mxu3 %v17713_v63 }
 0x404   :  { %v20211_v3 = vld [vmem:[#allocation5 + $0x2364] sm:$0xf0] }
 0x405   :  { %v17424_v53 = vld [vmem:[#allocation5 + $0x2548] sm:$0xf]  ;;  %v17169_v11 = vor.u32 %v20211_v3, %v17168_v62  ;;  %10244 = vmatpush.bf16.msra.mxu0 %v16913_v10 }
 0x406   :  { %v20275_v6 = vld [vmem:[#allocation5 + $0x2564] sm:$0xf0] }
 0x407   :  { %v17680_v51 = vld [vmem:[#allocation5 + $0x2748] sm:$0xf]  ;;  %v17425_v14 = vor.u32 %v20275_v6, %v17424_v53  ;;  %10257 = vmatpush.bf16.msra.mxu1 %v17169_v11  ;;  %v10017_v53 = vpop.f32.mrf.mxu2  ;;  %v10030_v11 = vpop.f32.mrf.mxu3 }
 0x408   :  { %v20339_v7 = vld [vmem:[#allocation5 + $0x2764] sm:$0xf0]  ;;  %v10018_v10 = vadd.f32 %v10017_v53, %v10005_v52 }
 0x409   :  { %v16880_v16 = vld [vmem:[#allocation5 + $0x2108] sm:$0xf]  ;;  %v17681_v58 = vor.u32 %v20339_v7, %v17680_v51  ;;  %10270 = vmatpush.bf16.msra.mxu2 %v17425_v14 }
 0x40a   :  { %v20139_v21 = vld [vmem:[#allocation5 + $0x2124] sm:$0xf0] }
 0x40b   :  { %v17136_v28 = vld [vmem:[#allocation5 + $0x2308] sm:$0xf]  ;;  %v16881_v4 = vor.u32 %v20139_v21, %v16880_v16  ;;  %10283 = vmatpush.bf16.msra.mxu3 %v17681_v58  ;;  %v9993_v21 = vpop.f32.mrf.mxu0  ;;  %v10006_v58 = vpop.f32.mrf.mxu1 }
 0x40c   :  { %v20203_v29 = vld [vmem:[#allocation5 + $0x2324] sm:$0xf0] }
 0x40d   :  { %v17392_v0 = vld [vmem:[#allocation5 + $0x2508] sm:$0xf]  ;;  %v17137_v46 = vor.u32 %v20203_v29, %v17136_v28  ;;  %10245 = vmatpush.bf16.msra.mxu0 %v16881_v4  ;;  %v21126_v29 = vadd.f32 %v10030_v11, %v10018_v10 }
 0x40e   :  { %v20267_v30 = vld [vmem:[#allocation5 + $0x2524] sm:$0xf0] }
 0x40f   :  { %v17648_v35 = vld [vmem:[#allocation5 + $0x2708] sm:$0xf]  ;;  %v17393_v47 = vor.u32 %v20267_v30, %v17392_v0  ;;  %10258 = vmatpush.bf16.msra.mxu1 %v17137_v46  ;;  %v10032_v53 = vpop.f32.mrf.mxu3 }
 0x410   :  { %v20331_v39 = vld [vmem:[#allocation5 + $0x2724] sm:$0xf0] }
 0x411   :  { %v16848_v12 = vld [vmem:[#allocation5 + $0x20c8] sm:$0xf]  ;;  %v17649_v50 = vor.u32 %v20331_v39, %v17648_v35  ;;  %10271 = vmatpush.bf16.msra.mxu2 %v17393_v47 }
 0x412   :  { %v20131_v48 = vld [vmem:[#allocation5 + $0x20e4] sm:$0xf0] }
 0x413   :  { %v17104_v49 = vld [vmem:[#allocation5 + $0x22c8] sm:$0xf]  ;;  %v16849_v43 = vor.u32 %v20131_v48, %v16848_v12  ;;  %10284 = vmatpush.bf16.msra.mxu3 %v17649_v50 }
 0x414   :  { %v20195_v54 = vld [vmem:[#allocation5 + $0x22e4] sm:$0xf0] }
 0x415   :  { %v17360_v55 = vld [vmem:[#allocation5 + $0x24c8] sm:$0xf]  ;;  %v17105_v44 = vor.u32 %v20195_v54, %v17104_v49  ;;  %10246 = vmatpush.bf16.msra.mxu0 %v16849_v43 }
 0x416   :  { %v20259_v56 = vld [vmem:[#allocation5 + $0x24e4] sm:$0xf0] }
 0x417   :  { %v17616_v17 = vld [vmem:[#allocation5 + $0x26c8] sm:$0xf]  ;;  %v17361_v59 = vor.u32 %v20259_v56, %v17360_v55  ;;  %10259 = vmatpush.bf16.msra.mxu1 %v17105_v44 }
 0x418   :  { %v20323_v57 = vld [vmem:[#allocation5 + $0x26e4] sm:$0xf0] }
 0x419   :  { %v16816_v60 = vld [vmem:[#allocation5 + $0x2088] sm:$0xf]  ;;  %v17617_v3 = vor.u32 %v20323_v57, %v17616_v17  ;;  %10272 = vmatpush.bf16.msra.mxu2 %v17361_v59 }
 0x41a   :  { %v20123_v62 = vld [vmem:[#allocation5 + $0x20a4] sm:$0xf0] }
 0x41b   :  { %v17072_v63 = vld [vmem:[#allocation5 + $0x2288] sm:$0xf]  ;;  %v16817_v28 = vor.u32 %v20123_v62, %v16816_v60  ;;  %10285 = vmatpush.bf16.msra.mxu3 %v17617_v3  ;;  %v10019_v60 = vpop.f32.mrf.mxu2 }
 0x41c   :  { %v20187_v6 = vld [vmem:[#allocation5 + $0x22a4] sm:$0xf0] }
 0x41d   :  { %v17328_v51 = vld [vmem:[#allocation5 + $0x2488] sm:$0xf]  ;;  %v17073_v0 = vor.u32 %v20187_v6, %v17072_v63  ;;  %10247 = vmatpush.bf16.msra.mxu0 %v16817_v28 }
 0x41e   :  { %v20251_v7 = vld [vmem:[#allocation5 + $0x24a4] sm:$0xf0] }
 0x41f   :  { %v17584_v14 = vld [vmem:[#allocation5 + $0x2688] sm:$0xf]  ;;  %v17329_v30 = vor.u32 %v20251_v7, %v17328_v51  ;;  %10260 = vmatpush.bf16.msra.mxu1 %v17073_v0 }
 0x420   :  { %v20315_v16 = vld [vmem:[#allocation5 + $0x26a4] sm:$0xf0] }
 0x421   :  { %v16784_v33 = vld [vmem:[#allocation5 + $0x2048] sm:$0xf]  ;;  %v17585_v41 = vor.u32 %v20315_v16, %v17584_v14  ;;  %10273 = vmatpush.bf16.msra.mxu2 %v17329_v30 }
 0x422   :  { %v20115_v35 = vld [vmem:[#allocation5 + $0x2064] sm:$0xf0] }
 0x423   :  { %v17040_v39 = vld [vmem:[#allocation5 + $0x2248] sm:$0xf]  ;;  %v16785_v48 = vor.u32 %v20115_v35, %v16784_v33  ;;  %10286 = vmatpush.bf16.msra.mxu3 %v17585_v41 }
 0x424   :  { %v20179_v4 = vld [vmem:[#allocation5 + $0x2264] sm:$0xf0] }
 0x425   :  { %v17296_v45 = vld [vmem:[#allocation5 + $0x2448] sm:$0xf]  ;;  %v17041_v52 = vor.u32 %v20179_v4, %v17040_v39  ;;  %10248 = vmatpush.bf16.msra.mxu0 %v16785_v48 }
 0x426   :  { %v20243_v46 = vld [vmem:[#allocation5 + $0x2464] sm:$0xf0] }
 0x427   :  { %v17552_v47 = vld [vmem:[#allocation5 + $0x2648] sm:$0xf]  ;;  %v17297_v54 = vor.u32 %v20243_v46, %v17296_v45  ;;  %10261 = vmatpush.bf16.msra.mxu1 %v17041_v52 }
 0x428   :  { %v20307_v12 = vld [vmem:[#allocation5 + $0x2664] sm:$0xf0] }
 0x429   :  { %v16752_v49 = vld [vmem:[#allocation5 + $0x2008] sm:$0xf]  ;;  %v17553_v57 = vor.u32 %v20307_v12, %v17552_v47  ;;  %10274 = vmatpush.bf16.msra.mxu2 %v17297_v54 }
 0x42a   :  { %v20107_v50 = vld [vmem:[#allocation5 + $0x2024] sm:$0xf0] }
 0x42b   :  { %v17008_v55 = vld [vmem:[#allocation5 + $0x2208] sm:$0xf]  ;;  %v16753_v6 = vor.u32 %v20107_v50, %v16752_v49  ;;  %10287 = vmatpush.bf16.msra.mxu3 %v17553_v57 }
 0x42c   :  { %v20171_v56 = vld [vmem:[#allocation5 + $0x2224] sm:$0xf0] }
 0x42d   :  { %v17264_v17 = vld [vmem:[#allocation5 + $0x2408] sm:$0xf]  ;;  %v17009_v11 = vor.u32 %v20171_v56, %v17008_v55  ;;  %10249 = vmatpush.bf16.msra.mxu0 %v16753_v6 }
 0x42e   :  { %v20235_v43 = vld [vmem:[#allocation5 + $0x2424] sm:$0xf0] }
 0x42f   :  { %v17520_v44 = vld [vmem:[#allocation5 + $0x2608] sm:$0xf]  ;;  %v17265_v14 = vor.u32 %v20235_v43, %v17264_v17  ;;  %10262 = vmatpush.bf16.msra.mxu1 %v17009_v11 }
 0x430   :  { %v20299_v59 = vld [vmem:[#allocation5 + $0x2624] sm:$0xf0]  ;;  %10250 = vmatmul.bf16.vlgmr.msra.gmra.mxu0 %v21030_v24 }
 0x431   :  { %v18000_v62 = vld [vmem:[#allocation5 + $0x29c8] sm:$0xf]  ;;  %v17521_v28 = vor.u32 %v20299_v59, %v17520_v44  ;;  %10275 = vmatpush.bf16.msra.mxu2 %v17265_v14 }
 0x432   :  { %v20419_v63 = vld [vmem:[#allocation5 + $0x29e4] sm:$0xf0]  ;;  %10263 = vmatmul.bf16.vlgmr.msra.gmra.mxu1 %v21034_v32 }
 0x433   :  { %v18256_v3 = vld [vmem:[#allocation5 + $0x2bc8] sm:$0xf]  ;;  %v18001_v58 = vor.u32 %v20419_v63, %v18000_v62  ;;  %10288 = vmatpush.bf16.msra.mxu3 %v17521_v28 }
 0x434   :  { %v20483_v51 = vld [vmem:[#allocation5 + $0x2be4] sm:$0xf0]  ;;  %10276 = vmatmul.bf16.vlgmr.msra.gmra.mxu2 %v21032_v31 }
 0x435   :  { %v18512_v7 = vld [vmem:[#allocation5 + $0x2dc8] sm:$0xf]  ;;  %v18257_v0 = vor.u32 %v20483_v51, %v18256_v3  ;;  %10294 = vmatpush.bf16.msrb.mxu0 %v18001_v58  ;;  %v20701_v51 = vld [vmem:[#allocation7] sm:$0xff] }
 0x436   :  { %v20547_v10 = vld [vmem:[#allocation5 + $0x2de4] sm:$0xf0]  ;;  %10289 = vmatmul.bf16.vlgmr.msra.gmra.mxu3 %v21036_v36 }
 0x437   :  { %v18768_v16 = vld [vmem:[#allocation5 + $0x2fc8] sm:$0xf]  ;;  %v18513_v30 = vor.u32 %v20547_v10, %v18512_v7  ;;  %10307 = vmatpush.bf16.msrb.mxu1 %v18257_v0  ;;  %v1716_v7 = vperm.slane %v20701_v51, 2  ;;  %v10043_v0 = vpop.f32.mrf.mxu0 }
 0x438   :  { %v20611_v21 = vld [vmem:[#allocation5 + $0x2fe4] sm:$0xf0] }
 0x439   :  { %v17968_v33 = vld [vmem:[#allocation5 + $0x2988] sm:$0xf]  ;;  %v18769_v41 = vor.u32 %v20611_v21, %v18768_v16  ;;  %10320 = vmatpush.bf16.msrb.mxu2 %v18513_v30 }
 0x43a   :  { %v20411_v35 = vld [vmem:[#allocation5 + $0x29a4] sm:$0xf0] }
 0x43b   :  { %v18224_v39 = vld [vmem:[#allocation5 + $0x2b88] sm:$0xf]  ;;  %v17969_v48 = vor.u32 %v20411_v35, %v17968_v33  ;;  %10333 = vmatpush.bf16.msrb.mxu3 %v18769_v41 }
 0x43c   :  { %v20475_v4 = vld [vmem:[#allocation5 + $0x2ba4] sm:$0xf0] }
 0x43d   :  { %v18480_v45 = vld [vmem:[#allocation5 + $0x2d88] sm:$0xf]  ;;  %v18225_v49 = vor.u32 %v20475_v4, %v18224_v39  ;;  %10295 = vmatpush.bf16.msrb.mxu0 %v17969_v48  ;;  %v10044_v4 = vadd.f32 %v10043_v0, %v1716_v7 }
 0x43e   :  { %v20539_v46 = vld [vmem:[#allocation5 + $0x2da4] sm:$0xf0] }
 0x43f   :  { %v18736_v47 = vld [vmem:[#allocation5 + $0x2f88] sm:$0xf]  ;;  %v18481_v50 = vor.u32 %v20539_v46, %v18480_v45  ;;  %10308 = vmatpush.bf16.msrb.mxu1 %v18225_v49  ;;  %v10056_v45 = vpop.f32.mrf.mxu1 }
 0x440   :  { %v20603_v12 = vld [vmem:[#allocation5 + $0x2fa4] sm:$0xf0] }
 0x441   :  { %v17936_v52 = vld [vmem:[#allocation5 + $0x2948] sm:$0xf]  ;;  %v18737_v56 = vor.u32 %v20603_v12, %v18736_v47  ;;  %10321 = vmatpush.bf16.msrb.mxu2 %v18481_v50 }
 0x442   :  { %v20403_v54 = vld [vmem:[#allocation5 + $0x2964] sm:$0xf0] }
 0x443   :  { %v18192_v55 = vld [vmem:[#allocation5 + $0x2b48] sm:$0xf]  ;;  %v17937_v60 = vor.u32 %v20403_v54, %v17936_v52  ;;  %10334 = vmatpush.bf16.msrb.mxu3 %v18737_v56  ;;  %v10057_v52 = vadd.f32 %v10056_v45, %v10044_v4 }
 0x444   :  { %v20467_v17 = vld [vmem:[#allocation5 + $0x2b64] sm:$0xf0] }
 0x445   :  { %v18448_v57 = vld [vmem:[#allocation5 + $0x2d48] sm:$0xf]  ;;  %v18193_v63 = vor.u32 %v20467_v17, %v18192_v55  ;;  %10296 = vmatpush.bf16.msrb.mxu0 %v17937_v60 }
 0x446   :  { %v20531_v43 = vld [vmem:[#allocation5 + $0x2d64] sm:$0xf0] }
 0x447   :  { %v18704_v44 = vld [vmem:[#allocation5 + $0x2f48] sm:$0xf]  ;;  %v18449_v3 = vor.u32 %v20531_v43, %v18448_v57  ;;  %10309 = vmatpush.bf16.msrb.mxu1 %v18193_v63  ;;  %v10058_v0 = vpop.f32.mrf.mxu1 }
 0x448   :  { %v20595_v59 = vld [vmem:[#allocation5 + $0x2f64] sm:$0xf0]  ;;  %v12850_v0 = vld [vmem:[#allocation5 + $0x1a8] sm:$0xf0] }
 0x449   :  { %v17904_v62 = vld [vmem:[#allocation5 + $0x2908] sm:$0xf]  ;;  %v18705_v10 = vor.u32 %v20595_v59, %v18704_v44  ;;  %10322 = vmatpush.bf16.msrb.mxu2 %v18449_v3  ;;  %v10069_v44 = vpop.f32.mrf.mxu2 }
 0x44a   :  { %v20395_v53 = vld [vmem:[#allocation5 + $0x2924] sm:$0xf0]  ;;  %v10070_v3 = vadd.f32 %v10069_v44, %v10057_v52  ;;  %v19135_v44 = vld [vmem:[#allocation5 + $0x1cc] sm:$0xf] }
 0x44b   :  { %v18160_v6 = vld [vmem:[#allocation5 + $0x2b08] sm:$0xf]  ;;  %v17905_v58 = vor.u32 %v20395_v53, %v17904_v62  ;;  %10335 = vmatpush.bf16.msrb.mxu3 %v18705_v10  ;;  %v10082_v53 = vpop.f32.mrf.mxu3 }
 0x44c   :  { %v20459_v11 = vld [vmem:[#allocation5 + $0x2b24] sm:$0xf0]  ;;  %v21132_v10 = vadd.f32 %v10082_v53, %v10070_v3  ;;  %v19263_v3 = vld [vmem:[#allocation5 + $0x5cc] sm:$0xf] }
 0x44d   :  { %v18416_v14 = vld [vmem:[#allocation5 + $0x2d08] sm:$0xf]  ;;  %v18161_v30 = vor.u32 %v20459_v11, %v18160_v6  ;;  %10297 = vmatpush.bf16.msrb.mxu0 %v17905_v58  ;;  %v10045_v11 = vpop.f32.mrf.mxu0  ;;  %v13394_v53 = vld [vmem:[#allocation5 + $0x5e8] sm:$0xf0] }
 0x44e   :  { %v20523_v16 = vld [vmem:[#allocation5 + $0x2d24] sm:$0xf0]  ;;  %v13650_v11 = vld [vmem:[#allocation5 + $0x7e8] sm:$0xf0] }
 0x44f   :  { %v18672_v21 = vld [vmem:[#allocation5 + $0x2f08] sm:$0xf]  ;;  %v18417_v33 = vor.u32 %v20523_v16, %v18416_v14  ;;  %10310 = vmatpush.bf16.msrb.mxu1 %v18161_v30 }
 0x450   :  { %v20587_v28 = vld [vmem:[#allocation5 + $0x2f24] sm:$0xf0] }
 0x451   :  { %v17872_v35 = vld [vmem:[#allocation5 + $0x28c8] sm:$0xf]  ;;  %v18673_v46 = vor.u32 %v20587_v28, %v18672_v21  ;;  %10323 = vmatpush.bf16.msrb.mxu2 %v18417_v33 }
 0x452   :  { %v20387_v39 = vld [vmem:[#allocation5 + $0x28e4] sm:$0xf0] }
 0x453   :  { %v18128_v41 = vld [vmem:[#allocation5 + $0x2ac8] sm:$0xf]  ;;  %v17873_v54 = vor.u32 %v20387_v39, %v17872_v35  ;;  %10336 = vmatpush.bf16.msrb.mxu3 %v18673_v46 }
 0x454   :  { %v20451_v47 = vld [vmem:[#allocation5 + $0x2ae4] sm:$0xf0] }
 0x455   :  { %v18384_v12 = vld [vmem:[#allocation5 + $0x2cc8] sm:$0xf]  ;;  %v18129_v55 = vor.u32 %v20451_v47, %v18128_v41  ;;  %10298 = vmatpush.bf16.msrb.mxu0 %v17873_v54  ;;  %v10071_v54 = vpop.f32.mrf.mxu2 }
 0x456   :  { %v20515_v48 = vld [vmem:[#allocation5 + $0x2ce4] sm:$0xf0]  ;;  %v13074_v54 = vld [vmem:[#allocation5 + $0x368] sm:$0xf0] }
 0x457   :  { %v18640_v49 = vld [vmem:[#allocation5 + $0x2ec8] sm:$0xf]  ;;  %v18385_v56 = vor.u32 %v20515_v48, %v18384_v12  ;;  %10311 = vmatpush.bf16.msrb.mxu1 %v18129_v55 }
 0x458   :  { %v20579_v50 = vld [vmem:[#allocation5 + $0x2ee4] sm:$0xf0] }
 0x459   :  { %v17840_v17 = vld [vmem:[#allocation5 + $0x2888] sm:$0xf]  ;;  %v18641_v59 = vor.u32 %v20579_v50, %v18640_v49  ;;  %10324 = vmatpush.bf16.msrb.mxu2 %v18385_v56 }
 0x45a   :  { %v20379_v57 = vld [vmem:[#allocation5 + $0x28a4] sm:$0xf0] }
 0x45b   :  { %v18096_v43 = vld [vmem:[#allocation5 + $0x2a88] sm:$0xf]  ;;  %v17841_v7 = vor.u32 %v20379_v57, %v17840_v17  ;;  %10337 = vmatpush.bf16.msrb.mxu3 %v18641_v59  ;;  %v12882_v59 = vld [vmem:[#allocation5 + $0x1e8] sm:$0xf0] }
 0x45c   :  { %v20443_v60 = vld [vmem:[#allocation5 + $0x2aa4] sm:$0xf0] }
 0x45d   :  { %v18352_v62 = vld [vmem:[#allocation5 + $0x2c88] sm:$0xf]  ;;  %v18097_v14 = vor.u32 %v20443_v60, %v18096_v43  ;;  %10299 = vmatpush.bf16.msrb.mxu0 %v17841_v7  ;;  %v10084_v43 = vpop.f32.mrf.mxu3  ;;  %v19199_v60 = vld [vmem:[#allocation5 + $0x3cc] sm:$0xf] }
 0x45e   :  { %v20507_v63 = vld [vmem:[#allocation5 + $0x2ca4] sm:$0xf0]  ;;  %v19327_v7 = vld [vmem:[#allocation5 + $0x7cc] sm:$0xf] }
 0x45f   :  { %v18608_v6 = vld [vmem:[#allocation5 + $0x2e88] sm:$0xf]  ;;  %v18353_v16 = vor.u32 %v20507_v63, %v18352_v62  ;;  %10312 = vmatpush.bf16.msrb.mxu1 %v18097_v14  ;;  %v13138_v63 = vld [vmem:[#allocation5 + $0x3e8] sm:$0xf0] }
 0x460   :  { %v20571_v51 = vld [vmem:[#allocation5 + $0x2ea4] sm:$0xf0] }
 0x461   :  { %v17808_v21 = vld [vmem:[#allocation5 + $0x2848] sm:$0xf]  ;;  %v18609_v30 = vor.u32 %v20571_v51, %v18608_v6  ;;  %10325 = vmatpush.bf16.msrb.mxu2 %v18353_v16  ;;  %v12885_v16 = vor.u32 %v19135_v44, %v12882_v59 }
 0x462   :  { %v20371_v28 = vld [vmem:[#allocation5 + $0x2864] sm:$0xf0] }
 0x463   :  { %v18064_v58 = vld [vmem:[#allocation5 + $0x2a48] sm:$0xf]  ;;  %v17809_v45 = vor.u32 %v20371_v28, %v17808_v21  ;;  %10338 = vmatpush.bf16.msrb.mxu3 %v18609_v30  ;;  %v13141_v21 = vor.u32 %v19199_v60, %v13138_v63  ;;  %v13397_v28 = vor.u32 %v19263_v3, %v13394_v53  ;;  %v19191_v30 = vld [vmem:[#allocation5 + $0x38c] sm:$0xf] }
 0x464   :  { %v20435_v33 = vld [vmem:[#allocation5 + $0x2a64] sm:$0xf0]  ;;  %v19111_v60 = vld [vmem:[#allocation5 + $0x10c] sm:$0xf] }
 0x465   :  { %v18320_v35 = vld [vmem:[#allocation5 + $0x2c48] sm:$0xf]  ;;  %v18065_v12 = vor.u32 %v20435_v33, %v18064_v58  ;;  %10300 = vmatpush.bf16.msrb.mxu0 %v17809_v45  ;;  %v19127_v58 = vld [vmem:[#allocation5 + $0x18c] sm:$0xf]  ;;  %v13653_v33 = vor.u32 %v19327_v7, %v13650_v11 }
 0x466   :  { %v20499_v39 = vld [vmem:[#allocation5 + $0x2c64] sm:$0xf0]  ;;  %v13618_v45 = vld [vmem:[#allocation5 + $0x7a8] sm:$0xf0] }
 0x467   :  { %v18576_v41 = vld [vmem:[#allocation5 + $0x2e48] sm:$0xf]  ;;  %v18321_v48 = vor.u32 %v20499_v39, %v18320_v35  ;;  %10313 = vmatpush.bf16.msrb.mxu1 %v18065_v12  ;;  %v13106_v35 = vld [vmem:[#allocation5 + $0x3a8] sm:$0xf0] }
 0x468   :  { %v20563_v4 = vld [vmem:[#allocation5 + $0x2e64] sm:$0xf0]  ;;  %v19255_v39 = vld [vmem:[#allocation5 + $0x58c] sm:$0xf] }
 0x469   :  { %v17776_v46 = vld [vmem:[#allocation5 + $0x2808] sm:$0xf]  ;;  %v18577_v55 = vor.u32 %v20563_v4, %v18576_v41  ;;  %10326 = vmatpush.bf16.msrb.mxu2 %v18321_v48  ;;  %v13362_v41 = vld [vmem:[#allocation5 + $0x5a8] sm:$0xf0] }
 0x46a   :  { %v20363_v47 = vld [vmem:[#allocation5 + $0x2824] sm:$0xf0]  ;;  %v19319_v4 = vld [vmem:[#allocation5 + $0x78c] sm:$0xf]  ;;  %v13365_v12 = vor.u32 %v19255_v39, %v13362_v41 }
 0x46b   :  { %v18032_v49 = vld [vmem:[#allocation5 + $0x2a08] sm:$0xf]  ;;  %v17777_v62 = vor.u32 %v20363_v47, %v17776_v46  ;;  %10339 = vmatpush.bf16.msrb.mxu3 %v18577_v55  ;;  %v12853_v46 = vor.u32 %v19127_v58, %v12850_v0  ;;  %v13109_v47 = vor.u32 %v19191_v30, %v13106_v35  ;;  %v19119_v48 = vld [vmem:[#allocation5 + $0x14c] sm:$0xf]  ;;  %v10108_v35 = vpop.f32.mrf.mxu1 }
 0x46c   :  { %v20427_v50 = vld [vmem:[#allocation5 + $0x2a24] sm:$0xf0]  ;;  %v19247_v55 = vld [vmem:[#allocation5 + $0x54c] sm:$0xf] }
 0x46d   :  { %v18288_v52 = vld [vmem:[#allocation5 + $0x2c08] sm:$0xf]  ;;  %v18033_v6 = vor.u32 %v20427_v50, %v18032_v49  ;;  %10301 = vmatpush.bf16.msrb.mxu0 %v17777_v62  ;;  %v12818_v49 = vld [vmem:[#allocation5 + $0x168] sm:$0xf0] }
 0x46e   :  { %v20491_v56 = vld [vmem:[#allocation5 + $0x2c24] sm:$0xf0]  ;;  %v19183_v50 = vld [vmem:[#allocation5 + $0x34c] sm:$0xf]  ;;  %v12821_v43 = vor.u32 %v19119_v48, %v12818_v49 }
 0x46f   :  { %v18544_v17 = vld [vmem:[#allocation5 + $0x2e08] sm:$0xf]  ;;  %v18289_v51 = vor.u32 %v20491_v56, %v18288_v52  ;;  %10314 = vmatpush.bf16.msrb.mxu1 %v18033_v6  ;;  %v13621_v52 = vor.u32 %v19319_v4, %v13618_v45  ;;  %v13330_v56 = vld [vmem:[#allocation5 + $0x568] sm:$0xf0]  ;;  %v13077_v44 = vor.u32 %v19183_v50, %v13074_v54 }
 0x470   :  { %v20555_v57 = vld [vmem:[#allocation5 + $0x2e24] sm:$0xf0]  ;;  %10302 = vmatmul.bf16.vlgmr.msrb.gmra.mxu0 %v21044_v61  ;;  %v13333_v59 = vor.u32 %v19247_v55, %v13330_v56  ;;  %v12786_v62 = vld [vmem:[#allocation5 + $0x128] sm:$0xf0]  ;;  %v10121_v56 = vpop.f32.mrf.mxu2 }
 0x471   :  { %v18545_v14 = vor.u32 %v20555_v57, %v18544_v17  ;;  %10327 = vmatpush.bf16.msrb.mxu2 %v18289_v51  ;;  %10346 = vmatpush.bf16.msra.mxu0 %v12885_v16  ;;  %v19311_v17 = vld [vmem:[#allocation5 + $0x74c] sm:$0xf]  ;;  %v10095_v16 = vpop.f32.mrf.mxu0 }
 0x472   :  { %10315 = vmatmul.bf16.vlgmr.msrb.gmra.mxu1 %v21048_v2  ;;  %v13586_v57 = vld [vmem:[#allocation5 + $0x768] sm:$0xf0] }
 0x473   :  { %10340 = vmatpush.bf16.msrb.mxu3 %v18545_v14  ;;  %10359 = vmatpush.bf16.msra.mxu1 %v13141_v21  ;;  %v19175_v63 = vld [vmem:[#allocation5 + $0x30c] sm:$0xf]  ;;  %v13589_v3 = vor.u32 %v19311_v17, %v13586_v57  ;;  %v12789_v14 = vor.u32 %v19111_v60, %v12786_v62 }
 0x474   :  { %10328 = vmatmul.bf16.vlgmr.msrb.gmra.mxu2 %v21046_v1  ;;  %v13042_v53 = vld [vmem:[#allocation5 + $0x328] sm:$0xf0] }
 0x475   :  { %10372 = vmatpush.bf16.msra.mxu2 %v13397_v28  ;;  %10347 = vmatpush.bf16.msra.mxu0 %v12853_v46  ;;  %v19239_v6 = vld [vmem:[#allocation5 + $0x50c] sm:$0xf]  ;;  %v13045_v21 = vor.u32 %v19175_v63, %v13042_v53 }
 0x476   :  { %10341 = vmatmul.bf16.vlgmr.msrb.gmra.mxu3 %v21050_v5  ;;  %v13298_v51 = vld [vmem:[#allocation5 + $0x528] sm:$0xf0] }
 0x477   :  { %10385 = vmatpush.bf16.msra.mxu3 %v13653_v33  ;;  %10360 = vmatpush.bf16.msra.mxu1 %v13109_v47  ;;  %v19303_v7 = vld [vmem:[#allocation5 + $0x70c] sm:$0xf]  ;;  %v13301_v28 = vor.u32 %v19239_v6, %v13298_v51  ;;  %v10096_v33 = vadd.f32 %v10095_v16, %v21132_v10  ;;  %v10110_v16 = vpop.f32.mrf.mxu1 }
 0x478   :  { %v13554_v11 = vld [vmem:[#allocation5 + $0x728] sm:$0xf0] }
 0x479   :  { %10373 = vmatpush.bf16.msra.mxu2 %v13365_v12  ;;  %10348 = vmatpush.bf16.msra.mxu0 %v12821_v43  ;;  %v19103_v58 = vld [vmem:[#allocation5 + $0xcc] sm:$0xf]  ;;  %v13557_v39 = vor.u32 %v19303_v7, %v13554_v11  ;;  %v10109_v12 = vadd.f32 %v10108_v35, %v10096_v33  ;;  %v10097_v53 = vpop.f32.mrf.mxu0 }
 0x47a   :  { %v12754_v0 = vld [vmem:[#allocation5 + $0xe8] sm:$0xf0] }
 0x47b   :  { %10386 = vmatpush.bf16.msra.mxu3 %v13621_v52  ;;  %10361 = vmatpush.bf16.msra.mxu1 %v13077_v44  ;;  %v19167_v30 = vld [vmem:[#allocation5 + $0x2cc] sm:$0xf]  ;;  %v12757_v48 = vor.u32 %v19103_v58, %v12754_v0  ;;  %v10122_v44 = vadd.f32 %v10121_v56, %v10109_v12 }
 0x47c   :  { %v13010_v41 = vld [vmem:[#allocation5 + $0x2e8] sm:$0xf0] }
 0x47d   :  { %10374 = vmatpush.bf16.msra.mxu2 %v13333_v59  ;;  %v19231_v4 = vld [vmem:[#allocation5 + $0x4cc] sm:$0xf]  ;;  %10349 = vmatpush.bf16.msra.mxu0 %v12789_v14  ;;  %v13013_v49 = vor.u32 %v19167_v30, %v13010_v41  ;;  %v10134_v59 = vpop.f32.mrf.mxu3 }
 0x47e   :  { %v13266_v45 = vld [vmem:[#allocation5 + $0x4e8] sm:$0xf0] }
 0x47f   :  { %10387 = vmatpush.bf16.msra.mxu3 %v13589_v3  ;;  %v19295_v46 = vld [vmem:[#allocation5 + $0x6cc] sm:$0xf]  ;;  %10362 = vmatpush.bf16.msra.mxu1 %v13045_v21  ;;  %v13269_v50 = vor.u32 %v19231_v4, %v13266_v45  ;;  %v21139_v3 = vadd.f32 %v10134_v59, %v10122_v44 }
 0x480   :  { %v13522_v47 = vld [vmem:[#allocation5 + $0x6e8] sm:$0xf0] }
 0x481   :  { %10375 = vmatpush.bf16.msra.mxu2 %v13301_v28  ;;  %v19095_v52 = vld [vmem:[#allocation5 + $0x8c] sm:$0xf]  ;;  %v13525_v10 = vor.u32 %v19295_v46, %v13522_v47  ;;  %10350 = vmatpush.bf16.msra.mxu0 %v12757_v48  ;;  %v10123_v48 = vpop.f32.mrf.mxu2 }
 0x482   :  { %v12722_v54 = vld [vmem:[#allocation5 + $0xa8] sm:$0xf0] }
 0x483   :  { %v19159_v55 = vld [vmem:[#allocation5 + $0x28c] sm:$0xf]  ;;  %10388 = vmatpush.bf16.msra.mxu3 %v13557_v39  ;;  %v12725_v63 = vor.u32 %v19095_v52, %v12722_v54  ;;  %10363 = vmatpush.bf16.msra.mxu1 %v13013_v49 }
 0x484   :  { %v12978_v17 = vld [vmem:[#allocation5 + $0x2a8] sm:$0xf0] }
 0x485   :  { %v19223_v57 = vld [vmem:[#allocation5 + $0x48c] sm:$0xf]  ;;  %10376 = vmatpush.bf16.msra.mxu2 %v13269_v50  ;;  %v12981_v6 = vor.u32 %v19159_v55, %v12978_v17  ;;  %10351 = vmatpush.bf16.msra.mxu0 %v12725_v63  ;;  %v10136_v55 = vpop.f32.mrf.mxu3 }
 0x486   :  { %v13234_v43 = vld [vmem:[#allocation5 + $0x4a8] sm:$0xf0] }
 0x487   :  { %v19287_v60 = vld [vmem:[#allocation5 + $0x68c] sm:$0xf]  ;;  %v13237_v51 = vor.u32 %v19223_v57, %v13234_v43  ;;  %10389 = vmatpush.bf16.msra.mxu3 %v13525_v10  ;;  %10364 = vmatpush.bf16.msra.mxu1 %v12981_v6 }
 0x488   :  { %v13490_v62 = vld [vmem:[#allocation5 + $0x6a8] sm:$0xf0] }
 0x489   :  { %v19087_v7 = vld [vmem:[#allocation5 + $0x4c] sm:$0xf]  ;;  %v13493_v21 = vor.u32 %v19287_v60, %v13490_v62  ;;  %10377 = vmatpush.bf16.msra.mxu2 %v13237_v51 }
 0x48a   :  { %v12690_v11 = vld [vmem:[#allocation5 + $0x68] sm:$0xf0] }
 0x48b   :  { %v19151_v14 = vld [vmem:[#allocation5 + $0x24c] sm:$0xf]  ;;  %v12693_v35 = vor.u32 %v19087_v7, %v12690_v11  ;;  %10390 = vmatpush.bf16.msra.mxu3 %v13493_v21 }
 0x48c   :  { %v12946_v28 = vld [vmem:[#allocation5 + $0x268] sm:$0xf0] }
 0x48d   :  { %v19215_v58 = vld [vmem:[#allocation5 + $0x44c] sm:$0xf]  ;;  %v12949_v4 = vor.u32 %v19151_v14, %v12946_v28  ;;  %10352 = vmatpush.bf16.msra.mxu0 %v12693_v35 }
 0x48e   :  { %v13202_v0 = vld [vmem:[#allocation5 + $0x468] sm:$0xf0] }
 0x48f   :  { %v19279_v30 = vld [vmem:[#allocation5 + $0x64c] sm:$0xf]  ;;  %v13205_v45 = vor.u32 %v19215_v58, %v13202_v0  ;;  %10365 = vmatpush.bf16.msra.mxu1 %v12949_v4 }
 0x490   :  { %v13458_v33 = vld [vmem:[#allocation5 + $0x668] sm:$0xf0] }
 0x491   :  { %v19079_v39 = vld [vmem:[#allocation5 + $0xc] sm:$0xf]  ;;  %v13461_v49 = vor.u32 %v19279_v30, %v13458_v33  ;;  %10378 = vmatpush.bf16.msra.mxu2 %v13205_v45 }
 0x492   :  { %v12658_v41 = vld [vmem:[#allocation5 + $0x28] sm:$0xf0] }
 0x493   :  { %v19143_v46 = vld [vmem:[#allocation5 + $0x20c] sm:$0xf]  ;;  %v12661_v57 = vor.u32 %v19079_v39, %v12658_v41  ;;  %10391 = vmatpush.bf16.msra.mxu3 %v13461_v49 }
 0x494   :  { %v12914_v47 = vld [vmem:[#allocation5 + $0x228] sm:$0xf0] }
 0x495   :  { %v19207_v12 = vld [vmem:[#allocation5 + $0x40c] sm:$0xf]  ;;  %v12917_v60 = vor.u32 %v19143_v46, %v12914_v47  ;;  %10353 = vmatpush.bf16.msra.mxu0 %v12661_v57 }
 0x496   :  { %v13170_v50 = vld [vmem:[#allocation5 + $0x428] sm:$0xf0] }
 0x497   :  { %v19271_v52 = vld [vmem:[#allocation5 + $0x60c] sm:$0xf]  ;;  %v13173_v62 = vor.u32 %v19207_v12, %v13170_v50  ;;  %10366 = vmatpush.bf16.msra.mxu1 %v12917_v60 }
 0x498   :  { %v13426_v54 = vld [vmem:[#allocation5 + $0x628] sm:$0xf0]  ;;  %10354 = vmatmul.bf16.vlgmr.msra.gmra.mxu0 %v20984_v9 }
 0x499   :  { %v19391_v56 = vld [vmem:[#allocation5 + $0x9cc] sm:$0xf]  ;;  %v13429_v6 = vor.u32 %v19271_v52, %v13426_v54  ;;  %10379 = vmatpush.bf16.msra.mxu2 %v13173_v62 }
 0x49a   :  { %v13906_v10 = vld [vmem:[#allocation5 + $0x9e8] sm:$0xf0]  ;;  %10367 = vmatmul.bf16.vlgmr.msra.gmra.mxu1 %v20991_v25 }
 0x49b   :  { %v19455_v17 = vld [vmem:[#allocation5 + $0xbcc] sm:$0xf]  ;;  %v13909_v51 = vor.u32 %v19391_v56, %v13906_v10  ;;  %10392 = vmatpush.bf16.msra.mxu3 %v13429_v6 }
 0x49c   :  { %v14162_v43 = vld [vmem:[#allocation5 + $0xbe8] sm:$0xf0]  ;;  %10380 = vmatmul.bf16.vlgmr.msra.gmra.mxu2 %v20982_v8 }
 0x49d   :  { %v19519_v44 = vld [vmem:[#allocation5 + $0xdcc] sm:$0xf]  ;;  %v14165_v7 = vor.u32 %v19455_v17, %v14162_v43  ;;  %10398 = vmatpush.bf16.msrb.mxu0 %v13909_v51 }
 0x49e   :  { %v14418_v59 = vld [vmem:[#allocation5 + $0xde8] sm:$0xf0]  ;;  %10393 = vmatmul.bf16.vlgmr.msra.gmra.mxu3 %v20986_v15 }
 0x49f   :  { %v19583_v63 = vld [vmem:[#allocation5 + $0xfcc] sm:$0xf]  ;;  %v14421_v11 = vor.u32 %v19519_v44, %v14418_v59  ;;  %10411 = vmatpush.bf16.msrb.mxu1 %v14165_v7 }
 0x4a0   :  { %v14674_v53 = vld [vmem:[#allocation5 + $0xfe8] sm:$0xf0] }
 0x4a1   :  { %v19383_v14 = vld [vmem:[#allocation5 + $0x98c] sm:$0xf]  ;;  %v14677_v28 = vor.u32 %v19583_v63, %v14674_v53  ;;  %10424 = vmatpush.bf16.msrb.mxu2 %v14421_v11  ;;  %v10147_v63 = vpop.f32.mrf.mxu0  ;;  %v10160_v11 = vpop.f32.mrf.mxu1 }
 0x4a2   :  { %v13874_v16 = vld [vmem:[#allocation5 + $0x9a8] sm:$0xf0]  ;;  %v10148_v51 = vadd.f32 %v10147_v63, %v21139_v3 }
 0x4a3   :  { %v19447_v21 = vld [vmem:[#allocation5 + $0xb8c] sm:$0xf]  ;;  %v13877_v39 = vor.u32 %v19383_v14, %v13874_v16  ;;  %10437 = vmatpush.bf16.msrb.mxu3 %v14677_v28 }
 0x4a4   :  { %v14130_v58 = vld [vmem:[#allocation5 + $0xba8] sm:$0xf0] }
 0x4a5   :  { %v19511_v0 = vld [vmem:[#allocation5 + $0xd8c] sm:$0xf]  ;;  %v14133_v41 = vor.u32 %v19447_v21, %v14130_v58  ;;  %10399 = vmatpush.bf16.msrb.mxu0 %v13877_v39 }
 0x4a6   :  { %v14386_v30 = vld [vmem:[#allocation5 + $0xda8] sm:$0xf0] }
 0x4a7   :  { %v19575_v33 = vld [vmem:[#allocation5 + $0xf8c] sm:$0xf]  ;;  %v14389_v4 = vor.u32 %v19511_v0, %v14386_v30  ;;  %10412 = vmatpush.bf16.msrb.mxu1 %v14133_v41  ;;  %v10161_v30 = vadd.f32 %v10160_v11, %v10148_v51 }
 0x4a8   :  { %v14642_v35 = vld [vmem:[#allocation5 + $0xfa8] sm:$0xf0] }
 0x4a9   :  { %v19375_v45 = vld [vmem:[#allocation5 + $0x94c] sm:$0xf]  ;;  %v14645_v12 = vor.u32 %v19575_v33, %v14642_v35  ;;  %10425 = vmatpush.bf16.msrb.mxu2 %v14389_v4 }
 0x4aa   :  { %v13842_v46 = vld [vmem:[#allocation5 + $0x968] sm:$0xf0] }
 0x4ab   :  { %v19439_v47 = vld [vmem:[#allocation5 + $0xb4c] sm:$0xf]  ;;  %v13845_v55 = vor.u32 %v19375_v45, %v13842_v46  ;;  %10438 = vmatpush.bf16.msrb.mxu3 %v14645_v12 }
 0x4ac   :  { %v14098_v48 = vld [vmem:[#allocation5 + $0xb68] sm:$0xf0] }
 0x4ad   :  { %v19503_v49 = vld [vmem:[#allocation5 + $0xd4c] sm:$0xf]  ;;  %v14101_v56 = vor.u32 %v19439_v47, %v14098_v48  ;;  %10400 = vmatpush.bf16.msrb.mxu0 %v13845_v55 }
 0x4ae   :  { %v14354_v50 = vld [vmem:[#allocation5 + $0xd68] sm:$0xf0] }
 0x4af   :  { %v19567_v52 = vld [vmem:[#allocation5 + $0xf4c] sm:$0xf]  ;;  %v14357_v10 = vor.u32 %v19503_v49, %v14354_v50  ;;  %10413 = vmatpush.bf16.msrb.mxu1 %v14101_v56  ;;  %v10173_v50 = vpop.f32.mrf.mxu2 }
 0x4b0   :  { %v14610_v54 = vld [vmem:[#allocation5 + $0xf68] sm:$0xf0]  ;;  %v10174_v56 = vadd.f32 %v10173_v50, %v10161_v30 }
 0x4b1   :  { %v19367_v17 = vld [vmem:[#allocation5 + $0x90c] sm:$0xf]  ;;  %v14613_v44 = vor.u32 %v19567_v52, %v14610_v54  ;;  %10426 = vmatpush.bf16.msrb.mxu2 %v14357_v10  ;;  %v10186_v10 = vpop.f32.mrf.mxu3 }
 0x4b2   :  { %v13810_v57 = vld [vmem:[#allocation5 + $0x928] sm:$0xf0] }
 0x4b3   :  { %v19431_v43 = vld [vmem:[#allocation5 + $0xb0c] sm:$0xf]  ;;  %v13813_v7 = vor.u32 %v19367_v17, %v13810_v57  ;;  %10439 = vmatpush.bf16.msrb.mxu3 %v14613_v44 }
 0x4b4   :  { %v14066_v59 = vld [vmem:[#allocation5 + $0xb28] sm:$0xf0] }
 0x4b5   :  { %v19495_v60 = vld [vmem:[#allocation5 + $0xd0c] sm:$0xf]  ;;  %v14069_v14 = vor.u32 %v19431_v43, %v14066_v59  ;;  %10401 = vmatpush.bf16.msrb.mxu0 %v13813_v7  ;;  %v10149_v43 = vpop.f32.mrf.mxu0  ;;  %v10162_v59 = vpop.f32.mrf.mxu1 }
 0x4b6   :  { %v14322_v62 = vld [vmem:[#allocation5 + $0xd28] sm:$0xf0] }
 0x4b7   :  { %v19559_v53 = vld [vmem:[#allocation5 + $0xf0c] sm:$0xf]  ;;  %v14325_v16 = vor.u32 %v19495_v60, %v14322_v62  ;;  %10414 = vmatpush.bf16.msrb.mxu1 %v14069_v14  ;;  %v21146_v60 = vadd.f32 %v10186_v10, %v10174_v56 }
 0x4b8   :  { %v14578_v6 = vld [vmem:[#allocation5 + $0xf28] sm:$0xf0] }
 0x4b9   :  { %v19359_v21 = vld [vmem:[#allocation5 + $0x8cc] sm:$0xf]  ;;  %v14581_v0 = vor.u32 %v19559_v53, %v14578_v6  ;;  %10427 = vmatpush.bf16.msrb.mxu2 %v14325_v16 }
 0x4ba   :  { %v13778_v28 = vld [vmem:[#allocation5 + $0x8e8] sm:$0xf0] }
 0x4bb   :  { %v19423_v58 = vld [vmem:[#allocation5 + $0xacc] sm:$0xf]  ;;  %v13781_v45 = vor.u32 %v19359_v21, %v13778_v28  ;;  %10440 = vmatpush.bf16.msrb.mxu3 %v14581_v0 }
 0x4bc   :  { %v14034_v33 = vld [vmem:[#allocation5 + $0xae8] sm:$0xf0] }
 0x4bd   :  { %v19487_v35 = vld [vmem:[#allocation5 + $0xccc] sm:$0xf]  ;;  %v14037_v3 = vor.u32 %v19423_v58, %v14034_v33  ;;  %10402 = vmatpush.bf16.msrb.mxu0 %v13781_v45 }
 0x4be   :  { %v14290_v39 = vld [vmem:[#allocation5 + $0xce8] sm:$0xf0] }
 0x4bf   :  { %v19551_v41 = vld [vmem:[#allocation5 + $0xecc] sm:$0xf]  ;;  %v14293_v46 = vor.u32 %v19487_v35, %v14290_v39  ;;  %10415 = vmatpush.bf16.msrb.mxu1 %v14037_v3 }
 0x4c0   :  { %v14546_v4 = vld [vmem:[#allocation5 + $0xee8] sm:$0xf0] }
 0x4c1   :  { %v19351_v47 = vld [vmem:[#allocation5 + $0x88c] sm:$0xf]  ;;  %v14549_v49 = vor.u32 %v19551_v41, %v14546_v4  ;;  %10428 = vmatpush.bf16.msrb.mxu2 %v14293_v46 }
 0x4c2   :  { %v13746_v12 = vld [vmem:[#allocation5 + $0x8a8] sm:$0xf0] }
 0x4c3   :  { %v19415_v48 = vld [vmem:[#allocation5 + $0xa8c] sm:$0xf]  ;;  %v13749_v44 = vor.u32 %v19351_v47, %v13746_v12  ;;  %10441 = vmatpush.bf16.msrb.mxu3 %v14549_v49  ;;  %v10175_v12 = vpop.f32.mrf.mxu2 }
 0x4c4   :  { %v14002_v52 = vld [vmem:[#allocation5 + $0xaa8] sm:$0xf0] }
 0x4c5   :  { %v19479_v54 = vld [vmem:[#allocation5 + $0xc8c] sm:$0xf]  ;;  %v14005_v62 = vor.u32 %v19415_v48, %v14002_v52  ;;  %10403 = vmatpush.bf16.msrb.mxu0 %v13749_v44  ;;  %v10188_v52 = vpop.f32.mrf.mxu3 }
 0x4c6   :  { %v14258_v55 = vld [vmem:[#allocation5 + $0xca8] sm:$0xf0] }
 0x4c7   :  { %v19543_v17 = vld [vmem:[#allocation5 + $0xe8c] sm:$0xf]  ;;  %v14261_v63 = vor.u32 %v19479_v54, %v14258_v55  ;;  %10416 = vmatpush.bf16.msrb.mxu1 %v14005_v62 }
 0x4c8   :  { %v14514_v57 = vld [vmem:[#allocation5 + $0xea8] sm:$0xf0] }
 0x4c9   :  { %v19343_v53 = vld [vmem:[#allocation5 + $0x84c] sm:$0xf]  ;;  %v14517_v7 = vor.u32 %v19543_v17, %v14514_v57  ;;  %10429 = vmatpush.bf16.msrb.mxu2 %v14261_v63 }
 0x4ca   :  { %v13714_v6 = vld [vmem:[#allocation5 + $0x868] sm:$0xf0] }
 0x4cb   :  { %v19407_v51 = vld [vmem:[#allocation5 + $0xa4c] sm:$0xf]  ;;  %v13717_v58 = vor.u32 %v19343_v53, %v13714_v6  ;;  %10442 = vmatpush.bf16.msrb.mxu3 %v14517_v7 }
 0x4cc   :  { %v13970_v11 = vld [vmem:[#allocation5 + $0xa68] sm:$0xf0] }
 0x4cd   :  { %v19471_v14 = vld [vmem:[#allocation5 + $0xc4c] sm:$0xf]  ;;  %v13973_v33 = vor.u32 %v19407_v51, %v13970_v11  ;;  %10404 = vmatpush.bf16.msrb.mxu0 %v13717_v58 }
 0x4ce   :  { %v14226_v16 = vld [vmem:[#allocation5 + $0xc68] sm:$0xf0] }
 0x4cf   :  { %v19535_v21 = vld [vmem:[#allocation5 + $0xe4c] sm:$0xf]  ;;  %v14229_v35 = vor.u32 %v19471_v14, %v14226_v16  ;;  %10417 = vmatpush.bf16.msrb.mxu1 %v13973_v33 }
 0x4d0   :  { %v14482_v28 = vld [vmem:[#allocation5 + $0xe68] sm:$0xf0] }
 0x4d1   :  { %v19335_v0 = vld [vmem:[#allocation5 + $0x80c] sm:$0xf]  ;;  %v14485_v45 = vor.u32 %v19535_v21, %v14482_v28  ;;  %10430 = vmatpush.bf16.msrb.mxu2 %v14229_v35 }
 0x4d2   :  { %v13682_v30 = vld [vmem:[#allocation5 + $0x828] sm:$0xf0] }
 0x4d3   :  { %v19399_v39 = vld [vmem:[#allocation5 + $0xa0c] sm:$0xf]  ;;  %v13685_v54 = vor.u32 %v19335_v0, %v13682_v30  ;;  %10443 = vmatpush.bf16.msrb.mxu3 %v14485_v45 }
 0x4d4   :  { %v13938_v41 = vld [vmem:[#allocation5 + $0xa28] sm:$0xf0] }
 0x4d5   :  { %v19463_v4 = vld [vmem:[#allocation5 + $0xc0c] sm:$0xf]  ;;  %v13941_v17 = vor.u32 %v19399_v39, %v13938_v41  ;;  %10405 = vmatpush.bf16.msrb.mxu0 %v13685_v54 }
 0x4d6   :  { %v14194_v3 = vld [vmem:[#allocation5 + $0xc28] sm:$0xf0] }
 0x4d7   :  { %v19527_v46 = vld [vmem:[#allocation5 + $0xe0c] sm:$0xf]  ;;  %v14197_v57 = vor.u32 %v19463_v4, %v14194_v3  ;;  %10418 = vmatpush.bf16.msrb.mxu1 %v13941_v17 }
 0x4d8   :  { %v14450_v47 = vld [vmem:[#allocation5 + $0xe28] sm:$0xf0]  ;;  %10406 = vmatmul.bf16.vlgmr.msrb.gmra.mxu0 %v20996_v37 }
 0x4d9   :  { %v19647_v48 = vld [vmem:[#allocation5 + $0x11cc] sm:$0xf]  ;;  %v14453_v59 = vor.u32 %v19527_v46, %v14450_v47  ;;  %10431 = vmatpush.bf16.msrb.mxu2 %v14197_v57 }
 0x4da   :  { %v14930_v49 = vld [vmem:[#allocation5 + $0x11e8] sm:$0xf0]  ;;  %10419 = vmatmul.bf16.vlgmr.msrb.gmra.mxu1 %v21000_v40 }
 0x4db   :  { %v19711_v50 = vld [vmem:[#allocation5 + $0x13cc] sm:$0xf]  ;;  %v14933_v62 = vor.u32 %v19647_v48, %v14930_v49  ;;  %10444 = vmatpush.bf16.msrb.mxu3 %v14453_v59 }
 0x4dc   :  { %v15186_v55 = vld [vmem:[#allocation5 + $0x13e8] sm:$0xf0]  ;;  %10432 = vmatmul.bf16.vlgmr.msrb.gmra.mxu2 %v20994_v34 }
 0x4dd   :  { %v19775_v56 = vld [vmem:[#allocation5 + $0x15cc] sm:$0xf]  ;;  %v15189_v63 = vor.u32 %v19711_v50, %v15186_v55  ;;  %10450 = vmatpush.bf16.msra.mxu0 %v14933_v62 }
 0x4de   :  { %v15442_v10 = vld [vmem:[#allocation5 + $0x15e8] sm:$0xf0]  ;;  %10445 = vmatmul.bf16.vlgmr.msrb.gmra.mxu3 %v20998_v38 }
 0x4df   :  { %v19839_v43 = vld [vmem:[#allocation5 + $0x17cc] sm:$0xf]  ;;  %v15445_v53 = vor.u32 %v19775_v56, %v15442_v10  ;;  %10463 = vmatpush.bf16.msra.mxu1 %v15189_v63 }
 0x4e0   :  { %v15698_v44 = vld [vmem:[#allocation5 + $0x17e8] sm:$0xf0] }
 0x4e1   :  { %v19639_v6 = vld [vmem:[#allocation5 + $0x118c] sm:$0xf]  ;;  %v15701_v11 = vor.u32 %v19839_v43, %v15698_v44  ;;  %10476 = vmatpush.bf16.msra.mxu2 %v15445_v53  ;;  %v10199_v43 = vpop.f32.mrf.mxu0  ;;  %v10212_v53 = vpop.f32.mrf.mxu1 }
 0x4e2   :  { %v14898_v51 = vld [vmem:[#allocation5 + $0x11a8] sm:$0xf0]  ;;  %v10200_v62 = vadd.f32 %v10199_v43, %v21146_v60 }
 0x4e3   :  { %v19703_v7 = vld [vmem:[#allocation5 + $0x138c] sm:$0xf]  ;;  %v14901_v0 = vor.u32 %v19639_v6, %v14898_v51  ;;  %10489 = vmatpush.bf16.msra.mxu3 %v15701_v11 }
 0x4e4   :  { %v15154_v14 = vld [vmem:[#allocation5 + $0x13a8] sm:$0xf0] }
 0x4e5   :  { %v19767_v16 = vld [vmem:[#allocation5 + $0x158c] sm:$0xf]  ;;  %v15157_v30 = vor.u32 %v19703_v7, %v15154_v14  ;;  %10451 = vmatpush.bf16.msra.mxu0 %v14901_v0 }
 0x4e6   :  { %v15410_v21 = vld [vmem:[#allocation5 + $0x15a8] sm:$0xf0] }
 0x4e7   :  { %v19831_v28 = vld [vmem:[#allocation5 + $0x178c] sm:$0xf]  ;;  %v15413_v33 = vor.u32 %v19767_v16, %v15410_v21  ;;  %10464 = vmatpush.bf16.msra.mxu1 %v15157_v30  ;;  %v10213_v21 = vadd.f32 %v10212_v53, %v10200_v62 }
 0x4e8   :  { %v15666_v58 = vld [vmem:[#allocation5 + $0x17a8] sm:$0xf0] }
 0x4e9   :  { %v19631_v35 = vld [vmem:[#allocation5 + $0x114c] sm:$0xf]  ;;  %v15669_v4 = vor.u32 %v19831_v28, %v15666_v58  ;;  %10477 = vmatpush.bf16.msra.mxu2 %v15413_v33 }
 0x4ea   :  { %v14866_v39 = vld [vmem:[#allocation5 + $0x1168] sm:$0xf0] }
 0x4eb   :  { %v19695_v41 = vld [vmem:[#allocation5 + $0x134c] sm:$0xf]  ;;  %v14869_v48 = vor.u32 %v19631_v35, %v14866_v39  ;;  %10490 = vmatpush.bf16.msra.mxu3 %v15669_v4 }
 0x4ec   :  { %v15122_v45 = vld [vmem:[#allocation5 + $0x1368] sm:$0xf0] }
 0x4ed   :  { %v19759_v3 = vld [vmem:[#allocation5 + $0x154c] sm:$0xf]  ;;  %v15125_v49 = vor.u32 %v19695_v41, %v15122_v45  ;;  %10452 = vmatpush.bf16.msra.mxu0 %v14869_v48 }
 0x4ee   :  { %v15378_v46 = vld [vmem:[#allocation5 + $0x1568] sm:$0xf0] }
 0x4ef   :  { %v19823_v47 = vld [vmem:[#allocation5 + $0x174c] sm:$0xf]  ;;  %v15381_v50 = vor.u32 %v19759_v3, %v15378_v46  ;;  %10465 = vmatpush.bf16.msra.mxu1 %v15125_v49  ;;  %v10225_v46 = vpop.f32.mrf.mxu2 }
 0x4f0   :  { %v15634_v12 = vld [vmem:[#allocation5 + $0x1768] sm:$0xf0]  ;;  %v10226_v49 = vadd.f32 %v10225_v46, %v10213_v21 }
 0x4f1   :  { %v19623_v52 = vld [vmem:[#allocation5 + $0x110c] sm:$0xf]  ;;  %v15637_v56 = vor.u32 %v19823_v47, %v15634_v12  ;;  %10478 = vmatpush.bf16.msra.mxu2 %v15381_v50  ;;  %v10238_v50 = vpop.f32.mrf.mxu3 }
 0x4f2   :  { %v14834_v54 = vld [vmem:[#allocation5 + $0x1128] sm:$0xf0] }
 0x4f3   :  { %v19687_v55 = vld [vmem:[#allocation5 + $0x130c] sm:$0xf]  ;;  %v14837_v63 = vor.u32 %v19623_v52, %v14834_v54  ;;  %10491 = vmatpush.bf16.msra.mxu3 %v15637_v56 }
 0x4f4   :  { %v15090_v10 = vld [vmem:[#allocation5 + $0x1328] sm:$0xf0] }
 0x4f5   :  { %v19751_v17 = vld [vmem:[#allocation5 + $0x150c] sm:$0xf]  ;;  %v15093_v6 = vor.u32 %v19687_v55, %v15090_v10  ;;  %10453 = vmatpush.bf16.msra.mxu0 %v14837_v63  ;;  %v10201_v55 = vpop.f32.mrf.mxu0  ;;  %v10214_v10 = vpop.f32.mrf.mxu1 }
 0x4f6   :  { %v15346_v57 = vld [vmem:[#allocation5 + $0x1528] sm:$0xf0] }
 0x4f7   :  { %v19815_v44 = vld [vmem:[#allocation5 + $0x170c] sm:$0xf]  ;;  %v15349_v51 = vor.u32 %v19751_v17, %v15346_v57  ;;  %10466 = vmatpush.bf16.msra.mxu1 %v15093_v6  ;;  %v21153_v17 = vadd.f32 %v10238_v50, %v10226_v49 }
 0x4f8   :  { %v15602_v59 = vld [vmem:[#allocation5 + $0x1728] sm:$0xf0] }
 0x4f9   :  { %v19615_v7 = vld [vmem:[#allocation5 + $0x10cc] sm:$0xf]  ;;  %v15605_v16 = vor.u32 %v19815_v44, %v15602_v59  ;;  %10479 = vmatpush.bf16.msra.mxu2 %v15349_v51 }
 0x4fa   :  { %v14802_v11 = vld [vmem:[#allocation5 + $0x10e8] sm:$0xf0] }
 0x4fb   :  { %v19679_v14 = vld [vmem:[#allocation5 + $0x12cc] sm:$0xf]  ;;  %v14805_v35 = vor.u32 %v19615_v7, %v14802_v11  ;;  %10492 = vmatpush.bf16.msra.mxu3 %v15605_v16 }
 0x4fc   :  { %v15058_v28 = vld [vmem:[#allocation5 + $0x12e8] sm:$0xf0] }
 0x4fd   :  { %v19743_v58 = vld [vmem:[#allocation5 + $0x14cc] sm:$0xf]  ;;  %v15061_v60 = vor.u32 %v19679_v14, %v15058_v28  ;;  %10454 = vmatpush.bf16.msra.mxu0 %v14805_v35 }
 0x4fe   :  { %v15314_v0 = vld [vmem:[#allocation5 + $0x14e8] sm:$0xf0] }
 0x4ff   :  { %v19807_v30 = vld [vmem:[#allocation5 + $0x16cc] sm:$0xf]  ;;  %v15317_v39 = vor.u32 %v19743_v58, %v15314_v0  ;;  %10467 = vmatpush.bf16.msra.mxu1 %v15061_v60 }
 0x500   :  { %v15570_v33 = vld [vmem:[#allocation5 + $0x16e8] sm:$0xf0] }
 0x501   :  { %v19607_v41 = vld [vmem:[#allocation5 + $0x108c] sm:$0xf]  ;;  %v15573_v3 = vor.u32 %v19807_v30, %v15570_v33  ;;  %10480 = vmatpush.bf16.msra.mxu2 %v15317_v39 }
 0x502   :  { %v14770_v4 = vld [vmem:[#allocation5 + $0x10a8] sm:$0xf0] }
 0x503   :  { %v19671_v45 = vld [vmem:[#allocation5 + $0x128c] sm:$0xf]  ;;  %v14773_v56 = vor.u32 %v19607_v41, %v14770_v4  ;;  %10493 = vmatpush.bf16.msra.mxu3 %v15573_v3  ;;  %v10227_v4 = vpop.f32.mrf.mxu2 }
 0x504   :  { %v15026_v47 = vld [vmem:[#allocation5 + $0x12a8] sm:$0xf0] }
 0x505   :  { %v19735_v12 = vld [vmem:[#allocation5 + $0x148c] sm:$0xf]  ;;  %v15029_v57 = vor.u32 %v19671_v45, %v15026_v47  ;;  %10455 = vmatpush.bf16.msra.mxu0 %v14773_v56  ;;  %v10240_v47 = vpop.f32.mrf.mxu3 }
 0x506   :  { %v15282_v48 = vld [vmem:[#allocation5 + $0x14a8] sm:$0xf0] }
 0x507   :  { %v19799_v52 = vld [vmem:[#allocation5 + $0x168c] sm:$0xf]  ;;  %v15285_v43 = vor.u32 %v19735_v12, %v15282_v48  ;;  %10468 = vmatpush.bf16.msra.mxu1 %v15029_v57 }
 0x508   :  { %v15538_v54 = vld [vmem:[#allocation5 + $0x16a8] sm:$0xf0] }
 0x509   :  { %v19599_v44 = vld [vmem:[#allocation5 + $0x104c] sm:$0xf]  ;;  %v15541_v63 = vor.u32 %v19799_v52, %v15538_v54  ;;  %10481 = vmatpush.bf16.msra.mxu2 %v15285_v43 }
 0x50a   :  { %v14738_v59 = vld [vmem:[#allocation5 + $0x1068] sm:$0xf0] }
 0x50b   :  { %v19663_v62 = vld [vmem:[#allocation5 + $0x124c] sm:$0xf]  ;;  %v14741_v14 = vor.u32 %v19599_v44, %v14738_v59  ;;  %10494 = vmatpush.bf16.msra.mxu3 %v15541_v63 }
 0x50c   :  { %v14994_v53 = vld [vmem:[#allocation5 + $0x1268] sm:$0xf0] }
 0x50d   :  { %v19727_v6 = vld [vmem:[#allocation5 + $0x144c] sm:$0xf]  ;;  %v14997_v28 = vor.u32 %v19663_v62, %v14994_v53  ;;  %10456 = vmatpush.bf16.msra.mxu0 %v14741_v14 }
 0x50e   :  { %v15250_v51 = vld [vmem:[#allocation5 + $0x1468] sm:$0xf0] }
 0x50f   :  { %v19791_v7 = vld [vmem:[#allocation5 + $0x164c] sm:$0xf]  ;;  %v15253_v58 = vor.u32 %v19727_v6, %v15250_v51  ;;  %10469 = vmatpush.bf16.msra.mxu1 %v14997_v28 }
 0x510   :  { %v15506_v11 = vld [vmem:[#allocation5 + $0x1668] sm:$0xf0] }
 0x511   :  { %v19591_v16 = vld [vmem:[#allocation5 + $0x100c] sm:$0xf]  ;;  %v15509_v35 = vor.u32 %v19791_v7, %v15506_v11  ;;  %10482 = vmatpush.bf16.msra.mxu2 %v15253_v58 }
 0x512   :  { %v14706_v21 = vld [vmem:[#allocation5 + $0x1028] sm:$0xf0] }
 0x513   :  { %v19655_v0 = vld [vmem:[#allocation5 + $0x120c] sm:$0xf]  ;;  %v14709_v12 = vor.u32 %v19591_v16, %v14706_v21  ;;  %10495 = vmatpush.bf16.msra.mxu3 %v15509_v35 }
 0x514   :  { %v14962_v30 = vld [vmem:[#allocation5 + $0x1228] sm:$0xf0] }
 0x515   :  { %v19719_v33 = vld [vmem:[#allocation5 + $0x140c] sm:$0xf]  ;;  %v14965_v52 = vor.u32 %v19655_v0, %v14962_v30  ;;  %10457 = vmatpush.bf16.msra.mxu0 %v14709_v12 }
 0x516   :  { %v15218_v60 = vld [vmem:[#allocation5 + $0x1428] sm:$0xf0] }
 0x517   :  { %v19783_v39 = vld [vmem:[#allocation5 + $0x160c] sm:$0xf]  ;;  %v15221_v54 = vor.u32 %v19719_v33, %v15218_v60  ;;  %10470 = vmatpush.bf16.msra.mxu1 %v14965_v52 }
 0x518   :  { %v15474_v41 = vld [vmem:[#allocation5 + $0x1628] sm:$0xf0]  ;;  %10458 = vmatmul.bf16.vlgmr.msra.gmra.mxu0 %v21006_v18 }
 0x519   :  { %v19903_v45 = vld [vmem:[#allocation5 + $0x19cc] sm:$0xf]  ;;  %v15477_v10 = vor.u32 %v19783_v39, %v15474_v41  ;;  %10483 = vmatpush.bf16.msra.mxu2 %v15221_v54 }
 0x51a   :  { %v15954_v3 = vld [vmem:[#allocation5 + $0x19e8] sm:$0xf0]  ;;  %10471 = vmatmul.bf16.vlgmr.msra.gmra.mxu1 %v21010_v23 }
 0x51b   :  { %v19967_v46 = vld [vmem:[#allocation5 + $0x1bcc] sm:$0xf]  ;;  %v15957_v57 = vor.u32 %v19903_v45, %v15954_v3  ;;  %10496 = vmatpush.bf16.msra.mxu3 %v15477_v10 }
 0x51c   :  { %v16210_v48 = vld [vmem:[#allocation5 + $0x1be8] sm:$0xf0]  ;;  %10484 = vmatmul.bf16.vlgmr.msra.gmra.mxu2 %v21008_v22 }
 0x51d   :  { %v20031_v49 = vld [vmem:[#allocation5 + $0x1dcc] sm:$0xf]  ;;  %v16213_v43 = vor.u32 %v19967_v46, %v16210_v48  ;;  %10502 = vmatpush.bf16.msrb.mxu0 %v15957_v57 }
 0x51e   :  { %v16466_v50 = vld [vmem:[#allocation5 + $0x1de8] sm:$0xf0]  ;;  %10497 = vmatmul.bf16.vlgmr.msra.gmra.mxu3 %v21012_v27 }
 0x51f   :  { %v20095_v55 = vld [vmem:[#allocation5 + $0x1fcc] sm:$0xf]  ;;  %v16469_v44 = vor.u32 %v20031_v49, %v16466_v50  ;;  %10515 = vmatpush.bf16.msrb.mxu1 %v16213_v43 }
 0x520   :  { %v16722_v56 = vld [vmem:[#allocation5 + $0x1fe8] sm:$0xf0] }
 0x521   :  { %v19895_v59 = vld [vmem:[#allocation5 + $0x198c] sm:$0xf]  ;;  %v16725_v53 = vor.u32 %v20095_v55, %v16722_v56  ;;  %10528 = vmatpush.bf16.msrb.mxu2 %v16469_v44  ;;  %v10251_v55 = vpop.f32.mrf.mxu0  ;;  %v10264_v44 = vpop.f32.mrf.mxu1 }
 0x522   :  { %v15922_v62 = vld [vmem:[#allocation5 + $0x19a8] sm:$0xf0]  ;;  %v10252_v57 = vadd.f32 %v10251_v55, %v21153_v17 }
 0x523   :  { %v19959_v63 = vld [vmem:[#allocation5 + $0x1b8c] sm:$0xf]  ;;  %v15925_v16 = vor.u32 %v19895_v59, %v15922_v62  ;;  %10541 = vmatpush.bf16.msrb.mxu3 %v16725_v53 }
 0x524   :  { %v16178_v6 = vld [vmem:[#allocation5 + $0x1ba8] sm:$0xf0] }
 0x525   :  { %v20023_v51 = vld [vmem:[#allocation5 + $0x1d8c] sm:$0xf]  ;;  %v16181_v21 = vor.u32 %v19959_v63, %v16178_v6  ;;  %10503 = vmatpush.bf16.msrb.mxu0 %v15925_v16 }
 0x526   :  { %v16434_v7 = vld [vmem:[#allocation5 + $0x1da8] sm:$0xf0] }
 0x527   :  { %v20087_v11 = vld [vmem:[#allocation5 + $0x1f8c] sm:$0xf]  ;;  %v16437_v28 = vor.u32 %v20023_v51, %v16434_v7  ;;  %10516 = vmatpush.bf16.msrb.mxu1 %v16181_v21  ;;  %v10265_v7 = vadd.f32 %v10264_v44, %v10252_v57 }
 0x528   :  { %v16690_v14 = vld [vmem:[#allocation5 + $0x1fa8] sm:$0xf0] }
 0x529   :  { %v19887_v58 = vld [vmem:[#allocation5 + $0x194c] sm:$0xf]  ;;  %v16693_v33 = vor.u32 %v20087_v11, %v16690_v14  ;;  %10529 = vmatpush.bf16.msrb.mxu2 %v16437_v28 }
 0x52a   :  { %v15890_v0 = vld [vmem:[#allocation5 + $0x1968] sm:$0xf0] }
 0x52b   :  { %v19951_v30 = vld [vmem:[#allocation5 + $0x1b4c] sm:$0xf]  ;;  %v15893_v45 = vor.u32 %v19887_v58, %v15890_v0  ;;  %10542 = vmatpush.bf16.msrb.mxu3 %v16693_v33 }
 0x52c   :  { %v16146_v35 = vld [vmem:[#allocation5 + $0x1b68] sm:$0xf0] }
 0x52d   :  { %v20015_v60 = vld [vmem:[#allocation5 + $0x1d4c] sm:$0xf]  ;;  %v16149_v3 = vor.u32 %v19951_v30, %v16146_v35  ;;  %10504 = vmatpush.bf16.msrb.mxu0 %v15893_v45 }
 0x52e   :  { %v16402_v39 = vld [vmem:[#allocation5 + $0x1d68] sm:$0xf0] }
 0x52f   :  { %v20079_v41 = vld [vmem:[#allocation5 + $0x1f4c] sm:$0xf]  ;;  %v16405_v46 = vor.u32 %v20015_v60, %v16402_v39  ;;  %10517 = vmatpush.bf16.msrb.mxu1 %v16149_v3  ;;  %v10277_v39 = vpop.f32.mrf.mxu2 }
 0x530   :  { %v16658_v4 = vld [vmem:[#allocation5 + $0x1f68] sm:$0xf0]  ;;  %v10278_v3 = vadd.f32 %v10277_v39, %v10265_v7 }
 0x531   :  { %v19879_v47 = vld [vmem:[#allocation5 + $0x190c] sm:$0xf]  ;;  %v16661_v49 = vor.u32 %v20079_v41, %v16658_v4  ;;  %10530 = vmatpush.bf16.msrb.mxu2 %v16405_v46  ;;  %v10290_v46 = vpop.f32.mrf.mxu3 }
 0x532   :  { %v15858_v12 = vld [vmem:[#allocation5 + $0x1928] sm:$0xf0] }
 0x533   :  { %v19943_v48 = vld [vmem:[#allocation5 + $0x1b0c] sm:$0xf]  ;;  %v15861_v43 = vor.u32 %v19879_v47, %v15858_v12  ;;  %10543 = vmatpush.bf16.msrb.mxu3 %v16661_v49 }
 0x534   :  { %v16114_v50 = vld [vmem:[#allocation5 + $0x1b28] sm:$0xf0] }
 0x535   :  { %v20007_v52 = vld [vmem:[#allocation5 + $0x1d0c] sm:$0xf]  ;;  %v16117_v59 = vor.u32 %v19943_v48, %v16114_v50  ;;  %10505 = vmatpush.bf16.msrb.mxu0 %v15861_v43  ;;  %v10253_v48 = vpop.f32.mrf.mxu0  ;;  %v10266_v50 = vpop.f32.mrf.mxu1 }
 0x536   :  { %v16370_v54 = vld [vmem:[#allocation5 + $0x1d28] sm:$0xf0] }
 0x537   :  { %v20071_v56 = vld [vmem:[#allocation5 + $0x1f0c] sm:$0xf]  ;;  %v16373_v62 = vor.u32 %v20007_v52, %v16370_v54  ;;  %10518 = vmatpush.bf16.msrb.mxu1 %v16117_v59  ;;  %v21160_v52 = vadd.f32 %v10290_v46, %v10278_v3 }
 0x538   :  { %v16626_v10 = vld [vmem:[#allocation5 + $0x1f28] sm:$0xf0] }
 0x539   :  { %v19871_v63 = vld [vmem:[#allocation5 + $0x18cc] sm:$0xf]  ;;  %v16629_v51 = vor.u32 %v20071_v56, %v16626_v10  ;;  %10531 = vmatpush.bf16.msrb.mxu2 %v16373_v62 }
 0x53a   :  { %v15826_v53 = vld [vmem:[#allocation5 + $0x18e8] sm:$0xf0] }
 0x53b   :  { %v19935_v6 = vld [vmem:[#allocation5 + $0x1acc] sm:$0xf]  ;;  %v15829_v58 = vor.u32 %v19871_v63, %v15826_v53  ;;  %10544 = vmatpush.bf16.msrb.mxu3 %v16629_v51 }
 0x53c   :  { %v16082_v11 = vld [vmem:[#allocation5 + $0x1ae8] sm:$0xf0] }
 0x53d   :  { %v19999_v14 = vld [vmem:[#allocation5 + $0x1ccc] sm:$0xf]  ;;  %v16085_v17 = vor.u32 %v19935_v6, %v16082_v11  ;;  %10506 = vmatpush.bf16.msrb.mxu0 %v15829_v58 }
 0x53e   :  { %v16338_v16 = vld [vmem:[#allocation5 + $0x1ce8] sm:$0xf0] }
 0x53f   :  { %v20063_v21 = vld [vmem:[#allocation5 + $0x1ecc] sm:$0xf]  ;;  %v16341_v0 = vor.u32 %v19999_v14, %v16338_v16  ;;  %10519 = vmatpush.bf16.msrb.mxu1 %v16085_v17 }
 0x540   :  { %v16594_v28 = vld [vmem:[#allocation5 + $0x1ee8] sm:$0xf0] }
 0x541   :  { %v19863_v30 = vld [vmem:[#allocation5 + $0x188c] sm:$0xf]  ;;  %v16597_v60 = vor.u32 %v20063_v21, %v16594_v28  ;;  %10532 = vmatpush.bf16.msrb.mxu2 %v16341_v0 }
 0x542   :  { %v15794_v33 = vld [vmem:[#allocation5 + $0x18a8] sm:$0xf0] }
 0x543   :  { %v19927_v35 = vld [vmem:[#allocation5 + $0x1a8c] sm:$0xf]  ;;  %v15797_v49 = vor.u32 %v19863_v30, %v15794_v33  ;;  %10545 = vmatpush.bf16.msrb.mxu3 %v16597_v60  ;;  %v10279_v33 = vpop.f32.mrf.mxu2 }
 0x544   :  { %v16050_v41 = vld [vmem:[#allocation5 + $0x1aa8] sm:$0xf0] }
 0x545   :  { %v19991_v4 = vld [vmem:[#allocation5 + $0x1c8c] sm:$0xf]  ;;  %v16053_v54 = vor.u32 %v19927_v35, %v16050_v41  ;;  %10507 = vmatpush.bf16.msrb.mxu0 %v15797_v49  ;;  %v10292_v41 = vpop.f32.mrf.mxu3 }
 0x546   :  { %v16306_v45 = vld [vmem:[#allocation5 + $0x1ca8] sm:$0xf0] }
 0x547   :  { %v20055_v47 = vld [vmem:[#allocation5 + $0x1e8c] sm:$0xf]  ;;  %v16309_v55 = vor.u32 %v19991_v4, %v16306_v45  ;;  %10520 = vmatpush.bf16.msrb.mxu1 %v16053_v54 }
 0x548   :  { %v16562_v12 = vld [vmem:[#allocation5 + $0x1ea8] sm:$0xf0] }
 0x549   :  { %v19855_v56 = vld [vmem:[#allocation5 + $0x184c] sm:$0xf]  ;;  %v16565_v43 = vor.u32 %v20055_v47, %v16562_v12  ;;  %10533 = vmatpush.bf16.msrb.mxu2 %v16309_v55 }
 0x54a   :  { %v15762_v10 = vld [vmem:[#allocation5 + $0x1868] sm:$0xf0] }
 0x54b   :  { %v19919_v57 = vld [vmem:[#allocation5 + $0x1a4c] sm:$0xf]  ;;  %v15765_v6 = vor.u32 %v19855_v56, %v15762_v10  ;;  %10546 = vmatpush.bf16.msrb.mxu3 %v16565_v43 }
 0x54c   :  { %v16018_v44 = vld [vmem:[#allocation5 + $0x1a68] sm:$0xf0] }
 0x54d   :  { %v19983_v59 = vld [vmem:[#allocation5 + $0x1c4c] sm:$0xf]  ;;  %v16021_v11 = vor.u32 %v19919_v57, %v16018_v44  ;;  %10508 = vmatpush.bf16.msrb.mxu0 %v15765_v6 }
 0x54e   :  { %v16274_v62 = vld [vmem:[#allocation5 + $0x1c68] sm:$0xf0] }
 0x54f   :  { %v20047_v63 = vld [vmem:[#allocation5 + $0x1e4c] sm:$0xf]  ;;  %v16277_v14 = vor.u32 %v19983_v59, %v16274_v62  ;;  %10521 = vmatpush.bf16.msrb.mxu1 %v16021_v11 }
 0x550   :  { %v16530_v53 = vld [vmem:[#allocation5 + $0x1e68] sm:$0xf0] }
 0x551   :  { %v19847_v51 = vld [vmem:[#allocation5 + $0x180c] sm:$0xf]  ;;  %v16533_v58 = vor.u32 %v20047_v63, %v16530_v53  ;;  %10534 = vmatpush.bf16.msrb.mxu2 %v16277_v14 }
 0x552   :  { %v15730_v7 = vld [vmem:[#allocation5 + $0x1828] sm:$0xf0] }
 0x553   :  { %v19911_v16 = vld [vmem:[#allocation5 + $0x1a0c] sm:$0xf]  ;;  %v15733_v4 = vor.u32 %v19847_v51, %v15730_v7  ;;  %10547 = vmatpush.bf16.msrb.mxu3 %v16533_v58 }
 0x554   :  { %v15986_v21 = vld [vmem:[#allocation5 + $0x1a28] sm:$0xf0] }
 0x555   :  { %v19975_v28 = vld [vmem:[#allocation5 + $0x1c0c] sm:$0xf]  ;;  %v15989_v47 = vor.u32 %v19911_v16, %v15986_v21  ;;  %10509 = vmatpush.bf16.msrb.mxu0 %v15733_v4 }
 0x556   :  { %v16242_v17 = vld [vmem:[#allocation5 + $0x1c28] sm:$0xf0] }
 0x557   :  { %v20039_v0 = vld [vmem:[#allocation5 + $0x1e0c] sm:$0xf]  ;;  %v16245_v12 = vor.u32 %v19975_v28, %v16242_v17  ;;  %10522 = vmatpush.bf16.msrb.mxu1 %v15989_v47 }
 0x558   :  { %v16498_v30 = vld [vmem:[#allocation5 + $0x1e28] sm:$0xf0]  ;;  %10510 = vmatmul.bf16.vlgmr.msrb.gmra.mxu0 %v21018_v13 }
 0x559   :  { %v20159_v35 = vld [vmem:[#allocation5 + $0x21cc] sm:$0xf]  ;;  %v16501_v50 = vor.u32 %v20039_v0, %v16498_v30  ;;  %10535 = vmatpush.bf16.msrb.mxu2 %v16245_v12 }
 0x55a   :  { %v16978_v60 = vld [vmem:[#allocation5 + $0x21e8] sm:$0xf0]  ;;  %10523 = vmatmul.bf16.vlgmr.msrb.gmra.mxu1 %v21022_v20 }
 0x55b   :  { %v20223_v39 = vld [vmem:[#allocation5 + $0x23cc] sm:$0xf]  ;;  %v16981_v54 = vor.u32 %v20159_v35, %v16978_v60  ;;  %10548 = vmatpush.bf16.msrb.mxu3 %v16501_v50 }
 0x55c   :  { %v17234_v45 = vld [vmem:[#allocation5 + $0x23e8] sm:$0xf0]  ;;  %10536 = vmatmul.bf16.vlgmr.msrb.gmra.mxu2 %v21020_v19 }
 0x55d   :  { %v20287_v3 = vld [vmem:[#allocation5 + $0x25cc] sm:$0xf]  ;;  %v17237_v55 = vor.u32 %v20223_v39, %v17234_v45  ;;  %10554 = vmatpush.bf16.msra.mxu0 %v16981_v54 }
 0x55e   :  { %v17490_v46 = vld [vmem:[#allocation5 + $0x25e8] sm:$0xf0]  ;;  %10549 = vmatmul.bf16.vlgmr.msrb.gmra.mxu3 %v21024_v26 }
 0x55f   :  { %v20351_v48 = vld [vmem:[#allocation5 + $0x27cc] sm:$0xf]  ;;  %v17493_v56 = vor.u32 %v20287_v3, %v17490_v46  ;;  %10567 = vmatpush.bf16.msra.mxu1 %v17237_v55 }
 0x560   :  { %v17746_v49 = vld [vmem:[#allocation5 + $0x27e8] sm:$0xf0] }
 0x561   :  { %v20151_v10 = vld [vmem:[#allocation5 + $0x218c] sm:$0xf]  ;;  %v17749_v44 = vor.u32 %v20351_v48, %v17746_v49  ;;  %10580 = vmatpush.bf16.msra.mxu2 %v17493_v56  ;;  %v10303_v48 = vpop.f32.mrf.mxu0  ;;  %v10316_v56 = vpop.f32.mrf.mxu1 }
 0x562   :  { %v16946_v57 = vld [vmem:[#allocation5 + $0x21a8] sm:$0xf0]  ;;  %v10304_v54 = vadd.f32 %v10303_v48, %v21160_v52 }
 0x563   :  { %v20215_v43 = vld [vmem:[#allocation5 + $0x238c] sm:$0xf]  ;;  %v16949_v51 = vor.u32 %v20151_v10, %v16946_v57  ;;  %10593 = vmatpush.bf16.msra.mxu3 %v17749_v44 }
 0x564   :  { %v17202_v59 = vld [vmem:[#allocation5 + $0x23a8] sm:$0xf0] }
 0x565   :  { %v20279_v62 = vld [vmem:[#allocation5 + $0x258c] sm:$0xf]  ;;  %v17205_v7 = vor.u32 %v20215_v43, %v17202_v59  ;;  %10555 = vmatpush.bf16.msra.mxu0 %v16949_v51 }
 0x566   :  { %v17458_v63 = vld [vmem:[#allocation5 + $0x25a8] sm:$0xf0] }
 0x567   :  { %v20343_v53 = vld [vmem:[#allocation5 + $0x278c] sm:$0xf]  ;;  %v17461_v11 = vor.u32 %v20279_v62, %v17458_v63  ;;  %10568 = vmatpush.bf16.msra.mxu1 %v17205_v7  ;;  %v10317_v63 = vadd.f32 %v10316_v56, %v10304_v54 }
 0x568   :  { %v17714_v6 = vld [vmem:[#allocation5 + $0x27a8] sm:$0xf0] }
 0x569   :  { %v20143_v14 = vld [vmem:[#allocation5 + $0x214c] sm:$0xf]  ;;  %v17717_v28 = vor.u32 %v20343_v53, %v17714_v6  ;;  %10581 = vmatpush.bf16.msra.mxu2 %v17461_v11 }
 0x56a   :  { %v16914_v16 = vld [vmem:[#allocation5 + $0x2168] sm:$0xf0] }
 0x56b   :  { %v20207_v21 = vld [vmem:[#allocation5 + $0x234c] sm:$0xf]  ;;  %v16917_v35 = vor.u32 %v20143_v14, %v16914_v16  ;;  %10594 = vmatpush.bf16.msra.mxu3 %v17717_v28 }
 0x56c   :  { %v17170_v58 = vld [vmem:[#allocation5 + $0x2368] sm:$0xf0] }
 0x56d   :  { %v20271_v17 = vld [vmem:[#allocation5 + $0x254c] sm:$0xf]  ;;  %v17173_v60 = vor.u32 %v20207_v21, %v17170_v58  ;;  %10556 = vmatpush.bf16.msra.mxu0 %v16917_v35 }
 0x56e   :  { %v17426_v0 = vld [vmem:[#allocation5 + $0x2568] sm:$0xf0] }
 0x56f   :  { %v20335_v30 = vld [vmem:[#allocation5 + $0x274c] sm:$0xf]  ;;  %v17429_v39 = vor.u32 %v20271_v17, %v17426_v0  ;;  %10569 = vmatpush.bf16.msra.mxu1 %v17173_v60  ;;  %v10329_v0 = vpop.f32.mrf.mxu2 }
 0x570   :  { %v17682_v33 = vld [vmem:[#allocation5 + $0x2768] sm:$0xf0]  ;;  %v10330_v60 = vadd.f32 %v10329_v0, %v10317_v63 }
 0x571   :  { %v20135_v41 = vld [vmem:[#allocation5 + $0x210c] sm:$0xf]  ;;  %v17685_v3 = vor.u32 %v20335_v30, %v17682_v33  ;;  %10582 = vmatpush.bf16.msra.mxu2 %v17429_v39  ;;  %v10342_v39 = vpop.f32.mrf.mxu3 }
 0x572   :  { %v16882_v4 = vld [vmem:[#allocation5 + $0x2128] sm:$0xf0] }
 0x573   :  { %v20199_v45 = vld [vmem:[#allocation5 + $0x230c] sm:$0xf]  ;;  %v16885_v55 = vor.u32 %v20135_v41, %v16882_v4  ;;  %10595 = vmatpush.bf16.msra.mxu3 %v17685_v3 }
 0x574   :  { %v17138_v46 = vld [vmem:[#allocation5 + $0x2328] sm:$0xf0] }
 0x575   :  { %v20263_v47 = vld [vmem:[#allocation5 + $0x250c] sm:$0xf]  ;;  %v17141_v10 = vor.u32 %v20199_v45, %v17138_v46  ;;  %10557 = vmatpush.bf16.msra.mxu0 %v16885_v55  ;;  %v10305_v45 = vpop.f32.mrf.mxu0  ;;  %v10318_v46 = vpop.f32.mrf.mxu1 }
 0x576   :  { %v17394_v12 = vld [vmem:[#allocation5 + $0x2528] sm:$0xf0] }
 0x577   :  { %v20327_v49 = vld [vmem:[#allocation5 + $0x270c] sm:$0xf]  ;;  %v17397_v57 = vor.u32 %v20263_v47, %v17394_v12  ;;  %10570 = vmatpush.bf16.msra.mxu1 %v17141_v10  ;;  %v21167_v47 = vadd.f32 %v10342_v39, %v10330_v60 }
 0x578   :  { %v17650_v50 = vld [vmem:[#allocation5 + $0x2728] sm:$0xf0] }
 0x579   :  { %v20127_v43 = vld [vmem:[#allocation5 + $0x20cc] sm:$0xf]  ;;  %v17653_v62 = vor.u32 %v20327_v49, %v17650_v50  ;;  %10583 = vmatpush.bf16.msra.mxu2 %v17397_v57 }
 0x57a   :  { %v16850_v44 = vld [vmem:[#allocation5 + $0x20e8] sm:$0xf0] }
 0x57b   :  { %v20191_v59 = vld [vmem:[#allocation5 + $0x22cc] sm:$0xf]  ;;  %v16853_v14 = vor.u32 %v20127_v43, %v16850_v44  ;;  %10596 = vmatpush.bf16.msra.mxu3 %v17653_v62 }
 0x57c   :  { %v17106_v53 = vld [vmem:[#allocation5 + $0x22e8] sm:$0xf0] }
 0x57d   :  { %v20255_v6 = vld [vmem:[#allocation5 + $0x24cc] sm:$0xf]  ;;  %v17109_v52 = vor.u32 %v20191_v59, %v17106_v53  ;;  %10558 = vmatpush.bf16.msra.mxu0 %v16853_v14 }
 0x57e   :  { %v17362_v51 = vld [vmem:[#allocation5 + $0x24e8] sm:$0xf0] }
 0x57f   :  { %v20319_v7 = vld [vmem:[#allocation5 + $0x26cc] sm:$0xf]  ;;  %v17365_v16 = vor.u32 %v20255_v6, %v17362_v51  ;;  %10571 = vmatpush.bf16.msra.mxu1 %v17109_v52 }
 0x580   :  { %v17618_v11 = vld [vmem:[#allocation5 + $0x26e8] sm:$0xf0] }
 0x581   :  { %v20119_v21 = vld [vmem:[#allocation5 + $0x208c] sm:$0xf]  ;;  %v17621_v17 = vor.u32 %v20319_v7, %v17618_v11  ;;  %10584 = vmatpush.bf16.msra.mxu2 %v17365_v16 }
 0x582   :  { %v16818_v28 = vld [vmem:[#allocation5 + $0x20a8] sm:$0xf0] }
 0x583   :  { %v20183_v58 = vld [vmem:[#allocation5 + $0x228c] sm:$0xf]  ;;  %v16821_v3 = vor.u32 %v20119_v21, %v16818_v28  ;;  %10597 = vmatpush.bf16.msra.mxu3 %v17621_v17  ;;  %v10331_v28 = vpop.f32.mrf.mxu2 }
 0x584   :  { %v17074_v30 = vld [vmem:[#allocation5 + $0x22a8] sm:$0xf0] }
 0x585   :  { %v20247_v33 = vld [vmem:[#allocation5 + $0x248c] sm:$0xf]  ;;  %v17077_v12 = vor.u32 %v20183_v58, %v17074_v30  ;;  %10559 = vmatpush.bf16.msra.mxu0 %v16821_v3  ;;  %v10344_v30 = vpop.f32.mrf.mxu3 }
 0x586   :  { %v17330_v35 = vld [vmem:[#allocation5 + $0x24a8] sm:$0xf0] }
 0x587   :  { %v20311_v41 = vld [vmem:[#allocation5 + $0x268c] sm:$0xf]  ;;  %v17333_v48 = vor.u32 %v20247_v33, %v17330_v35  ;;  %10572 = vmatpush.bf16.msra.mxu1 %v17077_v12 }
 0x588   :  { %v17586_v4 = vld [vmem:[#allocation5 + $0x26a8] sm:$0xf0] }
 0x589   :  { %v20111_v49 = vld [vmem:[#allocation5 + $0x204c] sm:$0xf]  ;;  %v17589_v55 = vor.u32 %v20311_v41, %v17586_v4  ;;  %10585 = vmatpush.bf16.msra.mxu2 %v17333_v48 }
 0x58a   :  { %v16786_v50 = vld [vmem:[#allocation5 + $0x2068] sm:$0xf0] }
 0x58b   :  { %v20175_v54 = vld [vmem:[#allocation5 + $0x224c] sm:$0xf]  ;;  %v16789_v59 = vor.u32 %v20111_v49, %v16786_v50  ;;  %10598 = vmatpush.bf16.msra.mxu3 %v17589_v55 }
 0x58c   :  { %v17042_v56 = vld [vmem:[#allocation5 + $0x2268] sm:$0xf0] }
 0x58d   :  { %v20239_v10 = vld [vmem:[#allocation5 + $0x244c] sm:$0xf]  ;;  %v17045_v53 = vor.u32 %v20175_v54, %v17042_v56  ;;  %10560 = vmatpush.bf16.msra.mxu0 %v16789_v59 }
 0x58e   :  { %v17298_v57 = vld [vmem:[#allocation5 + $0x2468] sm:$0xf0] }
 0x58f   :  { %v20303_v43 = vld [vmem:[#allocation5 + $0x264c] sm:$0xf]  ;;  %v17301_v6 = vor.u32 %v20239_v10, %v17298_v57  ;;  %10573 = vmatpush.bf16.msra.mxu1 %v17045_v53 }
 0x590   :  { %v17554_v44 = vld [vmem:[#allocation5 + $0x2668] sm:$0xf0] }
 0x591   :  { %v20103_v62 = vld [vmem:[#allocation5 + $0x200c] sm:$0xf]  ;;  %v17557_v14 = vor.u32 %v20303_v43, %v17554_v44  ;;  %10586 = vmatpush.bf16.msra.mxu2 %v17301_v6 }
 0x592   :  { %v16754_v63 = vld [vmem:[#allocation5 + $0x2028] sm:$0xf0] }
 0x593   :  { %v20167_v51 = vld [vmem:[#allocation5 + $0x220c] sm:$0xf]  ;;  %v16757_v33 = vor.u32 %v20103_v62, %v16754_v63  ;;  %10599 = vmatpush.bf16.msra.mxu3 %v17557_v14 }
 0x594   :  { %v17010_v7 = vld [vmem:[#allocation5 + $0x2228] sm:$0xf0] }
 0x595   :  { %v20231_v11 = vld [vmem:[#allocation5 + $0x240c] sm:$0xf]  ;;  %v17013_v41 = vor.u32 %v20167_v51, %v17010_v7  ;;  %10561 = vmatpush.bf16.msra.mxu0 %v16757_v33 }
 0x596   :  { %v17266_v52 = vld [vmem:[#allocation5 + $0x2428] sm:$0xf0] }
 0x597   :  { %v20295_v16 = vld [vmem:[#allocation5 + $0x260c] sm:$0xf]  ;;  %v17269_v4 = vor.u32 %v20231_v11, %v17266_v52  ;;  %10574 = vmatpush.bf16.msra.mxu1 %v17013_v41 }
 0x598   :  { %v17522_v21 = vld [vmem:[#allocation5 + $0x2628] sm:$0xf0]  ;;  %10562 = vmatmul.bf16.vlgmr.msra.gmra.mxu0 %v21030_v24 }
 0x599   :  { %v20415_v58 = vld [vmem:[#allocation5 + $0x29cc] sm:$0xf]  ;;  %v17525_v46 = vor.u32 %v20295_v16, %v17522_v21  ;;  %10587 = vmatpush.bf16.msra.mxu2 %v17269_v4 }
 0x59a   :  { %v18002_v17 = vld [vmem:[#allocation5 + $0x29e8] sm:$0xf0]  ;;  %10575 = vmatmul.bf16.vlgmr.msra.gmra.mxu1 %v21034_v32 }
 0x59b   :  { %v20479_v0 = vld [vmem:[#allocation5 + $0x2bcc] sm:$0xf]  ;;  %v18005_v12 = vor.u32 %v20415_v58, %v18002_v17  ;;  %10600 = vmatpush.bf16.msra.mxu3 %v17525_v46 }
 0x59c   :  { %v18258_v35 = vld [vmem:[#allocation5 + $0x2be8] sm:$0xf0]  ;;  %10588 = vmatmul.bf16.vlgmr.msra.gmra.mxu2 %v21032_v31 }
 0x59d   :  { %v20543_v60 = vld [vmem:[#allocation5 + $0x2dcc] sm:$0xf]  ;;  %v18261_v48 = vor.u32 %v20479_v0, %v18258_v35  ;;  %10606 = vmatpush.bf16.msrb.mxu0 %v18005_v12 }
 0x59e   :  { %v18514_v39 = vld [vmem:[#allocation5 + $0x2de8] sm:$0xf0]  ;;  %10601 = vmatmul.bf16.vlgmr.msra.gmra.mxu3 %v21036_v36 }
 0x59f   :  { %v20607_v45 = vld [vmem:[#allocation5 + $0x2fcc] sm:$0xf]  ;;  %v18517_v49 = vor.u32 %v20543_v60, %v18514_v39  ;;  %10619 = vmatpush.bf16.msrb.mxu1 %v18261_v48  ;;  %v20702_v60 = vld [vmem:[#allocation7] sm:$0xff] }
 0x5a0   :  { %v18770_v3 = vld [vmem:[#allocation5 + $0x2fe8] sm:$0xf0]  ;;  %v1717_v39 = vperm.slane %v20702_v60, 3 }
 0x5a1   :  { %v20407_v50 = vld [vmem:[#allocation5 + $0x298c] sm:$0xf]  ;;  %v18773_v56 = vor.u32 %v20607_v45, %v18770_v3  ;;  %10632 = vmatpush.bf16.msrb.mxu2 %v18517_v49  ;;  %v10355_v49 = vpop.f32.mrf.mxu0 }
 0x5a2   :  { %v17970_v54 = vld [vmem:[#allocation5 + $0x29a8] sm:$0xf0] }
 0x5a3   :  { %v20471_v55 = vld [vmem:[#allocation5 + $0x2b8c] sm:$0xf]  ;;  %v17973_v62 = vor.u32 %v20407_v50, %v17970_v54  ;;  %10645 = vmatpush.bf16.msrb.mxu3 %v18773_v56 }
 0x5a4   :  { %v18226_v10 = vld [vmem:[#allocation5 + $0x2ba8] sm:$0xf0] }
 0x5a5   :  { %v20535_v57 = vld [vmem:[#allocation5 + $0x2d8c] sm:$0xf]  ;;  %v18229_v63 = vor.u32 %v20471_v55, %v18226_v10  ;;  %10607 = vmatpush.bf16.msrb.mxu0 %v17973_v62 }
 0x5a6   :  { %v18482_v43 = vld [vmem:[#allocation5 + $0x2da8] sm:$0xf0] }
 0x5a7   :  { %v20599_v44 = vld [vmem:[#allocation5 + $0x2f8c] sm:$0xf]  ;;  %v18485_v53 = vor.u32 %v20535_v57, %v18482_v43  ;;  %10620 = vmatpush.bf16.msrb.mxu1 %v18229_v63  ;;  %v10356_v57 = vadd.f32 %v10355_v49, %v1717_v39  ;;  %v10368_v43 = vpop.f32.mrf.mxu1 }
 0x5a8   :  { %v18738_v59 = vld [vmem:[#allocation5 + $0x2fa8] sm:$0xf0] }
 0x5a9   :  { %v20399_v6 = vld [vmem:[#allocation5 + $0x294c] sm:$0xf]  ;;  %v18741_v11 = vor.u32 %v20599_v44, %v18738_v59  ;;  %10633 = vmatpush.bf16.msrb.mxu2 %v18485_v53 }
 0x5aa   :  { %v17938_v51 = vld [vmem:[#allocation5 + $0x2968] sm:$0xf0] }
 0x5ab   :  { %v20463_v7 = vld [vmem:[#allocation5 + $0x2b4c] sm:$0xf]  ;;  %v17941_v58 = vor.u32 %v20399_v6, %v17938_v51  ;;  %10646 = vmatpush.bf16.msrb.mxu3 %v18741_v11  ;;  %v10369_v51 = vadd.f32 %v10368_v43, %v10356_v57 }
 0x5ac   :  { %v18194_v14 = vld [vmem:[#allocation5 + $0x2b68] sm:$0xf0] }
 0x5ad   :  { %v20527_v52 = vld [vmem:[#allocation5 + $0x2d4c] sm:$0xf]  ;;  %v18197_v0 = vor.u32 %v20463_v7, %v18194_v14  ;;  %10608 = vmatpush.bf16.msrb.mxu0 %v17941_v58 }
 0x5ae   :  { %v18450_v16 = vld [vmem:[#allocation5 + $0x2d68] sm:$0xf0] }
 0x5af   :  { %v20591_v21 = vld [vmem:[#allocation5 + $0x2f4c] sm:$0xf]  ;;  %v18453_v30 = vor.u32 %v20527_v52, %v18450_v16  ;;  %10621 = vmatpush.bf16.msrb.mxu1 %v18197_v0 }
 0x5b0   :  { %v18706_v28 = vld [vmem:[#allocation5 + $0x2f68] sm:$0xf0] }
 0x5b1   :  { %v20391_v17 = vld [vmem:[#allocation5 + $0x290c] sm:$0xf]  ;;  %v18709_v41 = vor.u32 %v20591_v21, %v18706_v28  ;;  %10634 = vmatpush.bf16.msrb.mxu2 %v18453_v30  ;;  %v10381_v28 = vpop.f32.mrf.mxu2 }
 0x5b2   :  { %v17906_v33 = vld [vmem:[#allocation5 + $0x2928] sm:$0xf0] }
 0x5b3   :  { %v20455_v35 = vld [vmem:[#allocation5 + $0x2b0c] sm:$0xf]  ;;  %v17909_v48 = vor.u32 %v20391_v17, %v17906_v33  ;;  %10647 = vmatpush.bf16.msrb.mxu3 %v18709_v41  ;;  %v10382_v33 = vadd.f32 %v10381_v28, %v10369_v51 }
 0x5b4   :  { %v18162_v4 = vld [vmem:[#allocation5 + $0x2b28] sm:$0xf0] }
 0x5b5   :  { %v20519_v45 = vld [vmem:[#allocation5 + $0x2d0c] sm:$0xf]  ;;  %v18165_v50 = vor.u32 %v20455_v35, %v18162_v4  ;;  %10609 = vmatpush.bf16.msrb.mxu0 %v17909_v48  ;;  %v10394_v35 = vpop.f32.mrf.mxu3 }
 0x5b6   :  { %v18418_v3 = vld [vmem:[#allocation5 + $0x2d28] sm:$0xf0]  ;;  %v21173_v4 = vadd.f32 %v10394_v35, %v10382_v33  ;;  %v19204_v33 = vld [vmem:[#allocation5 + $0x3ec] sm:$0xf0] }
 0x5b7   :  { %v20583_v46 = vld [vmem:[#allocation5 + $0x2f0c] sm:$0xf]  ;;  %v18421_v54 = vor.u32 %v20519_v45, %v18418_v3  ;;  %10622 = vmatpush.bf16.msrb.mxu1 %v18165_v50  ;;  %v10357_v45 = vpop.f32.mrf.mxu0  ;;  %v10370_v50 = vpop.f32.mrf.mxu1  ;;  %v13400_v35 = vld [vmem:[#allocation5 + $0x5d0] sm:$0xf] }
 0x5b8   :  { %v18674_v12 = vld [vmem:[#allocation5 + $0x2f28] sm:$0xf0]  ;;  %v13656_v45 = vld [vmem:[#allocation5 + $0x7d0] sm:$0xf] }
 0x5b9   :  { %v20383_v55 = vld [vmem:[#allocation5 + $0x28cc] sm:$0xf]  ;;  %v18677_v44 = vor.u32 %v20583_v46, %v18674_v12  ;;  %10635 = vmatpush.bf16.msrb.mxu2 %v18421_v54  ;;  %v12856_v50 = vld [vmem:[#allocation5 + $0x190] sm:$0xf] }
 0x5ba   :  { %v17874_v56 = vld [vmem:[#allocation5 + $0x28e8] sm:$0xf0] }
 0x5bb   :  { %v20447_v10 = vld [vmem:[#allocation5 + $0x2acc] sm:$0xf]  ;;  %v17877_v7 = vor.u32 %v20383_v55, %v17874_v56  ;;  %10648 = vmatpush.bf16.msrb.mxu3 %v18677_v44 }
 0x5bc   :  { %v18130_v59 = vld [vmem:[#allocation5 + $0x2ae8] sm:$0xf0] }
 0x5bd   :  { %v20511_v62 = vld [vmem:[#allocation5 + $0x2ccc] sm:$0xf]  ;;  %v18133_v11 = vor.u32 %v20447_v10, %v18130_v59  ;;  %10610 = vmatpush.bf16.msrb.mxu0 %v17877_v7  ;;  %v10396_v28 = vpop.f32.mrf.mxu3 }
 0x5be   :  { %v18386_v63 = vld [vmem:[#allocation5 + $0x2ce8] sm:$0xf0]  ;;  %v19316_v28 = vld [vmem:[#allocation5 + $0x76c] sm:$0xf0] }
 0x5bf   :  { %v20575_v53 = vld [vmem:[#allocation5 + $0x2ecc] sm:$0xf]  ;;  %v18389_v14 = vor.u32 %v20511_v62, %v18386_v63  ;;  %10623 = vmatpush.bf16.msrb.mxu1 %v18133_v11  ;;  %v10383_v11 = vpop.f32.mrf.mxu2 }
 0x5c0   :  { %v18642_v6 = vld [vmem:[#allocation5 + $0x2ee8] sm:$0xf0] }
 0x5c1   :  { %v20375_v52 = vld [vmem:[#allocation5 + $0x288c] sm:$0xf]  ;;  %v18645_v58 = vor.u32 %v20575_v53, %v18642_v6  ;;  %10636 = vmatpush.bf16.msrb.mxu2 %v18389_v14 }
 0x5c2   :  { %v17842_v16 = vld [vmem:[#allocation5 + $0x28a8] sm:$0xf0] }
 0x5c3   :  { %v20439_v21 = vld [vmem:[#allocation5 + $0x2a8c] sm:$0xf]  ;;  %v17845_v41 = vor.u32 %v20375_v52, %v17842_v16  ;;  %10649 = vmatpush.bf16.msrb.mxu3 %v18645_v58  ;;  %v12888_v58 = vld [vmem:[#allocation5 + $0x1d0] sm:$0xf] }
 0x5c4   :  { %v18098_v17 = vld [vmem:[#allocation5 + $0x2aa8] sm:$0xf0] }
 0x5c5   :  { %v20503_v0 = vld [vmem:[#allocation5 + $0x2c8c] sm:$0xf]  ;;  %v18101_v3 = vor.u32 %v20439_v21, %v18098_v17  ;;  %10611 = vmatpush.bf16.msrb.mxu0 %v17845_v41  ;;  %v19140_v17 = vld [vmem:[#allocation5 + $0x1ec] sm:$0xf0] }
 0x5c6   :  { %v18354_v30 = vld [vmem:[#allocation5 + $0x2ca8] sm:$0xf0] }
 0x5c7   :  { %v20567_v60 = vld [vmem:[#allocation5 + $0x2e8c] sm:$0xf]  ;;  %v18357_v46 = vor.u32 %v20503_v0, %v18354_v30  ;;  %10624 = vmatpush.bf16.msrb.mxu1 %v18101_v3  ;;  %v13144_v0 = vld [vmem:[#allocation5 + $0x3d0] sm:$0xf] }
 0x5c8   :  { %v18610_v39 = vld [vmem:[#allocation5 + $0x2ea8] sm:$0xf0]  ;;  %v19332_v3 = vld [vmem:[#allocation5 + $0x7ec] sm:$0xf0] }
 0x5c9   :  { %v20367_v12 = vld [vmem:[#allocation5 + $0x284c] sm:$0xf]  ;;  %v18613_v54 = vor.u32 %v20567_v60, %v18610_v39  ;;  %10637 = vmatpush.bf16.msrb.mxu2 %v18357_v46  ;;  %v19268_v60 = vld [vmem:[#allocation5 + $0x5ec] sm:$0xf0] }
 0x5ca   :  { %v17810_v48 = vld [vmem:[#allocation5 + $0x2868] sm:$0xf0] }
 0x5cb   :  { %v20431_v49 = vld [vmem:[#allocation5 + $0x2a4c] sm:$0xf]  ;;  %v17813_v44 = vor.u32 %v20367_v12, %v17810_v48  ;;  %10650 = vmatpush.bf16.msrb.mxu3 %v18613_v54  ;;  %v12889_v12 = vor.u32 %v19140_v17, %v12888_v58  ;;  %v13145_v48 = vor.u32 %v19204_v33, %v13144_v0  ;;  %v19132_v54 = vld [vmem:[#allocation5 + $0x1ac] sm:$0xf0] }
 0x5cc   :  { %v18066_v55 = vld [vmem:[#allocation5 + $0x2a68] sm:$0xf0]  ;;  %v19116_v33 = vld [vmem:[#allocation5 + $0x12c] sm:$0xf0] }
 0x5cd   :  { %v20495_v56 = vld [vmem:[#allocation5 + $0x2c4c] sm:$0xf]  ;;  %v18069_v63 = vor.u32 %v20431_v49, %v18066_v55  ;;  %10612 = vmatpush.bf16.msrb.mxu0 %v17813_v44  ;;  %v13401_v49 = vor.u32 %v19268_v60, %v13400_v35  ;;  %v13112_v55 = vld [vmem:[#allocation5 + $0x390] sm:$0xf] }
 0x5ce   :  { %v18322_v10 = vld [vmem:[#allocation5 + $0x2c68] sm:$0xf0]  ;;  %v13624_v44 = vld [vmem:[#allocation5 + $0x790] sm:$0xf] }
 0x5cf   :  { %v20559_v57 = vld [vmem:[#allocation5 + $0x2e4c] sm:$0xf]  ;;  %v18325_v53 = vor.u32 %v20495_v56, %v18322_v10  ;;  %10625 = vmatpush.bf16.msrb.mxu1 %v18069_v63  ;;  %v13657_v56 = vor.u32 %v19332_v3, %v13656_v45  ;;  %v19196_v10 = vld [vmem:[#allocation5 + $0x3ac] sm:$0xf0] }
 0x5d0   :  { %v18578_v43 = vld [vmem:[#allocation5 + $0x2e68] sm:$0xf0]  ;;  %v13113_v63 = vor.u32 %v19196_v10, %v13112_v55  ;;  %v13048_v35 = vld [vmem:[#allocation5 + $0x310] sm:$0xf] }
 0x5d1   :  { %v20359_v59 = vld [vmem:[#allocation5 + $0x280c] sm:$0xf]  ;;  %v18581_v14 = vor.u32 %v20559_v57, %v18578_v43  ;;  %10638 = vmatpush.bf16.msrb.mxu2 %v18325_v53  ;;  %v13368_v57 = vld [vmem:[#allocation5 + $0x590] sm:$0xf] }
 0x5d2   :  { %v17778_v62 = vld [vmem:[#allocation5 + $0x2828] sm:$0xf0]  ;;  %v19260_v43 = vld [vmem:[#allocation5 + $0x5ac] sm:$0xf0] }
 0x5d3   :  { %v20423_v6 = vld [vmem:[#allocation5 + $0x2a0c] sm:$0xf]  ;;  %v17781_v30 = vor.u32 %v20359_v59, %v17778_v62  ;;  %10651 = vmatpush.bf16.msrb.mxu3 %v18581_v14  ;;  %v19324_v59 = vld [vmem:[#allocation5 + $0x7ac] sm:$0xf0]  ;;  %v12857_v62 = vor.u32 %v19132_v54, %v12856_v50  ;;  %v13369_v53 = vor.u32 %v19260_v43, %v13368_v57  ;;  %v10420_v57 = vpop.f32.mrf.mxu1 }
 0x5d4   :  { %v18034_v51 = vld [vmem:[#allocation5 + $0x2a28] sm:$0xf0]  ;;  %v13625_v11 = vor.u32 %v19324_v59, %v13624_v44  ;;  %v19188_v14 = vld [vmem:[#allocation5 + $0x36c] sm:$0xf0] }
 0x5d5   :  { %v20487_v7 = vld [vmem:[#allocation5 + $0x2c0c] sm:$0xf]  ;;  %v18037_v39 = vor.u32 %v20423_v6, %v18034_v51  ;;  %10613 = vmatpush.bf16.msrb.mxu0 %v17781_v30  ;;  %v12824_v6 = vld [vmem:[#allocation5 + $0x150] sm:$0xf] }
 0x5d6   :  { %v18290_v52 = vld [vmem:[#allocation5 + $0x2c28] sm:$0xf0]  ;;  %v19124_v51 = vld [vmem:[#allocation5 + $0x16c] sm:$0xf0] }
 0x5d7   :  { %v20551_v16 = vld [vmem:[#allocation5 + $0x2e0c] sm:$0xf]  ;;  %v18293_v41 = vor.u32 %v20487_v7, %v18290_v52  ;;  %10626 = vmatpush.bf16.msrb.mxu1 %v18037_v39  ;;  %v13080_v7 = vld [vmem:[#allocation5 + $0x350] sm:$0xf]  ;;  %v12825_v58 = vor.u32 %v19124_v51, %v12824_v6 }
 0x5d8   :  { %v18546_v21 = vld [vmem:[#allocation5 + $0x2e28] sm:$0xf0]  ;;  %10614 = vmatmul.bf16.vlgmr.msrb.gmra.mxu0 %v21044_v61  ;;  %v13336_v52 = vld [vmem:[#allocation5 + $0x550] sm:$0xf]  ;;  %v13081_v17 = vor.u32 %v19188_v14, %v13080_v7 }
 0x5d9   :  { %v18549_v46 = vor.u32 %v20551_v16, %v18546_v21  ;;  %10639 = vmatpush.bf16.msrb.mxu2 %v18293_v41  ;;  %10658 = vmatpush.bf16.msra.mxu0 %v12889_v12  ;;  %v19252_v16 = vld [vmem:[#allocation5 + $0x56c] sm:$0xf0] }
 0x5da   :  { %10627 = vmatmul.bf16.vlgmr.msrb.gmra.mxu1 %v21048_v2  ;;  %v13592_v21 = vld [vmem:[#allocation5 + $0x750] sm:$0xf]  ;;  %v13337_v0 = vor.u32 %v19252_v16, %v13336_v52 }
 0x5db   :  { %10652 = vmatpush.bf16.msrb.mxu3 %v18549_v46  ;;  %10671 = vmatpush.bf16.msra.mxu1 %v13145_v48  ;;  %v12792_v30 = vld [vmem:[#allocation5 + $0x110] sm:$0xf]  ;;  %v13593_v60 = vor.u32 %v19316_v28, %v13592_v21  ;;  %v10407_v48 = vpop.f32.mrf.mxu0  ;;  %v10433_v21 = vpop.f32.mrf.mxu2 }
 0x5dc   :  { %10640 = vmatmul.bf16.vlgmr.msrb.gmra.mxu2 %v21046_v1  ;;  %v19180_v39 = vld [vmem:[#allocation5 + $0x32c] sm:$0xf0]  ;;  %v12793_v12 = vor.u32 %v19116_v33, %v12792_v30  ;;  %v10408_v10 = vadd.f32 %v10407_v48, %v21173_v4  ;;  %v10446_v30 = vpop.f32.mrf.mxu3 }
 0x5dd   :  { %10684 = vmatpush.bf16.msra.mxu2 %v13401_v49  ;;  %10659 = vmatpush.bf16.msra.mxu0 %v12857_v62  ;;  %v13304_v41 = vld [vmem:[#allocation5 + $0x510] sm:$0xf]  ;;  %v13049_v49 = vor.u32 %v19180_v39, %v13048_v35 }
 0x5de   :  { %10653 = vmatmul.bf16.vlgmr.msrb.gmra.mxu3 %v21050_v5  ;;  %v19244_v45 = vld [vmem:[#allocation5 + $0x52c] sm:$0xf0]  ;;  %v10421_v6 = vadd.f32 %v10420_v57, %v10408_v10 }
 0x5df   :  { %10697 = vmatpush.bf16.msra.mxu3 %v13657_v56  ;;  %10672 = vmatpush.bf16.msra.mxu1 %v13113_v63  ;;  %v13560_v3 = vld [vmem:[#allocation5 + $0x710] sm:$0xf]  ;;  %v13305_v50 = vor.u32 %v19244_v45, %v13304_v41 }
 0x5e0   :  { %v19308_v46 = vld [vmem:[#allocation5 + $0x72c] sm:$0xf0] }
 0x5e1   :  { %10685 = vmatpush.bf16.msra.mxu2 %v13369_v53  ;;  %10660 = vmatpush.bf16.msra.mxu0 %v12825_v58  ;;  %v12760_v54 = vld [vmem:[#allocation5 + $0xd0] sm:$0xf]  ;;  %v13561_v43 = vor.u32 %v19308_v46, %v13560_v3 }
 0x5e2   :  { %v19108_v55 = vld [vmem:[#allocation5 + $0xec] sm:$0xf0] }
 0x5e3   :  { %10698 = vmatpush.bf16.msra.mxu3 %v13625_v11  ;;  %10673 = vmatpush.bf16.msra.mxu1 %v13081_v17  ;;  %v13016_v56 = vld [vmem:[#allocation5 + $0x2d0] sm:$0xf]  ;;  %v12761_v51 = vor.u32 %v19108_v55, %v12760_v54  ;;  %v10409_v41 = vpop.f32.mrf.mxu0 }
 0x5e4   :  { %v19172_v44 = vld [vmem:[#allocation5 + $0x2ec] sm:$0xf0] }
 0x5e5   :  { %10686 = vmatpush.bf16.msra.mxu2 %v13337_v0  ;;  %v13272_v59 = vld [vmem:[#allocation5 + $0x4d0] sm:$0xf]  ;;  %10661 = vmatpush.bf16.msra.mxu0 %v12793_v12  ;;  %v13017_v7 = vor.u32 %v19172_v44, %v13016_v56  ;;  %v10434_v0 = vadd.f32 %v10433_v21, %v10421_v6  ;;  %v10448_v21 = vpop.f32.mrf.mxu3 }
 0x5e6   :  { %v19236_v62 = vld [vmem:[#allocation5 + $0x4ec] sm:$0xf0] }
 0x5e7   :  { %10699 = vmatpush.bf16.msra.mxu3 %v13593_v60  ;;  %v13528_v63 = vld [vmem:[#allocation5 + $0x6d0] sm:$0xf]  ;;  %10674 = vmatpush.bf16.msra.mxu1 %v13049_v49  ;;  %v13273_v11 = vor.u32 %v19236_v62, %v13272_v59  ;;  %v21180_v39 = vadd.f32 %v10446_v30, %v10434_v0  ;;  %v10422_v49 = vpop.f32.mrf.mxu1 }
 0x5e8   :  { %v19300_v53 = vld [vmem:[#allocation5 + $0x6ec] sm:$0xf0] }
 0x5e9   :  { %10687 = vmatpush.bf16.msra.mxu2 %v13305_v50  ;;  %v12728_v14 = vld [vmem:[#allocation5 + $0x90] sm:$0xf]  ;;  %v13529_v4 = vor.u32 %v19300_v53, %v13528_v63  ;;  %10662 = vmatpush.bf16.msra.mxu0 %v12761_v51 }
 0x5ea   :  { %v19100_v52 = vld [vmem:[#allocation5 + $0xac] sm:$0xf0] }
 0x5eb   :  { %v12984_v16 = vld [vmem:[#allocation5 + $0x290] sm:$0xf]  ;;  %10700 = vmatpush.bf16.msra.mxu3 %v13561_v43  ;;  %v12729_v60 = vor.u32 %v19100_v52, %v12728_v14  ;;  %10675 = vmatpush.bf16.msra.mxu1 %v13017_v7  ;;  %v10435_v7 = vpop.f32.mrf.mxu2 }
 0x5ec   :  { %v19164_v28 = vld [vmem:[#allocation5 + $0x2ac] sm:$0xf0] }
 0x5ed   :  { %v13240_v58 = vld [vmem:[#allocation5 + $0x490] sm:$0xf]  ;;  %10688 = vmatpush.bf16.msra.mxu2 %v13273_v11  ;;  %v12985_v45 = vor.u32 %v19164_v28, %v12984_v16  ;;  %10663 = vmatpush.bf16.msra.mxu0 %v12729_v60 }
 0x5ee   :  { %v19228_v17 = vld [vmem:[#allocation5 + $0x4ac] sm:$0xf0] }
 0x5ef   :  { %v13496_v33 = vld [vmem:[#allocation5 + $0x690] sm:$0xf]  ;;  %v13241_v3 = vor.u32 %v19228_v17, %v13240_v58  ;;  %10701 = vmatpush.bf16.msra.mxu3 %v13529_v4  ;;  %10676 = vmatpush.bf16.msra.mxu1 %v12985_v45 }
 0x5f0   :  { %v19292_v35 = vld [vmem:[#allocation5 + $0x6ac] sm:$0xf0] }
 0x5f1   :  { %v12696_v46 = vld [vmem:[#allocation5 + $0x50] sm:$0xf]  ;;  %v13497_v50 = vor.u32 %v19292_v35, %v13496_v33  ;;  %10689 = vmatpush.bf16.msra.mxu2 %v13241_v3 }
 0x5f2   :  { %v19092_v12 = vld [vmem:[#allocation5 + $0x6c] sm:$0xf0] }
 0x5f3   :  { %v12952_v48 = vld [vmem:[#allocation5 + $0x250] sm:$0xf]  ;;  %v12697_v43 = vor.u32 %v19092_v12, %v12696_v46  ;;  %10702 = vmatpush.bf16.msra.mxu3 %v13497_v50 }
 0x5f4   :  { %v19156_v54 = vld [vmem:[#allocation5 + $0x26c] sm:$0xf0] }
 0x5f5   :  { %v13208_v55 = vld [vmem:[#allocation5 + $0x450] sm:$0xf]  ;;  %v12953_v62 = vor.u32 %v19156_v54, %v12952_v48  ;;  %10664 = vmatpush.bf16.msra.mxu0 %v12697_v43 }
 0x5f6   :  { %v19220_v56 = vld [vmem:[#allocation5 + $0x46c] sm:$0xf0] }
 0x5f7   :  { %v13464_v10 = vld [vmem:[#allocation5 + $0x650] sm:$0xf]  ;;  %v13209_v63 = vor.u32 %v19220_v56, %v13208_v55  ;;  %10677 = vmatpush.bf16.msra.mxu1 %v12953_v62 }
 0x5f8   :  { %v19284_v57 = vld [vmem:[#allocation5 + $0x66c] sm:$0xf0] }
 0x5f9   :  { %v12664_v44 = vld [vmem:[#allocation5 + $0x10] sm:$0xf]  ;;  %v13465_v11 = vor.u32 %v19284_v57, %v13464_v10  ;;  %10690 = vmatpush.bf16.msra.mxu2 %v13209_v63 }
 0x5fa   :  { %v19084_v59 = vld [vmem:[#allocation5 + $0x2c] sm:$0xf0] }
 0x5fb   :  { %v12920_v53 = vld [vmem:[#allocation5 + $0x210] sm:$0xf]  ;;  %v12665_v17 = vor.u32 %v19084_v59, %v12664_v44  ;;  %10703 = vmatpush.bf16.msra.mxu3 %v13465_v11 }
 0x5fc   :  { %v19148_v6 = vld [vmem:[#allocation5 + $0x22c] sm:$0xf0] }
 0x5fd   :  { %v13176_v51 = vld [vmem:[#allocation5 + $0x410] sm:$0xf]  ;;  %v12921_v35 = vor.u32 %v19148_v6, %v12920_v53  ;;  %10665 = vmatpush.bf16.msra.mxu0 %v12665_v17 }
 0x5fe   :  { %v19212_v14 = vld [vmem:[#allocation5 + $0x42c] sm:$0xf0] }
 0x5ff   :  { %v13432_v52 = vld [vmem:[#allocation5 + $0x610] sm:$0xf]  ;;  %v13177_v60 = vor.u32 %v19212_v14, %v13176_v51  ;;  %10678 = vmatpush.bf16.msra.mxu1 %v12921_v35 }
 0x600   :  { %v19276_v16 = vld [vmem:[#allocation5 + $0x62c] sm:$0xf0]  ;;  %10666 = vmatmul.bf16.vlgmr.msra.gmra.mxu0 %v20984_v9 }
 0x601   :  { %v13912_v4 = vld [vmem:[#allocation5 + $0x9d0] sm:$0xf]  ;;  %v13433_v3 = vor.u32 %v19276_v16, %v13432_v52  ;;  %10691 = vmatpush.bf16.msra.mxu2 %v13177_v60 }
 0x602   :  { %v19396_v28 = vld [vmem:[#allocation5 + $0x9ec] sm:$0xf0]  ;;  %10679 = vmatmul.bf16.vlgmr.msra.gmra.mxu1 %v20991_v25 }
 0x603   :  { %v14168_v58 = vld [vmem:[#allocation5 + $0xbd0] sm:$0xf]  ;;  %v13913_v46 = vor.u32 %v19396_v28, %v13912_v4  ;;  %10704 = vmatpush.bf16.msra.mxu3 %v13433_v3 }
 0x604   :  { %v19460_v0 = vld [vmem:[#allocation5 + $0xbec] sm:$0xf0]  ;;  %10692 = vmatmul.bf16.vlgmr.msra.gmra.mxu2 %v20982_v8 }
 0x605   :  { %v14424_v30 = vld [vmem:[#allocation5 + $0xdd0] sm:$0xf]  ;;  %v14169_v12 = vor.u32 %v19460_v0, %v14168_v58  ;;  %10710 = vmatpush.bf16.msrb.mxu0 %v13913_v46 }
 0x606   :  { %v19524_v33 = vld [vmem:[#allocation5 + $0xdec] sm:$0xf0]  ;;  %10705 = vmatmul.bf16.vlgmr.msra.gmra.mxu3 %v20986_v15 }
 0x607   :  { %v14680_v41 = vld [vmem:[#allocation5 + $0xfd0] sm:$0xf]  ;;  %v14425_v48 = vor.u32 %v19524_v33, %v14424_v30  ;;  %10723 = vmatpush.bf16.msrb.mxu1 %v14169_v12 }
 0x608   :  { %v19588_v45 = vld [vmem:[#allocation5 + $0xfec] sm:$0xf0] }
 0x609   :  { %v13880_v49 = vld [vmem:[#allocation5 + $0x990] sm:$0xf]  ;;  %v14681_v55 = vor.u32 %v19588_v45, %v14680_v41  ;;  %10736 = vmatpush.bf16.msrb.mxu2 %v14425_v48  ;;  %v10459_v45 = vpop.f32.mrf.mxu0 }
 0x60a   :  { %v19388_v50 = vld [vmem:[#allocation5 + $0x9ac] sm:$0xf0]  ;;  %v10460_v12 = vadd.f32 %v10459_v45, %v21180_v39 }
 0x60b   :  { %v14136_v54 = vld [vmem:[#allocation5 + $0xb90] sm:$0xf]  ;;  %v13881_v59 = vor.u32 %v19388_v50, %v13880_v49  ;;  %10749 = vmatpush.bf16.msrb.mxu3 %v14681_v55  ;;  %v10472_v49 = vpop.f32.mrf.mxu1 }
 0x60c   :  { %v19452_v56 = vld [vmem:[#allocation5 + $0xbac] sm:$0xf0] }
 0x60d   :  { %v14392_v10 = vld [vmem:[#allocation5 + $0xd90] sm:$0xf]  ;;  %v14137_v62 = vor.u32 %v19452_v56, %v14136_v54  ;;  %10711 = vmatpush.bf16.msrb.mxu0 %v13881_v59 }
 0x60e   :  { %v19516_v57 = vld [vmem:[#allocation5 + $0xdac] sm:$0xf0] }
 0x60f   :  { %v14648_v43 = vld [vmem:[#allocation5 + $0xf90] sm:$0xf]  ;;  %v14393_v63 = vor.u32 %v19516_v57, %v14392_v10  ;;  %10724 = vmatpush.bf16.msrb.mxu1 %v14137_v62 }
 0x610   :  { %v19580_v44 = vld [vmem:[#allocation5 + $0xfac] sm:$0xf0] }
 0x611   :  { %v13848_v53 = vld [vmem:[#allocation5 + $0x950] sm:$0xf]  ;;  %v14649_v7 = vor.u32 %v19580_v44, %v14648_v43  ;;  %10737 = vmatpush.bf16.msrb.mxu2 %v14393_v63  ;;  %v10473_v43 = vadd.f32 %v10472_v49, %v10460_v12 }
 0x612   :  { %v19380_v6 = vld [vmem:[#allocation5 + $0x96c] sm:$0xf0] }
 0x613   :  { %v14104_v51 = vld [vmem:[#allocation5 + $0xb50] sm:$0xf]  ;;  %v13849_v4 = vor.u32 %v19380_v6, %v13848_v53  ;;  %10750 = vmatpush.bf16.msrb.mxu3 %v14649_v7 }
 0x614   :  { %v19444_v11 = vld [vmem:[#allocation5 + $0xb6c] sm:$0xf0] }
 0x615   :  { %v14360_v14 = vld [vmem:[#allocation5 + $0xd50] sm:$0xf]  ;;  %v14105_v28 = vor.u32 %v19444_v11, %v14104_v51  ;;  %10712 = vmatpush.bf16.msrb.mxu0 %v13849_v4 }
 0x616   :  { %v19508_v52 = vld [vmem:[#allocation5 + $0xd6c] sm:$0xf0] }
 0x617   :  { %v14616_v16 = vld [vmem:[#allocation5 + $0xf50] sm:$0xf]  ;;  %v14361_v58 = vor.u32 %v19508_v52, %v14360_v14  ;;  %10725 = vmatpush.bf16.msrb.mxu1 %v14105_v28 }
 0x618   :  { %v19572_v21 = vld [vmem:[#allocation5 + $0xf6c] sm:$0xf0] }
 0x619   :  { %v13816_v17 = vld [vmem:[#allocation5 + $0x910] sm:$0xf]  ;;  %v14617_v33 = vor.u32 %v19572_v21, %v14616_v16  ;;  %10738 = vmatpush.bf16.msrb.mxu2 %v14361_v58  ;;  %v10485_v16 = vpop.f32.mrf.mxu2 }
 0x61a   :  { %v19372_v0 = vld [vmem:[#allocation5 + $0x92c] sm:$0xf0]  ;;  %v10486_v58 = vadd.f32 %v10485_v16, %v10473_v43 }
 0x61b   :  { %v14072_v30 = vld [vmem:[#allocation5 + $0xb10] sm:$0xf]  ;;  %v13817_v48 = vor.u32 %v19372_v0, %v13816_v17  ;;  %10751 = vmatpush.bf16.msrb.mxu3 %v14617_v33  ;;  %v10498_v17 = vpop.f32.mrf.mxu3  ;;  %v10461_v33 = vpop.f32.mrf.mxu0 }
 0x61c   :  { %v19436_v35 = vld [vmem:[#allocation5 + $0xb2c] sm:$0xf0] }
 0x61d   :  { %v14328_v60 = vld [vmem:[#allocation5 + $0xd10] sm:$0xf]  ;;  %v14073_v50 = vor.u32 %v19436_v35, %v14072_v30  ;;  %10713 = vmatpush.bf16.msrb.mxu0 %v13817_v48 }
 0x61e   :  { %v19500_v41 = vld [vmem:[#allocation5 + $0xd2c] sm:$0xf0] }
 0x61f   :  { %v14584_v3 = vld [vmem:[#allocation5 + $0xf10] sm:$0xf]  ;;  %v14329_v54 = vor.u32 %v19500_v41, %v14328_v60  ;;  %10726 = vmatpush.bf16.msrb.mxu1 %v14073_v50  ;;  %v10474_v60 = vpop.f32.mrf.mxu1  ;;  %v21187_v41 = vadd.f32 %v10498_v17, %v10486_v58 }
 0x620   :  { %v19564_v46 = vld [vmem:[#allocation5 + $0xf2c] sm:$0xf0] }
 0x621   :  { %v13784_v55 = vld [vmem:[#allocation5 + $0x8d0] sm:$0xf]  ;;  %v14585_v57 = vor.u32 %v19564_v46, %v14584_v3  ;;  %10739 = vmatpush.bf16.msrb.mxu2 %v14329_v54 }
 0x622   :  { %v19364_v56 = vld [vmem:[#allocation5 + $0x8ec] sm:$0xf0] }
 0x623   :  { %v14040_v10 = vld [vmem:[#allocation5 + $0xad0] sm:$0xf]  ;;  %v13785_v6 = vor.u32 %v19364_v56, %v13784_v55  ;;  %10752 = vmatpush.bf16.msrb.mxu3 %v14585_v57 }
 0x624   :  { %v19428_v44 = vld [vmem:[#allocation5 + $0xaec] sm:$0xf0] }
 0x625   :  { %v14296_v59 = vld [vmem:[#allocation5 + $0xcd0] sm:$0xf]  ;;  %v14041_v39 = vor.u32 %v19428_v44, %v14040_v10  ;;  %10714 = vmatpush.bf16.msrb.mxu0 %v13785_v6 }
 0x626   :  { %v19492_v62 = vld [vmem:[#allocation5 + $0xcec] sm:$0xf0] }
 0x627   :  { %v14552_v63 = vld [vmem:[#allocation5 + $0xed0] sm:$0xf]  ;;  %v14297_v51 = vor.u32 %v19492_v62, %v14296_v59  ;;  %10727 = vmatpush.bf16.msrb.mxu1 %v14041_v39 }
 0x628   :  { %v19556_v53 = vld [vmem:[#allocation5 + $0xeec] sm:$0xf0] }
 0x629   :  { %v13752_v7 = vld [vmem:[#allocation5 + $0x890] sm:$0xf]  ;;  %v14553_v52 = vor.u32 %v19556_v53, %v14552_v63  ;;  %10740 = vmatpush.bf16.msrb.mxu2 %v14297_v51 }
 0x62a   :  { %v19356_v11 = vld [vmem:[#allocation5 + $0x8ac] sm:$0xf0] }
 0x62b   :  { %v14008_v14 = vld [vmem:[#allocation5 + $0xa90] sm:$0xf]  ;;  %v13753_v35 = vor.u32 %v19356_v11, %v13752_v7  ;;  %10753 = vmatpush.bf16.msrb.mxu3 %v14553_v52 }
 0x62c   :  { %v19420_v21 = vld [vmem:[#allocation5 + $0xaac] sm:$0xf0] }
 0x62d   :  { %v14264_v4 = vld [vmem:[#allocation5 + $0xc90] sm:$0xf]  ;;  %v14009_v45 = vor.u32 %v19420_v21, %v14008_v14  ;;  %10715 = vmatpush.bf16.msrb.mxu0 %v13753_v35  ;;  %v10487_v14 = vpop.f32.mrf.mxu2 }
 0x62e   :  { %v19484_v28 = vld [vmem:[#allocation5 + $0xcac] sm:$0xf0] }
 0x62f   :  { %v14520_v0 = vld [vmem:[#allocation5 + $0xe90] sm:$0xf]  ;;  %v14265_v3 = vor.u32 %v19484_v28, %v14264_v4  ;;  %10728 = vmatpush.bf16.msrb.mxu1 %v14009_v45  ;;  %v10500_v4 = vpop.f32.mrf.mxu3 }
 0x630   :  { %v19548_v30 = vld [vmem:[#allocation5 + $0xeac] sm:$0xf0] }
 0x631   :  { %v13720_v46 = vld [vmem:[#allocation5 + $0x850] sm:$0xf]  ;;  %v14521_v49 = vor.u32 %v19548_v30, %v14520_v0  ;;  %10741 = vmatpush.bf16.msrb.mxu2 %v14265_v3 }
 0x632   :  { %v19348_v12 = vld [vmem:[#allocation5 + $0x86c] sm:$0xf0] }
 0x633   :  { %v13976_v48 = vld [vmem:[#allocation5 + $0xa50] sm:$0xf]  ;;  %v13721_v57 = vor.u32 %v19348_v12, %v13720_v46  ;;  %10754 = vmatpush.bf16.msrb.mxu3 %v14521_v49 }
 0x634   :  { %v19412_v50 = vld [vmem:[#allocation5 + $0xa6c] sm:$0xf0] }
 0x635   :  { %v14232_v54 = vld [vmem:[#allocation5 + $0xc50] sm:$0xf]  ;;  %v13977_v59 = vor.u32 %v19412_v50, %v13976_v48  ;;  %10716 = vmatpush.bf16.msrb.mxu0 %v13721_v57 }
 0x636   :  { %v19476_v55 = vld [vmem:[#allocation5 + $0xc6c] sm:$0xf0] }
 0x637   :  { %v14488_v56 = vld [vmem:[#allocation5 + $0xe50] sm:$0xf]  ;;  %v14233_v62 = vor.u32 %v19476_v55, %v14232_v54  ;;  %10729 = vmatpush.bf16.msrb.mxu1 %v13977_v59 }
 0x638   :  { %v19540_v10 = vld [vmem:[#allocation5 + $0xe6c] sm:$0xf0] }
 0x639   :  { %v13688_v43 = vld [vmem:[#allocation5 + $0x810] sm:$0xf]  ;;  %v14489_v39 = vor.u32 %v19540_v10, %v14488_v56  ;;  %10742 = vmatpush.bf16.msrb.mxu2 %v14233_v62 }
 0x63a   :  { %v19340_v44 = vld [vmem:[#allocation5 + $0x82c] sm:$0xf0] }
 0x63b   :  { %v13944_v63 = vld [vmem:[#allocation5 + $0xa10] sm:$0xf]  ;;  %v13689_v28 = vor.u32 %v19340_v44, %v13688_v43  ;;  %10755 = vmatpush.bf16.msrb.mxu3 %v14489_v39 }
 0x63c   :  { %v19404_v53 = vld [vmem:[#allocation5 + $0xa2c] sm:$0xf0] }
 0x63d   :  { %v14200_v6 = vld [vmem:[#allocation5 + $0xc10] sm:$0xf]  ;;  %v13945_v30 = vor.u32 %v19404_v53, %v13944_v63  ;;  %10717 = vmatpush.bf16.msrb.mxu0 %v13689_v28 }
 0x63e   :  { %v19468_v51 = vld [vmem:[#allocation5 + $0xc2c] sm:$0xf0] }
 0x63f   :  { %v14456_v7 = vld [vmem:[#allocation5 + $0xe10] sm:$0xf]  ;;  %v14201_v33 = vor.u32 %v19468_v51, %v14200_v6  ;;  %10730 = vmatpush.bf16.msrb.mxu1 %v13945_v30 }
 0x640   :  { %v19532_v11 = vld [vmem:[#allocation5 + $0xe2c] sm:$0xf0]  ;;  %10718 = vmatmul.bf16.vlgmr.msrb.gmra.mxu0 %v20996_v37 }
 0x641   :  { %v14936_v52 = vld [vmem:[#allocation5 + $0x11d0] sm:$0xf]  ;;  %v14457_v45 = vor.u32 %v19532_v11, %v14456_v7  ;;  %10743 = vmatpush.bf16.msrb.mxu2 %v14201_v33 }
 0x642   :  { %v19652_v16 = vld [vmem:[#allocation5 + $0x11ec] sm:$0xf0]  ;;  %10731 = vmatmul.bf16.vlgmr.msrb.gmra.mxu1 %v21000_v40 }
 0x643   :  { %v15192_v21 = vld [vmem:[#allocation5 + $0x13d0] sm:$0xf]  ;;  %v14937_v3 = vor.u32 %v19652_v16, %v14936_v52  ;;  %10756 = vmatpush.bf16.msrb.mxu3 %v14457_v45 }
 0x644   :  { %v19716_v58 = vld [vmem:[#allocation5 + $0x13ec] sm:$0xf0]  ;;  %10744 = vmatmul.bf16.vlgmr.msrb.gmra.mxu2 %v20994_v34 }
 0x645   :  { %v15448_v17 = vld [vmem:[#allocation5 + $0x15d0] sm:$0xf]  ;;  %v15193_v46 = vor.u32 %v19716_v58, %v15192_v21  ;;  %10762 = vmatpush.bf16.msra.mxu0 %v14937_v3 }
 0x646   :  { %v19780_v0 = vld [vmem:[#allocation5 + $0x15ec] sm:$0xf0]  ;;  %10757 = vmatmul.bf16.vlgmr.msrb.gmra.mxu3 %v20998_v38 }
 0x647   :  { %v15704_v35 = vld [vmem:[#allocation5 + $0x17d0] sm:$0xf]  ;;  %v15449_v12 = vor.u32 %v19780_v0, %v15448_v17  ;;  %10775 = vmatpush.bf16.msra.mxu1 %v15193_v46 }
 0x648   :  { %v19844_v60 = vld [vmem:[#allocation5 + $0x17ec] sm:$0xf0] }
 0x649   :  { %v14904_v48 = vld [vmem:[#allocation5 + $0x1190] sm:$0xf]  ;;  %v15705_v54 = vor.u32 %v19844_v60, %v15704_v35  ;;  %10788 = vmatpush.bf16.msra.mxu2 %v15449_v12  ;;  %v10511_v60 = vpop.f32.mrf.mxu0 }
 0x64a   :  { %v19644_v49 = vld [vmem:[#allocation5 + $0x11ac] sm:$0xf0]  ;;  %v10512_v46 = vadd.f32 %v10511_v60, %v21187_v41 }
 0x64b   :  { %v15160_v50 = vld [vmem:[#allocation5 + $0x1390] sm:$0xf]  ;;  %v14905_v44 = vor.u32 %v19644_v49, %v14904_v48  ;;  %10801 = vmatpush.bf16.msra.mxu3 %v15705_v54  ;;  %v10524_v48 = vpop.f32.mrf.mxu1 }
 0x64c   :  { %v19708_v55 = vld [vmem:[#allocation5 + $0x13ac] sm:$0xf0] }
 0x64d   :  { %v15416_v56 = vld [vmem:[#allocation5 + $0x1590] sm:$0xf]  ;;  %v15161_v59 = vor.u32 %v19708_v55, %v15160_v50  ;;  %10763 = vmatpush.bf16.msra.mxu0 %v14905_v44 }
 0x64e   :  { %v19772_v10 = vld [vmem:[#allocation5 + $0x15ac] sm:$0xf0] }
 0x64f   :  { %v15672_v57 = vld [vmem:[#allocation5 + $0x1790] sm:$0xf]  ;;  %v15417_v62 = vor.u32 %v19772_v10, %v15416_v56  ;;  %10776 = vmatpush.bf16.msra.mxu1 %v15161_v59 }
 0x650   :  { %v19836_v43 = vld [vmem:[#allocation5 + $0x17ac] sm:$0xf0] }
 0x651   :  { %v14872_v63 = vld [vmem:[#allocation5 + $0x1150] sm:$0xf]  ;;  %v15673_v39 = vor.u32 %v19836_v43, %v15672_v57  ;;  %10789 = vmatpush.bf16.msra.mxu2 %v15417_v62  ;;  %v10525_v57 = vadd.f32 %v10524_v48, %v10512_v46 }
 0x652   :  { %v19636_v53 = vld [vmem:[#allocation5 + $0x116c] sm:$0xf0] }
 0x653   :  { %v15128_v6 = vld [vmem:[#allocation5 + $0x1350] sm:$0xf]  ;;  %v14873_v16 = vor.u32 %v19636_v53, %v14872_v63  ;;  %10802 = vmatpush.bf16.msra.mxu3 %v15673_v39 }
 0x654   :  { %v19700_v51 = vld [vmem:[#allocation5 + $0x136c] sm:$0xf0] }
 0x655   :  { %v15384_v7 = vld [vmem:[#allocation5 + $0x1550] sm:$0xf]  ;;  %v15129_v21 = vor.u32 %v19700_v51, %v15128_v6  ;;  %10764 = vmatpush.bf16.msra.mxu0 %v14873_v16 }
 0x656   :  { %v19764_v11 = vld [vmem:[#allocation5 + $0x156c] sm:$0xf0] }
 0x657   :  { %v15640_v14 = vld [vmem:[#allocation5 + $0x1750] sm:$0xf]  ;;  %v15385_v4 = vor.u32 %v19764_v11, %v15384_v7  ;;  %10777 = vmatpush.bf16.msra.mxu1 %v15129_v21 }
 0x658   :  { %v19828_v52 = vld [vmem:[#allocation5 + $0x176c] sm:$0xf0] }
 0x659   :  { %v14840_v28 = vld [vmem:[#allocation5 + $0x1110] sm:$0xf]  ;;  %v15641_v0 = vor.u32 %v19828_v52, %v15640_v14  ;;  %10790 = vmatpush.bf16.msra.mxu2 %v15385_v4  ;;  %v10537_v14 = vpop.f32.mrf.mxu2 }
 0x65a   :  { %v19628_v58 = vld [vmem:[#allocation5 + $0x112c] sm:$0xf0]  ;;  %v10538_v4 = vadd.f32 %v10537_v14, %v10525_v57 }
 0x65b   :  { %v15096_v17 = vld [vmem:[#allocation5 + $0x1310] sm:$0xf]  ;;  %v14841_v12 = vor.u32 %v19628_v58, %v14840_v28  ;;  %10803 = vmatpush.bf16.msra.mxu3 %v15641_v0  ;;  %v10550_v28 = vpop.f32.mrf.mxu3  ;;  %v10513_v0 = vpop.f32.mrf.mxu0 }
 0x65c   :  { %v19692_v30 = vld [vmem:[#allocation5 + $0x132c] sm:$0xf0] }
 0x65d   :  { %v15352_v33 = vld [vmem:[#allocation5 + $0x1510] sm:$0xf]  ;;  %v15097_v49 = vor.u32 %v19692_v30, %v15096_v17  ;;  %10765 = vmatpush.bf16.msra.mxu0 %v14841_v12 }
 0x65e   :  { %v19756_v35 = vld [vmem:[#allocation5 + $0x152c] sm:$0xf0] }
 0x65f   :  { %v15608_v45 = vld [vmem:[#allocation5 + $0x1710] sm:$0xf]  ;;  %v15353_v50 = vor.u32 %v19756_v35, %v15352_v33  ;;  %10778 = vmatpush.bf16.msra.mxu1 %v15097_v49  ;;  %v10526_v33 = vpop.f32.mrf.mxu1  ;;  %v21194_v35 = vadd.f32 %v10550_v28, %v10538_v4 }
 0x660   :  { %v19820_v3 = vld [vmem:[#allocation5 + $0x172c] sm:$0xf0] }
 0x661   :  { %v14808_v54 = vld [vmem:[#allocation5 + $0x10d0] sm:$0xf]  ;;  %v15609_v10 = vor.u32 %v19820_v3, %v15608_v45  ;;  %10791 = vmatpush.bf16.msra.mxu2 %v15353_v50 }
 0x662   :  { %v19620_v55 = vld [vmem:[#allocation5 + $0x10ec] sm:$0xf0] }
 0x663   :  { %v15064_v56 = vld [vmem:[#allocation5 + $0x12d0] sm:$0xf]  ;;  %v14809_v53 = vor.u32 %v19620_v55, %v14808_v54  ;;  %10804 = vmatpush.bf16.msra.mxu3 %v15609_v10 }
 0x664   :  { %v19684_v43 = vld [vmem:[#allocation5 + $0x12ec] sm:$0xf0] }
 0x665   :  { %v15320_v44 = vld [vmem:[#allocation5 + $0x14d0] sm:$0xf]  ;;  %v15065_v41 = vor.u32 %v19684_v43, %v15064_v56  ;;  %10766 = vmatpush.bf16.msra.mxu0 %v14809_v53 }
 0x666   :  { %v19748_v59 = vld [vmem:[#allocation5 + $0x14ec] sm:$0xf0] }
 0x667   :  { %v15576_v62 = vld [vmem:[#allocation5 + $0x16d0] sm:$0xf]  ;;  %v15321_v6 = vor.u32 %v19748_v59, %v15320_v44  ;;  %10779 = vmatpush.bf16.msra.mxu1 %v15065_v41 }
 0x668   :  { %v19812_v63 = vld [vmem:[#allocation5 + $0x16ec] sm:$0xf0] }
 0x669   :  { %v14776_v39 = vld [vmem:[#allocation5 + $0x1090] sm:$0xf]  ;;  %v15577_v11 = vor.u32 %v19812_v63, %v15576_v62  ;;  %10792 = vmatpush.bf16.msra.mxu2 %v15321_v6 }
 0x66a   :  { %v19612_v51 = vld [vmem:[#allocation5 + $0x10ac] sm:$0xf0] }
 0x66b   :  { %v15032_v7 = vld [vmem:[#allocation5 + $0x1290] sm:$0xf]  ;;  %v14777_v30 = vor.u32 %v19612_v51, %v14776_v39  ;;  %10805 = vmatpush.bf16.msra.mxu3 %v15577_v11 }
 0x66c   :  { %v19676_v52 = vld [vmem:[#allocation5 + $0x12ac] sm:$0xf0] }
 0x66d   :  { %v15288_v16 = vld [vmem:[#allocation5 + $0x1490] sm:$0xf]  ;;  %v15033_v60 = vor.u32 %v19676_v52, %v15032_v7  ;;  %10767 = vmatpush.bf16.msra.mxu0 %v14777_v30  ;;  %v10539_v7 = vpop.f32.mrf.mxu2 }
 0x66e   :  { %v19740_v21 = vld [vmem:[#allocation5 + $0x14ac] sm:$0xf0] }
 0x66f   :  { %v15544_v58 = vld [vmem:[#allocation5 + $0x1690] sm:$0xf]  ;;  %v15289_v45 = vor.u32 %v19740_v21, %v15288_v16  ;;  %10780 = vmatpush.bf16.msra.mxu1 %v15033_v60  ;;  %v10552_v16 = vpop.f32.mrf.mxu3 }
 0x670   :  { %v19804_v17 = vld [vmem:[#allocation5 + $0x16ac] sm:$0xf0] }
 0x671   :  { %v14744_v3 = vld [vmem:[#allocation5 + $0x1050] sm:$0xf]  ;;  %v15545_v48 = vor.u32 %v19804_v17, %v15544_v58  ;;  %10793 = vmatpush.bf16.msra.mxu2 %v15289_v45 }
 0x672   :  { %v19604_v46 = vld [vmem:[#allocation5 + $0x106c] sm:$0xf0] }
 0x673   :  { %v15000_v12 = vld [vmem:[#allocation5 + $0x1250] sm:$0xf]  ;;  %v14745_v10 = vor.u32 %v19604_v46, %v14744_v3  ;;  %10806 = vmatpush.bf16.msra.mxu3 %v15545_v48 }
 0x674   :  { %v19668_v49 = vld [vmem:[#allocation5 + $0x126c] sm:$0xf0] }
 0x675   :  { %v15256_v50 = vld [vmem:[#allocation5 + $0x1450] sm:$0xf]  ;;  %v15001_v44 = vor.u32 %v19668_v49, %v15000_v12  ;;  %10768 = vmatpush.bf16.msra.mxu0 %v14745_v10 }
 0x676   :  { %v19732_v54 = vld [vmem:[#allocation5 + $0x146c] sm:$0xf0] }
 0x677   :  { %v15512_v55 = vld [vmem:[#allocation5 + $0x1650] sm:$0xf]  ;;  %v15257_v59 = vor.u32 %v19732_v54, %v15256_v50  ;;  %10781 = vmatpush.bf16.msra.mxu1 %v15001_v44 }
 0x678   :  { %v19796_v56 = vld [vmem:[#allocation5 + $0x166c] sm:$0xf0] }
 0x679   :  { %v14712_v57 = vld [vmem:[#allocation5 + $0x1010] sm:$0xf]  ;;  %v15513_v41 = vor.u32 %v19796_v56, %v15512_v55  ;;  %10794 = vmatpush.bf16.msra.mxu2 %v15257_v59 }
 0x67a   :  { %v19596_v43 = vld [vmem:[#allocation5 + $0x102c] sm:$0xf0] }
 0x67b   :  { %v14968_v62 = vld [vmem:[#allocation5 + $0x1210] sm:$0xf]  ;;  %v14713_v21 = vor.u32 %v19596_v43, %v14712_v57  ;;  %10807 = vmatpush.bf16.msra.mxu3 %v15513_v41 }
 0x67c   :  { %v19660_v63 = vld [vmem:[#allocation5 + $0x122c] sm:$0xf0] }
 0x67d   :  { %v15224_v53 = vld [vmem:[#allocation5 + $0x1410] sm:$0xf]  ;;  %v14969_v17 = vor.u32 %v19660_v63, %v14968_v62  ;;  %10769 = vmatpush.bf16.msra.mxu0 %v14713_v21 }
 0x67e   :  { %v19724_v6 = vld [vmem:[#allocation5 + $0x142c] sm:$0xf0] }
 0x67f   :  { %v15480_v39 = vld [vmem:[#allocation5 + $0x1610] sm:$0xf]  ;;  %v15225_v0 = vor.u32 %v19724_v6, %v15224_v53  ;;  %10782 = vmatpush.bf16.msra.mxu1 %v14969_v17 }
 0x680   :  { %v19788_v51 = vld [vmem:[#allocation5 + $0x162c] sm:$0xf0]  ;;  %10770 = vmatmul.bf16.vlgmr.msra.gmra.mxu0 %v21006_v18 }
 0x681   :  { %v15960_v11 = vld [vmem:[#allocation5 + $0x19d0] sm:$0xf]  ;;  %v15481_v60 = vor.u32 %v19788_v51, %v15480_v39  ;;  %10795 = vmatpush.bf16.msra.mxu2 %v15225_v0 }
 0x682   :  { %v19908_v14 = vld [vmem:[#allocation5 + $0x19ec] sm:$0xf0]  ;;  %10783 = vmatmul.bf16.vlgmr.msra.gmra.mxu1 %v21010_v23 }
 0x683   :  { %v16216_v52 = vld [vmem:[#allocation5 + $0x1bd0] sm:$0xf]  ;;  %v15961_v45 = vor.u32 %v19908_v14, %v15960_v11  ;;  %10808 = vmatpush.bf16.msra.mxu3 %v15481_v60 }
 0x684   :  { %v19972_v4 = vld [vmem:[#allocation5 + $0x1bec] sm:$0xf0]  ;;  %10796 = vmatmul.bf16.vlgmr.msra.gmra.mxu2 %v21008_v22 }
 0x685   :  { %v16472_v28 = vld [vmem:[#allocation5 + $0x1dd0] sm:$0xf]  ;;  %v16217_v3 = vor.u32 %v19972_v4, %v16216_v52  ;;  %10814 = vmatpush.bf16.msrb.mxu0 %v15961_v45 }
 0x686   :  { %v20036_v58 = vld [vmem:[#allocation5 + $0x1dec] sm:$0xf0]  ;;  %10809 = vmatmul.bf16.vlgmr.msra.gmra.mxu3 %v21012_v27 }
 0x687   :  { %v16728_v30 = vld [vmem:[#allocation5 + $0x1fd0] sm:$0xf]  ;;  %v16473_v46 = vor.u32 %v20036_v58, %v16472_v28  ;;  %10827 = vmatpush.bf16.msrb.mxu1 %v16217_v3 }
 0x688   :  { %v20100_v33 = vld [vmem:[#allocation5 + $0x1fec] sm:$0xf0] }
 0x689   :  { %v15928_v12 = vld [vmem:[#allocation5 + $0x1990] sm:$0xf]  ;;  %v16729_v50 = vor.u32 %v20100_v33, %v16728_v30  ;;  %10840 = vmatpush.bf16.msrb.mxu2 %v16473_v46  ;;  %v10563_v33 = vpop.f32.mrf.mxu0 }
 0x68a   :  { %v19900_v48 = vld [vmem:[#allocation5 + $0x19ac] sm:$0xf0]  ;;  %v10564_v3 = vadd.f32 %v10563_v33, %v21194_v35 }
 0x68b   :  { %v16184_v49 = vld [vmem:[#allocation5 + $0x1b90] sm:$0xf]  ;;  %v15929_v43 = vor.u32 %v19900_v48, %v15928_v12  ;;  %10853 = vmatpush.bf16.msrb.mxu3 %v16729_v50  ;;  %v10576_v12 = vpop.f32.mrf.mxu1 }
 0x68c   :  { %v19964_v54 = vld [vmem:[#allocation5 + $0x1bac] sm:$0xf0] }
 0x68d   :  { %v16440_v55 = vld [vmem:[#allocation5 + $0x1d90] sm:$0xf]  ;;  %v16185_v44 = vor.u32 %v19964_v54, %v16184_v49  ;;  %10815 = vmatpush.bf16.msrb.mxu0 %v15929_v43 }
 0x68e   :  { %v20028_v56 = vld [vmem:[#allocation5 + $0x1dac] sm:$0xf0] }
 0x68f   :  { %v16696_v10 = vld [vmem:[#allocation5 + $0x1f90] sm:$0xf]  ;;  %v16441_v59 = vor.u32 %v20028_v56, %v16440_v55  ;;  %10828 = vmatpush.bf16.msrb.mxu1 %v16185_v44 }
 0x690   :  { %v20092_v57 = vld [vmem:[#allocation5 + $0x1fac] sm:$0xf0] }
 0x691   :  { %v15896_v62 = vld [vmem:[#allocation5 + $0x1950] sm:$0xf]  ;;  %v16697_v41 = vor.u32 %v20092_v57, %v16696_v10  ;;  %10841 = vmatpush.bf16.msrb.mxu2 %v16441_v59  ;;  %v10577_v10 = vadd.f32 %v10576_v12, %v10564_v3 }
 0x692   :  { %v19892_v63 = vld [vmem:[#allocation5 + $0x196c] sm:$0xf0] }
 0x693   :  { %v16152_v53 = vld [vmem:[#allocation5 + $0x1b50] sm:$0xf]  ;;  %v15897_v14 = vor.u32 %v19892_v63, %v15896_v62  ;;  %10854 = vmatpush.bf16.msrb.mxu3 %v16697_v41 }
 0x694   :  { %v19956_v6 = vld [vmem:[#allocation5 + $0x1b6c] sm:$0xf0] }
 0x695   :  { %v16408_v39 = vld [vmem:[#allocation5 + $0x1d50] sm:$0xf]  ;;  %v16153_v52 = vor.u32 %v19956_v6, %v16152_v53  ;;  %10816 = vmatpush.bf16.msrb.mxu0 %v15897_v14 }
 0x696   :  { %v20020_v51 = vld [vmem:[#allocation5 + $0x1d6c] sm:$0xf0] }
 0x697   :  { %v16664_v7 = vld [vmem:[#allocation5 + $0x1f50] sm:$0xf]  ;;  %v16409_v16 = vor.u32 %v20020_v51, %v16408_v39  ;;  %10829 = vmatpush.bf16.msrb.mxu1 %v16153_v52 }
 0x698   :  { %v20084_v11 = vld [vmem:[#allocation5 + $0x1f6c] sm:$0xf0] }
 0x699   :  { %v15864_v21 = vld [vmem:[#allocation5 + $0x1910] sm:$0xf]  ;;  %v16665_v58 = vor.u32 %v20084_v11, %v16664_v7  ;;  %10842 = vmatpush.bf16.msrb.mxu2 %v16409_v16  ;;  %v10589_v7 = vpop.f32.mrf.mxu2 }
 0x69a   :  { %v19884_v4 = vld [vmem:[#allocation5 + $0x192c] sm:$0xf0]  ;;  %v10590_v16 = vadd.f32 %v10589_v7, %v10577_v10 }
 0x69b   :  { %v16120_v28 = vld [vmem:[#allocation5 + $0x1b10] sm:$0xf]  ;;  %v15865_v46 = vor.u32 %v19884_v4, %v15864_v21  ;;  %10855 = vmatpush.bf16.msrb.mxu3 %v16665_v58  ;;  %v10602_v21 = vpop.f32.mrf.mxu3  ;;  %v10565_v58 = vpop.f32.mrf.mxu0 }
 0x69c   :  { %v19948_v17 = vld [vmem:[#allocation5 + $0x1b2c] sm:$0xf0] }
 0x69d   :  { %v16376_v0 = vld [vmem:[#allocation5 + $0x1d10] sm:$0xf]  ;;  %v16121_v48 = vor.u32 %v19948_v17, %v16120_v28  ;;  %10817 = vmatpush.bf16.msrb.mxu0 %v15865_v46 }
 0x69e   :  { %v20012_v30 = vld [vmem:[#allocation5 + $0x1d2c] sm:$0xf0] }
 0x69f   :  { %v16632_v60 = vld [vmem:[#allocation5 + $0x1f10] sm:$0xf]  ;;  %v16377_v49 = vor.u32 %v20012_v30, %v16376_v0  ;;  %10830 = vmatpush.bf16.msrb.mxu1 %v16121_v48  ;;  %v10578_v0 = vpop.f32.mrf.mxu1  ;;  %v21201_v30 = vadd.f32 %v10602_v21, %v10590_v16 }
 0x6a0   :  { %v20076_v45 = vld [vmem:[#allocation5 + $0x1f2c] sm:$0xf0] }
 0x6a1   :  { %v15832_v50 = vld [vmem:[#allocation5 + $0x18d0] sm:$0xf]  ;;  %v16633_v56 = vor.u32 %v20076_v45, %v16632_v60  ;;  %10843 = vmatpush.bf16.msrb.mxu2 %v16377_v49 }
 0x6a2   :  { %v19876_v54 = vld [vmem:[#allocation5 + $0x18ec] sm:$0xf0] }
 0x6a3   :  { %v16088_v55 = vld [vmem:[#allocation5 + $0x1ad0] sm:$0xf]  ;;  %v15833_v63 = vor.u32 %v19876_v54, %v15832_v50  ;;  %10856 = vmatpush.bf16.msrb.mxu3 %v16633_v56 }
 0x6a4   :  { %v19940_v57 = vld [vmem:[#allocation5 + $0x1aec] sm:$0xf0] }
 0x6a5   :  { %v16344_v43 = vld [vmem:[#allocation5 + $0x1cd0] sm:$0xf]  ;;  %v16089_v35 = vor.u32 %v19940_v57, %v16088_v55  ;;  %10818 = vmatpush.bf16.msrb.mxu0 %v15833_v63 }
 0x6a6   :  { %v20004_v44 = vld [vmem:[#allocation5 + $0x1cec] sm:$0xf0] }
 0x6a7   :  { %v16600_v59 = vld [vmem:[#allocation5 + $0x1ed0] sm:$0xf]  ;;  %v16345_v53 = vor.u32 %v20004_v44, %v16344_v43  ;;  %10831 = vmatpush.bf16.msrb.mxu1 %v16089_v35 }
 0x6a8   :  { %v20068_v62 = vld [vmem:[#allocation5 + $0x1eec] sm:$0xf0] }
 0x6a9   :  { %v15800_v41 = vld [vmem:[#allocation5 + $0x1890] sm:$0xf]  ;;  %v16601_v51 = vor.u32 %v20068_v62, %v16600_v59  ;;  %10844 = vmatpush.bf16.msrb.mxu2 %v16345_v53 }
 0x6aa   :  { %v19868_v6 = vld [vmem:[#allocation5 + $0x18ac] sm:$0xf0] }
 0x6ab   :  { %v16056_v39 = vld [vmem:[#allocation5 + $0x1a90] sm:$0xf]  ;;  %v15801_v17 = vor.u32 %v19868_v6, %v15800_v41  ;;  %10857 = vmatpush.bf16.msrb.mxu3 %v16601_v51 }
 0x6ac   :  { %v19932_v11 = vld [vmem:[#allocation5 + $0x1aac] sm:$0xf0] }
 0x6ad   :  { %v16312_v14 = vld [vmem:[#allocation5 + $0x1c90] sm:$0xf]  ;;  %v16057_v33 = vor.u32 %v19932_v11, %v16056_v39  ;;  %10819 = vmatpush.bf16.msrb.mxu0 %v15801_v17  ;;  %v10591_v39 = vpop.f32.mrf.mxu2 }
 0x6ae   :  { %v19996_v52 = vld [vmem:[#allocation5 + $0x1cac] sm:$0xf0] }
 0x6af   :  { %v16568_v4 = vld [vmem:[#allocation5 + $0x1e90] sm:$0xf]  ;;  %v16313_v60 = vor.u32 %v19996_v52, %v16312_v14  ;;  %10832 = vmatpush.bf16.msrb.mxu1 %v16057_v33  ;;  %v10604_v14 = vpop.f32.mrf.mxu3 }
 0x6b0   :  { %v20060_v28 = vld [vmem:[#allocation5 + $0x1eac] sm:$0xf0] }
 0x6b1   :  { %v15768_v45 = vld [vmem:[#allocation5 + $0x1850] sm:$0xf]  ;;  %v16569_v12 = vor.u32 %v20060_v28, %v16568_v4  ;;  %10845 = vmatpush.bf16.msrb.mxu2 %v16313_v60 }
 0x6b2   :  { %v19860_v3 = vld [vmem:[#allocation5 + $0x186c] sm:$0xf0] }
 0x6b3   :  { %v16024_v46 = vld [vmem:[#allocation5 + $0x1a50] sm:$0xf]  ;;  %v15769_v56 = vor.u32 %v19860_v3, %v15768_v45  ;;  %10858 = vmatpush.bf16.msrb.mxu3 %v16569_v12 }
 0x6b4   :  { %v19924_v48 = vld [vmem:[#allocation5 + $0x1a6c] sm:$0xf0] }
 0x6b5   :  { %v16280_v49 = vld [vmem:[#allocation5 + $0x1c50] sm:$0xf]  ;;  %v16025_v43 = vor.u32 %v19924_v48, %v16024_v46  ;;  %10820 = vmatpush.bf16.msrb.mxu0 %v15769_v56 }
 0x6b6   :  { %v19988_v50 = vld [vmem:[#allocation5 + $0x1c6c] sm:$0xf0] }
 0x6b7   :  { %v16536_v54 = vld [vmem:[#allocation5 + $0x1e50] sm:$0xf]  ;;  %v16281_v44 = vor.u32 %v19988_v50, %v16280_v49  ;;  %10833 = vmatpush.bf16.msrb.mxu1 %v16025_v43 }
 0x6b8   :  { %v20052_v55 = vld [vmem:[#allocation5 + $0x1e6c] sm:$0xf0] }
 0x6b9   :  { %v15736_v10 = vld [vmem:[#allocation5 + $0x1810] sm:$0xf]  ;;  %v16537_v35 = vor.u32 %v20052_v55, %v16536_v54  ;;  %10846 = vmatpush.bf16.msrb.mxu2 %v16281_v44 }
 0x6ba   :  { %v19852_v57 = vld [vmem:[#allocation5 + $0x182c] sm:$0xf0] }
 0x6bb   :  { %v15992_v59 = vld [vmem:[#allocation5 + $0x1a10] sm:$0xf]  ;;  %v15737_v52 = vor.u32 %v19852_v57, %v15736_v10  ;;  %10859 = vmatpush.bf16.msrb.mxu3 %v16537_v35 }
 0x6bc   :  { %v19916_v62 = vld [vmem:[#allocation5 + $0x1a2c] sm:$0xf0] }
 0x6bd   :  { %v16248_v63 = vld [vmem:[#allocation5 + $0x1c10] sm:$0xf]  ;;  %v15993_v28 = vor.u32 %v19916_v62, %v15992_v59  ;;  %10821 = vmatpush.bf16.msrb.mxu0 %v15737_v52 }
 0x6be   :  { %v19980_v53 = vld [vmem:[#allocation5 + $0x1c2c] sm:$0xf0] }
 0x6bf   :  { %v16504_v41 = vld [vmem:[#allocation5 + $0x1e10] sm:$0xf]  ;;  %v16249_v58 = vor.u32 %v19980_v53, %v16248_v63  ;;  %10834 = vmatpush.bf16.msrb.mxu1 %v15993_v28 }
 0x6c0   :  { %v20044_v6 = vld [vmem:[#allocation5 + $0x1e2c] sm:$0xf0]  ;;  %10822 = vmatmul.bf16.vlgmr.msrb.gmra.mxu0 %v21018_v13 }
 0x6c1   :  { %v16984_v51 = vld [vmem:[#allocation5 + $0x21d0] sm:$0xf]  ;;  %v16505_v33 = vor.u32 %v20044_v6, %v16504_v41  ;;  %10847 = vmatpush.bf16.msrb.mxu2 %v16249_v58 }
 0x6c2   :  { %v20164_v7 = vld [vmem:[#allocation5 + $0x21ec] sm:$0xf0]  ;;  %10835 = vmatmul.bf16.vlgmr.msrb.gmra.mxu1 %v21022_v20 }
 0x6c3   :  { %v17240_v11 = vld [vmem:[#allocation5 + $0x23d0] sm:$0xf]  ;;  %v16985_v60 = vor.u32 %v20164_v7, %v16984_v51  ;;  %10860 = vmatpush.bf16.msrb.mxu3 %v16505_v33 }
 0x6c4   :  { %v20228_v16 = vld [vmem:[#allocation5 + $0x23ec] sm:$0xf0]  ;;  %10848 = vmatmul.bf16.vlgmr.msrb.gmra.mxu2 %v21020_v19 }
 0x6c5   :  { %v17496_v21 = vld [vmem:[#allocation5 + $0x25d0] sm:$0xf]  ;;  %v17241_v45 = vor.u32 %v20228_v16, %v17240_v11  ;;  %10866 = vmatpush.bf16.msra.mxu0 %v16985_v60 }
 0x6c6   :  { %v20292_v4 = vld [vmem:[#allocation5 + $0x25ec] sm:$0xf0]  ;;  %10861 = vmatmul.bf16.vlgmr.msrb.gmra.mxu3 %v21024_v26 }
 0x6c7   :  { %v17752_v17 = vld [vmem:[#allocation5 + $0x27d0] sm:$0xf]  ;;  %v17497_v3 = vor.u32 %v20292_v4, %v17496_v21  ;;  %10879 = vmatpush.bf16.msra.mxu1 %v17241_v45 }
 0x6c8   :  { %v20356_v0 = vld [vmem:[#allocation5 + $0x27ec] sm:$0xf0] }
 0x6c9   :  { %v16952_v46 = vld [vmem:[#allocation5 + $0x2190] sm:$0xf]  ;;  %v17753_v49 = vor.u32 %v20356_v0, %v17752_v17  ;;  %10892 = vmatpush.bf16.msra.mxu2 %v17497_v3  ;;  %v10615_v0 = vpop.f32.mrf.mxu0 }
 0x6ca   :  { %v20156_v12 = vld [vmem:[#allocation5 + $0x21ac] sm:$0xf0]  ;;  %v10616_v45 = vadd.f32 %v10615_v0, %v21201_v30 }
 0x6cb   :  { %v17208_v48 = vld [vmem:[#allocation5 + $0x2390] sm:$0xf]  ;;  %v16953_v57 = vor.u32 %v20156_v12, %v16952_v46  ;;  %10905 = vmatpush.bf16.msra.mxu3 %v17753_v49  ;;  %v10628_v46 = vpop.f32.mrf.mxu1 }
 0x6cc   :  { %v20220_v50 = vld [vmem:[#allocation5 + $0x23ac] sm:$0xf0] }
 0x6cd   :  { %v17464_v54 = vld [vmem:[#allocation5 + $0x2590] sm:$0xf]  ;;  %v17209_v43 = vor.u32 %v20220_v50, %v17208_v48  ;;  %10867 = vmatpush.bf16.msra.mxu0 %v16953_v57 }
 0x6ce   :  { %v20284_v55 = vld [vmem:[#allocation5 + $0x25ac] sm:$0xf0] }
 0x6cf   :  { %v17720_v56 = vld [vmem:[#allocation5 + $0x2790] sm:$0xf]  ;;  %v17465_v44 = vor.u32 %v20284_v55, %v17464_v54  ;;  %10880 = vmatpush.bf16.msra.mxu1 %v17209_v43 }
 0x6d0   :  { %v20348_v10 = vld [vmem:[#allocation5 + $0x27ac] sm:$0xf0] }
 0x6d1   :  { %v16920_v59 = vld [vmem:[#allocation5 + $0x2150] sm:$0xf]  ;;  %v17721_v35 = vor.u32 %v20348_v10, %v17720_v56  ;;  %10893 = vmatpush.bf16.msra.mxu2 %v17465_v44  ;;  %v10629_v56 = vadd.f32 %v10628_v46, %v10616_v45 }
 0x6d2   :  { %v20148_v62 = vld [vmem:[#allocation5 + $0x216c] sm:$0xf0] }
 0x6d3   :  { %v17176_v63 = vld [vmem:[#allocation5 + $0x2350] sm:$0xf]  ;;  %v16921_v7 = vor.u32 %v20148_v62, %v16920_v59  ;;  %10906 = vmatpush.bf16.msra.mxu3 %v17721_v35 }
 0x6d4   :  { %v20212_v53 = vld [vmem:[#allocation5 + $0x236c] sm:$0xf0] }
 0x6d5   :  { %v17432_v41 = vld [vmem:[#allocation5 + $0x2550] sm:$0xf]  ;;  %v17177_v11 = vor.u32 %v20212_v53, %v17176_v63  ;;  %10868 = vmatpush.bf16.msra.mxu0 %v16921_v7 }
 0x6d6   :  { %v20276_v6 = vld [vmem:[#allocation5 + $0x256c] sm:$0xf0] }
 0x6d7   :  { %v17688_v39 = vld [vmem:[#allocation5 + $0x2750] sm:$0xf]  ;;  %v17433_v14 = vor.u32 %v20276_v6, %v17432_v41  ;;  %10881 = vmatpush.bf16.msra.mxu1 %v17177_v11 }
 0x6d8   :  { %v20340_v51 = vld [vmem:[#allocation5 + $0x276c] sm:$0xf0] }
 0x6d9   :  { %v16888_v52 = vld [vmem:[#allocation5 + $0x2110] sm:$0xf]  ;;  %v17689_v4 = vor.u32 %v20340_v51, %v17688_v39  ;;  %10894 = vmatpush.bf16.msra.mxu2 %v17433_v14  ;;  %v10641_v39 = vpop.f32.mrf.mxu2 }
 0x6da   :  { %v20140_v16 = vld [vmem:[#allocation5 + $0x212c] sm:$0xf0]  ;;  %v10642_v14 = vadd.f32 %v10641_v39, %v10629_v56 }
 0x6db   :  { %v17144_v21 = vld [vmem:[#allocation5 + $0x2310] sm:$0xf]  ;;  %v16889_v3 = vor.u32 %v20140_v16, %v16888_v52  ;;  %10907 = vmatpush.bf16.msra.mxu3 %v17689_v4  ;;  %v10654_v52 = vpop.f32.mrf.mxu3  ;;  %v10617_v4 = vpop.f32.mrf.mxu0 }
 0x6dc   :  { %v20204_v28 = vld [vmem:[#allocation5 + $0x232c] sm:$0xf0] }
 0x6dd   :  { %v17400_v58 = vld [vmem:[#allocation5 + $0x2510] sm:$0xf]  ;;  %v17145_v12 = vor.u32 %v20204_v28, %v17144_v21  ;;  %10869 = vmatpush.bf16.msra.mxu0 %v16889_v3 }
 0x6de   :  { %v20268_v17 = vld [vmem:[#allocation5 + $0x252c] sm:$0xf0] }
 0x6df   :  { %v17656_v33 = vld [vmem:[#allocation5 + $0x2710] sm:$0xf]  ;;  %v17401_v48 = vor.u32 %v20268_v17, %v17400_v58  ;;  %10882 = vmatpush.bf16.msra.mxu1 %v17145_v12  ;;  %v10630_v58 = vpop.f32.mrf.mxu1  ;;  %v21208_v17 = vadd.f32 %v10654_v52, %v10642_v14 }
 0x6e0   :  { %v20332_v60 = vld [vmem:[#allocation5 + $0x272c] sm:$0xf0] }
 0x6e1   :  { %v16856_v49 = vld [vmem:[#allocation5 + $0x20d0] sm:$0xf]  ;;  %v17657_v55 = vor.u32 %v20332_v60, %v17656_v33  ;;  %10895 = vmatpush.bf16.msra.mxu2 %v17401_v48 }
 0x6e2   :  { %v20132_v50 = vld [vmem:[#allocation5 + $0x20ec] sm:$0xf0] }
 0x6e3   :  { %v17112_v54 = vld [vmem:[#allocation5 + $0x22d0] sm:$0xf]  ;;  %v16857_v62 = vor.u32 %v20132_v50, %v16856_v49  ;;  %10908 = vmatpush.bf16.msra.mxu3 %v17657_v55 }
 0x6e4   :  { %v20196_v10 = vld [vmem:[#allocation5 + $0x22ec] sm:$0xf0] }
 0x6e5   :  { %v17368_v57 = vld [vmem:[#allocation5 + $0x24d0] sm:$0xf]  ;;  %v17113_v30 = vor.u32 %v20196_v10, %v17112_v54  ;;  %10870 = vmatpush.bf16.msra.mxu0 %v16857_v62 }
 0x6e6   :  { %v20260_v43 = vld [vmem:[#allocation5 + $0x24ec] sm:$0xf0] }
 0x6e7   :  { %v17624_v44 = vld [vmem:[#allocation5 + $0x26d0] sm:$0xf]  ;;  %v17369_v63 = vor.u32 %v20260_v43, %v17368_v57  ;;  %10883 = vmatpush.bf16.msra.mxu1 %v17113_v30 }
 0x6e8   :  { %v20324_v59 = vld [vmem:[#allocation5 + $0x26ec] sm:$0xf0] }
 0x6e9   :  { %v16824_v35 = vld [vmem:[#allocation5 + $0x2090] sm:$0xf]  ;;  %v17625_v6 = vor.u32 %v20324_v59, %v17624_v44  ;;  %10896 = vmatpush.bf16.msra.mxu2 %v17369_v63 }
 0x6ea   :  { %v20124_v53 = vld [vmem:[#allocation5 + $0x20ac] sm:$0xf0] }
 0x6eb   :  { %v17080_v41 = vld [vmem:[#allocation5 + $0x2290] sm:$0xf]  ;;  %v16825_v28 = vor.u32 %v20124_v53, %v16824_v35  ;;  %10909 = vmatpush.bf16.msra.mxu3 %v17625_v6 }
 0x6ec   :  { %v20188_v51 = vld [vmem:[#allocation5 + $0x22ac] sm:$0xf0] }
 0x6ed   :  { %v17336_v7 = vld [vmem:[#allocation5 + $0x2490] sm:$0xf]  ;;  %v17081_v0 = vor.u32 %v20188_v51, %v17080_v41  ;;  %10871 = vmatpush.bf16.msra.mxu0 %v16825_v28  ;;  %v10643_v41 = vpop.f32.mrf.mxu2 }
 0x6ee   :  { %v20252_v11 = vld [vmem:[#allocation5 + $0x24ac] sm:$0xf0] }
 0x6ef   :  { %v17592_v16 = vld [vmem:[#allocation5 + $0x2690] sm:$0xf]  ;;  %v17337_v33 = vor.u32 %v20252_v11, %v17336_v7  ;;  %10884 = vmatpush.bf16.msra.mxu1 %v17081_v0  ;;  %v10656_v7 = vpop.f32.mrf.mxu3 }
 0x6f0   :  { %v20316_v21 = vld [vmem:[#allocation5 + $0x26ac] sm:$0xf0] }
 0x6f1   :  { %v16792_v60 = vld [vmem:[#allocation5 + $0x2050] sm:$0xf]  ;;  %v17593_v46 = vor.u32 %v20316_v21, %v17592_v16  ;;  %10897 = vmatpush.bf16.msra.mxu2 %v17337_v33 }
 0x6f2   :  { %v20116_v45 = vld [vmem:[#allocation5 + $0x206c] sm:$0xf0] }
 0x6f3   :  { %v17048_v3 = vld [vmem:[#allocation5 + $0x2250] sm:$0xf]  ;;  %v16793_v55 = vor.u32 %v20116_v45, %v16792_v60  ;;  %10910 = vmatpush.bf16.msra.mxu3 %v17593_v46 }
 0x6f4   :  { %v20180_v12 = vld [vmem:[#allocation5 + $0x226c] sm:$0xf0] }
 0x6f5   :  { %v17304_v48 = vld [vmem:[#allocation5 + $0x2450] sm:$0xf]  ;;  %v17049_v57 = vor.u32 %v20180_v12, %v17048_v3  ;;  %10872 = vmatpush.bf16.msra.mxu0 %v16793_v55 }
 0x6f6   :  { %v20244_v49 = vld [vmem:[#allocation5 + $0x246c] sm:$0xf0] }
 0x6f7   :  { %v17560_v50 = vld [vmem:[#allocation5 + $0x2650] sm:$0xf]  ;;  %v17305_v43 = vor.u32 %v20244_v49, %v17304_v48  ;;  %10885 = vmatpush.bf16.msra.mxu1 %v17049_v57 }
 0x6f8   :  { %v20308_v54 = vld [vmem:[#allocation5 + $0x266c] sm:$0xf0] }
 0x6f9   :  { %v16760_v56 = vld [vmem:[#allocation5 + $0x2010] sm:$0xf]  ;;  %v17561_v30 = vor.u32 %v20308_v54, %v17560_v50  ;;  %10898 = vmatpush.bf16.msra.mxu2 %v17305_v43 }
 0x6fa   :  { %v20108_v10 = vld [vmem:[#allocation5 + $0x202c] sm:$0xf0] }
 0x6fb   :  { %v17016_v44 = vld [vmem:[#allocation5 + $0x2210] sm:$0xf]  ;;  %v16761_v11 = vor.u32 %v20108_v10, %v16760_v56  ;;  %10911 = vmatpush.bf16.msra.mxu3 %v17561_v30 }
 0x6fc   :  { %v20172_v59 = vld [vmem:[#allocation5 + $0x222c] sm:$0xf0] }
 0x6fd   :  { %v17272_v62 = vld [vmem:[#allocation5 + $0x2410] sm:$0xf]  ;;  %v17017_v21 = vor.u32 %v20172_v59, %v17016_v44  ;;  %10873 = vmatpush.bf16.msra.mxu0 %v16761_v11 }
 0x6fe   :  { %v20236_v63 = vld [vmem:[#allocation5 + $0x242c] sm:$0xf0] }
 0x6ff   :  { %v17528_v35 = vld [vmem:[#allocation5 + $0x2610] sm:$0xf]  ;;  %v17273_v4 = vor.u32 %v20236_v63, %v17272_v62  ;;  %10886 = vmatpush.bf16.msra.mxu1 %v17017_v21 }
 0x700   :  { %v20300_v53 = vld [vmem:[#allocation5 + $0x262c] sm:$0xf0]  ;;  %10874 = vmatmul.bf16.vlgmr.msra.gmra.mxu0 %v21030_v24 }
 0x701   :  { %v18008_v6 = vld [vmem:[#allocation5 + $0x29d0] sm:$0xf]  ;;  %v17529_v0 = vor.u32 %v20300_v53, %v17528_v35  ;;  %10899 = vmatpush.bf16.msra.mxu2 %v17273_v4 }
 0x702   :  { %v20420_v39 = vld [vmem:[#allocation5 + $0x29ec] sm:$0xf0]  ;;  %10887 = vmatmul.bf16.vlgmr.msra.gmra.mxu1 %v21034_v32 }
 0x703   :  { %v18264_v51 = vld [vmem:[#allocation5 + $0x2bd0] sm:$0xf]  ;;  %v18009_v33 = vor.u32 %v20420_v39, %v18008_v6  ;;  %10912 = vmatpush.bf16.msra.mxu3 %v17529_v0 }
 0x704   :  { %v20484_v14 = vld [vmem:[#allocation5 + $0x2bec] sm:$0xf0]  ;;  %10900 = vmatmul.bf16.vlgmr.msra.gmra.mxu2 %v21032_v31 }
 0x705   :  { %v18520_v52 = vld [vmem:[#allocation5 + $0x2dd0] sm:$0xf]  ;;  %v18265_v60 = vor.u32 %v20484_v14, %v18264_v51  ;;  %10918 = vmatpush.bf16.msrb.mxu0 %v18009_v33 }
 0x706   :  { %v20548_v16 = vld [vmem:[#allocation5 + $0x2dec] sm:$0xf0]  ;;  %10913 = vmatmul.bf16.vlgmr.msra.gmra.mxu3 %v21036_v36 }
 0x707   :  { %v18776_v28 = vld [vmem:[#allocation5 + $0x2fd0] sm:$0xf]  ;;  %v18521_v45 = vor.u32 %v20548_v16, %v18520_v52  ;;  %10931 = vmatpush.bf16.msrb.mxu1 %v18265_v60  ;;  %v20703_v16 = vld [vmem:[#allocation7] sm:$0xff] }
 0x708   :  { %v20612_v58 = vld [vmem:[#allocation5 + $0x2fec] sm:$0xf0]  ;;  %v1718_v21 = vperm.slane %v20703_v16, 4  ;;  %v10706_v16 = vpop.f32.mrf.mxu3 }
 0x709   :  { %v17976_v3 = vld [vmem:[#allocation5 + $0x2990] sm:$0xf]  ;;  %v18777_v48 = vor.u32 %v20612_v58, %v18776_v28  ;;  %10944 = vmatpush.bf16.msrb.mxu2 %v18521_v45 }
 0x70a   :  { %v20412_v46 = vld [vmem:[#allocation5 + $0x29ac] sm:$0xf0] }
 0x70b   :  { %v18232_v12 = vld [vmem:[#allocation5 + $0x2b90] sm:$0xf]  ;;  %v17977_v10 = vor.u32 %v20412_v46, %v17976_v3  ;;  %10957 = vmatpush.bf16.msrb.mxu3 %v18777_v48  ;;  %v10667_v3 = vpop.f32.mrf.mxu0 }
 0x70c   :  { %v20476_v49 = vld [vmem:[#allocation5 + $0x2bac] sm:$0xf0] }
 0x70d   :  { %v18488_v50 = vld [vmem:[#allocation5 + $0x2d90] sm:$0xf]  ;;  %v18233_v57 = vor.u32 %v20476_v49, %v18232_v12  ;;  %10919 = vmatpush.bf16.msrb.mxu0 %v17977_v10 }
 0x70e   :  { %v20540_v54 = vld [vmem:[#allocation5 + $0x2dac] sm:$0xf0] }
 0x70f   :  { %v18744_v55 = vld [vmem:[#allocation5 + $0x2f90] sm:$0xf]  ;;  %v18489_v43 = vor.u32 %v20540_v54, %v18488_v50  ;;  %10932 = vmatpush.bf16.msrb.mxu1 %v18233_v57  ;;  %v10668_v54 = vadd.f32 %v10667_v3, %v1718_v21 }
 0x710   :  { %v20604_v56 = vld [vmem:[#allocation5 + $0x2fac] sm:$0xf0] }
 0x711   :  { %v17944_v44 = vld [vmem:[#allocation5 + $0x2950] sm:$0xf]  ;;  %v18745_v30 = vor.u32 %v20604_v56, %v18744_v55  ;;  %10945 = vmatpush.bf16.msrb.mxu2 %v18489_v43  ;;  %v10680_v55 = vpop.f32.mrf.mxu1 }
 0x712   :  { %v20404_v59 = vld [vmem:[#allocation5 + $0x296c] sm:$0xf0] }
 0x713   :  { %v18200_v62 = vld [vmem:[#allocation5 + $0x2b50] sm:$0xf]  ;;  %v17945_v39 = vor.u32 %v20404_v59, %v17944_v44  ;;  %10958 = vmatpush.bf16.msrb.mxu3 %v18745_v30 }
 0x714   :  { %v20468_v63 = vld [vmem:[#allocation5 + $0x2b6c] sm:$0xf0] }
 0x715   :  { %v18456_v35 = vld [vmem:[#allocation5 + $0x2d50] sm:$0xf]  ;;  %v18201_v7 = vor.u32 %v20468_v63, %v18200_v62  ;;  %10920 = vmatpush.bf16.msrb.mxu0 %v17945_v39  ;;  %v10681_v62 = vadd.f32 %v10680_v55, %v10668_v54  ;;  %v10693_v39 = vpop.f32.mrf.mxu2 }
 0x716   :  { %v20532_v53 = vld [vmem:[#allocation5 + $0x2d6c] sm:$0xf0] }
 0x717   :  { %v18712_v41 = vld [vmem:[#allocation5 + $0x2f50] sm:$0xf]  ;;  %v18457_v11 = vor.u32 %v20532_v53, %v18456_v35  ;;  %10933 = vmatpush.bf16.msrb.mxu1 %v18201_v7 }
 0x718   :  { %v20596_v6 = vld [vmem:[#allocation5 + $0x2f6c] sm:$0xf0] }
 0x719   :  { %v17912_v51 = vld [vmem:[#allocation5 + $0x2910] sm:$0xf]  ;;  %v18713_v4 = vor.u32 %v20596_v6, %v18712_v41  ;;  %10946 = vmatpush.bf16.msrb.mxu2 %v18457_v11 }
 0x71a   :  { %v20396_v14 = vld [vmem:[#allocation5 + $0x292c] sm:$0xf0] }
 0x71b   :  { %v18168_v52 = vld [vmem:[#allocation5 + $0x2b10] sm:$0xf]  ;;  %v17913_v45 = vor.u32 %v20396_v14, %v17912_v51  ;;  %10959 = vmatpush.bf16.msrb.mxu3 %v18713_v4 }
 0x71c   :  { %v20460_v28 = vld [vmem:[#allocation5 + $0x2b2c] sm:$0xf0] }
 0x71d   :  { %v18424_v58 = vld [vmem:[#allocation5 + $0x2d10] sm:$0xf]  ;;  %v18169_v46 = vor.u32 %v20460_v28, %v18168_v52  ;;  %10921 = vmatpush.bf16.msrb.mxu0 %v17913_v45  ;;  %v10694_v52 = vadd.f32 %v10693_v39, %v10681_v62 }
 0x71e   :  { %v20524_v0 = vld [vmem:[#allocation5 + $0x2d2c] sm:$0xf0] }
 0x71f   :  { %v18680_v33 = vld [vmem:[#allocation5 + $0x2f10] sm:$0xf]  ;;  %v18425_v12 = vor.u32 %v20524_v0, %v18424_v58  ;;  %10934 = vmatpush.bf16.msrb.mxu1 %v18169_v46  ;;  %v21214_v58 = vadd.f32 %v10706_v16, %v10694_v52  ;;  %v10669_v0 = vpop.f32.mrf.mxu0  ;;  %v13146_v16 = vld [vmem:[#allocation5 + $0x3f0] sm:$0xf0] }
 0x720   :  { %v20588_v60 = vld [vmem:[#allocation5 + $0x2f2c] sm:$0xf0] }
 0x721   :  { %v17880_v48 = vld [vmem:[#allocation5 + $0x28d0] sm:$0xf]  ;;  %v18681_v56 = vor.u32 %v20588_v60, %v18680_v33  ;;  %10947 = vmatpush.bf16.msrb.mxu2 %v18425_v12  ;;  %v10682_v12 = vpop.f32.mrf.mxu1 }
 0x722   :  { %v20388_v49 = vld [vmem:[#allocation5 + $0x28ec] sm:$0xf0] }
 0x723   :  { %v18136_v50 = vld [vmem:[#allocation5 + $0x2ad0] sm:$0xf]  ;;  %v17881_v30 = vor.u32 %v20388_v49, %v17880_v48  ;;  %10960 = vmatpush.bf16.msrb.mxu3 %v18681_v56 }
 0x724   :  { %v20452_v10 = vld [vmem:[#allocation5 + $0x2aec] sm:$0xf0] }
 0x725   :  { %v18392_v57 = vld [vmem:[#allocation5 + $0x2cd0] sm:$0xf]  ;;  %v18137_v63 = vor.u32 %v20452_v10, %v18136_v50  ;;  %10922 = vmatpush.bf16.msrb.mxu0 %v17881_v30 }
 0x726   :  { %v20516_v43 = vld [vmem:[#allocation5 + $0x2cec] sm:$0xf0] }
 0x727   :  { %v18648_v44 = vld [vmem:[#allocation5 + $0x2ed0] sm:$0xf]  ;;  %v18393_v35 = vor.u32 %v20516_v43, %v18392_v57  ;;  %10935 = vmatpush.bf16.msrb.mxu1 %v18137_v63 }
 0x728   :  { %v20580_v59 = vld [vmem:[#allocation5 + $0x2eec] sm:$0xf0] }
 0x729   :  { %v17848_v53 = vld [vmem:[#allocation5 + $0x2890] sm:$0xf]  ;;  %v18649_v51 = vor.u32 %v20580_v59, %v18648_v44  ;;  %10948 = vmatpush.bf16.msrb.mxu2 %v18393_v35  ;;  %v10695_v35 = vpop.f32.mrf.mxu2 }
 0x72a   :  { %v20380_v41 = vld [vmem:[#allocation5 + $0x28ac] sm:$0xf0]  ;;  %v19184_v35 = vld [vmem:[#allocation5 + $0x354] sm:$0xf] }
 0x72b   :  { %v18104_v6 = vld [vmem:[#allocation5 + $0x2a90] sm:$0xf]  ;;  %v17849_v28 = vor.u32 %v20380_v41, %v17848_v53  ;;  %10961 = vmatpush.bf16.msrb.mxu3 %v18649_v51  ;;  %v10708_v51 = vpop.f32.mrf.mxu3 }
 0x72c   :  { %v20444_v7 = vld [vmem:[#allocation5 + $0x2aac] sm:$0xf0]  ;;  %v19312_v51 = vld [vmem:[#allocation5 + $0x754] sm:$0xf] }
 0x72d   :  { %v18360_v11 = vld [vmem:[#allocation5 + $0x2c90] sm:$0xf]  ;;  %v18105_v33 = vor.u32 %v20444_v7, %v18104_v6  ;;  %10923 = vmatpush.bf16.msrb.mxu0 %v17849_v28  ;;  %v19136_v7 = vld [vmem:[#allocation5 + $0x1d4] sm:$0xf] }
 0x72e   :  { %v20508_v14 = vld [vmem:[#allocation5 + $0x2cac] sm:$0xf0] }
 0x72f   :  { %v18616_v21 = vld [vmem:[#allocation5 + $0x2e90] sm:$0xf]  ;;  %v18361_v60 = vor.u32 %v20508_v14, %v18360_v11  ;;  %10936 = vmatpush.bf16.msrb.mxu1 %v18105_v33  ;;  %v12890_v11 = vld [vmem:[#allocation5 + $0x1f0] sm:$0xf0] }
 0x730   :  { %v20572_v4 = vld [vmem:[#allocation5 + $0x2eac] sm:$0xf0]  ;;  %v19200_v14 = vld [vmem:[#allocation5 + $0x3d4] sm:$0xf] }
 0x731   :  { %v17816_v45 = vld [vmem:[#allocation5 + $0x2850] sm:$0xf]  ;;  %v18617_v48 = vor.u32 %v20572_v4, %v18616_v21  ;;  %10949 = vmatpush.bf16.msrb.mxu2 %v18361_v60  ;;  %v19264_v21 = vld [vmem:[#allocation5 + $0x5d4] sm:$0xf] }
 0x732   :  { %v20372_v3 = vld [vmem:[#allocation5 + $0x286c] sm:$0xf0]  ;;  %v13402_v4 = vld [vmem:[#allocation5 + $0x5f0] sm:$0xf0] }
 0x733   :  { %v18072_v46 = vld [vmem:[#allocation5 + $0x2a50] sm:$0xf]  ;;  %v17817_v10 = vor.u32 %v20372_v3, %v17816_v45  ;;  %10962 = vmatpush.bf16.msrb.mxu3 %v18617_v48  ;;  %v19328_v33 = vld [vmem:[#allocation5 + $0x7d4] sm:$0xf]  ;;  %v12893_v3 = vor.u32 %v19136_v7, %v12890_v11  ;;  %v13405_v12 = vor.u32 %v19264_v21, %v13402_v4 }
 0x734   :  { %v20436_v49 = vld [vmem:[#allocation5 + $0x2a6c] sm:$0xf0]  ;;  %v13658_v60 = vld [vmem:[#allocation5 + $0x7f0] sm:$0xf0] }
 0x735   :  { %v18328_v50 = vld [vmem:[#allocation5 + $0x2c50] sm:$0xf]  ;;  %v18073_v44 = vor.u32 %v20436_v49, %v18072_v46  ;;  %10924 = vmatpush.bf16.msrb.mxu0 %v17817_v10  ;;  %v13149_v46 = vor.u32 %v19200_v14, %v13146_v16  ;;  %v19128_v48 = vld [vmem:[#allocation5 + $0x194] sm:$0xf] }
 0x736   :  { %v20500_v54 = vld [vmem:[#allocation5 + $0x2c6c] sm:$0xf0]  ;;  %v12858_v49 = vld [vmem:[#allocation5 + $0x1b0] sm:$0xf0] }
 0x737   :  { %v18584_v55 = vld [vmem:[#allocation5 + $0x2e50] sm:$0xf]  ;;  %v18329_v59 = vor.u32 %v20500_v54, %v18328_v50  ;;  %10937 = vmatpush.bf16.msrb.mxu1 %v18073_v44  ;;  %v19192_v50 = vld [vmem:[#allocation5 + $0x394] sm:$0xf]  ;;  %v13661_v54 = vor.u32 %v19328_v33, %v13658_v60  ;;  %v12861_v44 = vor.u32 %v19128_v48, %v12858_v49 }
 0x738   :  { %v20564_v56 = vld [vmem:[#allocation5 + $0x2e6c] sm:$0xf0]  ;;  %v13370_v10 = vld [vmem:[#allocation5 + $0x5b0] sm:$0xf0] }
 0x739   :  { %v17784_v57 = vld [vmem:[#allocation5 + $0x2810] sm:$0xf]  ;;  %v18585_v53 = vor.u32 %v20564_v56, %v18584_v55  ;;  %10950 = vmatpush.bf16.msrb.mxu2 %v18329_v59  ;;  %v13114_v55 = vld [vmem:[#allocation5 + $0x3b0] sm:$0xf0] }
 0x73a   :  { %v20364_v43 = vld [vmem:[#allocation5 + $0x282c] sm:$0xf0]  ;;  %v19256_v56 = vld [vmem:[#allocation5 + $0x594] sm:$0xf]  ;;  %v13117_v59 = vor.u32 %v19192_v50, %v13114_v55 }
 0x73b   :  { %v18040_v62 = vld [vmem:[#allocation5 + $0x2a10] sm:$0xf]  ;;  %v17785_v52 = vor.u32 %v20364_v43, %v17784_v57  ;;  %10963 = vmatpush.bf16.msrb.mxu3 %v18585_v53  ;;  %v19320_v57 = vld [vmem:[#allocation5 + $0x794] sm:$0xf] }
 0x73c   :  { %v20428_v30 = vld [vmem:[#allocation5 + $0x2a2c] sm:$0xf0]  ;;  %v13626_v43 = vld [vmem:[#allocation5 + $0x7b0] sm:$0xf0] }
 0x73d   :  { %v18296_v63 = vld [vmem:[#allocation5 + $0x2c10] sm:$0xf]  ;;  %v18041_v28 = vor.u32 %v20428_v30, %v18040_v62  ;;  %10925 = vmatpush.bf16.msrb.mxu0 %v17785_v52  ;;  %v13373_v62 = vor.u32 %v19256_v56, %v13370_v10  ;;  %v19120_v30 = vld [vmem:[#allocation5 + $0x154] sm:$0xf]  ;;  %v13629_v53 = vor.u32 %v19320_v57, %v13626_v43  ;;  %v10732_v10 = vpop.f32.mrf.mxu1 }
 0x73e   :  { %v20492_v41 = vld [vmem:[#allocation5 + $0x2c2c] sm:$0xf0]  ;;  %v13594_v7 = vld [vmem:[#allocation5 + $0x770] sm:$0xf0] }
 0x73f   :  { %v18552_v6 = vld [vmem:[#allocation5 + $0x2e10] sm:$0xf]  ;;  %v18297_v0 = vor.u32 %v20492_v41, %v18296_v63  ;;  %10938 = vmatpush.bf16.msrb.mxu1 %v18041_v28  ;;  %v12826_v63 = vld [vmem:[#allocation5 + $0x170] sm:$0xf0]  ;;  %v13597_v28 = vor.u32 %v19312_v51, %v13594_v7  ;;  %v10745_v7 = vpop.f32.mrf.mxu2 }
 0x740   :  { %v20556_v39 = vld [vmem:[#allocation5 + $0x2e2c] sm:$0xf0]  ;;  %10926 = vmatmul.bf16.vlgmr.msrb.gmra.mxu0 %v21044_v61  ;;  %v13082_v41 = vld [vmem:[#allocation5 + $0x370] sm:$0xf0]  ;;  %v12829_v11 = vor.u32 %v19120_v30, %v12826_v63 }
 0x741   :  { %v18553_v45 = vor.u32 %v20556_v39, %v18552_v6  ;;  %10951 = vmatpush.bf16.msrb.mxu2 %v18297_v0  ;;  %10970 = vmatpush.bf16.msra.mxu0 %v12893_v3  ;;  %v19248_v6 = vld [vmem:[#allocation5 + $0x554] sm:$0xf]  ;;  %v13085_v14 = vor.u32 %v19184_v35, %v13082_v41 }
 0x742   :  { %v13338_v39 = vld [vmem:[#allocation5 + $0x570] sm:$0xf0]  ;;  %10939 = vmatmul.bf16.vlgmr.msrb.gmra.mxu1 %v21048_v2 }
 0x743   :  { %10964 = vmatpush.bf16.msrb.mxu3 %v18553_v45  ;;  %10983 = vmatpush.bf16.msra.mxu1 %v13149_v46  ;;  %v13341_v52 = vor.u32 %v19248_v6, %v13338_v39  ;;  %v19112_v16 = vld [vmem:[#allocation5 + $0x114] sm:$0xf] }
 0x744   :  { %10952 = vmatmul.bf16.vlgmr.msrb.gmra.mxu2 %v21046_v1  ;;  %v12794_v21 = vld [vmem:[#allocation5 + $0x130] sm:$0xf0] }
 0x745   :  { %10996 = vmatpush.bf16.msra.mxu2 %v13405_v12  ;;  %10971 = vmatpush.bf16.msra.mxu0 %v12861_v44  ;;  %v19176_v4 = vld [vmem:[#allocation5 + $0x314] sm:$0xf]  ;;  %v12797_v46 = vor.u32 %v19112_v16, %v12794_v21  ;;  %v10719_v12 = vpop.f32.mrf.mxu0  ;;  %v10758_v21 = vpop.f32.mrf.mxu3 }
 0x746   :  { %10965 = vmatmul.bf16.vlgmr.msrb.gmra.mxu3 %v21050_v5  ;;  %v13050_v0 = vld [vmem:[#allocation5 + $0x330] sm:$0xf0]  ;;  %v10720_v56 = vadd.f32 %v10719_v12, %v21214_v58 }
 0x747   :  { %11009 = vmatpush.bf16.msra.mxu3 %v13661_v54  ;;  %10984 = vmatpush.bf16.msra.mxu1 %v13117_v59  ;;  %v19240_v33 = vld [vmem:[#allocation5 + $0x514] sm:$0xf]  ;;  %v13053_v48 = vor.u32 %v19176_v4, %v13050_v0 }
 0x748   :  { %v13306_v60 = vld [vmem:[#allocation5 + $0x530] sm:$0xf0]  ;;  %v10733_v63 = vadd.f32 %v10732_v10, %v10720_v56 }
 0x749   :  { %10997 = vmatpush.bf16.msra.mxu2 %v13373_v62  ;;  %v19304_v45 = vld [vmem:[#allocation5 + $0x714] sm:$0xf]  ;;  %10972 = vmatpush.bf16.msra.mxu0 %v12829_v11  ;;  %v13309_v49 = vor.u32 %v19240_v33, %v13306_v60 }
 0x74a   :  { %v13562_v3 = vld [vmem:[#allocation5 + $0x730] sm:$0xf0]  ;;  %v10746_v16 = vadd.f32 %v10745_v7, %v10733_v63 }
 0x74b   :  { %11010 = vmatpush.bf16.msra.mxu3 %v13629_v53  ;;  %10985 = vmatpush.bf16.msra.mxu1 %v13085_v14  ;;  %v19104_v50 = vld [vmem:[#allocation5 + $0xd4] sm:$0xf]  ;;  %v13565_v57 = vor.u32 %v19304_v45, %v13562_v3 }
 0x74c   :  { %v12762_v54 = vld [vmem:[#allocation5 + $0xf0] sm:$0xf0]  ;;  %v21221_v33 = vadd.f32 %v10758_v21, %v10746_v16 }
 0x74d   :  { %10998 = vmatpush.bf16.msra.mxu2 %v13341_v52  ;;  %v19168_v55 = vld [vmem:[#allocation5 + $0x2d4] sm:$0xf]  ;;  %10973 = vmatpush.bf16.msra.mxu0 %v12797_v46  ;;  %v12765_v35 = vor.u32 %v19104_v50, %v12762_v54  ;;  %v10721_v60 = vpop.f32.mrf.mxu0 }
 0x74e   :  { %v13018_v43 = vld [vmem:[#allocation5 + $0x2f0] sm:$0xf0] }
 0x74f   :  { %11011 = vmatpush.bf16.msra.mxu3 %v13597_v28  ;;  %v19232_v44 = vld [vmem:[#allocation5 + $0x4d4] sm:$0xf]  ;;  %10986 = vmatpush.bf16.msra.mxu1 %v13053_v48  ;;  %v13021_v53 = vor.u32 %v19168_v55, %v13018_v43 }
 0x750   :  { %v13274_v59 = vld [vmem:[#allocation5 + $0x4f0] sm:$0xf0] }
 0x751   :  { %v19296_v62 = vld [vmem:[#allocation5 + $0x6d4] sm:$0xf]  ;;  %10999 = vmatpush.bf16.msra.mxu2 %v13309_v49  ;;  %v13277_v41 = vor.u32 %v19232_v44, %v13274_v59  ;;  %10974 = vmatpush.bf16.msra.mxu0 %v12765_v35  ;;  %v10734_v49 = vpop.f32.mrf.mxu1 }
 0x752   :  { %v13530_v30 = vld [vmem:[#allocation5 + $0x6f0] sm:$0xf0] }
 0x753   :  { %v19096_v6 = vld [vmem:[#allocation5 + $0x94] sm:$0xf]  ;;  %11012 = vmatpush.bf16.msra.mxu3 %v13565_v57  ;;  %v13533_v58 = vor.u32 %v19296_v62, %v13530_v30  ;;  %10987 = vmatpush.bf16.msra.mxu1 %v13021_v53 }
 0x754   :  { %v12730_v39 = vld [vmem:[#allocation5 + $0xb0] sm:$0xf0] }
 0x755   :  { %v19160_v51 = vld [vmem:[#allocation5 + $0x294] sm:$0xf]  ;;  %v12733_v0 = vor.u32 %v19096_v6, %v12730_v39  ;;  %11000 = vmatpush.bf16.msra.mxu2 %v13277_v41  ;;  %v10747_v41 = vpop.f32.mrf.mxu2 }
 0x756   :  { %v12986_v11 = vld [vmem:[#allocation5 + $0x2b0] sm:$0xf0] }
 0x757   :  { %v19224_v14 = vld [vmem:[#allocation5 + $0x494] sm:$0xf]  ;;  %v12989_v45 = vor.u32 %v19160_v51, %v12986_v11  ;;  %11013 = vmatpush.bf16.msra.mxu3 %v13533_v58  ;;  %10975 = vmatpush.bf16.msra.mxu0 %v12733_v0  ;;  %v10760_v58 = vpop.f32.mrf.mxu3 }
 0x758   :  { %v13242_v52 = vld [vmem:[#allocation5 + $0x4b0] sm:$0xf0] }
 0x759   :  { %v19288_v4 = vld [vmem:[#allocation5 + $0x694] sm:$0xf]  ;;  %v13245_v3 = vor.u32 %v19224_v14, %v13242_v52  ;;  %10988 = vmatpush.bf16.msra.mxu1 %v12989_v45 }
 0x75a   :  { %v13498_v28 = vld [vmem:[#allocation5 + $0x6b0] sm:$0xf0] }
 0x75b   :  { %v19088_v46 = vld [vmem:[#allocation5 + $0x54] sm:$0xf]  ;;  %v13501_v50 = vor.u32 %v19288_v4, %v13498_v28  ;;  %11001 = vmatpush.bf16.msra.mxu2 %v13245_v3 }
 0x75c   :  { %v12698_v12 = vld [vmem:[#allocation5 + $0x70] sm:$0xf0] }
 0x75d   :  { %v19152_v48 = vld [vmem:[#allocation5 + $0x254] sm:$0xf]  ;;  %v12701_v43 = vor.u32 %v19088_v46, %v12698_v12  ;;  %11014 = vmatpush.bf16.msra.mxu3 %v13501_v50 }
 0x75e   :  { %v12954_v54 = vld [vmem:[#allocation5 + $0x270] sm:$0xf0] }
 0x75f   :  { %v19216_v55 = vld [vmem:[#allocation5 + $0x454] sm:$0xf]  ;;  %v12957_v62 = vor.u32 %v19152_v48, %v12954_v54  ;;  %10976 = vmatpush.bf16.msra.mxu0 %v12701_v43 }
 0x760   :  { %v13210_v56 = vld [vmem:[#allocation5 + $0x470] sm:$0xf0] }
 0x761   :  { %v19280_v10 = vld [vmem:[#allocation5 + $0x654] sm:$0xf]  ;;  %v13213_v30 = vor.u32 %v19216_v55, %v13210_v56  ;;  %10989 = vmatpush.bf16.msra.mxu1 %v12957_v62 }
 0x762   :  { %v13466_v57 = vld [vmem:[#allocation5 + $0x670] sm:$0xf0] }
 0x763   :  { %v19080_v44 = vld [vmem:[#allocation5 + $0x14] sm:$0xf]  ;;  %v13469_v6 = vor.u32 %v19280_v10, %v13466_v57  ;;  %11002 = vmatpush.bf16.msra.mxu2 %v13213_v30 }
 0x764   :  { %v12666_v59 = vld [vmem:[#allocation5 + $0x30] sm:$0xf0] }
 0x765   :  { %v19144_v63 = vld [vmem:[#allocation5 + $0x214] sm:$0xf]  ;;  %v12669_v16 = vor.u32 %v19080_v44, %v12666_v59  ;;  %11015 = vmatpush.bf16.msra.mxu3 %v13469_v6 }
 0x766   :  { %v12922_v35 = vld [vmem:[#allocation5 + $0x230] sm:$0xf0] }
 0x767   :  { %v19208_v53 = vld [vmem:[#allocation5 + $0x414] sm:$0xf]  ;;  %v12925_v0 = vor.u32 %v19144_v63, %v12922_v35  ;;  %10977 = vmatpush.bf16.msra.mxu0 %v12669_v16 }
 0x768   :  { %v13178_v39 = vld [vmem:[#allocation5 + $0x430] sm:$0xf0] }
 0x769   :  { %v19272_v51 = vld [vmem:[#allocation5 + $0x614] sm:$0xf]  ;;  %v13181_v60 = vor.u32 %v19208_v53, %v13178_v39  ;;  %10990 = vmatpush.bf16.msra.mxu1 %v12925_v0 }
 0x76a   :  { %v13434_v7 = vld [vmem:[#allocation5 + $0x630] sm:$0xf0]  ;;  %10978 = vmatmul.bf16.vlgmr.msra.gmra.mxu0 %v20984_v9 }
 0x76b   :  { %v19392_v11 = vld [vmem:[#allocation5 + $0x9d4] sm:$0xf]  ;;  %v13437_v46 = vor.u32 %v19272_v51, %v13434_v7  ;;  %11003 = vmatpush.bf16.msra.mxu2 %v13181_v60 }
 0x76c   :  { %v13914_v14 = vld [vmem:[#allocation5 + $0x9f0] sm:$0xf0]  ;;  %10991 = vmatmul.bf16.vlgmr.msra.gmra.mxu1 %v20991_v25 }
 0x76d   :  { %v19456_v52 = vld [vmem:[#allocation5 + $0xbd4] sm:$0xf]  ;;  %v13917_v12 = vor.u32 %v19392_v11, %v13914_v14  ;;  %11016 = vmatpush.bf16.msra.mxu3 %v13437_v46  ;;  %v10771_v46 = vpop.f32.mrf.mxu0 }
 0x76e   :  { %v14170_v21 = vld [vmem:[#allocation5 + $0xbf0] sm:$0xf0]  ;;  %11004 = vmatmul.bf16.vlgmr.msra.gmra.mxu2 %v20982_v8 }
 0x76f   :  { %v19520_v4 = vld [vmem:[#allocation5 + $0xdd4] sm:$0xf]  ;;  %v14173_v48 = vor.u32 %v19456_v52, %v14170_v21  ;;  %11022 = vmatpush.bf16.msrb.mxu0 %v13917_v12 }
 0x770   :  { %v14426_v28 = vld [vmem:[#allocation5 + $0xdf0] sm:$0xf0]  ;;  %11017 = vmatmul.bf16.vlgmr.msra.gmra.mxu3 %v20986_v15 }
 0x771   :  { %v19584_v45 = vld [vmem:[#allocation5 + $0xfd4] sm:$0xf]  ;;  %v14429_v49 = vor.u32 %v19520_v4, %v14426_v28  ;;  %11035 = vmatpush.bf16.msrb.mxu1 %v14173_v48 }
 0x772   :  { %v14682_v3 = vld [vmem:[#allocation5 + $0xff0] sm:$0xf0] }
 0x773   :  { %v19384_v50 = vld [vmem:[#allocation5 + $0x994] sm:$0xf]  ;;  %v14685_v56 = vor.u32 %v19584_v45, %v14682_v3  ;;  %11048 = vmatpush.bf16.msrb.mxu2 %v14429_v49  ;;  %v10772_v49 = vadd.f32 %v10771_v46, %v21221_v33 }
 0x774   :  { %v13882_v54 = vld [vmem:[#allocation5 + $0x9b0] sm:$0xf0] }
 0x775   :  { %v19448_v55 = vld [vmem:[#allocation5 + $0xb94] sm:$0xf]  ;;  %v13885_v62 = vor.u32 %v19384_v50, %v13882_v54  ;;  %11061 = vmatpush.bf16.msrb.mxu3 %v14685_v56  ;;  %v10784_v54 = vpop.f32.mrf.mxu1 }
 0x776   :  { %v14138_v10 = vld [vmem:[#allocation5 + $0xbb0] sm:$0xf0] }
 0x777   :  { %v19512_v57 = vld [vmem:[#allocation5 + $0xd94] sm:$0xf]  ;;  %v14141_v30 = vor.u32 %v19448_v55, %v14138_v10  ;;  %11023 = vmatpush.bf16.msrb.mxu0 %v13885_v62 }
 0x778   :  { %v14394_v43 = vld [vmem:[#allocation5 + $0xdb0] sm:$0xf0] }
 0x779   :  { %v19576_v44 = vld [vmem:[#allocation5 + $0xf94] sm:$0xf]  ;;  %v14397_v63 = vor.u32 %v19512_v57, %v14394_v43  ;;  %11036 = vmatpush.bf16.msrb.mxu1 %v14141_v30 }
 0x77a   :  { %v14650_v59 = vld [vmem:[#allocation5 + $0xfb0] sm:$0xf0] }
 0x77b   :  { %v19376_v35 = vld [vmem:[#allocation5 + $0x954] sm:$0xf]  ;;  %v14653_v6 = vor.u32 %v19576_v44, %v14650_v59  ;;  %11049 = vmatpush.bf16.msrb.mxu2 %v14397_v63  ;;  %v10785_v59 = vadd.f32 %v10784_v54, %v10772_v49 }
 0x77c   :  { %v13850_v53 = vld [vmem:[#allocation5 + $0x970] sm:$0xf0] }
 0x77d   :  { %v19440_v41 = vld [vmem:[#allocation5 + $0xb54] sm:$0xf]  ;;  %v13853_v14 = vor.u32 %v19376_v35, %v13850_v53  ;;  %11062 = vmatpush.bf16.msrb.mxu3 %v14653_v6 }
 0x77e   :  { %v14106_v39 = vld [vmem:[#allocation5 + $0xb70] sm:$0xf0] }
 0x77f   :  { %v19504_v51 = vld [vmem:[#allocation5 + $0xd54] sm:$0xf]  ;;  %v14109_v52 = vor.u32 %v19440_v41, %v14106_v39  ;;  %11024 = vmatpush.bf16.msrb.mxu0 %v13853_v14 }
 0x780   :  { %v14362_v7 = vld [vmem:[#allocation5 + $0xd70] sm:$0xf0] }
 0x781   :  { %v19568_v58 = vld [vmem:[#allocation5 + $0xf54] sm:$0xf]  ;;  %v14365_v16 = vor.u32 %v19504_v51, %v14362_v7  ;;  %11037 = vmatpush.bf16.msrb.mxu1 %v14109_v52 }
 0x782   :  { %v14618_v11 = vld [vmem:[#allocation5 + $0xf70] sm:$0xf0] }
 0x783   :  { %v19368_v21 = vld [vmem:[#allocation5 + $0x914] sm:$0xf]  ;;  %v14621_v0 = vor.u32 %v19568_v58, %v14618_v11  ;;  %11050 = vmatpush.bf16.msrb.mxu2 %v14365_v16  ;;  %v10797_v11 = vpop.f32.mrf.mxu2 }
 0x784   :  { %v13818_v4 = vld [vmem:[#allocation5 + $0x930] sm:$0xf0] }
 0x785   :  { %v19432_v28 = vld [vmem:[#allocation5 + $0xb14] sm:$0xf]  ;;  %v13821_v50 = vor.u32 %v19368_v21, %v13818_v4  ;;  %11063 = vmatpush.bf16.msrb.mxu3 %v14621_v0  ;;  %v10798_v21 = vadd.f32 %v10797_v11, %v10785_v59  ;;  %v10810_v4 = vpop.f32.mrf.mxu3 }
 0x786   :  { %v14074_v60 = vld [vmem:[#allocation5 + $0xb30] sm:$0xf0] }
 0x787   :  { %v19496_v45 = vld [vmem:[#allocation5 + $0xd14] sm:$0xf]  ;;  %v14077_v55 = vor.u32 %v19432_v28, %v14074_v60  ;;  %11025 = vmatpush.bf16.msrb.mxu0 %v13821_v50  ;;  %v10773_v60 = vpop.f32.mrf.mxu0  ;;  %v21228_v46 = vadd.f32 %v10810_v4, %v10798_v21 }
 0x788   :  { %v14330_v3 = vld [vmem:[#allocation5 + $0xd30] sm:$0xf0] }
 0x789   :  { %v19560_v12 = vld [vmem:[#allocation5 + $0xf14] sm:$0xf]  ;;  %v14333_v56 = vor.u32 %v19496_v45, %v14330_v3  ;;  %11038 = vmatpush.bf16.msrb.mxu1 %v14077_v55  ;;  %v10786_v3 = vpop.f32.mrf.mxu1 }
 0x78a   :  { %v14586_v48 = vld [vmem:[#allocation5 + $0xf30] sm:$0xf0] }
 0x78b   :  { %v19360_v10 = vld [vmem:[#allocation5 + $0x8d4] sm:$0xf]  ;;  %v14589_v44 = vor.u32 %v19560_v12, %v14586_v48  ;;  %11051 = vmatpush.bf16.msrb.mxu2 %v14333_v56 }
 0x78c   :  { %v13786_v57 = vld [vmem:[#allocation5 + $0x8f0] sm:$0xf0] }
 0x78d   :  { %v19424_v43 = vld [vmem:[#allocation5 + $0xad4] sm:$0xf]  ;;  %v13789_v41 = vor.u32 %v19360_v10, %v13786_v57  ;;  %11064 = vmatpush.bf16.msrb.mxu3 %v14589_v44 }
 0x78e   :  { %v14042_v62 = vld [vmem:[#allocation5 + $0xaf0] sm:$0xf0] }
 0x78f   :  { %v19488_v30 = vld [vmem:[#allocation5 + $0xcd4] sm:$0xf]  ;;  %v14045_v33 = vor.u32 %v19424_v43, %v14042_v62  ;;  %11026 = vmatpush.bf16.msrb.mxu0 %v13789_v41 }
 0x790   :  { %v14298_v63 = vld [vmem:[#allocation5 + $0xcf0] sm:$0xf0] }
 0x791   :  { %v19552_v35 = vld [vmem:[#allocation5 + $0xed4] sm:$0xf]  ;;  %v14301_v6 = vor.u32 %v19488_v30, %v14298_v63  ;;  %11039 = vmatpush.bf16.msrb.mxu1 %v14045_v33 }
 0x792   :  { %v14554_v53 = vld [vmem:[#allocation5 + $0xef0] sm:$0xf0] }
 0x793   :  { %v19352_v39 = vld [vmem:[#allocation5 + $0x894] sm:$0xf]  ;;  %v14557_v58 = vor.u32 %v19552_v35, %v14554_v53  ;;  %11052 = vmatpush.bf16.msrb.mxu2 %v14301_v6 }
 0x794   :  { %v13754_v51 = vld [vmem:[#allocation5 + $0x8b0] sm:$0xf0] }
 0x795   :  { %v19416_v7 = vld [vmem:[#allocation5 + $0xa94] sm:$0xf]  ;;  %v13757_v45 = vor.u32 %v19352_v39, %v13754_v51  ;;  %11065 = vmatpush.bf16.msrb.mxu3 %v14557_v58  ;;  %v10799_v58 = vpop.f32.mrf.mxu2 }
 0x796   :  { %v14010_v14 = vld [vmem:[#allocation5 + $0xab0] sm:$0xf0] }
 0x797   :  { %v19480_v52 = vld [vmem:[#allocation5 + $0xc94] sm:$0xf]  ;;  %v14013_v12 = vor.u32 %v19416_v7, %v14010_v14  ;;  %11027 = vmatpush.bf16.msrb.mxu0 %v13757_v45 }
 0x798   :  { %v14266_v16 = vld [vmem:[#allocation5 + $0xcb0] sm:$0xf0] }
 0x799   :  { %v19544_v28 = vld [vmem:[#allocation5 + $0xe94] sm:$0xf]  ;;  %v14269_v48 = vor.u32 %v19480_v52, %v14266_v16  ;;  %11040 = vmatpush.bf16.msrb.mxu1 %v14013_v12  ;;  %v10812_v16 = vpop.f32.mrf.mxu3 }
 0x79a   :  { %v14522_v0 = vld [vmem:[#allocation5 + $0xeb0] sm:$0xf0] }
 0x79b   :  { %v19344_v49 = vld [vmem:[#allocation5 + $0x854] sm:$0xf]  ;;  %v14525_v55 = vor.u32 %v19544_v28, %v14522_v0  ;;  %11053 = vmatpush.bf16.msrb.mxu2 %v14269_v48 }
 0x79c   :  { %v13722_v50 = vld [vmem:[#allocation5 + $0x870] sm:$0xf0] }
 0x79d   :  { %v19408_v54 = vld [vmem:[#allocation5 + $0xa54] sm:$0xf]  ;;  %v13725_v59 = vor.u32 %v19344_v49, %v13722_v50  ;;  %11066 = vmatpush.bf16.msrb.mxu3 %v14525_v55 }
 0x79e   :  { %v13978_v56 = vld [vmem:[#allocation5 + $0xa70] sm:$0xf0] }
 0x79f   :  { %v19472_v10 = vld [vmem:[#allocation5 + $0xc54] sm:$0xf]  ;;  %v13981_v63 = vor.u32 %v19408_v54, %v13978_v56  ;;  %11028 = vmatpush.bf16.msrb.mxu0 %v13725_v59 }
 0x7a0   :  { %v14234_v57 = vld [vmem:[#allocation5 + $0xc70] sm:$0xf0] }
 0x7a1   :  { %v19536_v43 = vld [vmem:[#allocation5 + $0xe54] sm:$0xf]  ;;  %v14237_v35 = vor.u32 %v19472_v10, %v14234_v57  ;;  %11041 = vmatpush.bf16.msrb.mxu1 %v13981_v63 }
 0x7a2   :  { %v14490_v44 = vld [vmem:[#allocation5 + $0xe70] sm:$0xf0] }
 0x7a3   :  { %v19336_v62 = vld [vmem:[#allocation5 + $0x814] sm:$0xf]  ;;  %v14493_v6 = vor.u32 %v19536_v43, %v14490_v44  ;;  %11054 = vmatpush.bf16.msrb.mxu2 %v14237_v35 }
 0x7a4   :  { %v13690_v30 = vld [vmem:[#allocation5 + $0x830] sm:$0xf0] }
 0x7a5   :  { %v19400_v53 = vld [vmem:[#allocation5 + $0xa14] sm:$0xf]  ;;  %v13693_v21 = vor.u32 %v19336_v62, %v13690_v30  ;;  %11067 = vmatpush.bf16.msrb.mxu3 %v14493_v6 }
 0x7a6   :  { %v13946_v41 = vld [vmem:[#allocation5 + $0xa30] sm:$0xf0] }
 0x7a7   :  { %v19464_v33 = vld [vmem:[#allocation5 + $0xc14] sm:$0xf]  ;;  %v13949_v60 = vor.u32 %v19400_v53, %v13946_v41  ;;  %11029 = vmatpush.bf16.msrb.mxu0 %v13693_v21 }
 0x7a8   :  { %v14202_v39 = vld [vmem:[#allocation5 + $0xc30] sm:$0xf0] }
 0x7a9   :  { %v19528_v51 = vld [vmem:[#allocation5 + $0xe14] sm:$0xf]  ;;  %v14205_v45 = vor.u32 %v19464_v33, %v14202_v39  ;;  %11042 = vmatpush.bf16.msrb.mxu1 %v13949_v60 }
 0x7aa   :  { %v14458_v7 = vld [vmem:[#allocation5 + $0xe30] sm:$0xf0]  ;;  %11030 = vmatmul.bf16.vlgmr.msrb.gmra.mxu0 %v20996_v37 }
 0x7ab   :  { %v19648_v11 = vld [vmem:[#allocation5 + $0x11d4] sm:$0xf]  ;;  %v14461_v48 = vor.u32 %v19528_v51, %v14458_v7  ;;  %11055 = vmatpush.bf16.msrb.mxu2 %v14205_v45 }
 0x7ac   :  { %v14938_v14 = vld [vmem:[#allocation5 + $0x11f0] sm:$0xf0]  ;;  %11043 = vmatmul.bf16.vlgmr.msrb.gmra.mxu1 %v21000_v40 }
 0x7ad   :  { %v19712_v52 = vld [vmem:[#allocation5 + $0x13d4] sm:$0xf]  ;;  %v14941_v49 = vor.u32 %v19648_v11, %v14938_v14  ;;  %11068 = vmatpush.bf16.msrb.mxu3 %v14461_v48  ;;  %v10823_v48 = vpop.f32.mrf.mxu0 }
 0x7ae   :  { %v15194_v4 = vld [vmem:[#allocation5 + $0x13f0] sm:$0xf0]  ;;  %11056 = vmatmul.bf16.vlgmr.msrb.gmra.mxu2 %v20994_v34 }
 0x7af   :  { %v19776_v28 = vld [vmem:[#allocation5 + $0x15d4] sm:$0xf]  ;;  %v15197_v50 = vor.u32 %v19712_v52, %v15194_v4  ;;  %11074 = vmatpush.bf16.msra.mxu0 %v14941_v49 }
 0x7b0   :  { %v15450_v0 = vld [vmem:[#allocation5 + $0x15f0] sm:$0xf0]  ;;  %11069 = vmatmul.bf16.vlgmr.msrb.gmra.mxu3 %v20998_v38 }
 0x7b1   :  { %v19840_v3 = vld [vmem:[#allocation5 + $0x17d4] sm:$0xf]  ;;  %v15453_v54 = vor.u32 %v19776_v28, %v15450_v0  ;;  %11087 = vmatpush.bf16.msra.mxu1 %v15197_v50 }
 0x7b2   :  { %v15706_v12 = vld [vmem:[#allocation5 + $0x17f0] sm:$0xf0] }
 0x7b3   :  { %v19640_v55 = vld [vmem:[#allocation5 + $0x1194] sm:$0xf]  ;;  %v15709_v57 = vor.u32 %v19840_v3, %v15706_v12  ;;  %11100 = vmatpush.bf16.msra.mxu2 %v15453_v54  ;;  %v10824_v54 = vadd.f32 %v10823_v48, %v21228_v46 }
 0x7b4   :  { %v14906_v56 = vld [vmem:[#allocation5 + $0x11b0] sm:$0xf0] }
 0x7b5   :  { %v19704_v10 = vld [vmem:[#allocation5 + $0x1394] sm:$0xf]  ;;  %v14909_v63 = vor.u32 %v19640_v55, %v14906_v56  ;;  %11113 = vmatpush.bf16.msra.mxu3 %v15709_v57  ;;  %v10836_v56 = vpop.f32.mrf.mxu1 }
 0x7b6   :  { %v15162_v43 = vld [vmem:[#allocation5 + $0x13b0] sm:$0xf0] }
 0x7b7   :  { %v19768_v44 = vld [vmem:[#allocation5 + $0x1594] sm:$0xf]  ;;  %v15165_v35 = vor.u32 %v19704_v10, %v15162_v43  ;;  %11075 = vmatpush.bf16.msra.mxu0 %v14909_v63 }
 0x7b8   :  { %v15418_v59 = vld [vmem:[#allocation5 + $0x15b0] sm:$0xf0] }
 0x7b9   :  { %v19832_v62 = vld [vmem:[#allocation5 + $0x1794] sm:$0xf]  ;;  %v15421_v53 = vor.u32 %v19768_v44, %v15418_v59  ;;  %11088 = vmatpush.bf16.msra.mxu1 %v15165_v35 }
 0x7ba   :  { %v15674_v30 = vld [vmem:[#allocation5 + $0x17b0] sm:$0xf0] }
 0x7bb   :  { %v19632_v41 = vld [vmem:[#allocation5 + $0x1154] sm:$0xf]  ;;  %v15677_v39 = vor.u32 %v19832_v62, %v15674_v30  ;;  %11101 = vmatpush.bf16.msra.mxu2 %v15421_v53  ;;  %v10837_v30 = vadd.f32 %v10836_v56, %v10824_v54 }
 0x7bc   :  { %v14874_v33 = vld [vmem:[#allocation5 + $0x1170] sm:$0xf0] }
 0x7bd   :  { %v19696_v6 = vld [vmem:[#allocation5 + $0x1354] sm:$0xf]  ;;  %v14877_v52 = vor.u32 %v19632_v41, %v14874_v33  ;;  %11114 = vmatpush.bf16.msra.mxu3 %v15677_v39 }
 0x7be   :  { %v15130_v51 = vld [vmem:[#allocation5 + $0x1370] sm:$0xf0] }
 0x7bf   :  { %v19760_v7 = vld [vmem:[#allocation5 + $0x1554] sm:$0xf]  ;;  %v15133_v16 = vor.u32 %v19696_v6, %v15130_v51  ;;  %11076 = vmatpush.bf16.msra.mxu0 %v14877_v52 }
 0x7c0   :  { %v15386_v58 = vld [vmem:[#allocation5 + $0x1570] sm:$0xf0] }
 0x7c1   :  { %v19824_v11 = vld [vmem:[#allocation5 + $0x1754] sm:$0xf]  ;;  %v15389_v21 = vor.u32 %v19760_v7, %v15386_v58  ;;  %11089 = vmatpush.bf16.msra.mxu1 %v15133_v16 }
 0x7c2   :  { %v15642_v14 = vld [vmem:[#allocation5 + $0x1770] sm:$0xf0] }
 0x7c3   :  { %v19624_v4 = vld [vmem:[#allocation5 + $0x1114] sm:$0xf]  ;;  %v15645_v60 = vor.u32 %v19824_v11, %v15642_v14  ;;  %11102 = vmatpush.bf16.msra.mxu2 %v15389_v21  ;;  %v10849_v14 = vpop.f32.mrf.mxu2 }
 0x7c4   :  { %v14842_v28 = vld [vmem:[#allocation5 + $0x1130] sm:$0xf0] }
 0x7c5   :  { %v19688_v0 = vld [vmem:[#allocation5 + $0x1314] sm:$0xf]  ;;  %v14845_v55 = vor.u32 %v19624_v4, %v14842_v28  ;;  %11115 = vmatpush.bf16.msra.mxu3 %v15645_v60  ;;  %v10850_v4 = vadd.f32 %v10849_v14, %v10837_v30  ;;  %v10862_v28 = vpop.f32.mrf.mxu3 }
 0x7c6   :  { %v15098_v45 = vld [vmem:[#allocation5 + $0x1330] sm:$0xf0] }
 0x7c7   :  { %v19752_v3 = vld [vmem:[#allocation5 + $0x1514] sm:$0xf]  ;;  %v15101_v10 = vor.u32 %v19688_v0, %v15098_v45  ;;  %11077 = vmatpush.bf16.msra.mxu0 %v14845_v55  ;;  %v10825_v45 = vpop.f32.mrf.mxu0  ;;  %v21235_v48 = vadd.f32 %v10862_v28, %v10850_v4 }
 0x7c8   :  { %v15354_v12 = vld [vmem:[#allocation5 + $0x1530] sm:$0xf0] }
 0x7c9   :  { %v19816_v49 = vld [vmem:[#allocation5 + $0x1714] sm:$0xf]  ;;  %v15357_v57 = vor.u32 %v19752_v3, %v15354_v12  ;;  %11090 = vmatpush.bf16.msra.mxu1 %v15101_v10  ;;  %v10838_v12 = vpop.f32.mrf.mxu1 }
 0x7ca   :  { %v15610_v50 = vld [vmem:[#allocation5 + $0x1730] sm:$0xf0] }
 0x7cb   :  { %v19616_v43 = vld [vmem:[#allocation5 + $0x10d4] sm:$0xf]  ;;  %v15613_v62 = vor.u32 %v19816_v49, %v15610_v50  ;;  %11103 = vmatpush.bf16.msra.mxu2 %v15357_v57 }
 0x7cc   :  { %v14810_v44 = vld [vmem:[#allocation5 + $0x10f0] sm:$0xf0] }
 0x7cd   :  { %v19680_v59 = vld [vmem:[#allocation5 + $0x12d4] sm:$0xf]  ;;  %v14813_v6 = vor.u32 %v19616_v43, %v14810_v44  ;;  %11116 = vmatpush.bf16.msra.mxu3 %v15613_v62 }
 0x7ce   :  { %v15066_v63 = vld [vmem:[#allocation5 + $0x12f0] sm:$0xf0] }
 0x7cf   :  { %v19744_v35 = vld [vmem:[#allocation5 + $0x14d4] sm:$0xf]  ;;  %v15069_v46 = vor.u32 %v19680_v59, %v15066_v63  ;;  %11078 = vmatpush.bf16.msra.mxu0 %v14813_v6 }
 0x7d0   :  { %v15322_v53 = vld [vmem:[#allocation5 + $0x14f0] sm:$0xf0] }
 0x7d1   :  { %v19808_v41 = vld [vmem:[#allocation5 + $0x16d4] sm:$0xf]  ;;  %v15325_v39 = vor.u32 %v19744_v35, %v15322_v53  ;;  %11091 = vmatpush.bf16.msra.mxu1 %v15069_v46 }
 0x7d2   :  { %v15578_v33 = vld [vmem:[#allocation5 + $0x16f0] sm:$0xf0] }
 0x7d3   :  { %v19608_v51 = vld [vmem:[#allocation5 + $0x1094] sm:$0xf]  ;;  %v15581_v11 = vor.u32 %v19808_v41, %v15578_v33  ;;  %11104 = vmatpush.bf16.msra.mxu2 %v15325_v39 }
 0x7d4   :  { %v14778_v7 = vld [vmem:[#allocation5 + $0x10b0] sm:$0xf0] }
 0x7d5   :  { %v19672_v58 = vld [vmem:[#allocation5 + $0x1294] sm:$0xf]  ;;  %v14781_v3 = vor.u32 %v19608_v51, %v14778_v7  ;;  %11117 = vmatpush.bf16.msra.mxu3 %v15581_v11  ;;  %v10851_v11 = vpop.f32.mrf.mxu2 }
 0x7d6   :  { %v15034_v52 = vld [vmem:[#allocation5 + $0x12b0] sm:$0xf0] }
 0x7d7   :  { %v19736_v16 = vld [vmem:[#allocation5 + $0x1494] sm:$0xf]  ;;  %v15037_v49 = vor.u32 %v19672_v58, %v15034_v52  ;;  %11079 = vmatpush.bf16.msra.mxu0 %v14781_v3 }
 0x7d8   :  { %v15290_v21 = vld [vmem:[#allocation5 + $0x14b0] sm:$0xf0] }
 0x7d9   :  { %v19800_v0 = vld [vmem:[#allocation5 + $0x1694] sm:$0xf]  ;;  %v15293_v50 = vor.u32 %v19736_v16, %v15290_v21  ;;  %11092 = vmatpush.bf16.msra.mxu1 %v15037_v49  ;;  %v10864_v21 = vpop.f32.mrf.mxu3 }
 0x7da   :  { %v15546_v60 = vld [vmem:[#allocation5 + $0x16b0] sm:$0xf0] }
 0x7db   :  { %v19600_v54 = vld [vmem:[#allocation5 + $0x1054] sm:$0xf]  ;;  %v15549_v10 = vor.u32 %v19800_v0, %v15546_v60  ;;  %11105 = vmatpush.bf16.msra.mxu2 %v15293_v50 }
 0x7dc   :  { %v14746_v55 = vld [vmem:[#allocation5 + $0x1070] sm:$0xf0] }
 0x7dd   :  { %v19664_v56 = vld [vmem:[#allocation5 + $0x1254] sm:$0xf]  ;;  %v14749_v30 = vor.u32 %v19600_v54, %v14746_v55  ;;  %11118 = vmatpush.bf16.msra.mxu3 %v15549_v10 }
 0x7de   :  { %v15002_v57 = vld [vmem:[#allocation5 + $0x1270] sm:$0xf0] }
 0x7df   :  { %v19728_v43 = vld [vmem:[#allocation5 + $0x1454] sm:$0xf]  ;;  %v15005_v53 = vor.u32 %v19664_v56, %v15002_v57  ;;  %11080 = vmatpush.bf16.msra.mxu0 %v14749_v30 }
 0x7e0   :  { %v15258_v44 = vld [vmem:[#allocation5 + $0x1470] sm:$0xf0] }
 0x7e1   :  { %v19792_v59 = vld [vmem:[#allocation5 + $0x1654] sm:$0xf]  ;;  %v15261_v41 = vor.u32 %v19728_v43, %v15258_v44  ;;  %11093 = vmatpush.bf16.msra.mxu1 %v15005_v53 }
 0x7e2   :  { %v15514_v62 = vld [vmem:[#allocation5 + $0x1670] sm:$0xf0] }
 0x7e3   :  { %v19592_v63 = vld [vmem:[#allocation5 + $0x1014] sm:$0xf]  ;;  %v15517_v39 = vor.u32 %v19792_v59, %v15514_v62  ;;  %11106 = vmatpush.bf16.msra.mxu2 %v15261_v41 }
 0x7e4   :  { %v14714_v35 = vld [vmem:[#allocation5 + $0x1030] sm:$0xf0] }
 0x7e5   :  { %v19656_v33 = vld [vmem:[#allocation5 + $0x1214] sm:$0xf]  ;;  %v14717_v4 = vor.u32 %v19592_v63, %v14714_v35  ;;  %11119 = vmatpush.bf16.msra.mxu3 %v15517_v39 }
 0x7e6   :  { %v14970_v6 = vld [vmem:[#allocation5 + $0x1230] sm:$0xf0] }
 0x7e7   :  { %v19720_v46 = vld [vmem:[#allocation5 + $0x1414] sm:$0xf]  ;;  %v14973_v45 = vor.u32 %v19656_v33, %v14970_v6  ;;  %11081 = vmatpush.bf16.msra.mxu0 %v14717_v4 }
 0x7e8   :  { %v15226_v51 = vld [vmem:[#allocation5 + $0x1430] sm:$0xf0] }
 0x7e9   :  { %v19784_v7 = vld [vmem:[#allocation5 + $0x1614] sm:$0xf]  ;;  %v15229_v3 = vor.u32 %v19720_v46, %v15226_v51  ;;  %11094 = vmatpush.bf16.msra.mxu1 %v14973_v45 }
 0x7ea   :  { %v15482_v58 = vld [vmem:[#allocation5 + $0x1630] sm:$0xf0]  ;;  %11082 = vmatmul.bf16.vlgmr.msra.gmra.mxu0 %v21006_v18 }
 0x7eb   :  { %v19904_v14 = vld [vmem:[#allocation5 + $0x19d4] sm:$0xf]  ;;  %v15485_v50 = vor.u32 %v19784_v7, %v15482_v58  ;;  %11107 = vmatpush.bf16.msra.mxu2 %v15229_v3 }
 0x7ec   :  { %v15962_v52 = vld [vmem:[#allocation5 + $0x19f0] sm:$0xf0]  ;;  %11095 = vmatmul.bf16.vlgmr.msra.gmra.mxu1 %v21010_v23 }
 0x7ed   :  { %v19968_v16 = vld [vmem:[#allocation5 + $0x1bd4] sm:$0xf]  ;;  %v15965_v54 = vor.u32 %v19904_v14, %v15962_v52  ;;  %11120 = vmatpush.bf16.msra.mxu3 %v15485_v50  ;;  %v10875_v50 = vpop.f32.mrf.mxu0 }
 0x7ee   :  { %v16218_v28 = vld [vmem:[#allocation5 + $0x1bf0] sm:$0xf0]  ;;  %11108 = vmatmul.bf16.vlgmr.msra.gmra.mxu2 %v21008_v22 }
 0x7ef   :  { %v20032_v0 = vld [vmem:[#allocation5 + $0x1dd4] sm:$0xf]  ;;  %v16221_v55 = vor.u32 %v19968_v16, %v16218_v28  ;;  %11126 = vmatpush.bf16.msrb.mxu0 %v15965_v54 }
 0x7f0   :  { %v16474_v60 = vld [vmem:[#allocation5 + $0x1df0] sm:$0xf0]  ;;  %11121 = vmatmul.bf16.vlgmr.msra.gmra.mxu3 %v21012_v27 }
 0x7f1   :  { %v20096_v12 = vld [vmem:[#allocation5 + $0x1fd4] sm:$0xf]  ;;  %v16477_v56 = vor.u32 %v20032_v0, %v16474_v60  ;;  %11139 = vmatpush.bf16.msrb.mxu1 %v16221_v55 }
 0x7f2   :  { %v16730_v49 = vld [vmem:[#allocation5 + $0x1ff0] sm:$0xf0] }
 0x7f3   :  { %v19896_v10 = vld [vmem:[#allocation5 + $0x1994] sm:$0xf]  ;;  %v16733_v44 = vor.u32 %v20096_v12, %v16730_v49  ;;  %11152 = vmatpush.bf16.msrb.mxu2 %v16477_v56  ;;  %v10876_v56 = vadd.f32 %v10875_v50, %v21235_v48 }
 0x7f4   :  { %v15930_v57 = vld [vmem:[#allocation5 + $0x19b0] sm:$0xf0] }
 0x7f5   :  { %v19960_v43 = vld [vmem:[#allocation5 + $0x1b94] sm:$0xf]  ;;  %v15933_v53 = vor.u32 %v19896_v10, %v15930_v57  ;;  %11165 = vmatpush.bf16.msrb.mxu3 %v16733_v44  ;;  %v10888_v57 = vpop.f32.mrf.mxu1 }
 0x7f6   :  { %v16186_v59 = vld [vmem:[#allocation5 + $0x1bb0] sm:$0xf0] }
 0x7f7   :  { %v20024_v62 = vld [vmem:[#allocation5 + $0x1d94] sm:$0xf]  ;;  %v16189_v41 = vor.u32 %v19960_v43, %v16186_v59  ;;  %11127 = vmatpush.bf16.msrb.mxu0 %v15933_v53 }
 0x7f8   :  { %v16442_v30 = vld [vmem:[#allocation5 + $0x1db0] sm:$0xf0] }
 0x7f9   :  { %v20088_v63 = vld [vmem:[#allocation5 + $0x1f94] sm:$0xf]  ;;  %v16445_v33 = vor.u32 %v20024_v62, %v16442_v30  ;;  %11140 = vmatpush.bf16.msrb.mxu1 %v16189_v41 }
 0x7fa   :  { %v16698_v35 = vld [vmem:[#allocation5 + $0x1fb0] sm:$0xf0] }
 0x7fb   :  { %v19888_v6 = vld [vmem:[#allocation5 + $0x1954] sm:$0xf]  ;;  %v16701_v51 = vor.u32 %v20088_v63, %v16698_v35  ;;  %11153 = vmatpush.bf16.msrb.mxu2 %v16445_v33  ;;  %v10889_v35 = vadd.f32 %v10888_v57, %v10876_v56 }
 0x7fc   :  { %v15898_v46 = vld [vmem:[#allocation5 + $0x1970] sm:$0xf0] }
 0x7fd   :  { %v19952_v39 = vld [vmem:[#allocation5 + $0x1b54] sm:$0xf]  ;;  %v15901_v16 = vor.u32 %v19888_v6, %v15898_v46  ;;  %11166 = vmatpush.bf16.msrb.mxu3 %v16701_v51 }
 0x7fe   :  { %v16154_v7 = vld [vmem:[#allocation5 + $0x1b70] sm:$0xf0] }
 0x7ff   :  { %v20016_v58 = vld [vmem:[#allocation5 + $0x1d54] sm:$0xf]  ;;  %v16157_v21 = vor.u32 %v19952_v39, %v16154_v7  ;;  %11128 = vmatpush.bf16.msrb.mxu0 %v15901_v16 }
 0x800   :  { %v16410_v11 = vld [vmem:[#allocation5 + $0x1d70] sm:$0xf0] }
 0x801   :  { %v20080_v14 = vld [vmem:[#allocation5 + $0x1f54] sm:$0xf]  ;;  %v16413_v4 = vor.u32 %v20016_v58, %v16410_v11  ;;  %11141 = vmatpush.bf16.msrb.mxu1 %v16157_v21 }
 0x802   :  { %v16666_v52 = vld [vmem:[#allocation5 + $0x1f70] sm:$0xf0] }
 0x803   :  { %v19880_v28 = vld [vmem:[#allocation5 + $0x1914] sm:$0xf]  ;;  %v16669_v45 = vor.u32 %v20080_v14, %v16666_v52  ;;  %11154 = vmatpush.bf16.msrb.mxu2 %v16413_v4  ;;  %v10901_v52 = vpop.f32.mrf.mxu2 }
 0x804   :  { %v15866_v0 = vld [vmem:[#allocation5 + $0x1930] sm:$0xf0] }
 0x805   :  { %v19944_v60 = vld [vmem:[#allocation5 + $0x1b14] sm:$0xf]  ;;  %v15869_v10 = vor.u32 %v19880_v28, %v15866_v0  ;;  %11167 = vmatpush.bf16.msrb.mxu3 %v16669_v45  ;;  %v10902_v28 = vadd.f32 %v10901_v52, %v10889_v35  ;;  %v10914_v0 = vpop.f32.mrf.mxu3 }
 0x806   :  { %v16122_v3 = vld [vmem:[#allocation5 + $0x1b30] sm:$0xf0] }
 0x807   :  { %v20008_v12 = vld [vmem:[#allocation5 + $0x1d14] sm:$0xf]  ;;  %v16125_v43 = vor.u32 %v19944_v60, %v16122_v3  ;;  %11129 = vmatpush.bf16.msrb.mxu0 %v15869_v10  ;;  %v10877_v3 = vpop.f32.mrf.mxu0  ;;  %v21242_v50 = vadd.f32 %v10914_v0, %v10902_v28 }
 0x808   :  { %v16378_v49 = vld [vmem:[#allocation5 + $0x1d30] sm:$0xf0] }
 0x809   :  { %v20072_v54 = vld [vmem:[#allocation5 + $0x1f14] sm:$0xf]  ;;  %v16381_v44 = vor.u32 %v20008_v12, %v16378_v49  ;;  %11142 = vmatpush.bf16.msrb.mxu1 %v16125_v43  ;;  %v10890_v49 = vpop.f32.mrf.mxu1 }
 0x80a   :  { %v16634_v55 = vld [vmem:[#allocation5 + $0x1f30] sm:$0xf0] }
 0x80b   :  { %v19872_v59 = vld [vmem:[#allocation5 + $0x18d4] sm:$0xf]  ;;  %v16637_v63 = vor.u32 %v20072_v54, %v16634_v55  ;;  %11155 = vmatpush.bf16.msrb.mxu2 %v16381_v44 }
 0x80c   :  { %v15834_v62 = vld [vmem:[#allocation5 + $0x18f0] sm:$0xf0] }
 0x80d   :  { %v19936_v30 = vld [vmem:[#allocation5 + $0x1ad4] sm:$0xf]  ;;  %v15837_v39 = vor.u32 %v19872_v59, %v15834_v62  ;;  %11168 = vmatpush.bf16.msrb.mxu3 %v16637_v63 }
 0x80e   :  { %v16090_v53 = vld [vmem:[#allocation5 + $0x1af0] sm:$0xf0] }
 0x80f   :  { %v20000_v41 = vld [vmem:[#allocation5 + $0x1cd4] sm:$0xf]  ;;  %v16093_v48 = vor.u32 %v19936_v30, %v16090_v53  ;;  %11130 = vmatpush.bf16.msrb.mxu0 %v15837_v39 }
 0x810   :  { %v16346_v33 = vld [vmem:[#allocation5 + $0x1cf0] sm:$0xf0] }
 0x811   :  { %v20064_v6 = vld [vmem:[#allocation5 + $0x1ed4] sm:$0xf]  ;;  %v16349_v51 = vor.u32 %v20000_v41, %v16346_v33  ;;  %11143 = vmatpush.bf16.msrb.mxu1 %v16093_v48 }
 0x812   :  { %v16602_v46 = vld [vmem:[#allocation5 + $0x1ef0] sm:$0xf0] }
 0x813   :  { %v19864_v7 = vld [vmem:[#allocation5 + $0x1894] sm:$0xf]  ;;  %v16605_v14 = vor.u32 %v20064_v6, %v16602_v46  ;;  %11156 = vmatpush.bf16.msrb.mxu2 %v16349_v51 }
 0x814   :  { %v15802_v58 = vld [vmem:[#allocation5 + $0x18b0] sm:$0xf0] }
 0x815   :  { %v19928_v11 = vld [vmem:[#allocation5 + $0x1a94] sm:$0xf]  ;;  %v15805_v12 = vor.u32 %v19864_v7, %v15802_v58  ;;  %11169 = vmatpush.bf16.msrb.mxu3 %v16605_v14  ;;  %v10903_v14 = vpop.f32.mrf.mxu2 }
 0x816   :  { %v16058_v16 = vld [vmem:[#allocation5 + $0x1ab0] sm:$0xf0] }
 0x817   :  { %v19992_v21 = vld [vmem:[#allocation5 + $0x1c94] sm:$0xf]  ;;  %v16061_v54 = vor.u32 %v19928_v11, %v16058_v16  ;;  %11131 = vmatpush.bf16.msrb.mxu0 %v15805_v12 }
 0x818   :  { %v16314_v4 = vld [vmem:[#allocation5 + $0x1cb0] sm:$0xf0] }
 0x819   :  { %v20056_v60 = vld [vmem:[#allocation5 + $0x1e94] sm:$0xf]  ;;  %v16317_v55 = vor.u32 %v19992_v21, %v16314_v4  ;;  %11144 = vmatpush.bf16.msrb.mxu1 %v16061_v54  ;;  %v10916_v4 = vpop.f32.mrf.mxu3 }
 0x81a   :  { %v16570_v45 = vld [vmem:[#allocation5 + $0x1eb0] sm:$0xf0] }
 0x81b   :  { %v19856_v56 = vld [vmem:[#allocation5 + $0x1854] sm:$0xf]  ;;  %v16573_v43 = vor.u32 %v20056_v60, %v16570_v45  ;;  %11157 = vmatpush.bf16.msrb.mxu2 %v16317_v55 }
 0x81c   :  { %v15770_v10 = vld [vmem:[#allocation5 + $0x1870] sm:$0xf0] }
 0x81d   :  { %v19920_v57 = vld [vmem:[#allocation5 + $0x1a54] sm:$0xf]  ;;  %v15773_v35 = vor.u32 %v19856_v56, %v15770_v10  ;;  %11170 = vmatpush.bf16.msrb.mxu3 %v16573_v43 }
 0x81e   :  { %v16026_v44 = vld [vmem:[#allocation5 + $0x1a70] sm:$0xf0] }
 0x81f   :  { %v19984_v59 = vld [vmem:[#allocation5 + $0x1c54] sm:$0xf]  ;;  %v16029_v33 = vor.u32 %v19920_v57, %v16026_v44  ;;  %11132 = vmatpush.bf16.msrb.mxu0 %v15773_v35 }
 0x820   :  { %v16282_v62 = vld [vmem:[#allocation5 + $0x1c70] sm:$0xf0] }
 0x821   :  { %v20048_v30 = vld [vmem:[#allocation5 + $0x1e54] sm:$0xf]  ;;  %v16285_v6 = vor.u32 %v19984_v59, %v16282_v62  ;;  %11145 = vmatpush.bf16.msrb.mxu1 %v16029_v33 }
 0x822   :  { %v16538_v63 = vld [vmem:[#allocation5 + $0x1e70] sm:$0xf0] }
 0x823   :  { %v19848_v53 = vld [vmem:[#allocation5 + $0x1814] sm:$0xf]  ;;  %v16541_v51 = vor.u32 %v20048_v30, %v16538_v63  ;;  %11158 = vmatpush.bf16.msrb.mxu2 %v16285_v6 }
 0x824   :  { %v15738_v41 = vld [vmem:[#allocation5 + $0x1830] sm:$0xf0] }
 0x825   :  { %v19912_v46 = vld [vmem:[#allocation5 + $0x1a14] sm:$0xf]  ;;  %v15741_v28 = vor.u32 %v19848_v53, %v15738_v41  ;;  %11171 = vmatpush.bf16.msrb.mxu3 %v16541_v51 }
 0x826   :  { %v15994_v39 = vld [vmem:[#allocation5 + $0x1a30] sm:$0xf0] }
 0x827   :  { %v19976_v48 = vld [vmem:[#allocation5 + $0x1c14] sm:$0xf]  ;;  %v15997_v3 = vor.u32 %v19912_v46, %v15994_v39  ;;  %11133 = vmatpush.bf16.msrb.mxu0 %v15741_v28 }
 0x828   :  { %v16250_v7 = vld [vmem:[#allocation5 + $0x1c30] sm:$0xf0] }
 0x829   :  { %v20040_v58 = vld [vmem:[#allocation5 + $0x1e14] sm:$0xf]  ;;  %v16253_v12 = vor.u32 %v19976_v48, %v16250_v7  ;;  %11146 = vmatpush.bf16.msrb.mxu1 %v15997_v3 }
 0x82a   :  { %v16506_v11 = vld [vmem:[#allocation5 + $0x1e30] sm:$0xf0]  ;;  %11134 = vmatmul.bf16.vlgmr.msrb.gmra.mxu0 %v21018_v13 }
 0x82b   :  { %v20160_v52 = vld [vmem:[#allocation5 + $0x21d4] sm:$0xf]  ;;  %v16509_v55 = vor.u32 %v20040_v58, %v16506_v11  ;;  %11159 = vmatpush.bf16.msrb.mxu2 %v16253_v12 }
 0x82c   :  { %v16986_v16 = vld [vmem:[#allocation5 + $0x21f0] sm:$0xf0]  ;;  %11147 = vmatmul.bf16.vlgmr.msrb.gmra.mxu1 %v21022_v20 }
 0x82d   :  { %v20224_v21 = vld [vmem:[#allocation5 + $0x23d4] sm:$0xf]  ;;  %v16989_v56 = vor.u32 %v20160_v52, %v16986_v16  ;;  %11172 = vmatpush.bf16.msrb.mxu3 %v16509_v55  ;;  %v10927_v55 = vpop.f32.mrf.mxu0 }
 0x82e   :  { %v17242_v0 = vld [vmem:[#allocation5 + $0x23f0] sm:$0xf0]  ;;  %11160 = vmatmul.bf16.vlgmr.msrb.gmra.mxu2 %v21020_v19 }
 0x82f   :  { %v20288_v60 = vld [vmem:[#allocation5 + $0x25d4] sm:$0xf]  ;;  %v17245_v10 = vor.u32 %v20224_v21, %v17242_v0  ;;  %11178 = vmatpush.bf16.msra.mxu0 %v16989_v56 }
 0x830   :  { %v17498_v45 = vld [vmem:[#allocation5 + $0x25f0] sm:$0xf0]  ;;  %11173 = vmatmul.bf16.vlgmr.msrb.gmra.mxu3 %v21024_v26 }
 0x831   :  { %v20352_v49 = vld [vmem:[#allocation5 + $0x27d4] sm:$0xf]  ;;  %v17501_v57 = vor.u32 %v20288_v60, %v17498_v45  ;;  %11191 = vmatpush.bf16.msra.mxu1 %v17245_v10 }
 0x832   :  { %v17754_v54 = vld [vmem:[#allocation5 + $0x27f0] sm:$0xf0] }
 0x833   :  { %v20152_v43 = vld [vmem:[#allocation5 + $0x2194] sm:$0xf]  ;;  %v17757_v62 = vor.u32 %v20352_v49, %v17754_v54  ;;  %11204 = vmatpush.bf16.msra.mxu2 %v17501_v57  ;;  %v10928_v57 = vadd.f32 %v10927_v55, %v21242_v50 }
 0x834   :  { %v16954_v44 = vld [vmem:[#allocation5 + $0x21b0] sm:$0xf0] }
 0x835   :  { %v20216_v59 = vld [vmem:[#allocation5 + $0x2394] sm:$0xf]  ;;  %v16957_v33 = vor.u32 %v20152_v43, %v16954_v44  ;;  %11217 = vmatpush.bf16.msra.mxu3 %v17757_v62  ;;  %v10940_v44 = vpop.f32.mrf.mxu1 }
 0x836   :  { %v17210_v30 = vld [vmem:[#allocation5 + $0x23b0] sm:$0xf0] }
 0x837   :  { %v20280_v63 = vld [vmem:[#allocation5 + $0x2594] sm:$0xf]  ;;  %v17213_v6 = vor.u32 %v20216_v59, %v17210_v30  ;;  %11179 = vmatpush.bf16.msra.mxu0 %v16957_v33 }
 0x838   :  { %v17466_v35 = vld [vmem:[#allocation5 + $0x25b0] sm:$0xf0] }
 0x839   :  { %v20344_v53 = vld [vmem:[#allocation5 + $0x2794] sm:$0xf]  ;;  %v17469_v46 = vor.u32 %v20280_v63, %v17466_v35  ;;  %11192 = vmatpush.bf16.msra.mxu1 %v17213_v6 }
 0x83a   :  { %v17722_v41 = vld [vmem:[#allocation5 + $0x27b0] sm:$0xf0] }
 0x83b   :  { %v20144_v39 = vld [vmem:[#allocation5 + $0x2154] sm:$0xf]  ;;  %v17725_v7 = vor.u32 %v20344_v53, %v17722_v41  ;;  %11205 = vmatpush.bf16.msra.mxu2 %v17469_v46  ;;  %v10941_v41 = vadd.f32 %v10940_v44, %v10928_v57 }
 0x83c   :  { %v16922_v48 = vld [vmem:[#allocation5 + $0x2170] sm:$0xf0] }
 0x83d   :  { %v20208_v51 = vld [vmem:[#allocation5 + $0x2354] sm:$0xf]  ;;  %v16925_v21 = vor.u32 %v20144_v39, %v16922_v48  ;;  %11218 = vmatpush.bf16.msra.mxu3 %v17725_v7 }
 0x83e   :  { %v17178_v58 = vld [vmem:[#allocation5 + $0x2370] sm:$0xf0] }
 0x83f   :  { %v20272_v11 = vld [vmem:[#allocation5 + $0x2554] sm:$0xf]  ;;  %v17181_v4 = vor.u32 %v20208_v51, %v17178_v58  ;;  %11180 = vmatpush.bf16.msra.mxu0 %v16925_v21 }
 0x840   :  { %v17434_v14 = vld [vmem:[#allocation5 + $0x2570] sm:$0xf0] }
 0x841   :  { %v20336_v52 = vld [vmem:[#allocation5 + $0x2754] sm:$0xf]  ;;  %v17437_v28 = vor.u32 %v20272_v11, %v17434_v14  ;;  %11193 = vmatpush.bf16.msra.mxu1 %v17181_v4 }
 0x842   :  { %v17690_v16 = vld [vmem:[#allocation5 + $0x2770] sm:$0xf0] }
 0x843   :  { %v20136_v0 = vld [vmem:[#allocation5 + $0x2114] sm:$0xf]  ;;  %v17693_v3 = vor.u32 %v20336_v52, %v17690_v16  ;;  %11206 = vmatpush.bf16.msra.mxu2 %v17437_v28  ;;  %v10953_v16 = vpop.f32.mrf.mxu2 }
 0x844   :  { %v16890_v60 = vld [vmem:[#allocation5 + $0x2130] sm:$0xf0] }
 0x845   :  { %v20200_v45 = vld [vmem:[#allocation5 + $0x2314] sm:$0xf]  ;;  %v16893_v43 = vor.u32 %v20136_v0, %v16890_v60  ;;  %11219 = vmatpush.bf16.msra.mxu3 %v17693_v3  ;;  %v10954_v0 = vadd.f32 %v10953_v16, %v10941_v41  ;;  %v10966_v60 = vpop.f32.mrf.mxu3 }
 0x846   :  { %v17146_v12 = vld [vmem:[#allocation5 + $0x2330] sm:$0xf0] }
 0x847   :  { %v20264_v49 = vld [vmem:[#allocation5 + $0x2514] sm:$0xf]  ;;  %v17149_v59 = vor.u32 %v20200_v45, %v17146_v12  ;;  %11181 = vmatpush.bf16.msra.mxu0 %v16893_v43  ;;  %v10929_v12 = vpop.f32.mrf.mxu0  ;;  %v21249_v55 = vadd.f32 %v10966_v60, %v10954_v0 }
 0x848   :  { %v17402_v54 = vld [vmem:[#allocation5 + $0x2530] sm:$0xf0] }
 0x849   :  { %v20328_v56 = vld [vmem:[#allocation5 + $0x2714] sm:$0xf]  ;;  %v17405_v62 = vor.u32 %v20264_v49, %v17402_v54  ;;  %11194 = vmatpush.bf16.msra.mxu1 %v17149_v59  ;;  %v10942_v54 = vpop.f32.mrf.mxu1 }
 0x84a   :  { %v17658_v10 = vld [vmem:[#allocation5 + $0x2730] sm:$0xf0] }
 0x84b   :  { %v20128_v30 = vld [vmem:[#allocation5 + $0x20d4] sm:$0xf]  ;;  %v17661_v53 = vor.u32 %v20328_v56, %v17658_v10  ;;  %11207 = vmatpush.bf16.msra.mxu2 %v17405_v62 }
 0x84c   :  { %v16858_v63 = vld [vmem:[#allocation5 + $0x20f0] sm:$0xf0] }
 0x84d   :  { %v20192_v35 = vld [vmem:[#allocation5 + $0x22d4] sm:$0xf]  ;;  %v16861_v51 = vor.u32 %v20128_v30, %v16858_v63  ;;  %11220 = vmatpush.bf16.msra.mxu3 %v17661_v53 }
 0x84e   :  { %v17114_v33 = vld [vmem:[#allocation5 + $0x22f0] sm:$0xf0] }
 0x84f   :  { %v20256_v6 = vld [vmem:[#allocation5 + $0x24d4] sm:$0xf]  ;;  %v17117_v50 = vor.u32 %v20192_v35, %v17114_v33  ;;  %11182 = vmatpush.bf16.msra.mxu0 %v16861_v51 }
 0x850   :  { %v17370_v46 = vld [vmem:[#allocation5 + $0x24f0] sm:$0xf0] }
 0x851   :  { %v20320_v39 = vld [vmem:[#allocation5 + $0x26d4] sm:$0xf]  ;;  %v17373_v7 = vor.u32 %v20256_v6, %v17370_v46  ;;  %11195 = vmatpush.bf16.msra.mxu1 %v17117_v50 }
 0x852   :  { %v17626_v48 = vld [vmem:[#allocation5 + $0x26f0] sm:$0xf0] }
 0x853   :  { %v20120_v58 = vld [vmem:[#allocation5 + $0x2094] sm:$0xf]  ;;  %v17629_v52 = vor.u32 %v20320_v39, %v17626_v48  ;;  %11208 = vmatpush.bf16.msra.mxu2 %v17373_v7 }
 0x854   :  { %v16826_v11 = vld [vmem:[#allocation5 + $0x20b0] sm:$0xf0] }
 0x855   :  { %v20184_v14 = vld [vmem:[#allocation5 + $0x2294] sm:$0xf]  ;;  %v16829_v49 = vor.u32 %v20120_v58, %v16826_v11  ;;  %11221 = vmatpush.bf16.msra.mxu3 %v17629_v52  ;;  %v10955_v52 = vpop.f32.mrf.mxu2 }
 0x856   :  { %v17082_v21 = vld [vmem:[#allocation5 + $0x22b0] sm:$0xf0] }
 0x857   :  { %v20248_v4 = vld [vmem:[#allocation5 + $0x2494] sm:$0xf]  ;;  %v17085_v56 = vor.u32 %v20184_v14, %v17082_v21  ;;  %11183 = vmatpush.bf16.msra.mxu0 %v16829_v49 }
 0x858   :  { %v17338_v28 = vld [vmem:[#allocation5 + $0x24b0] sm:$0xf0] }
 0x859   :  { %v20312_v45 = vld [vmem:[#allocation5 + $0x2694] sm:$0xf]  ;;  %v17341_v10 = vor.u32 %v20248_v4, %v17338_v28  ;;  %11196 = vmatpush.bf16.msra.mxu1 %v17085_v56  ;;  %v10968_v28 = vpop.f32.mrf.mxu3 }
 0x85a   :  { %v17594_v3 = vld [vmem:[#allocation5 + $0x26b0] sm:$0xf0] }
 0x85b   :  { %v20112_v57 = vld [vmem:[#allocation5 + $0x2054] sm:$0xf]  ;;  %v17597_v59 = vor.u32 %v20312_v45, %v17594_v3  ;;  %11209 = vmatpush.bf16.msra.mxu2 %v17341_v10 }
 0x85c   :  { %v16794_v43 = vld [vmem:[#allocation5 + $0x2070] sm:$0xf0] }
 0x85d   :  { %v20176_v44 = vld [vmem:[#allocation5 + $0x2254] sm:$0xf]  ;;  %v16797_v41 = vor.u32 %v20112_v57, %v16794_v43  ;;  %11222 = vmatpush.bf16.msra.mxu3 %v17597_v59 }
 0x85e   :  { %v17050_v62 = vld [vmem:[#allocation5 + $0x2270] sm:$0xf0] }
 0x85f   :  { %v20240_v30 = vld [vmem:[#allocation5 + $0x2454] sm:$0xf]  ;;  %v17053_v46 = vor.u32 %v20176_v44, %v17050_v62  ;;  %11184 = vmatpush.bf16.msra.mxu0 %v16797_v41 }
 0x860   :  { %v17306_v63 = vld [vmem:[#allocation5 + $0x2470] sm:$0xf0] }
 0x861   :  { %v20304_v35 = vld [vmem:[#allocation5 + $0x2654] sm:$0xf]  ;;  %v17309_v39 = vor.u32 %v20240_v30, %v17306_v63  ;;  %11197 = vmatpush.bf16.msra.mxu1 %v17053_v46 }
 0x862   :  { %v17562_v53 = vld [vmem:[#allocation5 + $0x2670] sm:$0xf0] }
 0x863   :  { %v20104_v33 = vld [vmem:[#allocation5 + $0x2014] sm:$0xf]  ;;  %v17565_v7 = vor.u32 %v20304_v35, %v17562_v53  ;;  %11210 = vmatpush.bf16.msra.mxu2 %v17309_v39 }
 0x864   :  { %v16762_v6 = vld [vmem:[#allocation5 + $0x2030] sm:$0xf0] }
 0x865   :  { %v20168_v48 = vld [vmem:[#allocation5 + $0x2214] sm:$0xf]  ;;  %v16765_v0 = vor.u32 %v20104_v33, %v16762_v6  ;;  %11223 = vmatpush.bf16.msra.mxu3 %v17565_v7 }
 0x866   :  { %v17018_v51 = vld [vmem:[#allocation5 + $0x2230] sm:$0xf0] }
 0x867   :  { %v20232_v50 = vld [vmem:[#allocation5 + $0x2414] sm:$0xf]  ;;  %v17021_v12 = vor.u32 %v20168_v48, %v17018_v51  ;;  %11185 = vmatpush.bf16.msra.mxu0 %v16765_v0 }
 0x868   :  { %v17274_v58 = vld [vmem:[#allocation5 + $0x2430] sm:$0xf0] }
 0x869   :  { %v20296_v11 = vld [vmem:[#allocation5 + $0x2614] sm:$0xf]  ;;  %v17277_v49 = vor.u32 %v20232_v50, %v17274_v58  ;;  %11198 = vmatpush.bf16.msra.mxu1 %v17021_v12  ;;  %v20704_v12 = vld [vmem:[#allocation7] sm:$0xff] }
 0x86a   :  { %v17530_v14 = vld [vmem:[#allocation5 + $0x2630] sm:$0xf0]  ;;  %11186 = vmatmul.bf16.vlgmr.msra.gmra.mxu0 %v21030_v24 }
 0x86b   :  { %v20416_v16 = vld [vmem:[#allocation5 + $0x29d4] sm:$0xf]  ;;  %v17533_v10 = vor.u32 %v20296_v11, %v17530_v14  ;;  %11211 = vmatpush.bf16.msra.mxu2 %v17277_v49  ;;  %v1719_v49 = vperm.slane %v20704_v12, 5 }
 0x86c   :  { %v18010_v21 = vld [vmem:[#allocation5 + $0x29f0] sm:$0xf0]  ;;  %11199 = vmatmul.bf16.vlgmr.msra.gmra.mxu1 %v21034_v32 }
 0x86d   :  { %v20480_v4 = vld [vmem:[#allocation5 + $0x2bd4] sm:$0xf]  ;;  %v18013_v57 = vor.u32 %v20416_v16, %v18010_v21  ;;  %11224 = vmatpush.bf16.msra.mxu3 %v17533_v10 }
 0x86e   :  { %v18266_v60 = vld [vmem:[#allocation5 + $0x2bf0] sm:$0xf0]  ;;  %11212 = vmatmul.bf16.vlgmr.msra.gmra.mxu2 %v21032_v31 }
 0x86f   :  { %v20544_v45 = vld [vmem:[#allocation5 + $0x2dd4] sm:$0xf]  ;;  %v18269_v43 = vor.u32 %v20480_v4, %v18266_v60  ;;  %11230 = vmatpush.bf16.msrb.mxu0 %v18013_v57 }
 0x870   :  { %v18522_v3 = vld [vmem:[#allocation5 + $0x2df0] sm:$0xf0]  ;;  %11225 = vmatmul.bf16.vlgmr.msra.gmra.mxu3 %v21036_v36 }
 0x871   :  { %v20608_v54 = vld [vmem:[#allocation5 + $0x2fd4] sm:$0xf]  ;;  %v18525_v44 = vor.u32 %v20544_v45, %v18522_v3  ;;  %11243 = vmatpush.bf16.msrb.mxu1 %v18269_v43 }
 0x872   :  { %v18778_v56 = vld [vmem:[#allocation5 + $0x2ff0] sm:$0xf0] }
 0x873   :  { %v20408_v59 = vld [vmem:[#allocation5 + $0x2994] sm:$0xf]  ;;  %v18781_v63 = vor.u32 %v20608_v54, %v18778_v56  ;;  %11256 = vmatpush.bf16.msrb.mxu2 %v18525_v44 }
 0x874   :  { %v17978_v62 = vld [vmem:[#allocation5 + $0x29b0] sm:$0xf0] }
 0x875   :  { %v20472_v30 = vld [vmem:[#allocation5 + $0x2b94] sm:$0xf]  ;;  %v17981_v46 = vor.u32 %v20408_v59, %v17978_v62  ;;  %11269 = vmatpush.bf16.msrb.mxu3 %v18781_v63  ;;  %v10979_v62 = vpop.f32.mrf.mxu0 }
 0x876   :  { %v18234_v35 = vld [vmem:[#allocation5 + $0x2bb0] sm:$0xf0] }
 0x877   :  { %v20536_v53 = vld [vmem:[#allocation5 + $0x2d94] sm:$0xf]  ;;  %v18237_v39 = vor.u32 %v20472_v30, %v18234_v35  ;;  %11231 = vmatpush.bf16.msrb.mxu0 %v17981_v46 }
 0x878   :  { %v18490_v41 = vld [vmem:[#allocation5 + $0x2db0] sm:$0xf0] }
 0x879   :  { %v20600_v33 = vld [vmem:[#allocation5 + $0x2f94] sm:$0xf]  ;;  %v18493_v48 = vor.u32 %v20536_v53, %v18490_v41  ;;  %11244 = vmatpush.bf16.msrb.mxu1 %v18237_v39 }
 0x87a   :  { %v18746_v6 = vld [vmem:[#allocation5 + $0x2fb0] sm:$0xf0] }
 0x87b   :  { %v20400_v51 = vld [vmem:[#allocation5 + $0x2954] sm:$0xf]  ;;  %v18749_v58 = vor.u32 %v20600_v33, %v18746_v6  ;;  %11257 = vmatpush.bf16.msrb.mxu2 %v18493_v48  ;;  %v10980_v33 = vadd.f32 %v10979_v62, %v1719_v49  ;;  %v10992_v6 = vpop.f32.mrf.mxu1  ;;  %v11018_v49 = vpop.f32.mrf.mxu3 }
 0x87c   :  { %v17946_v50 = vld [vmem:[#allocation5 + $0x2970] sm:$0xf0] }
 0x87d   :  { %v20464_v7 = vld [vmem:[#allocation5 + $0x2b54] sm:$0xf]  ;;  %v17949_v4 = vor.u32 %v20400_v51, %v17946_v50  ;;  %11270 = vmatpush.bf16.msrb.mxu3 %v18749_v58  ;;  %v10993_v58 = vadd.f32 %v10992_v6, %v10980_v33 }
 0x87e   :  { %v18202_v11 = vld [vmem:[#allocation5 + $0x2b70] sm:$0xf0] }
 0x87f   :  { %v20528_v14 = vld [vmem:[#allocation5 + $0x2d54] sm:$0xf]  ;;  %v18205_v0 = vor.u32 %v20464_v7, %v18202_v11  ;;  %11232 = vmatpush.bf16.msrb.mxu0 %v17949_v4 }
 0x880   :  { %v18458_v52 = vld [vmem:[#allocation5 + $0x2d70] sm:$0xf0] }
 0x881   :  { %v20592_v16 = vld [vmem:[#allocation5 + $0x2f54] sm:$0xf]  ;;  %v18461_v60 = vor.u32 %v20528_v14, %v18458_v52  ;;  %11245 = vmatpush.bf16.msrb.mxu1 %v18205_v0 }
 0x882   :  { %v18714_v21 = vld [vmem:[#allocation5 + $0x2f70] sm:$0xf0] }
 0x883   :  { %v20392_v28 = vld [vmem:[#allocation5 + $0x2914] sm:$0xf]  ;;  %v18717_v54 = vor.u32 %v20592_v16, %v18714_v21  ;;  %11258 = vmatpush.bf16.msrb.mxu2 %v18461_v60 }
 0x884   :  { %v17914_v45 = vld [vmem:[#allocation5 + $0x2930] sm:$0xf0] }
 0x885   :  { %v20456_v3 = vld [vmem:[#allocation5 + $0x2b14] sm:$0xf]  ;;  %v17917_v59 = vor.u32 %v20392_v28, %v17914_v45  ;;  %11271 = vmatpush.bf16.msrb.mxu3 %v18717_v54  ;;  %v11005_v28 = vpop.f32.mrf.mxu2 }
 0x886   :  { %v18170_v56 = vld [vmem:[#allocation5 + $0x2b30] sm:$0xf0]  ;;  %v11006_v12 = vadd.f32 %v11005_v28, %v10993_v58 }
 0x887   :  { %v20520_v10 = vld [vmem:[#allocation5 + $0x2d14] sm:$0xf]  ;;  %v18173_v30 = vor.u32 %v20456_v3, %v18170_v56  ;;  %11233 = vmatpush.bf16.msrb.mxu0 %v17917_v59 }
 0x888   :  { %v18426_v57 = vld [vmem:[#allocation5 + $0x2d30] sm:$0xf0] }
 0x889   :  { %v20584_v43 = vld [vmem:[#allocation5 + $0x2f14] sm:$0xf]  ;;  %v18429_v63 = vor.u32 %v20520_v10, %v18426_v57  ;;  %11246 = vmatpush.bf16.msrb.mxu1 %v18173_v30  ;;  %v21255_v57 = vadd.f32 %v11018_v49, %v11006_v12  ;;  %v13152_v12 = vld [vmem:[#allocation5 + $0x3d8] sm:$0xf] }
 0x88a   :  { %v18682_v44 = vld [vmem:[#allocation5 + $0x2f30] sm:$0xf0] }
 0x88b   :  { %v20384_v35 = vld [vmem:[#allocation5 + $0x28d4] sm:$0xf]  ;;  %v18685_v46 = vor.u32 %v20584_v43, %v18682_v44  ;;  %11259 = vmatpush.bf16.msrb.mxu2 %v18429_v63  ;;  %v10981_v43 = vpop.f32.mrf.mxu0 }
 0x88c   :  { %v17882_v53 = vld [vmem:[#allocation5 + $0x28f0] sm:$0xf0] }
 0x88d   :  { %v20448_v41 = vld [vmem:[#allocation5 + $0x2ad4] sm:$0xf]  ;;  %v17885_v11 = vor.u32 %v20384_v35, %v17882_v53  ;;  %11272 = vmatpush.bf16.msrb.mxu3 %v18685_v46  ;;  %v10994_v35 = vpop.f32.mrf.mxu1 }
 0x88e   :  { %v18138_v39 = vld [vmem:[#allocation5 + $0x2af0] sm:$0xf0] }
 0x88f   :  { %v20512_v48 = vld [vmem:[#allocation5 + $0x2cd4] sm:$0xf]  ;;  %v18141_v14 = vor.u32 %v20448_v41, %v18138_v39  ;;  %11234 = vmatpush.bf16.msrb.mxu0 %v17885_v11 }
 0x890   :  { %v18394_v51 = vld [vmem:[#allocation5 + $0x2cf0] sm:$0xf0] }
 0x891   :  { %v20576_v50 = vld [vmem:[#allocation5 + $0x2ed4] sm:$0xf]  ;;  %v18397_v52 = vor.u32 %v20512_v48, %v18394_v51  ;;  %11247 = vmatpush.bf16.msrb.mxu1 %v18141_v14 }
 0x892   :  { %v18650_v7 = vld [vmem:[#allocation5 + $0x2ef0] sm:$0xf0] }
 0x893   :  { %v20376_v16 = vld [vmem:[#allocation5 + $0x2894] sm:$0xf]  ;;  %v18653_v0 = vor.u32 %v20576_v50, %v18650_v7  ;;  %11260 = vmatpush.bf16.msrb.mxu2 %v18397_v52 }
 0x894   :  { %v17850_v21 = vld [vmem:[#allocation5 + $0x28b0] sm:$0xf0] }
 0x895   :  { %v20440_v4 = vld [vmem:[#allocation5 + $0x2a94] sm:$0xf]  ;;  %v17853_v10 = vor.u32 %v20376_v16, %v17850_v21  ;;  %11273 = vmatpush.bf16.msrb.mxu3 %v18653_v0  ;;  %v11007_v16 = vpop.f32.mrf.mxu2 }
 0x896   :  { %v18106_v60 = vld [vmem:[#allocation5 + $0x2ab0] sm:$0xf0]  ;;  %v19125_v16 = vld [vmem:[#allocation5 + $0x174] sm:$0xf0] }
 0x897   :  { %v20504_v45 = vld [vmem:[#allocation5 + $0x2c94] sm:$0xf]  ;;  %v18109_v44 = vor.u32 %v20440_v4, %v18106_v60  ;;  %11235 = vmatpush.bf16.msrb.mxu0 %v17853_v10  ;;  %v11020_v60 = vpop.f32.mrf.mxu3  ;;  %v19269_v10 = vld [vmem:[#allocation5 + $0x5f4] sm:$0xf0] }
 0x898   :  { %v18362_v3 = vld [vmem:[#allocation5 + $0x2cb0] sm:$0xf0]  ;;  %v19253_v60 = vld [vmem:[#allocation5 + $0x574] sm:$0xf0] }
 0x899   :  { %v20568_v54 = vld [vmem:[#allocation5 + $0x2e94] sm:$0xf]  ;;  %v18365_v59 = vor.u32 %v20504_v45, %v18362_v3  ;;  %11248 = vmatpush.bf16.msrb.mxu1 %v18109_v44  ;;  %v12896_v45 = vld [vmem:[#allocation5 + $0x1d8] sm:$0xf] }
 0x89a   :  { %v18618_v56 = vld [vmem:[#allocation5 + $0x2eb0] sm:$0xf0]  ;;  %v19141_v3 = vld [vmem:[#allocation5 + $0x1f4] sm:$0xf0] }
 0x89b   :  { %v20368_v62 = vld [vmem:[#allocation5 + $0x2854] sm:$0xf]  ;;  %v18621_v53 = vor.u32 %v20568_v54, %v18618_v56  ;;  %11261 = vmatpush.bf16.msrb.mxu2 %v18365_v59  ;;  %v19205_v54 = vld [vmem:[#allocation5 + $0x3f4] sm:$0xf0] }
 0x89c   :  { %v17818_v30 = vld [vmem:[#allocation5 + $0x2870] sm:$0xf0]  ;;  %v13408_v56 = vld [vmem:[#allocation5 + $0x5d8] sm:$0xf]  ;;  %v13153_v35 = vor.u32 %v19205_v54, %v13152_v12 }
 0x89d   :  { %v20432_v63 = vld [vmem:[#allocation5 + $0x2a54] sm:$0xf]  ;;  %v17821_v48 = vor.u32 %v20368_v62, %v17818_v30  ;;  %11274 = vmatpush.bf16.msrb.mxu3 %v18621_v53  ;;  %v13664_v59 = vld [vmem:[#allocation5 + $0x7d8] sm:$0xf]  ;;  %v13409_v53 = vor.u32 %v19269_v10, %v13408_v56 }
 0x89e   :  { %v18074_v41 = vld [vmem:[#allocation5 + $0x2a70] sm:$0xf0]  ;;  %v19333_v62 = vld [vmem:[#allocation5 + $0x7f4] sm:$0xf0] }
 0x89f   :  { %v20496_v33 = vld [vmem:[#allocation5 + $0x2c54] sm:$0xf]  ;;  %v18077_v7 = vor.u32 %v20432_v63, %v18074_v41  ;;  %11236 = vmatpush.bf16.msrb.mxu0 %v17821_v48  ;;  %v12897_v63 = vor.u32 %v19141_v3, %v12896_v45  ;;  %v12864_v41 = vld [vmem:[#allocation5 + $0x198] sm:$0xf] }
 0x8a0   :  { %v18330_v6 = vld [vmem:[#allocation5 + $0x2c70] sm:$0xf0]  ;;  %v13376_v48 = vld [vmem:[#allocation5 + $0x598] sm:$0xf] }
 0x8a1   :  { %v20560_v46 = vld [vmem:[#allocation5 + $0x2e54] sm:$0xf]  ;;  %v18333_v58 = vor.u32 %v20496_v33, %v18330_v6  ;;  %11249 = vmatpush.bf16.msrb.mxu1 %v18077_v7  ;;  %v19133_v33 = vld [vmem:[#allocation5 + $0x1b4] sm:$0xf0] }
 0x8a2   :  { %v18586_v39 = vld [vmem:[#allocation5 + $0x2e70] sm:$0xf0]  ;;  %v13120_v6 = vld [vmem:[#allocation5 + $0x398] sm:$0xf] }
 0x8a3   :  { %v20360_v51 = vld [vmem:[#allocation5 + $0x2814] sm:$0xf]  ;;  %v18589_v21 = vor.u32 %v20560_v46, %v18586_v39  ;;  %11262 = vmatpush.bf16.msrb.mxu2 %v18333_v58  ;;  %v13665_v46 = vor.u32 %v19333_v62, %v13664_v59  ;;  %v19197_v39 = vld [vmem:[#allocation5 + $0x3b4] sm:$0xf0]  ;;  %v12865_v58 = vor.u32 %v19133_v33, %v12864_v41  ;;  %v11031_v41 = vpop.f32.mrf.mxu0 }
 0x8a4   :  { %v17786_v50 = vld [vmem:[#allocation5 + $0x2830] sm:$0xf0]  ;;  %v19325_v7 = vld [vmem:[#allocation5 + $0x7b4] sm:$0xf0] }
 0x8a5   :  { %v20424_v11 = vld [vmem:[#allocation5 + $0x2a14] sm:$0xf]  ;;  %v17789_v49 = vor.u32 %v20360_v51, %v17786_v50  ;;  %11275 = vmatpush.bf16.msrb.mxu3 %v18589_v21  ;;  %v19261_v51 = vld [vmem:[#allocation5 + $0x5b4] sm:$0xf0] }
 0x8a6   :  { %v18042_v14 = vld [vmem:[#allocation5 + $0x2a30] sm:$0xf0]  ;;  %v13632_v50 = vld [vmem:[#allocation5 + $0x798] sm:$0xf] }
 0x8a7   :  { %v20488_v52 = vld [vmem:[#allocation5 + $0x2c14] sm:$0xf]  ;;  %v18045_v43 = vor.u32 %v20424_v11, %v18042_v14  ;;  %11237 = vmatpush.bf16.msrb.mxu0 %v17789_v49  ;;  %v13121_v11 = vor.u32 %v19197_v39, %v13120_v6  ;;  %v13377_v14 = vor.u32 %v19261_v51, %v13376_v48  ;;  %v13088_v21 = vld [vmem:[#allocation5 + $0x358] sm:$0xf]  ;;  %v11032_v51 = vadd.f32 %v11031_v41, %v21255_v57 }
 0x8a8   :  { %v18298_v4 = vld [vmem:[#allocation5 + $0x2c30] sm:$0xf0]  ;;  %v13600_v45 = vld [vmem:[#allocation5 + $0x758] sm:$0xf] }
 0x8a9   :  { %v20552_v28 = vld [vmem:[#allocation5 + $0x2e14] sm:$0xf]  ;;  %v18301_v44 = vor.u32 %v20488_v52, %v18298_v4  ;;  %11250 = vmatpush.bf16.msrb.mxu1 %v18045_v43  ;;  %v12832_v52 = vld [vmem:[#allocation5 + $0x158] sm:$0xf]  ;;  %v13633_v4 = vor.u32 %v19325_v7, %v13632_v50  ;;  %v11044_v50 = vpop.f32.mrf.mxu1 }
 0x8aa   :  { %v18554_v0 = vld [vmem:[#allocation5 + $0x2e30] sm:$0xf0]  ;;  %11238 = vmatmul.bf16.vlgmr.msrb.gmra.mxu0 %v21044_v61  ;;  %v19317_v3 = vld [vmem:[#allocation5 + $0x774] sm:$0xf0]  ;;  %v12833_v12 = vor.u32 %v19125_v16, %v12832_v52 }
 0x8ab   :  { %v18557_v30 = vor.u32 %v20552_v28, %v18554_v0  ;;  %11263 = vmatpush.bf16.msrb.mxu2 %v18301_v44  ;;  %11282 = vmatpush.bf16.msra.mxu0 %v12897_v63  ;;  %v19189_v28 = vld [vmem:[#allocation5 + $0x374] sm:$0xf0]  ;;  %v13601_v44 = vor.u32 %v19317_v3, %v13600_v45 }
 0x8ac   :  { %v13344_v0 = vld [vmem:[#allocation5 + $0x558] sm:$0xf]  ;;  %11251 = vmatmul.bf16.vlgmr.msrb.gmra.mxu1 %v21048_v2  ;;  %v13089_v49 = vor.u32 %v19189_v28, %v13088_v21  ;;  %v11045_v21 = vadd.f32 %v11044_v50, %v11032_v51 }
 0x8ad   :  { %11276 = vmatpush.bf16.msrb.mxu3 %v18557_v30  ;;  %11295 = vmatpush.bf16.msra.mxu1 %v13153_v35  ;;  %v13345_v54 = vor.u32 %v19253_v60, %v13344_v0  ;;  %v12800_v56 = vld [vmem:[#allocation5 + $0x118] sm:$0xf] }
 0x8ae   :  { %11264 = vmatmul.bf16.vlgmr.msrb.gmra.mxu2 %v21046_v1  ;;  %v19117_v10 = vld [vmem:[#allocation5 + $0x134] sm:$0xf0] }
 0x8af   :  { %11308 = vmatpush.bf16.msra.mxu2 %v13409_v53  ;;  %11283 = vmatpush.bf16.msra.mxu0 %v12865_v58  ;;  %v13056_v43 = vld [vmem:[#allocation5 + $0x318] sm:$0xf]  ;;  %v12801_v53 = vor.u32 %v19117_v10, %v12800_v56 }
 0x8b0   :  { %11277 = vmatmul.bf16.vlgmr.msrb.gmra.mxu3 %v21050_v5  ;;  %v19181_v59 = vld [vmem:[#allocation5 + $0x334] sm:$0xf0] }
 0x8b1   :  { %11321 = vmatpush.bf16.msra.mxu3 %v13665_v46  ;;  %11296 = vmatpush.bf16.msra.mxu1 %v13121_v11  ;;  %v13312_v62 = vld [vmem:[#allocation5 + $0x518] sm:$0xf]  ;;  %v13057_v33 = vor.u32 %v19181_v59, %v13056_v43  ;;  %v11070_v43 = vpop.f32.mrf.mxu3 }
 0x8b2   :  { %v19245_v30 = vld [vmem:[#allocation5 + $0x534] sm:$0xf0] }
 0x8b3   :  { %11309 = vmatpush.bf16.msra.mxu2 %v13377_v14  ;;  %v13568_v63 = vld [vmem:[#allocation5 + $0x718] sm:$0xf]  ;;  %11284 = vmatpush.bf16.msra.mxu0 %v12833_v12  ;;  %v13313_v6 = vor.u32 %v19245_v30, %v13312_v62  ;;  %v11057_v12 = vpop.f32.mrf.mxu2 }
 0x8b4   :  { %v19309_v35 = vld [vmem:[#allocation5 + $0x734] sm:$0xf0]  ;;  %v11058_v10 = vadd.f32 %v11057_v12, %v11045_v21 }
 0x8b5   :  { %11322 = vmatpush.bf16.msra.mxu3 %v13633_v4  ;;  %11297 = vmatpush.bf16.msra.mxu1 %v13089_v49  ;;  %v12768_v46 = vld [vmem:[#allocation5 + $0xd8] sm:$0xf]  ;;  %v13569_v7 = vor.u32 %v19309_v35, %v13568_v63  ;;  %v11033_v63 = vpop.f32.mrf.mxu0 }
 0x8b6   :  { %v19109_v39 = vld [vmem:[#allocation5 + $0xf4] sm:$0xf0]  ;;  %v21262_v30 = vadd.f32 %v11070_v43, %v11058_v10 }
 0x8b7   :  { %11310 = vmatpush.bf16.msra.mxu2 %v13345_v54  ;;  %v13024_v48 = vld [vmem:[#allocation5 + $0x2d8] sm:$0xf]  ;;  %11285 = vmatpush.bf16.msra.mxu0 %v12801_v53  ;;  %v12769_v4 = vor.u32 %v19109_v39, %v12768_v46  ;;  %v11046_v46 = vpop.f32.mrf.mxu1 }
 0x8b8   :  { %v19173_v58 = vld [vmem:[#allocation5 + $0x2f4] sm:$0xf0] }
 0x8b9   :  { %11323 = vmatpush.bf16.msra.mxu3 %v13601_v44  ;;  %v13280_v11 = vld [vmem:[#allocation5 + $0x4d8] sm:$0xf]  ;;  %11298 = vmatpush.bf16.msra.mxu1 %v13057_v33  ;;  %v13025_v28 = vor.u32 %v19173_v58, %v13024_v48 }
 0x8ba   :  { %v19237_v14 = vld [vmem:[#allocation5 + $0x4f4] sm:$0xf0] }
 0x8bb   :  { %v13536_v52 = vld [vmem:[#allocation5 + $0x6d8] sm:$0xf]  ;;  %11311 = vmatpush.bf16.msra.mxu2 %v13313_v6  ;;  %v13281_v0 = vor.u32 %v19237_v14, %v13280_v11  ;;  %11286 = vmatpush.bf16.msra.mxu0 %v12769_v4 }
 0x8bc   :  { %v19301_v16 = vld [vmem:[#allocation5 + $0x6f4] sm:$0xf0] }
 0x8bd   :  { %v12736_v60 = vld [vmem:[#allocation5 + $0x98] sm:$0xf]  ;;  %11324 = vmatpush.bf16.msra.mxu3 %v13569_v7  ;;  %v13537_v57 = vor.u32 %v19301_v16, %v13536_v52  ;;  %11299 = vmatpush.bf16.msra.mxu1 %v13025_v28 }
 0x8be   :  { %v19101_v45 = vld [vmem:[#allocation5 + $0xb4] sm:$0xf0] }
 0x8bf   :  { %v12992_v3 = vld [vmem:[#allocation5 + $0x298] sm:$0xf]  ;;  %v12737_v62 = vor.u32 %v19101_v45, %v12736_v60  ;;  %11312 = vmatpush.bf16.msra.mxu2 %v13281_v0  ;;  %v11059_v60 = vpop.f32.mrf.mxu2 }
 0x8c0   :  { %v19165_v49 = vld [vmem:[#allocation5 + $0x2b4] sm:$0xf0] }
 0x8c1   :  { %v13248_v54 = vld [vmem:[#allocation5 + $0x498] sm:$0xf]  ;;  %v12993_v35 = vor.u32 %v19165_v49, %v12992_v3  ;;  %11325 = vmatpush.bf16.msra.mxu3 %v13537_v57  ;;  %11287 = vmatpush.bf16.msra.mxu0 %v12737_v62  ;;  %v11072_v49 = vpop.f32.mrf.mxu3 }
 0x8c2   :  { %v19229_v56 = vld [vmem:[#allocation5 + $0x4b4] sm:$0xf0] }
 0x8c3   :  { %v13504_v44 = vld [vmem:[#allocation5 + $0x698] sm:$0xf]  ;;  %v13249_v53 = vor.u32 %v19229_v56, %v13248_v54  ;;  %11300 = vmatpush.bf16.msra.mxu1 %v12993_v35 }
 0x8c4   :  { %v19293_v59 = vld [vmem:[#allocation5 + $0x6b4] sm:$0xf0] }
 0x8c5   :  { %v12704_v41 = vld [vmem:[#allocation5 + $0x58] sm:$0xf]  ;;  %v13505_v39 = vor.u32 %v19293_v59, %v13504_v44  ;;  %11313 = vmatpush.bf16.msra.mxu2 %v13249_v53 }
 0x8c6   :  { %v19093_v33 = vld [vmem:[#allocation5 + $0x74] sm:$0xf0] }
 0x8c7   :  { %v12960_v6 = vld [vmem:[#allocation5 + $0x258] sm:$0xf]  ;;  %v12705_v11 = vor.u32 %v19093_v33, %v12704_v41  ;;  %11326 = vmatpush.bf16.msra.mxu3 %v13505_v39 }
 0x8c8   :  { %v19157_v48 = vld [vmem:[#allocation5 + $0x274] sm:$0xf0] }
 0x8c9   :  { %v13216_v51 = vld [vmem:[#allocation5 + $0x458] sm:$0xf]  ;;  %v12961_v16 = vor.u32 %v19157_v48, %v12960_v6  ;;  %11288 = vmatpush.bf16.msra.mxu0 %v12705_v11 }
 0x8ca   :  { %v19221_v50 = vld [vmem:[#allocation5 + $0x474] sm:$0xf0] }
 0x8cb   :  { %v13472_v7 = vld [vmem:[#allocation5 + $0x658] sm:$0xf]  ;;  %v13217_v21 = vor.u32 %v19221_v50, %v13216_v51  ;;  %11301 = vmatpush.bf16.msra.mxu1 %v12961_v16 }
 0x8cc   :  { %v19285_v58 = vld [vmem:[#allocation5 + $0x674] sm:$0xf0] }
 0x8cd   :  { %v12672_v14 = vld [vmem:[#allocation5 + $0x18] sm:$0xf]  ;;  %v13473_v45 = vor.u32 %v19285_v58, %v13472_v7  ;;  %11314 = vmatpush.bf16.msra.mxu2 %v13217_v21 }
 0x8ce   :  { %v19085_v52 = vld [vmem:[#allocation5 + $0x34] sm:$0xf0] }
 0x8cf   :  { %v12928_v4 = vld [vmem:[#allocation5 + $0x218] sm:$0xf]  ;;  %v12673_v43 = vor.u32 %v19085_v52, %v12672_v14  ;;  %11327 = vmatpush.bf16.msra.mxu3 %v13473_v45 }
 0x8d0   :  { %v19149_v28 = vld [vmem:[#allocation5 + $0x234] sm:$0xf0] }
 0x8d1   :  { %v13184_v0 = vld [vmem:[#allocation5 + $0x418] sm:$0xf]  ;;  %v12929_v63 = vor.u32 %v19149_v28, %v12928_v4  ;;  %11289 = vmatpush.bf16.msra.mxu0 %v12673_v43 }
 0x8d2   :  { %v19213_v3 = vld [vmem:[#allocation5 + $0x434] sm:$0xf0] }
 0x8d3   :  { %v13440_v12 = vld [vmem:[#allocation5 + $0x618] sm:$0xf]  ;;  %v13185_v35 = vor.u32 %v19213_v3, %v13184_v0  ;;  %11302 = vmatpush.bf16.msra.mxu1 %v12929_v63 }
 0x8d4   :  { %v19277_v57 = vld [vmem:[#allocation5 + $0x634] sm:$0xf0]  ;;  %11290 = vmatmul.bf16.vlgmr.msra.gmra.mxu0 %v20984_v9 }
 0x8d5   :  { %v13920_v54 = vld [vmem:[#allocation5 + $0x9d8] sm:$0xf]  ;;  %v13441_v33 = vor.u32 %v19277_v57, %v13440_v12  ;;  %11315 = vmatpush.bf16.msra.mxu2 %v13185_v35 }
 0x8d6   :  { %v19397_v56 = vld [vmem:[#allocation5 + $0x9f4] sm:$0xf0]  ;;  %11303 = vmatmul.bf16.vlgmr.msra.gmra.mxu1 %v20991_v25 }
 0x8d7   :  { %v14176_v10 = vld [vmem:[#allocation5 + $0xbd8] sm:$0xf]  ;;  %v13921_v6 = vor.u32 %v19397_v56, %v13920_v54  ;;  %11328 = vmatpush.bf16.msra.mxu3 %v13441_v33 }
 0x8d8   :  { %v19461_v44 = vld [vmem:[#allocation5 + $0xbf4] sm:$0xf0]  ;;  %11316 = vmatmul.bf16.vlgmr.msra.gmra.mxu2 %v20982_v8 }
 0x8d9   :  { %v14432_v59 = vld [vmem:[#allocation5 + $0xdd8] sm:$0xf]  ;;  %v14177_v46 = vor.u32 %v19461_v44, %v14176_v10  ;;  %11334 = vmatpush.bf16.msrb.mxu0 %v13921_v6  ;;  %v11083_v6 = vpop.f32.mrf.mxu0 }
 0x8da   :  { %v19525_v62 = vld [vmem:[#allocation5 + $0xdf4] sm:$0xf0]  ;;  %11329 = vmatmul.bf16.vlgmr.msra.gmra.mxu3 %v20986_v15 }
 0x8db   :  { %v14688_v53 = vld [vmem:[#allocation5 + $0xfd8] sm:$0xf]  ;;  %v14433_v39 = vor.u32 %v19525_v62, %v14432_v59  ;;  %11347 = vmatpush.bf16.msrb.mxu1 %v14177_v46 }
 0x8dc   :  { %v19589_v41 = vld [vmem:[#allocation5 + $0xff4] sm:$0xf0] }
 0x8dd   :  { %v13888_v48 = vld [vmem:[#allocation5 + $0x998] sm:$0xf]  ;;  %v14689_v7 = vor.u32 %v19589_v41, %v14688_v53  ;;  %11360 = vmatpush.bf16.msrb.mxu2 %v14433_v39 }
 0x8de   :  { %v19389_v51 = vld [vmem:[#allocation5 + $0x9b4] sm:$0xf0] }
 0x8df   :  { %v14144_v50 = vld [vmem:[#allocation5 + $0xb98] sm:$0xf]  ;;  %v13889_v21 = vor.u32 %v19389_v51, %v13888_v48  ;;  %11373 = vmatpush.bf16.msrb.mxu3 %v14689_v7  ;;  %v11084_v48 = vadd.f32 %v11083_v6, %v21262_v30 }
 0x8e0   :  { %v19453_v58 = vld [vmem:[#allocation5 + $0xbb4] sm:$0xf0] }
 0x8e1   :  { %v14400_v11 = vld [vmem:[#allocation5 + $0xd98] sm:$0xf]  ;;  %v14145_v4 = vor.u32 %v19453_v58, %v14144_v50  ;;  %11335 = vmatpush.bf16.msrb.mxu0 %v13889_v21  ;;  %v11096_v50 = vpop.f32.mrf.mxu1 }
 0x8e2   :  { %v19517_v14 = vld [vmem:[#allocation5 + $0xdb4] sm:$0xf0]  ;;  %v11097_v21 = vadd.f32 %v11096_v50, %v11084_v48 }
 0x8e3   :  { %v14656_v52 = vld [vmem:[#allocation5 + $0xf98] sm:$0xf]  ;;  %v14401_v28 = vor.u32 %v19517_v14, %v14400_v11  ;;  %11348 = vmatpush.bf16.msrb.mxu1 %v14145_v4 }
 0x8e4   :  { %v19581_v16 = vld [vmem:[#allocation5 + $0xfb4] sm:$0xf0] }
 0x8e5   :  { %v13856_v0 = vld [vmem:[#allocation5 + $0x958] sm:$0xf]  ;;  %v14657_v3 = vor.u32 %v19581_v16, %v14656_v52  ;;  %11361 = vmatpush.bf16.msrb.mxu2 %v14401_v28 }
 0x8e6   :  { %v19381_v60 = vld [vmem:[#allocation5 + $0x974] sm:$0xf0] }
 0x8e7   :  { %v14112_v45 = vld [vmem:[#allocation5 + $0xb58] sm:$0xf]  ;;  %v13857_v10 = vor.u32 %v19381_v60, %v13856_v0  ;;  %11374 = vmatpush.bf16.msrb.mxu3 %v14657_v3 }
 0x8e8   :  { %v19445_v12 = vld [vmem:[#allocation5 + $0xb74] sm:$0xf0] }
 0x8e9   :  { %v14368_v57 = vld [vmem:[#allocation5 + $0xd58] sm:$0xf]  ;;  %v14113_v43 = vor.u32 %v19445_v12, %v14112_v45  ;;  %11336 = vmatpush.bf16.msrb.mxu0 %v13857_v10  ;;  %v11109_v10 = vpop.f32.mrf.mxu2  ;;  %v11098_v6 = vpop.f32.mrf.mxu1 }
 0x8ea   :  { %v19509_v49 = vld [vmem:[#allocation5 + $0xd74] sm:$0xf0] }
 0x8eb   :  { %v14624_v54 = vld [vmem:[#allocation5 + $0xf58] sm:$0xf]  ;;  %v14369_v44 = vor.u32 %v19509_v49, %v14368_v57  ;;  %11349 = vmatpush.bf16.msrb.mxu1 %v14113_v43 }
 0x8ec   :  { %v19573_v56 = vld [vmem:[#allocation5 + $0xf74] sm:$0xf0] }
 0x8ed   :  { %v13824_v59 = vld [vmem:[#allocation5 + $0x918] sm:$0xf]  ;;  %v14625_v35 = vor.u32 %v19573_v56, %v14624_v54  ;;  %11362 = vmatpush.bf16.msrb.mxu2 %v14369_v44 }
 0x8ee   :  { %v19373_v62 = vld [vmem:[#allocation5 + $0x934] sm:$0xf0] }
 0x8ef   :  { %v14080_v63 = vld [vmem:[#allocation5 + $0xb18] sm:$0xf]  ;;  %v13825_v51 = vor.u32 %v19373_v62, %v13824_v59  ;;  %11375 = vmatpush.bf16.msrb.mxu3 %v14625_v35  ;;  %v11110_v62 = vadd.f32 %v11109_v10, %v11097_v21 }
 0x8f0   :  { %v19437_v53 = vld [vmem:[#allocation5 + $0xb34] sm:$0xf0] }
 0x8f1   :  { %v14336_v41 = vld [vmem:[#allocation5 + $0xd18] sm:$0xf]  ;;  %v14081_v7 = vor.u32 %v19437_v53, %v14080_v63  ;;  %11337 = vmatpush.bf16.msrb.mxu0 %v13825_v51  ;;  %v11122_v63 = vpop.f32.mrf.mxu3  ;;  %v11111_v10 = vpop.f32.mrf.mxu2 }
 0x8f2   :  { %v19501_v33 = vld [vmem:[#allocation5 + $0xd34] sm:$0xf0] }
 0x8f3   :  { %v14592_v46 = vld [vmem:[#allocation5 + $0xf18] sm:$0xf]  ;;  %v14337_v58 = vor.u32 %v19501_v33, %v14336_v41  ;;  %11350 = vmatpush.bf16.msrb.mxu1 %v14081_v7  ;;  %v11085_v41 = vpop.f32.mrf.mxu0 }
 0x8f4   :  { %v19565_v39 = vld [vmem:[#allocation5 + $0xf34] sm:$0xf0] }
 0x8f5   :  { %v13792_v11 = vld [vmem:[#allocation5 + $0x8d8] sm:$0xf]  ;;  %v14593_v16 = vor.u32 %v19565_v39, %v14592_v46  ;;  %11363 = vmatpush.bf16.msrb.mxu2 %v14337_v58  ;;  %v21269_v46 = vadd.f32 %v11122_v63, %v11110_v62 }
 0x8f6   :  { %v19365_v14 = vld [vmem:[#allocation5 + $0x8f4] sm:$0xf0] }
 0x8f7   :  { %v14048_v52 = vld [vmem:[#allocation5 + $0xad8] sm:$0xf]  ;;  %v13793_v3 = vor.u32 %v19365_v14, %v13792_v11  ;;  %11376 = vmatpush.bf16.msrb.mxu3 %v14593_v16 }
 0x8f8   :  { %v19429_v4 = vld [vmem:[#allocation5 + $0xaf4] sm:$0xf0] }
 0x8f9   :  { %v14304_v28 = vld [vmem:[#allocation5 + $0xcd8] sm:$0xf]  ;;  %v14049_v30 = vor.u32 %v19429_v4, %v14048_v52  ;;  %11338 = vmatpush.bf16.msrb.mxu0 %v13793_v3  ;;  %v11124_v62 = vpop.f32.mrf.mxu3 }
 0x8fa   :  { %v19493_v0 = vld [vmem:[#allocation5 + $0xcf4] sm:$0xf0] }
 0x8fb   :  { %v14560_v60 = vld [vmem:[#allocation5 + $0xed8] sm:$0xf]  ;;  %v14305_v12 = vor.u32 %v19493_v0, %v14304_v28  ;;  %11351 = vmatpush.bf16.msrb.mxu1 %v14049_v30 }
 0x8fc   :  { %v19557_v45 = vld [vmem:[#allocation5 + $0xef4] sm:$0xf0] }
 0x8fd   :  { %v13760_v57 = vld [vmem:[#allocation5 + $0x898] sm:$0xf]  ;;  %v14561_v56 = vor.u32 %v19557_v45, %v14560_v60  ;;  %11364 = vmatpush.bf16.msrb.mxu2 %v14305_v12 }
 0x8fe   :  { %v19357_v49 = vld [vmem:[#allocation5 + $0x8b4] sm:$0xf0] }
 0x8ff   :  { %v14016_v54 = vld [vmem:[#allocation5 + $0xa98] sm:$0xf]  ;;  %v13761_v33 = vor.u32 %v19357_v49, %v13760_v57  ;;  %11377 = vmatpush.bf16.msrb.mxu3 %v14561_v56 }
 0x900   :  { %v19421_v43 = vld [vmem:[#allocation5 + $0xab4] sm:$0xf0] }
 0x901   :  { %v14272_v44 = vld [vmem:[#allocation5 + $0xc98] sm:$0xf]  ;;  %v14017_v39 = vor.u32 %v19421_v43, %v14016_v54  ;;  %11339 = vmatpush.bf16.msrb.mxu0 %v13761_v33 }
 0x902   :  { %v19485_v59 = vld [vmem:[#allocation5 + $0xcb4] sm:$0xf0] }
 0x903   :  { %v14528_v35 = vld [vmem:[#allocation5 + $0xe98] sm:$0xf]  ;;  %v14273_v48 = vor.u32 %v19485_v59, %v14272_v44  ;;  %11352 = vmatpush.bf16.msrb.mxu1 %v14017_v39 }
 0x904   :  { %v19549_v53 = vld [vmem:[#allocation5 + $0xeb4] sm:$0xf0] }
 0x905   :  { %v13728_v51 = vld [vmem:[#allocation5 + $0x858] sm:$0xf]  ;;  %v14529_v58 = vor.u32 %v19549_v53, %v14528_v35  ;;  %11365 = vmatpush.bf16.msrb.mxu2 %v14273_v48 }
 0x906   :  { %v19349_v50 = vld [vmem:[#allocation5 + $0x874] sm:$0xf0] }
 0x907   :  { %v13984_v7 = vld [vmem:[#allocation5 + $0xa58] sm:$0xf]  ;;  %v13729_v4 = vor.u32 %v19349_v50, %v13728_v51  ;;  %11378 = vmatpush.bf16.msrb.mxu3 %v14529_v58 }
 0x908   :  { %v19413_v11 = vld [vmem:[#allocation5 + $0xa74] sm:$0xf0] }
 0x909   :  { %v14240_v14 = vld [vmem:[#allocation5 + $0xc58] sm:$0xf]  ;;  %v13985_v60 = vor.u32 %v19413_v11, %v13984_v7  ;;  %11340 = vmatpush.bf16.msrb.mxu0 %v13729_v4 }
 0x90a   :  { %v19477_v52 = vld [vmem:[#allocation5 + $0xc74] sm:$0xf0] }
 0x90b   :  { %v14496_v16 = vld [vmem:[#allocation5 + $0xe58] sm:$0xf]  ;;  %v14241_v45 = vor.u32 %v19477_v52, %v14240_v14  ;;  %11353 = vmatpush.bf16.msrb.mxu1 %v13985_v60 }
 0x90c   :  { %v19541_v21 = vld [vmem:[#allocation5 + $0xe74] sm:$0xf0] }
 0x90d   :  { %v13696_v28 = vld [vmem:[#allocation5 + $0x818] sm:$0xf]  ;;  %v14497_v57 = vor.u32 %v19541_v21, %v14496_v16  ;;  %11366 = vmatpush.bf16.msrb.mxu2 %v14241_v45 }
 0x90e   :  { %v19341_v0 = vld [vmem:[#allocation5 + $0x834] sm:$0xf0] }
 0x90f   :  { %v13952_v3 = vld [vmem:[#allocation5 + $0xa18] sm:$0xf]  ;;  %v13697_v63 = vor.u32 %v19341_v0, %v13696_v28  ;;  %11379 = vmatpush.bf16.msrb.mxu3 %v14497_v57 }
 0x910   :  { %v19405_v30 = vld [vmem:[#allocation5 + $0xa34] sm:$0xf0] }
 0x911   :  { %v14208_v12 = vld [vmem:[#allocation5 + $0xc18] sm:$0xf]  ;;  %v13953_v33 = vor.u32 %v19405_v30, %v13952_v3  ;;  %11341 = vmatpush.bf16.msrb.mxu0 %v13697_v63 }
 0x912   :  { %v19469_v49 = vld [vmem:[#allocation5 + $0xc34] sm:$0xf0] }
 0x913   :  { %v14464_v54 = vld [vmem:[#allocation5 + $0xe18] sm:$0xf]  ;;  %v14209_v6 = vor.u32 %v19469_v49, %v14208_v12  ;;  %11354 = vmatpush.bf16.msrb.mxu1 %v13953_v33 }
 0x914   :  { %v19533_v56 = vld [vmem:[#allocation5 + $0xe34] sm:$0xf0]  ;;  %11342 = vmatmul.bf16.vlgmr.msrb.gmra.mxu0 %v20996_v37 }
 0x915   :  { %v14944_v43 = vld [vmem:[#allocation5 + $0x11d8] sm:$0xf]  ;;  %v14465_v51 = vor.u32 %v19533_v56, %v14464_v54  ;;  %11367 = vmatpush.bf16.msrb.mxu2 %v14209_v6 }
 0x916   :  { %v19653_v44 = vld [vmem:[#allocation5 + $0x11f4] sm:$0xf0]  ;;  %11355 = vmatmul.bf16.vlgmr.msrb.gmra.mxu1 %v21000_v40 }
 0x917   :  { %v15200_v59 = vld [vmem:[#allocation5 + $0x13d8] sm:$0xf]  ;;  %v14945_v50 = vor.u32 %v19653_v44, %v14944_v43  ;;  %11380 = vmatpush.bf16.msrb.mxu3 %v14465_v51 }
 0x918   :  { %v19717_v35 = vld [vmem:[#allocation5 + $0x13f4] sm:$0xf0]  ;;  %11368 = vmatmul.bf16.vlgmr.msrb.gmra.mxu2 %v20994_v34 }
 0x919   :  { %v15456_v53 = vld [vmem:[#allocation5 + $0x15d8] sm:$0xf]  ;;  %v15201_v7 = vor.u32 %v19717_v35, %v15200_v59  ;;  %11386 = vmatpush.bf16.msra.mxu0 %v14945_v50  ;;  %v11135_v50 = vpop.f32.mrf.mxu0 }
 0x91a   :  { %v19781_v41 = vld [vmem:[#allocation5 + $0x15f4] sm:$0xf0]  ;;  %11381 = vmatmul.bf16.vlgmr.msrb.gmra.mxu3 %v20998_v38 }
 0x91b   :  { %v15712_v39 = vld [vmem:[#allocation5 + $0x17d8] sm:$0xf]  ;;  %v15457_v58 = vor.u32 %v19781_v41, %v15456_v53  ;;  %11399 = vmatpush.bf16.msra.mxu1 %v15201_v7 }
 0x91c   :  { %v19845_v48 = vld [vmem:[#allocation5 + $0x17f4] sm:$0xf0] }
 0x91d   :  { %v14912_v11 = vld [vmem:[#allocation5 + $0x1198] sm:$0xf]  ;;  %v15713_v16 = vor.u32 %v19845_v48, %v15712_v39  ;;  %11412 = vmatpush.bf16.msra.mxu2 %v15457_v58 }
 0x91e   :  { %v19645_v14 = vld [vmem:[#allocation5 + $0x11b4] sm:$0xf0] }
 0x91f   :  { %v15168_v52 = vld [vmem:[#allocation5 + $0x1398] sm:$0xf]  ;;  %v14913_v45 = vor.u32 %v19645_v14, %v14912_v11  ;;  %11425 = vmatpush.bf16.msra.mxu3 %v15713_v16  ;;  %v11136_v11 = vadd.f32 %v11135_v50, %v21269_v46 }
 0x920   :  { %v19709_v21 = vld [vmem:[#allocation5 + $0x13b4] sm:$0xf0] }
 0x921   :  { %v15424_v4 = vld [vmem:[#allocation5 + $0x1598] sm:$0xf]  ;;  %v15169_v3 = vor.u32 %v19709_v21, %v15168_v52  ;;  %11387 = vmatpush.bf16.msra.mxu0 %v14913_v45  ;;  %v11148_v52 = vpop.f32.mrf.mxu1 }
 0x922   :  { %v19773_v28 = vld [vmem:[#allocation5 + $0x15b4] sm:$0xf0]  ;;  %v11149_v45 = vadd.f32 %v11148_v52, %v11136_v11 }
 0x923   :  { %v15680_v0 = vld [vmem:[#allocation5 + $0x1798] sm:$0xf]  ;;  %v15425_v30 = vor.u32 %v19773_v28, %v15424_v4  ;;  %11400 = vmatpush.bf16.msra.mxu1 %v15169_v3 }
 0x924   :  { %v19837_v60 = vld [vmem:[#allocation5 + $0x17b4] sm:$0xf0] }
 0x925   :  { %v14880_v12 = vld [vmem:[#allocation5 + $0x1158] sm:$0xf]  ;;  %v15681_v54 = vor.u32 %v19837_v60, %v15680_v0  ;;  %11413 = vmatpush.bf16.msra.mxu2 %v15425_v30 }
 0x926   :  { %v19637_v57 = vld [vmem:[#allocation5 + $0x1174] sm:$0xf0] }
 0x927   :  { %v15136_v49 = vld [vmem:[#allocation5 + $0x1358] sm:$0xf]  ;;  %v14881_v62 = vor.u32 %v19637_v57, %v14880_v12  ;;  %11426 = vmatpush.bf16.msra.mxu3 %v15681_v54 }
 0x928   :  { %v19701_v56 = vld [vmem:[#allocation5 + $0x1374] sm:$0xf0] }
 0x929   :  { %v15392_v10 = vld [vmem:[#allocation5 + $0x1558] sm:$0xf]  ;;  %v15137_v63 = vor.u32 %v19701_v56, %v15136_v49  ;;  %11388 = vmatpush.bf16.msra.mxu0 %v14881_v62  ;;  %v11161_v62 = vpop.f32.mrf.mxu2  ;;  %v11150_v50 = vpop.f32.mrf.mxu1 }
 0x92a   :  { %v19765_v43 = vld [vmem:[#allocation5 + $0x1574] sm:$0xf0] }
 0x92b   :  { %v15648_v44 = vld [vmem:[#allocation5 + $0x1758] sm:$0xf]  ;;  %v15393_v35 = vor.u32 %v19765_v43, %v15392_v10  ;;  %11401 = vmatpush.bf16.msra.mxu1 %v15137_v63 }
 0x92c   :  { %v19829_v59 = vld [vmem:[#allocation5 + $0x1774] sm:$0xf0] }
 0x92d   :  { %v14848_v53 = vld [vmem:[#allocation5 + $0x1118] sm:$0xf]  ;;  %v15649_v6 = vor.u32 %v19829_v59, %v15648_v44  ;;  %11414 = vmatpush.bf16.msra.mxu2 %v15393_v35 }
 0x92e   :  { %v19629_v41 = vld [vmem:[#allocation5 + $0x1134] sm:$0xf0] }
 0x92f   :  { %v15104_v33 = vld [vmem:[#allocation5 + $0x1318] sm:$0xf]  ;;  %v14849_v14 = vor.u32 %v19629_v41, %v14848_v53  ;;  %11427 = vmatpush.bf16.msra.mxu3 %v15649_v6  ;;  %v11162_v41 = vadd.f32 %v11161_v62, %v11149_v45 }
 0x930   :  { %v19693_v39 = vld [vmem:[#allocation5 + $0x1334] sm:$0xf0] }
 0x931   :  { %v15360_v48 = vld [vmem:[#allocation5 + $0x1518] sm:$0xf]  ;;  %v15105_v16 = vor.u32 %v19693_v39, %v15104_v33  ;;  %11389 = vmatpush.bf16.msra.mxu0 %v14849_v14  ;;  %v11174_v33 = vpop.f32.mrf.mxu3  ;;  %v11163_v62 = vpop.f32.mrf.mxu2 }
 0x932   :  { %v19757_v51 = vld [vmem:[#allocation5 + $0x1534] sm:$0xf0] }
 0x933   :  { %v15616_v7 = vld [vmem:[#allocation5 + $0x1718] sm:$0xf]  ;;  %v15361_v21 = vor.u32 %v19757_v51, %v15360_v48  ;;  %11402 = vmatpush.bf16.msra.mxu1 %v15105_v16  ;;  %v11137_v48 = vpop.f32.mrf.mxu0 }
 0x934   :  { %v19821_v58 = vld [vmem:[#allocation5 + $0x1734] sm:$0xf0] }
 0x935   :  { %v14816_v4 = vld [vmem:[#allocation5 + $0x10d8] sm:$0xf]  ;;  %v15617_v60 = vor.u32 %v19821_v58, %v15616_v7  ;;  %11415 = vmatpush.bf16.msra.mxu2 %v15361_v21  ;;  %v21276_v7 = vadd.f32 %v11174_v33, %v11162_v41 }
 0x936   :  { %v19621_v28 = vld [vmem:[#allocation5 + $0x10f4] sm:$0xf0] }
 0x937   :  { %v15072_v0 = vld [vmem:[#allocation5 + $0x12d8] sm:$0xf]  ;;  %v14817_v54 = vor.u32 %v19621_v28, %v14816_v4  ;;  %11428 = vmatpush.bf16.msra.mxu3 %v15617_v60 }
 0x938   :  { %v19685_v3 = vld [vmem:[#allocation5 + $0x12f4] sm:$0xf0] }
 0x939   :  { %v15328_v30 = vld [vmem:[#allocation5 + $0x14d8] sm:$0xf]  ;;  %v15073_v46 = vor.u32 %v19685_v3, %v15072_v0  ;;  %11390 = vmatpush.bf16.msra.mxu0 %v14817_v54  ;;  %v11176_v41 = vpop.f32.mrf.mxu3 }
 0x93a   :  { %v19749_v12 = vld [vmem:[#allocation5 + $0x14f4] sm:$0xf0] }
 0x93b   :  { %v15584_v57 = vld [vmem:[#allocation5 + $0x16d8] sm:$0xf]  ;;  %v15329_v56 = vor.u32 %v19749_v12, %v15328_v30  ;;  %11403 = vmatpush.bf16.msra.mxu1 %v15073_v46 }
 0x93c   :  { %v19813_v49 = vld [vmem:[#allocation5 + $0x16f4] sm:$0xf0] }
 0x93d   :  { %v14784_v10 = vld [vmem:[#allocation5 + $0x1098] sm:$0xf]  ;;  %v15585_v59 = vor.u32 %v19813_v49, %v15584_v57  ;;  %11416 = vmatpush.bf16.msra.mxu2 %v15329_v56 }
 0x93e   :  { %v19613_v43 = vld [vmem:[#allocation5 + $0x10b4] sm:$0xf0] }
 0x93f   :  { %v15040_v44 = vld [vmem:[#allocation5 + $0x1298] sm:$0xf]  ;;  %v14785_v51 = vor.u32 %v19613_v43, %v14784_v10  ;;  %11429 = vmatpush.bf16.msra.mxu3 %v15585_v59 }
 0x940   :  { %v19677_v63 = vld [vmem:[#allocation5 + $0x12b4] sm:$0xf0] }
 0x941   :  { %v15296_v35 = vld [vmem:[#allocation5 + $0x1498] sm:$0xf]  ;;  %v15041_v58 = vor.u32 %v19677_v63, %v15040_v44  ;;  %11391 = vmatpush.bf16.msra.mxu0 %v14785_v51 }
 0x942   :  { %v19741_v53 = vld [vmem:[#allocation5 + $0x14b4] sm:$0xf0] }
 0x943   :  { %v15552_v6 = vld [vmem:[#allocation5 + $0x1698] sm:$0xf]  ;;  %v15297_v11 = vor.u32 %v19741_v53, %v15296_v35  ;;  %11404 = vmatpush.bf16.msra.mxu1 %v15041_v58 }
 0x944   :  { %v19805_v39 = vld [vmem:[#allocation5 + $0x16b4] sm:$0xf0] }
 0x945   :  { %v14752_v14 = vld [vmem:[#allocation5 + $0x1058] sm:$0xf]  ;;  %v15553_v21 = vor.u32 %v19805_v39, %v15552_v6  ;;  %11417 = vmatpush.bf16.msra.mxu2 %v15297_v11 }
 0x946   :  { %v19605_v52 = vld [vmem:[#allocation5 + $0x1074] sm:$0xf0] }
 0x947   :  { %v15008_v16 = vld [vmem:[#allocation5 + $0x1258] sm:$0xf]  ;;  %v14753_v3 = vor.u32 %v19605_v52, %v14752_v14  ;;  %11430 = vmatpush.bf16.msra.mxu3 %v15553_v21 }
 0x948   :  { %v19669_v4 = vld [vmem:[#allocation5 + $0x1274] sm:$0xf0] }
 0x949   :  { %v15264_v28 = vld [vmem:[#allocation5 + $0x1458] sm:$0xf]  ;;  %v15009_v57 = vor.u32 %v19669_v4, %v15008_v16  ;;  %11392 = vmatpush.bf16.msra.mxu0 %v14753_v3 }
 0x94a   :  { %v19733_v0 = vld [vmem:[#allocation5 + $0x1474] sm:$0xf0] }
 0x94b   :  { %v15520_v60 = vld [vmem:[#allocation5 + $0x1658] sm:$0xf]  ;;  %v15265_v49 = vor.u32 %v19733_v0, %v15264_v28  ;;  %11405 = vmatpush.bf16.msra.mxu1 %v15009_v57 }
 0x94c   :  { %v19797_v45 = vld [vmem:[#allocation5 + $0x1674] sm:$0xf0] }
 0x94d   :  { %v14720_v30 = vld [vmem:[#allocation5 + $0x1018] sm:$0xf]  ;;  %v15521_v10 = vor.u32 %v19797_v45, %v15520_v60  ;;  %11418 = vmatpush.bf16.msra.mxu2 %v15265_v49 }
 0x94e   :  { %v19597_v12 = vld [vmem:[#allocation5 + $0x1034] sm:$0xf0] }
 0x94f   :  { %v14976_v54 = vld [vmem:[#allocation5 + $0x1218] sm:$0xf]  ;;  %v14721_v33 = vor.u32 %v19597_v12, %v14720_v30  ;;  %11431 = vmatpush.bf16.msra.mxu3 %v15521_v10 }
 0x950   :  { %v19661_v46 = vld [vmem:[#allocation5 + $0x1234] sm:$0xf0] }
 0x951   :  { %v15232_v56 = vld [vmem:[#allocation5 + $0x1418] sm:$0xf]  ;;  %v14977_v51 = vor.u32 %v19661_v46, %v14976_v54  ;;  %11393 = vmatpush.bf16.msra.mxu0 %v14721_v33 }
 0x952   :  { %v19725_v43 = vld [vmem:[#allocation5 + $0x1434] sm:$0xf0] }
 0x953   :  { %v15488_v44 = vld [vmem:[#allocation5 + $0x1618] sm:$0xf]  ;;  %v15233_v50 = vor.u32 %v19725_v43, %v15232_v56  ;;  %11406 = vmatpush.bf16.msra.mxu1 %v14977_v51 }
 0x954   :  { %v19789_v59 = vld [vmem:[#allocation5 + $0x1634] sm:$0xf0]  ;;  %11394 = vmatmul.bf16.vlgmr.msra.gmra.mxu0 %v21006_v18 }
 0x955   :  { %v15968_v63 = vld [vmem:[#allocation5 + $0x19d8] sm:$0xf]  ;;  %v15489_v14 = vor.u32 %v19789_v59, %v15488_v44  ;;  %11419 = vmatpush.bf16.msra.mxu2 %v15233_v50 }
 0x956   :  { %v19909_v35 = vld [vmem:[#allocation5 + $0x19f4] sm:$0xf0]  ;;  %11407 = vmatmul.bf16.vlgmr.msra.gmra.mxu1 %v21010_v23 }
 0x957   :  { %v16224_v53 = vld [vmem:[#allocation5 + $0x1bd8] sm:$0xf]  ;;  %v15969_v52 = vor.u32 %v19909_v35, %v15968_v63  ;;  %11432 = vmatpush.bf16.msra.mxu3 %v15489_v14 }
 0x958   :  { %v19973_v6 = vld [vmem:[#allocation5 + $0x1bf4] sm:$0xf0]  ;;  %11420 = vmatmul.bf16.vlgmr.msra.gmra.mxu2 %v21008_v22 }
 0x959   :  { %v16480_v39 = vld [vmem:[#allocation5 + $0x1dd8] sm:$0xf]  ;;  %v16225_v16 = vor.u32 %v19973_v6, %v16224_v53  ;;  %11438 = vmatpush.bf16.msrb.mxu0 %v15969_v52  ;;  %v11187_v52 = vpop.f32.mrf.mxu0 }
 0x95a   :  { %v20037_v48 = vld [vmem:[#allocation5 + $0x1df4] sm:$0xf0]  ;;  %11433 = vmatmul.bf16.vlgmr.msra.gmra.mxu3 %v21012_v27 }
 0x95b   :  { %v16736_v58 = vld [vmem:[#allocation5 + $0x1fd8] sm:$0xf]  ;;  %v16481_v21 = vor.u32 %v20037_v48, %v16480_v39  ;;  %11451 = vmatpush.bf16.msrb.mxu1 %v16225_v16 }
 0x95c   :  { %v20101_v11 = vld [vmem:[#allocation5 + $0x1ff4] sm:$0xf0] }
 0x95d   :  { %v15936_v4 = vld [vmem:[#allocation5 + $0x1998] sm:$0xf]  ;;  %v16737_v60 = vor.u32 %v20101_v11, %v16736_v58  ;;  %11464 = vmatpush.bf16.msrb.mxu2 %v16481_v21 }
 0x95e   :  { %v19901_v28 = vld [vmem:[#allocation5 + $0x19b4] sm:$0xf0] }
 0x95f   :  { %v16192_v0 = vld [vmem:[#allocation5 + $0x1b98] sm:$0xf]  ;;  %v15937_v49 = vor.u32 %v19901_v28, %v15936_v4  ;;  %11477 = vmatpush.bf16.msrb.mxu3 %v16737_v60  ;;  %v11188_v4 = vadd.f32 %v11187_v52, %v21276_v7 }
 0x960   :  { %v19965_v45 = vld [vmem:[#allocation5 + $0x1bb4] sm:$0xf0] }
 0x961   :  { %v16448_v3 = vld [vmem:[#allocation5 + $0x1d98] sm:$0xf]  ;;  %v16193_v54 = vor.u32 %v19965_v45, %v16192_v0  ;;  %11439 = vmatpush.bf16.msrb.mxu0 %v15937_v49  ;;  %v11200_v0 = vpop.f32.mrf.mxu1 }
 0x962   :  { %v20029_v30 = vld [vmem:[#allocation5 + $0x1db4] sm:$0xf0]  ;;  %v11201_v49 = vadd.f32 %v11200_v0, %v11188_v4 }
 0x963   :  { %v16704_v12 = vld [vmem:[#allocation5 + $0x1f98] sm:$0xf]  ;;  %v16449_v46 = vor.u32 %v20029_v30, %v16448_v3  ;;  %11452 = vmatpush.bf16.msrb.mxu1 %v16193_v54 }
 0x964   :  { %v20093_v57 = vld [vmem:[#allocation5 + $0x1fb4] sm:$0xf0] }
 0x965   :  { %v15904_v56 = vld [vmem:[#allocation5 + $0x1958] sm:$0xf]  ;;  %v16705_v44 = vor.u32 %v20093_v57, %v16704_v12  ;;  %11465 = vmatpush.bf16.msrb.mxu2 %v16449_v46 }
 0x966   :  { %v19893_v10 = vld [vmem:[#allocation5 + $0x1974] sm:$0xf0] }
 0x967   :  { %v16160_v43 = vld [vmem:[#allocation5 + $0x1b58] sm:$0xf]  ;;  %v15905_v41 = vor.u32 %v19893_v10, %v15904_v56  ;;  %11478 = vmatpush.bf16.msrb.mxu3 %v16705_v44 }
 0x968   :  { %v19957_v59 = vld [vmem:[#allocation5 + $0x1b74] sm:$0xf0] }
 0x969   :  { %v16416_v62 = vld [vmem:[#allocation5 + $0x1d58] sm:$0xf]  ;;  %v16161_v33 = vor.u32 %v19957_v59, %v16160_v43  ;;  %11440 = vmatpush.bf16.msrb.mxu0 %v15905_v41  ;;  %v11213_v41 = vpop.f32.mrf.mxu2  ;;  %v11202_v52 = vpop.f32.mrf.mxu1 }
 0x96a   :  { %v20021_v63 = vld [vmem:[#allocation5 + $0x1d74] sm:$0xf0] }
 0x96b   :  { %v16672_v35 = vld [vmem:[#allocation5 + $0x1f58] sm:$0xf]  ;;  %v16417_v6 = vor.u32 %v20021_v63, %v16416_v62  ;;  %11453 = vmatpush.bf16.msrb.mxu1 %v16161_v33 }
 0x96c   :  { %v20085_v53 = vld [vmem:[#allocation5 + $0x1f74] sm:$0xf0] }
 0x96d   :  { %v15872_v39 = vld [vmem:[#allocation5 + $0x1918] sm:$0xf]  ;;  %v16673_v50 = vor.u32 %v20085_v53, %v16672_v35  ;;  %11466 = vmatpush.bf16.msrb.mxu2 %v16417_v6 }
 0x96e   :  { %v19885_v48 = vld [vmem:[#allocation5 + $0x1934] sm:$0xf0] }
 0x96f   :  { %v16128_v51 = vld [vmem:[#allocation5 + $0x1b18] sm:$0xf]  ;;  %v15873_v28 = vor.u32 %v19885_v48, %v15872_v39  ;;  %11479 = vmatpush.bf16.msrb.mxu3 %v16673_v50  ;;  %v11214_v48 = vadd.f32 %v11213_v41, %v11201_v49 }
 0x970   :  { %v19949_v58 = vld [vmem:[#allocation5 + $0x1b34] sm:$0xf0] }
 0x971   :  { %v16384_v11 = vld [vmem:[#allocation5 + $0x1d18] sm:$0xf]  ;;  %v16129_v60 = vor.u32 %v19949_v58, %v16128_v51  ;;  %11441 = vmatpush.bf16.msrb.mxu0 %v15873_v28  ;;  %v11226_v51 = vpop.f32.mrf.mxu3  ;;  %v11215_v41 = vpop.f32.mrf.mxu2 }
 0x972   :  { %v20013_v14 = vld [vmem:[#allocation5 + $0x1d34] sm:$0xf0] }
 0x973   :  { %v16640_v16 = vld [vmem:[#allocation5 + $0x1f18] sm:$0xf]  ;;  %v16385_v45 = vor.u32 %v20013_v14, %v16384_v11  ;;  %11454 = vmatpush.bf16.msrb.mxu1 %v16129_v60  ;;  %v11189_v11 = vpop.f32.mrf.mxu0 }
 0x974   :  { %v20077_v21 = vld [vmem:[#allocation5 + $0x1f34] sm:$0xf0] }
 0x975   :  { %v15840_v3 = vld [vmem:[#allocation5 + $0x18d8] sm:$0xf]  ;;  %v16641_v57 = vor.u32 %v20077_v21, %v16640_v16  ;;  %11467 = vmatpush.bf16.msrb.mxu2 %v16385_v45  ;;  %v21283_v16 = vadd.f32 %v11226_v51, %v11214_v48 }
 0x976   :  { %v19877_v30 = vld [vmem:[#allocation5 + $0x18f4] sm:$0xf0] }
 0x977   :  { %v16096_v12 = vld [vmem:[#allocation5 + $0x1ad8] sm:$0xf]  ;;  %v15841_v44 = vor.u32 %v19877_v30, %v15840_v3  ;;  %11480 = vmatpush.bf16.msrb.mxu3 %v16641_v57 }
 0x978   :  { %v19941_v54 = vld [vmem:[#allocation5 + $0x1af4] sm:$0xf0] }
 0x979   :  { %v16352_v46 = vld [vmem:[#allocation5 + $0x1cd8] sm:$0xf]  ;;  %v16097_v7 = vor.u32 %v19941_v54, %v16096_v12  ;;  %11442 = vmatpush.bf16.msrb.mxu0 %v15841_v44  ;;  %v11228_v48 = vpop.f32.mrf.mxu3 }
 0x97a   :  { %v20005_v56 = vld [vmem:[#allocation5 + $0x1cf4] sm:$0xf0] }
 0x97b   :  { %v16608_v10 = vld [vmem:[#allocation5 + $0x1ed8] sm:$0xf]  ;;  %v16353_v59 = vor.u32 %v20005_v56, %v16352_v46  ;;  %11455 = vmatpush.bf16.msrb.mxu1 %v16097_v7 }
 0x97c   :  { %v20069_v43 = vld [vmem:[#allocation5 + $0x1ef4] sm:$0xf0] }
 0x97d   :  { %v15808_v62 = vld [vmem:[#allocation5 + $0x1898] sm:$0xf]  ;;  %v16609_v53 = vor.u32 %v20069_v43, %v16608_v10  ;;  %11468 = vmatpush.bf16.msrb.mxu2 %v16353_v59 }
 0x97e   :  { %v19869_v63 = vld [vmem:[#allocation5 + $0x18b4] sm:$0xf0] }
 0x97f   :  { %v16064_v35 = vld [vmem:[#allocation5 + $0x1a98] sm:$0xf]  ;;  %v15809_v14 = vor.u32 %v19869_v63, %v15808_v62  ;;  %11481 = vmatpush.bf16.msrb.mxu3 %v16609_v53 }
 0x980   :  { %v19933_v33 = vld [vmem:[#allocation5 + $0x1ab4] sm:$0xf0] }
 0x981   :  { %v16320_v6 = vld [vmem:[#allocation5 + $0x1c98] sm:$0xf]  ;;  %v16065_v21 = vor.u32 %v19933_v33, %v16064_v35  ;;  %11443 = vmatpush.bf16.msrb.mxu0 %v15809_v14 }
 0x982   :  { %v19997_v39 = vld [vmem:[#allocation5 + $0x1cb4] sm:$0xf0] }
 0x983   :  { %v16576_v50 = vld [vmem:[#allocation5 + $0x1e98] sm:$0xf]  ;;  %v16321_v4 = vor.u32 %v19997_v39, %v16320_v6  ;;  %11456 = vmatpush.bf16.msrb.mxu1 %v16065_v21 }
 0x984   :  { %v20061_v58 = vld [vmem:[#allocation5 + $0x1eb4] sm:$0xf0] }
 0x985   :  { %v15776_v28 = vld [vmem:[#allocation5 + $0x1858] sm:$0xf]  ;;  %v16577_v45 = vor.u32 %v20061_v58, %v16576_v50  ;;  %11469 = vmatpush.bf16.msrb.mxu2 %v16321_v4 }
 0x986   :  { %v19861_v0 = vld [vmem:[#allocation5 + $0x1874] sm:$0xf0] }
 0x987   :  { %v16032_v60 = vld [vmem:[#allocation5 + $0x1a58] sm:$0xf]  ;;  %v15777_v54 = vor.u32 %v19861_v0, %v15776_v28  ;;  %11482 = vmatpush.bf16.msrb.mxu3 %v16577_v45 }
 0x988   :  { %v19925_v3 = vld [vmem:[#allocation5 + $0x1a74] sm:$0xf0] }
 0x989   :  { %v16288_v30 = vld [vmem:[#allocation5 + $0x1c58] sm:$0xf]  ;;  %v16033_v10 = vor.u32 %v19925_v3, %v16032_v60  ;;  %11444 = vmatpush.bf16.msrb.mxu0 %v15777_v54 }
 0x98a   :  { %v19989_v12 = vld [vmem:[#allocation5 + $0x1c74] sm:$0xf0] }
 0x98b   :  { %v16544_v57 = vld [vmem:[#allocation5 + $0x1e58] sm:$0xf]  ;;  %v16289_v43 = vor.u32 %v19989_v12, %v16288_v30  ;;  %11457 = vmatpush.bf16.msrb.mxu1 %v16033_v10 }
 0x98c   :  { %v20053_v49 = vld [vmem:[#allocation5 + $0x1e74] sm:$0xf0] }
 0x98d   :  { %v15744_v46 = vld [vmem:[#allocation5 + $0x1818] sm:$0xf]  ;;  %v16545_v62 = vor.u32 %v20053_v49, %v16544_v57  ;;  %11470 = vmatpush.bf16.msrb.mxu2 %v16289_v43 }
 0x98e   :  { %v19853_v56 = vld [vmem:[#allocation5 + $0x1834] sm:$0xf0] }
 0x98f   :  { %v16000_v44 = vld [vmem:[#allocation5 + $0x1a18] sm:$0xf]  ;;  %v15745_v51 = vor.u32 %v19853_v56, %v15744_v46  ;;  %11483 = vmatpush.bf16.msrb.mxu3 %v16545_v62 }
 0x990   :  { %v19917_v7 = vld [vmem:[#allocation5 + $0x1a34] sm:$0xf0] }
 0x991   :  { %v16256_v59 = vld [vmem:[#allocation5 + $0x1c18] sm:$0xf]  ;;  %v16001_v14 = vor.u32 %v19917_v7, %v16000_v44  ;;  %11445 = vmatpush.bf16.msrb.mxu0 %v15745_v51 }
 0x992   :  { %v19981_v63 = vld [vmem:[#allocation5 + $0x1c34] sm:$0xf0] }
 0x993   :  { %v16512_v35 = vld [vmem:[#allocation5 + $0x1e18] sm:$0xf]  ;;  %v16257_v52 = vor.u32 %v19981_v63, %v16256_v59  ;;  %11458 = vmatpush.bf16.msrb.mxu1 %v16001_v14 }
 0x994   :  { %v20045_v53 = vld [vmem:[#allocation5 + $0x1e34] sm:$0xf0]  ;;  %11446 = vmatmul.bf16.vlgmr.msrb.gmra.mxu0 %v21018_v13 }
 0x995   :  { %v16992_v33 = vld [vmem:[#allocation5 + $0x21d8] sm:$0xf]  ;;  %v16513_v28 = vor.u32 %v20045_v53, %v16512_v35  ;;  %11471 = vmatpush.bf16.msrb.mxu2 %v16257_v52 }
 0x996   :  { %v20165_v6 = vld [vmem:[#allocation5 + $0x21f4] sm:$0xf0]  ;;  %11459 = vmatmul.bf16.vlgmr.msrb.gmra.mxu1 %v21022_v20 }
 0x997   :  { %v17248_v39 = vld [vmem:[#allocation5 + $0x23d8] sm:$0xf]  ;;  %v16993_v0 = vor.u32 %v20165_v6, %v16992_v33  ;;  %11484 = vmatpush.bf16.msrb.mxu3 %v16513_v28 }
 0x998   :  { %v20229_v50 = vld [vmem:[#allocation5 + $0x23f4] sm:$0xf0]  ;;  %11472 = vmatmul.bf16.vlgmr.msrb.gmra.mxu2 %v21020_v19 }
 0x999   :  { %v17504_v58 = vld [vmem:[#allocation5 + $0x25d8] sm:$0xf]  ;;  %v17249_v60 = vor.u32 %v20229_v50, %v17248_v39  ;;  %11490 = vmatpush.bf16.msra.mxu0 %v16993_v0  ;;  %v11239_v0 = vpop.f32.mrf.mxu0 }
 0x99a   :  { %v20293_v11 = vld [vmem:[#allocation5 + $0x25f4] sm:$0xf0]  ;;  %11485 = vmatmul.bf16.vlgmr.msrb.gmra.mxu3 %v21024_v26 }
 0x99b   :  { %v17760_v21 = vld [vmem:[#allocation5 + $0x27d8] sm:$0xf]  ;;  %v17505_v45 = vor.u32 %v20293_v11, %v17504_v58  ;;  %11503 = vmatpush.bf16.msra.mxu1 %v17249_v60 }
 0x99c   :  { %v20357_v4 = vld [vmem:[#allocation5 + $0x27f4] sm:$0xf0] }
 0x99d   :  { %v16960_v3 = vld [vmem:[#allocation5 + $0x2198] sm:$0xf]  ;;  %v17761_v57 = vor.u32 %v20357_v4, %v17760_v21  ;;  %11516 = vmatpush.bf16.msra.mxu2 %v17505_v45 }
 0x99e   :  { %v20157_v30 = vld [vmem:[#allocation5 + $0x21b4] sm:$0xf0] }
 0x99f   :  { %v17216_v12 = vld [vmem:[#allocation5 + $0x2398] sm:$0xf]  ;;  %v16961_v43 = vor.u32 %v20157_v30, %v16960_v3  ;;  %11529 = vmatpush.bf16.msra.mxu3 %v17761_v57  ;;  %v11240_v3 = vadd.f32 %v11239_v0, %v21283_v16 }
 0x9a0   :  { %v20221_v49 = vld [vmem:[#allocation5 + $0x23b4] sm:$0xf0] }
 0x9a1   :  { %v17472_v54 = vld [vmem:[#allocation5 + $0x2598] sm:$0xf]  ;;  %v17217_v44 = vor.u32 %v20221_v49, %v17216_v12  ;;  %11491 = vmatpush.bf16.msra.mxu0 %v16961_v43  ;;  %v11252_v12 = vpop.f32.mrf.mxu1 }
 0x9a2   :  { %v20285_v46 = vld [vmem:[#allocation5 + $0x25b4] sm:$0xf0]  ;;  %v11253_v43 = vadd.f32 %v11252_v12, %v11240_v3 }
 0x9a3   :  { %v17728_v56 = vld [vmem:[#allocation5 + $0x2798] sm:$0xf]  ;;  %v17473_v7 = vor.u32 %v20285_v46, %v17472_v54  ;;  %11504 = vmatpush.bf16.msra.mxu1 %v17217_v44 }
 0x9a4   :  { %v20349_v10 = vld [vmem:[#allocation5 + $0x27b4] sm:$0xf0] }
 0x9a5   :  { %v16928_v59 = vld [vmem:[#allocation5 + $0x2158] sm:$0xf]  ;;  %v17729_v35 = vor.u32 %v20349_v10, %v17728_v56  ;;  %11517 = vmatpush.bf16.msra.mxu2 %v17473_v7 }
 0x9a6   :  { %v20149_v62 = vld [vmem:[#allocation5 + $0x2174] sm:$0xf0] }
 0x9a7   :  { %v17184_v63 = vld [vmem:[#allocation5 + $0x2358] sm:$0xf]  ;;  %v16929_v48 = vor.u32 %v20149_v62, %v16928_v59  ;;  %11530 = vmatpush.bf16.msra.mxu3 %v17729_v35 }
 0x9a8   :  { %v20213_v53 = vld [vmem:[#allocation5 + $0x2374] sm:$0xf0] }
 0x9a9   :  { %v17440_v41 = vld [vmem:[#allocation5 + $0x2558] sm:$0xf]  ;;  %v17185_v51 = vor.u32 %v20213_v53, %v17184_v63  ;;  %11492 = vmatpush.bf16.msra.mxu0 %v16929_v48  ;;  %v11265_v48 = vpop.f32.mrf.mxu2  ;;  %v11254_v0 = vpop.f32.mrf.mxu1 }
 0x9aa   :  { %v20277_v33 = vld [vmem:[#allocation5 + $0x2574] sm:$0xf0] }
 0x9ab   :  { %v17696_v6 = vld [vmem:[#allocation5 + $0x2758] sm:$0xf]  ;;  %v17441_v50 = vor.u32 %v20277_v33, %v17440_v41  ;;  %11505 = vmatpush.bf16.msra.mxu1 %v17185_v51 }
 0x9ac   :  { %v20341_v39 = vld [vmem:[#allocation5 + $0x2774] sm:$0xf0] }
 0x9ad   :  { %v16896_v58 = vld [vmem:[#allocation5 + $0x2118] sm:$0xf]  ;;  %v17697_v52 = vor.u32 %v20341_v39, %v17696_v6  ;;  %11518 = vmatpush.bf16.msra.mxu2 %v17441_v50 }
 0x9ae   :  { %v20141_v11 = vld [vmem:[#allocation5 + $0x2134] sm:$0xf0] }
 0x9af   :  { %v17152_v14 = vld [vmem:[#allocation5 + $0x2318] sm:$0xf]  ;;  %v16897_v30 = vor.u32 %v20141_v11, %v16896_v58  ;;  %11531 = vmatpush.bf16.msra.mxu3 %v17697_v52  ;;  %v11266_v11 = vadd.f32 %v11265_v48, %v11253_v43 }
 0x9b0   :  { %v20205_v21 = vld [vmem:[#allocation5 + $0x2334] sm:$0xf0] }
 0x9b1   :  { %v17408_v4 = vld [vmem:[#allocation5 + $0x2518] sm:$0xf]  ;;  %v17153_v57 = vor.u32 %v20205_v21, %v17152_v14  ;;  %11493 = vmatpush.bf16.msra.mxu0 %v16897_v30  ;;  %v11278_v14 = vpop.f32.mrf.mxu3  ;;  %v11267_v48 = vpop.f32.mrf.mxu2 }
 0x9b2   :  { %v20269_v28 = vld [vmem:[#allocation5 + $0x2534] sm:$0xf0] }
 0x9b3   :  { %v17664_v60 = vld [vmem:[#allocation5 + $0x2718] sm:$0xf]  ;;  %v17409_v49 = vor.u32 %v20269_v28, %v17408_v4  ;;  %11506 = vmatpush.bf16.msra.mxu1 %v17153_v57  ;;  %v11241_v4 = vpop.f32.mrf.mxu0 }
 0x9b4   :  { %v20333_v45 = vld [vmem:[#allocation5 + $0x2734] sm:$0xf0] }
 0x9b5   :  { %v16864_v54 = vld [vmem:[#allocation5 + $0x20d8] sm:$0xf]  ;;  %v17665_v10 = vor.u32 %v20333_v45, %v17664_v60  ;;  %11519 = vmatpush.bf16.msra.mxu2 %v17409_v49  ;;  %v21290_v60 = vadd.f32 %v11278_v14, %v11266_v11 }
 0x9b6   :  { %v20133_v46 = vld [vmem:[#allocation5 + $0x20f4] sm:$0xf0] }
 0x9b7   :  { %v17120_v56 = vld [vmem:[#allocation5 + $0x22d8] sm:$0xf]  ;;  %v16865_v35 = vor.u32 %v20133_v46, %v16864_v54  ;;  %11532 = vmatpush.bf16.msra.mxu3 %v17665_v10 }
 0x9b8   :  { %v20197_v44 = vld [vmem:[#allocation5 + $0x22f4] sm:$0xf0] }
 0x9b9   :  { %v17376_v7 = vld [vmem:[#allocation5 + $0x24d8] sm:$0xf]  ;;  %v17121_v16 = vor.u32 %v20197_v44, %v17120_v56  ;;  %11494 = vmatpush.bf16.msra.mxu0 %v16865_v35  ;;  %v11280_v11 = vpop.f32.mrf.mxu3 }
 0x9ba   :  { %v20261_v59 = vld [vmem:[#allocation5 + $0x24f4] sm:$0xf0] }
 0x9bb   :  { %v17632_v62 = vld [vmem:[#allocation5 + $0x26d8] sm:$0xf]  ;;  %v17377_v53 = vor.u32 %v20261_v59, %v17376_v7  ;;  %11507 = vmatpush.bf16.msra.mxu1 %v17121_v16 }
 0x9bc   :  { %v20325_v63 = vld [vmem:[#allocation5 + $0x26f4] sm:$0xf0] }
 0x9bd   :  { %v16832_v41 = vld [vmem:[#allocation5 + $0x2098] sm:$0xf]  ;;  %v17633_v39 = vor.u32 %v20325_v63, %v17632_v62  ;;  %11520 = vmatpush.bf16.msra.mxu2 %v17377_v53 }
 0x9be   :  { %v20125_v33 = vld [vmem:[#allocation5 + $0x20b4] sm:$0xf0] }
 0x9bf   :  { %v17088_v6 = vld [vmem:[#allocation5 + $0x2298] sm:$0xf]  ;;  %v16833_v28 = vor.u32 %v20125_v33, %v16832_v41  ;;  %11533 = vmatpush.bf16.msra.mxu3 %v17633_v39 }
 0x9c0   :  { %v20189_v51 = vld [vmem:[#allocation5 + $0x22b4] sm:$0xf0] }
 0x9c1   :  { %v17344_v50 = vld [vmem:[#allocation5 + $0x2498] sm:$0xf]  ;;  %v17089_v45 = vor.u32 %v20189_v51, %v17088_v6  ;;  %11495 = vmatpush.bf16.msra.mxu0 %v16833_v28 }
 0x9c2   :  { %v20253_v58 = vld [vmem:[#allocation5 + $0x24b4] sm:$0xf0] }
 0x9c3   :  { %v17600_v52 = vld [vmem:[#allocation5 + $0x2698] sm:$0xf]  ;;  %v17345_v3 = vor.u32 %v20253_v58, %v17344_v50  ;;  %11508 = vmatpush.bf16.msra.mxu1 %v17089_v45 }
 0x9c4   :  { %v20317_v21 = vld [vmem:[#allocation5 + $0x26b4] sm:$0xf0] }
 0x9c5   :  { %v16800_v30 = vld [vmem:[#allocation5 + $0x2058] sm:$0xf]  ;;  %v17601_v49 = vor.u32 %v20317_v21, %v17600_v52  ;;  %11521 = vmatpush.bf16.msra.mxu2 %v17345_v3 }
 0x9c6   :  { %v20117_v12 = vld [vmem:[#allocation5 + $0x2074] sm:$0xf0] }
 0x9c7   :  { %v17056_v57 = vld [vmem:[#allocation5 + $0x2258] sm:$0xf]  ;;  %v16801_v44 = vor.u32 %v20117_v12, %v16800_v30  ;;  %11534 = vmatpush.bf16.msra.mxu3 %v17601_v49 }
 0x9c8   :  { %v20181_v54 = vld [vmem:[#allocation5 + $0x2274] sm:$0xf0] }
 0x9c9   :  { %v17312_v46 = vld [vmem:[#allocation5 + $0x2458] sm:$0xf]  ;;  %v17057_v62 = vor.u32 %v20181_v54, %v17056_v57  ;;  %11496 = vmatpush.bf16.msra.mxu0 %v16801_v44 }
 0x9ca   :  { %v20245_v56 = vld [vmem:[#allocation5 + $0x2474] sm:$0xf0] }
 0x9cb   :  { %v17568_v10 = vld [vmem:[#allocation5 + $0x2658] sm:$0xf]  ;;  %v17313_v63 = vor.u32 %v20245_v56, %v17312_v46  ;;  %11509 = vmatpush.bf16.msra.mxu1 %v17057_v62 }
 0x9cc   :  { %v20309_v43 = vld [vmem:[#allocation5 + $0x2674] sm:$0xf0] }
 0x9cd   :  { %v16768_v7 = vld [vmem:[#allocation5 + $0x2018] sm:$0xf]  ;;  %v17569_v41 = vor.u32 %v20309_v43, %v17568_v10  ;;  %11522 = vmatpush.bf16.msra.mxu2 %v17313_v63 }
 0x9ce   :  { %v20109_v59 = vld [vmem:[#allocation5 + $0x2034] sm:$0xf0] }
 0x9cf   :  { %v17024_v35 = vld [vmem:[#allocation5 + $0x2218] sm:$0xf]  ;;  %v16769_v14 = vor.u32 %v20109_v59, %v16768_v7  ;;  %11535 = vmatpush.bf16.msra.mxu3 %v17569_v41 }
 0x9d0   :  { %v20173_v16 = vld [vmem:[#allocation5 + $0x2234] sm:$0xf0] }
 0x9d1   :  { %v17280_v53 = vld [vmem:[#allocation5 + $0x2418] sm:$0xf]  ;;  %v17025_v28 = vor.u32 %v20173_v16, %v17024_v35  ;;  %11497 = vmatpush.bf16.msra.mxu0 %v16769_v14 }
 0x9d2   :  { %v20237_v33 = vld [vmem:[#allocation5 + $0x2434] sm:$0xf0] }
 0x9d3   :  { %v17536_v6 = vld [vmem:[#allocation5 + $0x2618] sm:$0xf]  ;;  %v17281_v0 = vor.u32 %v20237_v33, %v17280_v53  ;;  %11510 = vmatpush.bf16.msra.mxu1 %v17025_v28 }
 0x9d4   :  { %v20301_v39 = vld [vmem:[#allocation5 + $0x2634] sm:$0xf0]  ;;  %11498 = vmatmul.bf16.vlgmr.msra.gmra.mxu0 %v21030_v24 }
 0x9d5   :  { %v18016_v51 = vld [vmem:[#allocation5 + $0x29d8] sm:$0xf]  ;;  %v17537_v30 = vor.u32 %v20301_v39, %v17536_v6  ;;  %11523 = vmatpush.bf16.msra.mxu2 %v17281_v0  ;;  %v20705_v0 = vld [vmem:[#allocation7] sm:$0xff] }
 0x9d6   :  { %v20421_v50 = vld [vmem:[#allocation5 + $0x29f4] sm:$0xf0]  ;;  %11511 = vmatmul.bf16.vlgmr.msra.gmra.mxu1 %v21034_v32 }
 0x9d7   :  { %v18272_v58 = vld [vmem:[#allocation5 + $0x2bd8] sm:$0xf]  ;;  %v18017_v12 = vor.u32 %v20421_v50, %v18016_v51  ;;  %11536 = vmatpush.bf16.msra.mxu3 %v17537_v30 }
 0x9d8   :  { %v20485_v52 = vld [vmem:[#allocation5 + $0x2bf4] sm:$0xf0]  ;;  %11524 = vmatmul.bf16.vlgmr.msra.gmra.mxu2 %v21032_v31 }
 0x9d9   :  { %v18528_v21 = vld [vmem:[#allocation5 + $0x2dd8] sm:$0xf]  ;;  %v18273_v57 = vor.u32 %v20485_v52, %v18272_v58  ;;  %11542 = vmatpush.bf16.msrb.mxu0 %v18017_v12 }
 0x9da   :  { %v20549_v4 = vld [vmem:[#allocation5 + $0x2df4] sm:$0xf0]  ;;  %11537 = vmatmul.bf16.vlgmr.msra.gmra.mxu3 %v21036_v36 }
 0x9db   :  { %v18784_v45 = vld [vmem:[#allocation5 + $0x2fd8] sm:$0xf]  ;;  %v18529_v49 = vor.u32 %v20549_v4, %v18528_v21  ;;  %11555 = vmatpush.bf16.msrb.mxu1 %v18273_v57 }
 0x9dc   :  { %v20613_v3 = vld [vmem:[#allocation5 + $0x2ff4] sm:$0xf0] }
 0x9dd   :  { %v17984_v54 = vld [vmem:[#allocation5 + $0x2998] sm:$0xf]  ;;  %v18785_v10 = vor.u32 %v20613_v3, %v18784_v45  ;;  %11568 = vmatpush.bf16.msrb.mxu2 %v18529_v49  ;;  %v1720_v45 = vperm.slane %v20705_v0, 6 }
 0x9de   :  { %v20413_v46 = vld [vmem:[#allocation5 + $0x29b4] sm:$0xf0] }
 0x9df   :  { %v18240_v56 = vld [vmem:[#allocation5 + $0x2b98] sm:$0xf]  ;;  %v17985_v63 = vor.u32 %v20413_v46, %v17984_v54  ;;  %11581 = vmatpush.bf16.msrb.mxu3 %v18785_v10 }
 0x9e0   :  { %v20477_v43 = vld [vmem:[#allocation5 + $0x2bb4] sm:$0xf0] }
 0x9e1   :  { %v18496_v44 = vld [vmem:[#allocation5 + $0x2d98] sm:$0xf]  ;;  %v18241_v35 = vor.u32 %v20477_v43, %v18240_v56  ;;  %11543 = vmatpush.bf16.msrb.mxu0 %v17985_v63  ;;  %v11291_v56 = vpop.f32.mrf.mxu0  ;;  %v11304_v63 = vpop.f32.mrf.mxu1 }
 0x9e2   :  { %v20541_v7 = vld [vmem:[#allocation5 + $0x2db4] sm:$0xf0] }
 0x9e3   :  { %v18752_v59 = vld [vmem:[#allocation5 + $0x2f98] sm:$0xf]  ;;  %v18497_v16 = vor.u32 %v20541_v7, %v18496_v44  ;;  %11556 = vmatpush.bf16.msrb.mxu1 %v18241_v35 }
 0x9e4   :  { %v20605_v62 = vld [vmem:[#allocation5 + $0x2fb4] sm:$0xf0] }
 0x9e5   :  { %v17952_v53 = vld [vmem:[#allocation5 + $0x2958] sm:$0xf]  ;;  %v18753_v6 = vor.u32 %v20605_v62, %v18752_v59  ;;  %11569 = vmatpush.bf16.msrb.mxu2 %v18497_v16  ;;  %v11292_v62 = vadd.f32 %v11291_v56, %v1720_v45 }
 0x9e6   :  { %v20405_v41 = vld [vmem:[#allocation5 + $0x2974] sm:$0xf0] }
 0x9e7   :  { %v18208_v33 = vld [vmem:[#allocation5 + $0x2b58] sm:$0xf]  ;;  %v17953_v11 = vor.u32 %v20405_v41, %v17952_v53  ;;  %11582 = vmatpush.bf16.msrb.mxu3 %v18753_v6 }
 0x9e8   :  { %v20469_v39 = vld [vmem:[#allocation5 + $0x2b74] sm:$0xf0] }
 0x9e9   :  { %v18464_v48 = vld [vmem:[#allocation5 + $0x2d58] sm:$0xf]  ;;  %v18209_v52 = vor.u32 %v20469_v39, %v18208_v33  ;;  %11544 = vmatpush.bf16.msrb.mxu0 %v17953_v11  ;;  %v11305_v39 = vadd.f32 %v11304_v63, %v11292_v62 }
 0x9ea   :  { %v20533_v51 = vld [vmem:[#allocation5 + $0x2d74] sm:$0xf0] }
 0x9eb   :  { %v18720_v50 = vld [vmem:[#allocation5 + $0x2f58] sm:$0xf]  ;;  %v18465_v21 = vor.u32 %v20533_v51, %v18464_v48  ;;  %11557 = vmatpush.bf16.msrb.mxu1 %v18209_v52  ;;  %v11317_v52 = vpop.f32.mrf.mxu2 }
 0x9ec   :  { %v20597_v58 = vld [vmem:[#allocation5 + $0x2f74] sm:$0xf0]  ;;  %v11318_v45 = vadd.f32 %v11317_v52, %v11305_v39 }
 0x9ed   :  { %v17920_v14 = vld [vmem:[#allocation5 + $0x2918] sm:$0xf]  ;;  %v18721_v3 = vor.u32 %v20597_v58, %v18720_v50  ;;  %11570 = vmatpush.bf16.msrb.mxu2 %v18465_v21 }
 0x9ee   :  { %v20397_v4 = vld [vmem:[#allocation5 + $0x2934] sm:$0xf0] }
 0x9ef   :  { %v18176_v28 = vld [vmem:[#allocation5 + $0x2b18] sm:$0xf]  ;;  %v17921_v46 = vor.u32 %v20397_v4, %v17920_v14  ;;  %11583 = vmatpush.bf16.msrb.mxu3 %v18721_v3  ;;  %v11330_v3 = vpop.f32.mrf.mxu3 }
 0x9f0   :  { %v20461_v30 = vld [vmem:[#allocation5 + $0x2b34] sm:$0xf0] }
 0x9f1   :  { %v18432_v12 = vld [vmem:[#allocation5 + $0x2d18] sm:$0xf]  ;;  %v18177_v10 = vor.u32 %v20461_v30, %v18176_v28  ;;  %11545 = vmatpush.bf16.msrb.mxu0 %v17921_v46 }
 0x9f2   :  { %v20525_v57 = vld [vmem:[#allocation5 + $0x2d34] sm:$0xf0] }
 0x9f3   :  { %v18688_v49 = vld [vmem:[#allocation5 + $0x2f18] sm:$0xf]  ;;  %v18433_v43 = vor.u32 %v20525_v57, %v18432_v12  ;;  %11558 = vmatpush.bf16.msrb.mxu1 %v18177_v10 }
 0x9f4   :  { %v20589_v54 = vld [vmem:[#allocation5 + $0x2f34] sm:$0xf0] }
 0x9f5   :  { %v17888_v44 = vld [vmem:[#allocation5 + $0x28d8] sm:$0xf]  ;;  %v18689_v35 = vor.u32 %v20589_v54, %v18688_v49  ;;  %11571 = vmatpush.bf16.msrb.mxu2 %v18433_v43  ;;  %v21296_v49 = vadd.f32 %v11330_v3, %v11318_v45  ;;  %v11293_v54 = vpop.f32.mrf.mxu0  ;;  %v12898_v45 = vld [vmem:[#allocation5 + $0x1f8] sm:$0xf0] }
 0x9f6   :  { %v20389_v7 = vld [vmem:[#allocation5 + $0x28f4] sm:$0xf0]  ;;  %v19201_v3 = vld [vmem:[#allocation5 + $0x3dc] sm:$0xf] }
 0x9f7   :  { %v18144_v59 = vld [vmem:[#allocation5 + $0x2ad8] sm:$0xf]  ;;  %v17889_v48 = vor.u32 %v20389_v7, %v17888_v44  ;;  %11584 = vmatpush.bf16.msrb.mxu3 %v18689_v35  ;;  %v11306_v7 = vpop.f32.mrf.mxu1  ;;  %v13410_v54 = vld [vmem:[#allocation5 + $0x5f8] sm:$0xf0] }
 0x9f8   :  { %v20453_v16 = vld [vmem:[#allocation5 + $0x2af4] sm:$0xf0] }
 0x9f9   :  { %v18400_v53 = vld [vmem:[#allocation5 + $0x2cd8] sm:$0xf]  ;;  %v18145_v51 = vor.u32 %v20453_v16, %v18144_v59  ;;  %11546 = vmatpush.bf16.msrb.mxu0 %v17889_v48 }
 0x9fa   :  { %v20517_v41 = vld [vmem:[#allocation5 + $0x2cf4] sm:$0xf0] }
 0x9fb   :  { %v18656_v33 = vld [vmem:[#allocation5 + $0x2ed8] sm:$0xf]  ;;  %v18401_v50 = vor.u32 %v20517_v41, %v18400_v53  ;;  %11559 = vmatpush.bf16.msrb.mxu1 %v18145_v51 }
 0x9fc   :  { %v20581_v6 = vld [vmem:[#allocation5 + $0x2ef4] sm:$0xf0] }
 0x9fd   :  { %v17856_v58 = vld [vmem:[#allocation5 + $0x2898] sm:$0xf]  ;;  %v18657_v21 = vor.u32 %v20581_v6, %v18656_v33  ;;  %11572 = vmatpush.bf16.msrb.mxu2 %v18401_v50 }
 0x9fe   :  { %v20381_v11 = vld [vmem:[#allocation5 + $0x28b4] sm:$0xf0] }
 0x9ff   :  { %v18112_v14 = vld [vmem:[#allocation5 + $0x2a98] sm:$0xf]  ;;  %v17857_v57 = vor.u32 %v20381_v11, %v17856_v58  ;;  %11585 = vmatpush.bf16.msrb.mxu3 %v18657_v21  ;;  %v11319_v11 = vpop.f32.mrf.mxu2 }
 0xa00   :  { %v20445_v4 = vld [vmem:[#allocation5 + $0x2ab4] sm:$0xf0]  ;;  %v19121_v11 = vld [vmem:[#allocation5 + $0x15c] sm:$0xf] }
 0xa01   :  { %v18368_v28 = vld [vmem:[#allocation5 + $0x2c98] sm:$0xf]  ;;  %v18113_v46 = vor.u32 %v20445_v4, %v18112_v14  ;;  %11547 = vmatpush.bf16.msrb.mxu0 %v17857_v57  ;;  %v19265_v57 = vld [vmem:[#allocation5 + $0x5dc] sm:$0xf] }
 0xa02   :  { %v20509_v0 = vld [vmem:[#allocation5 + $0x2cb4] sm:$0xf0] }
 0xa03   :  { %v18624_v30 = vld [vmem:[#allocation5 + $0x2e98] sm:$0xf]  ;;  %v18369_v56 = vor.u32 %v20509_v0, %v18368_v28  ;;  %11560 = vmatpush.bf16.msrb.mxu1 %v18113_v46  ;;  %v11332_v28 = vpop.f32.mrf.mxu3  ;;  %v19137_v0 = vld [vmem:[#allocation5 + $0x1dc] sm:$0xf] }
 0xa04   :  { %v20573_v12 = vld [vmem:[#allocation5 + $0x2eb4] sm:$0xf0]  ;;  %v12901_v7 = vor.u32 %v19137_v0, %v12898_v45  ;;  %v19249_v28 = vld [vmem:[#allocation5 + $0x55c] sm:$0xf] }
 0xa05   :  { %v17824_v10 = vld [vmem:[#allocation5 + $0x2858] sm:$0xf]  ;;  %v18625_v59 = vor.u32 %v20573_v12, %v18624_v30  ;;  %11573 = vmatpush.bf16.msrb.mxu2 %v18369_v56  ;;  %v13154_v12 = vld [vmem:[#allocation5 + $0x3f8] sm:$0xf0] }
 0xa06   :  { %v20373_v43 = vld [vmem:[#allocation5 + $0x2874] sm:$0xf0]  ;;  %v13346_v0 = vld [vmem:[#allocation5 + $0x578] sm:$0xf0] }
 0xa07   :  { %v18080_v44 = vld [vmem:[#allocation5 + $0x2a58] sm:$0xf]  ;;  %v17825_v41 = vor.u32 %v20373_v43, %v17824_v10  ;;  %11586 = vmatpush.bf16.msrb.mxu3 %v18625_v59  ;;  %v19329_v10 = vld [vmem:[#allocation5 + $0x7dc] sm:$0xf]  ;;  %v13157_v59 = vor.u32 %v19201_v3, %v13154_v12 }
 0xa08   :  { %v20437_v62 = vld [vmem:[#allocation5 + $0x2a74] sm:$0xf0]  ;;  %v13666_v43 = vld [vmem:[#allocation5 + $0x7f8] sm:$0xf0] }
 0xa09   :  { %v18336_v63 = vld [vmem:[#allocation5 + $0x2c58] sm:$0xf]  ;;  %v18081_v39 = vor.u32 %v20437_v62, %v18080_v44  ;;  %11548 = vmatpush.bf16.msrb.mxu0 %v17825_v41  ;;  %v13413_v62 = vor.u32 %v19265_v57, %v13410_v54  ;;  %v13122_v41 = vld [vmem:[#allocation5 + $0x3b8] sm:$0xf0]  ;;  %v13349_v57 = vor.u32 %v19249_v28, %v13346_v0 }
 0xa0a   :  { %v20501_v35 = vld [vmem:[#allocation5 + $0x2c74] sm:$0xf0]  ;;  %v19313_v45 = vld [vmem:[#allocation5 + $0x75c] sm:$0xf] }
 0xa0b   :  { %v18592_v16 = vld [vmem:[#allocation5 + $0x2e58] sm:$0xf]  ;;  %v18337_v48 = vor.u32 %v20501_v35, %v18336_v63  ;;  %11561 = vmatpush.bf16.msrb.mxu1 %v18081_v39  ;;  %v19129_v63 = vld [vmem:[#allocation5 + $0x19c] sm:$0xf] }
 0xa0c   :  { %v20565_v53 = vld [vmem:[#allocation5 + $0x2e74] sm:$0xf0]  ;;  %v12866_v35 = vld [vmem:[#allocation5 + $0x1b8] sm:$0xf0] }
 0xa0d   :  { %v17792_v33 = vld [vmem:[#allocation5 + $0x2818] sm:$0xf]  ;;  %v18593_v14 = vor.u32 %v20565_v53, %v18592_v16  ;;  %11574 = vmatpush.bf16.msrb.mxu2 %v18337_v48  ;;  %v19193_v16 = vld [vmem:[#allocation5 + $0x39c] sm:$0xf]  ;;  %v13669_v53 = vor.u32 %v19329_v10, %v13666_v43 }
 0xa0e   :  { %v20365_v6 = vld [vmem:[#allocation5 + $0x2834] sm:$0xf0]  ;;  %v19321_v39 = vld [vmem:[#allocation5 + $0x79c] sm:$0xf] }
 0xa0f   :  { %v18048_v51 = vld [vmem:[#allocation5 + $0x2a18] sm:$0xf]  ;;  %v17793_v30 = vor.u32 %v20365_v6, %v17792_v33  ;;  %11587 = vmatpush.bf16.msrb.mxu3 %v18593_v14  ;;  %v19257_v33 = vld [vmem:[#allocation5 + $0x59c] sm:$0xf] }
 0xa10   :  { %v20429_v50 = vld [vmem:[#allocation5 + $0x2a34] sm:$0xf0]  ;;  %v13378_v6 = vld [vmem:[#allocation5 + $0x5b8] sm:$0xf0] }
 0xa11   :  { %v18304_v58 = vld [vmem:[#allocation5 + $0x2c18] sm:$0xf]  ;;  %v18049_v46 = vor.u32 %v20429_v50, %v18048_v51  ;;  %11549 = vmatpush.bf16.msrb.mxu0 %v17793_v30  ;;  %v13634_v48 = vld [vmem:[#allocation5 + $0x7b8] sm:$0xf0]  ;;  %v12869_v51 = vor.u32 %v19129_v63, %v12866_v35  ;;  %v13125_v50 = vor.u32 %v19193_v16, %v13122_v41  ;;  %v11343_v35 = vpop.f32.mrf.mxu0 }
 0xa12   :  { %v20493_v52 = vld [vmem:[#allocation5 + $0x2c34] sm:$0xf0]  ;;  %v12834_v14 = vld [vmem:[#allocation5 + $0x178] sm:$0xf0] }
 0xa13   :  { %v18560_v21 = vld [vmem:[#allocation5 + $0x2e18] sm:$0xf]  ;;  %v18305_v56 = vor.u32 %v20493_v52, %v18304_v58  ;;  %11562 = vmatpush.bf16.msrb.mxu1 %v18049_v46  ;;  %v13381_v58 = vor.u32 %v19257_v33, %v13378_v6  ;;  %v19185_v52 = vld [vmem:[#allocation5 + $0x35c] sm:$0xf]  ;;  %v12837_v30 = vor.u32 %v19121_v11, %v12834_v14 }
 0xa14   :  { %v20557_v4 = vld [vmem:[#allocation5 + $0x2e34] sm:$0xf0]  ;;  %11550 = vmatmul.bf16.vlgmr.msrb.gmra.mxu0 %v21044_v61  ;;  %v13602_v3 = vld [vmem:[#allocation5 + $0x778] sm:$0xf0] }
 0xa15   :  { %v18561_v44 = vor.u32 %v20557_v4, %v18560_v21  ;;  %11575 = vmatpush.bf16.msrb.mxu2 %v18305_v56  ;;  %11594 = vmatpush.bf16.msra.mxu0 %v12901_v7  ;;  %v13637_v21 = vor.u32 %v19321_v39, %v13634_v48  ;;  %v13090_v4 = vld [vmem:[#allocation5 + $0x378] sm:$0xf0]  ;;  %v13605_v10 = vor.u32 %v19313_v45, %v13602_v3  ;;  %v11356_v48 = vpop.f32.mrf.mxu1 }
 0xa16   :  { %11563 = vmatmul.bf16.vlgmr.msrb.gmra.mxu1 %v21048_v2  ;;  %v13093_v12 = vor.u32 %v19185_v52, %v13090_v4  ;;  %v19113_v54 = vld [vmem:[#allocation5 + $0x11c] sm:$0xf]  ;;  %v11344_v39 = vadd.f32 %v11343_v35, %v21296_v49 }
 0xa17   :  { %11588 = vmatpush.bf16.msrb.mxu3 %v18561_v44  ;;  %11607 = vmatpush.bf16.msra.mxu1 %v13157_v59  ;;  %v12802_v46 = vld [vmem:[#allocation5 + $0x138] sm:$0xf0] }
 0xa18   :  { %11576 = vmatmul.bf16.vlgmr.msrb.gmra.mxu2 %v21046_v1  ;;  %v19177_v56 = vld [vmem:[#allocation5 + $0x31c] sm:$0xf]  ;;  %v12805_v63 = vor.u32 %v19113_v54, %v12802_v46 }
 0xa19   :  { %11620 = vmatpush.bf16.msra.mxu2 %v13413_v62  ;;  %11595 = vmatpush.bf16.msra.mxu0 %v12869_v51  ;;  %v13058_v43 = vld [vmem:[#allocation5 + $0x338] sm:$0xf0] }
 0xa1a   :  { %11589 = vmatmul.bf16.vlgmr.msrb.gmra.mxu3 %v21050_v5  ;;  %v19241_v44 = vld [vmem:[#allocation5 + $0x51c] sm:$0xf]  ;;  %v13061_v16 = vor.u32 %v19177_v56, %v13058_v43 }
 0xa1b   :  { %11633 = vmatpush.bf16.msra.mxu3 %v13669_v53  ;;  %11608 = vmatpush.bf16.msra.mxu1 %v13125_v50  ;;  %v13314_v7 = vld [vmem:[#allocation5 + $0x538] sm:$0xf0] }
 0xa1c   :  { %v19305_v59 = vld [vmem:[#allocation5 + $0x71c] sm:$0xf]  ;;  %v13317_v53 = vor.u32 %v19241_v44, %v13314_v7 }
 0xa1d   :  { %11621 = vmatpush.bf16.msra.mxu2 %v13381_v58  ;;  %v13570_v62 = vld [vmem:[#allocation5 + $0x738] sm:$0xf0]  ;;  %11596 = vmatpush.bf16.msra.mxu0 %v12837_v30 }
 0xa1e   :  { %v19105_v41 = vld [vmem:[#allocation5 + $0xdc] sm:$0xf]  ;;  %v13573_v51 = vor.u32 %v19305_v59, %v13570_v62  ;;  %v11345_v62 = vpop.f32.mrf.mxu0 }
 0xa1f   :  { %11634 = vmatpush.bf16.msra.mxu3 %v13637_v21  ;;  %11609 = vmatpush.bf16.msra.mxu1 %v13093_v12  ;;  %v12770_v33 = vld [vmem:[#allocation5 + $0xf8] sm:$0xf0]  ;;  %v11357_v21 = vadd.f32 %v11356_v48, %v11344_v39  ;;  %v11369_v12 = vpop.f32.mrf.mxu2 }
 0xa20   :  { %v19169_v6 = vld [vmem:[#allocation5 + $0x2dc] sm:$0xf]  ;;  %v12773_v4 = vor.u32 %v19105_v41, %v12770_v33  ;;  %v11358_v33 = vpop.f32.mrf.mxu1 }
 0xa21   :  { %11622 = vmatpush.bf16.msra.mxu2 %v13349_v57  ;;  %v13026_v50 = vld [vmem:[#allocation5 + $0x2f8] sm:$0xf0]  ;;  %11597 = vmatpush.bf16.msra.mxu0 %v12805_v63  ;;  %v11370_v56 = vadd.f32 %v11369_v12, %v11357_v21 }
 0xa22   :  { %v19233_v58 = vld [vmem:[#allocation5 + $0x4dc] sm:$0xf]  ;;  %v13029_v28 = vor.u32 %v19169_v6, %v13026_v50 }
 0xa23   :  { %11635 = vmatpush.bf16.msra.mxu3 %v13605_v10  ;;  %v13282_v11 = vld [vmem:[#allocation5 + $0x4f8] sm:$0xf0]  ;;  %11610 = vmatpush.bf16.msra.mxu1 %v13061_v16  ;;  %v11382_v10 = vpop.f32.mrf.mxu3 }
 0xa24   :  { %v19297_v14 = vld [vmem:[#allocation5 + $0x6dc] sm:$0xf]  ;;  %v13285_v0 = vor.u32 %v19233_v58, %v13282_v11  ;;  %v21303_v59 = vadd.f32 %v11382_v10, %v11370_v56 }
 0xa25   :  { %v13538_v52 = vld [vmem:[#allocation5 + $0x6f8] sm:$0xf0]  ;;  %11623 = vmatpush.bf16.msra.mxu2 %v13317_v53  ;;  %11598 = vmatpush.bf16.msra.mxu0 %v12773_v4 }
 0xa26   :  { %v19097_v45 = vld [vmem:[#allocation5 + $0x9c] sm:$0xf]  ;;  %v13541_v49 = vor.u32 %v19297_v14, %v13538_v52 }
 0xa27   :  { %v12738_v3 = vld [vmem:[#allocation5 + $0xb8] sm:$0xf0]  ;;  %11636 = vmatpush.bf16.msra.mxu3 %v13573_v51  ;;  %11611 = vmatpush.bf16.msra.mxu1 %v13029_v28 }
 0xa28   :  { %v19161_v30 = vld [vmem:[#allocation5 + $0x29c] sm:$0xf]  ;;  %v12741_v7 = vor.u32 %v19097_v45, %v12738_v3  ;;  %v11371_v3 = vpop.f32.mrf.mxu2 }
 0xa29   :  { %v12994_v57 = vld [vmem:[#allocation5 + $0x2b8] sm:$0xf0]  ;;  %11624 = vmatpush.bf16.msra.mxu2 %v13285_v0 }
 0xa2a   :  { %v19225_v54 = vld [vmem:[#allocation5 + $0x49c] sm:$0xf]  ;;  %v12997_v63 = vor.u32 %v19161_v30, %v12994_v57  ;;  %11599 = vmatpush.bf16.msra.mxu0 %v12741_v7 }
 0xa2b   :  { %v13250_v46 = vld [vmem:[#allocation5 + $0x4b8] sm:$0xf0]  ;;  %11637 = vmatpush.bf16.msra.mxu3 %v13541_v49 }
 0xa2c   :  { %v19289_v43 = vld [vmem:[#allocation5 + $0x69c] sm:$0xf]  ;;  %v13253_v35 = vor.u32 %v19225_v54, %v13250_v46  ;;  %11612 = vmatpush.bf16.msra.mxu1 %v12997_v63  ;;  %v11384_v54 = vpop.f32.mrf.mxu3 }
 0xa2d   :  { %v13506_v44 = vld [vmem:[#allocation5 + $0x6b8] sm:$0xf0] }
 0xa2e   :  { %v19089_v16 = vld [vmem:[#allocation5 + $0x5c] sm:$0xf]  ;;  %v13509_v6 = vor.u32 %v19289_v43, %v13506_v44  ;;  %11625 = vmatpush.bf16.msra.mxu2 %v13253_v35 }
 0xa2f   :  { %v12706_v53 = vld [vmem:[#allocation5 + $0x78] sm:$0xf0] }
 0xa30   :  { %v19153_v41 = vld [vmem:[#allocation5 + $0x25c] sm:$0xf]  ;;  %v12709_v11 = vor.u32 %v19089_v16, %v12706_v53  ;;  %11638 = vmatpush.bf16.msra.mxu3 %v13509_v6 }
 0xa31   :  { %v12962_v39 = vld [vmem:[#allocation5 + $0x278] sm:$0xf0] }
 0xa32   :  { %v19217_v48 = vld [vmem:[#allocation5 + $0x45c] sm:$0xf]  ;;  %v12965_v21 = vor.u32 %v19153_v41, %v12962_v39  ;;  %11600 = vmatpush.bf16.msra.mxu0 %v12709_v11 }
 0xa33   :  { %v13218_v51 = vld [vmem:[#allocation5 + $0x478] sm:$0xf0] }
 0xa34   :  { %v19281_v50 = vld [vmem:[#allocation5 + $0x65c] sm:$0xf]  ;;  %v13221_v4 = vor.u32 %v19217_v48, %v13218_v51  ;;  %11613 = vmatpush.bf16.msra.mxu1 %v12965_v21 }
 0xa35   :  { %v13474_v58 = vld [vmem:[#allocation5 + $0x678] sm:$0xf0] }
 0xa36   :  { %v19081_v14 = vld [vmem:[#allocation5 + $0x1c] sm:$0xf]  ;;  %v13477_v30 = vor.u32 %v19281_v50, %v13474_v58  ;;  %11626 = vmatpush.bf16.msra.mxu2 %v13221_v4 }
 0xa37   :  { %v12674_v52 = vld [vmem:[#allocation5 + $0x38] sm:$0xf0] }
 0xa38   :  { %v19145_v28 = vld [vmem:[#allocation5 + $0x21c] sm:$0xf]  ;;  %v12677_v43 = vor.u32 %v19081_v14, %v12674_v52  ;;  %11639 = vmatpush.bf16.msra.mxu3 %v13477_v30 }
 0xa39   :  { %v12930_v0 = vld [vmem:[#allocation5 + $0x238] sm:$0xf0] }
 0xa3a   :  { %v19209_v45 = vld [vmem:[#allocation5 + $0x41c] sm:$0xf]  ;;  %v12933_v63 = vor.u32 %v19145_v28, %v12930_v0  ;;  %11601 = vmatpush.bf16.msra.mxu0 %v12677_v43 }
 0xa3b   :  { %v13186_v12 = vld [vmem:[#allocation5 + $0x438] sm:$0xf0] }
 0xa3c   :  { %v19273_v49 = vld [vmem:[#allocation5 + $0x61c] sm:$0xf]  ;;  %v13189_v35 = vor.u32 %v19209_v45, %v13186_v12  ;;  %11614 = vmatpush.bf16.msra.mxu1 %v12933_v63 }
 0xa3d   :  { %v13442_v57 = vld [vmem:[#allocation5 + $0x638] sm:$0xf0]  ;;  %11602 = vmatmul.bf16.vlgmr.msra.gmra.mxu0 %v20984_v9 }
 0xa3e   :  { %v19393_v46 = vld [vmem:[#allocation5 + $0x9dc] sm:$0xf]  ;;  %v13445_v41 = vor.u32 %v19273_v49, %v13442_v57  ;;  %11627 = vmatpush.bf16.msra.mxu2 %v13189_v35 }
 0xa3f   :  { %v13922_v56 = vld [vmem:[#allocation5 + $0x9f8] sm:$0xf0]  ;;  %11615 = vmatmul.bf16.vlgmr.msra.gmra.mxu1 %v20991_v25  ;;  %v11408_v25 = vpop.f32.mrf.mxu1 }
 0xa40   :  { %v19457_v10 = vld [vmem:[#allocation5 + $0xbdc] sm:$0xf]  ;;  %v13925_v33 = vor.u32 %v19393_v46, %v13922_v56  ;;  %11640 = vmatpush.bf16.msra.mxu3 %v13445_v41 }
 0xa41   :  { %v14178_v44 = vld [vmem:[#allocation5 + $0xbf8] sm:$0xf0]  ;;  %11628 = vmatmul.bf16.vlgmr.msra.gmra.mxu2 %v20982_v8 }
 0xa42   :  { %v19521_v7 = vld [vmem:[#allocation5 + $0xddc] sm:$0xf]  ;;  %v14181_v6 = vor.u32 %v19457_v10, %v14178_v44  ;;  %11646 = vmatpush.bf16.msrb.mxu0 %v13925_v33  ;;  %v11395_v33 = vpop.f32.mrf.mxu0 }
 0xa43   :  { %v14434_v62 = vld [vmem:[#allocation5 + $0xdf8] sm:$0xf0]  ;;  %11641 = vmatmul.bf16.vlgmr.msra.gmra.mxu3 %v20986_v15  ;;  %v11396_v15 = vadd.f32 %v11395_v33, %v21303_v59 }
 0xa44   :  { %v19585_v16 = vld [vmem:[#allocation5 + $0xfdc] sm:$0xf]  ;;  %v14437_v39 = vor.u32 %v19521_v7, %v14434_v62  ;;  %11659 = vmatpush.bf16.msrb.mxu1 %v14181_v6 }
 0xa45   :  { %v14690_v53 = vld [vmem:[#allocation5 + $0xff8] sm:$0xf0] }
 0xa46   :  { %v19385_v48 = vld [vmem:[#allocation5 + $0x99c] sm:$0xf]  ;;  %v14693_v58 = vor.u32 %v19585_v16, %v14690_v53  ;;  %11672 = vmatpush.bf16.msrb.mxu2 %v14437_v39 }
 0xa47   :  { %v13890_v51 = vld [vmem:[#allocation5 + $0x9b8] sm:$0xf0] }
 0xa48   :  { %v19449_v50 = vld [vmem:[#allocation5 + $0xb9c] sm:$0xf]  ;;  %v13893_v28 = vor.u32 %v19385_v48, %v13890_v51  ;;  %11685 = vmatpush.bf16.msrb.mxu3 %v14693_v58 }
 0xa49   :  { %v14146_v11 = vld [vmem:[#allocation5 + $0xbb8] sm:$0xf0] }
 0xa4a   :  { %v19513_v14 = vld [vmem:[#allocation5 + $0xd9c] sm:$0xf]  ;;  %v14149_v0 = vor.u32 %v19449_v50, %v14146_v11  ;;  %11647 = vmatpush.bf16.msrb.mxu0 %v13893_v28 }
 0xa4b   :  { %v14402_v52 = vld [vmem:[#allocation5 + $0xdb8] sm:$0xf0] }
 0xa4c   :  { %v19577_v21 = vld [vmem:[#allocation5 + $0xf9c] sm:$0xf]  ;;  %v14405_v45 = vor.u32 %v19513_v14, %v14402_v52  ;;  %11660 = vmatpush.bf16.msrb.mxu1 %v14149_v0  ;;  %v11409_v52 = vadd.f32 %v11408_v25, %v11396_v15 }
 0xa4d   :  { %v14658_v4 = vld [vmem:[#allocation5 + $0xfb8] sm:$0xf0] }
 0xa4e   :  { %v19377_v3 = vld [vmem:[#allocation5 + $0x95c] sm:$0xf]  ;;  %v14661_v49 = vor.u32 %v19577_v21, %v14658_v4  ;;  %11673 = vmatpush.bf16.msrb.mxu2 %v14405_v45 }
 0xa4f   :  { %v13858_v30 = vld [vmem:[#allocation5 + $0x978] sm:$0xf0] }
 0xa50   :  { %v19441_v12 = vld [vmem:[#allocation5 + $0xb5c] sm:$0xf]  ;;  %v13861_v43 = vor.u32 %v19377_v3, %v13858_v30  ;;  %11686 = vmatpush.bf16.msrb.mxu3 %v14661_v49 }
 0xa51   :  { %v14114_v57 = vld [vmem:[#allocation5 + $0xb78] sm:$0xf0] }
 0xa52   :  { %v19505_v54 = vld [vmem:[#allocation5 + $0xd5c] sm:$0xf]  ;;  %v14117_v44 = vor.u32 %v19441_v12, %v14114_v57  ;;  %11648 = vmatpush.bf16.msrb.mxu0 %v13861_v43 }
 0xa53   :  { %v14370_v46 = vld [vmem:[#allocation5 + $0xd78] sm:$0xf0] }
 0xa54   :  { %v19569_v56 = vld [vmem:[#allocation5 + $0xf5c] sm:$0xf]  ;;  %v14373_v7 = vor.u32 %v19505_v54, %v14370_v46  ;;  %11661 = vmatpush.bf16.msrb.mxu1 %v14117_v44  ;;  %v11421_v46 = vpop.f32.mrf.mxu2 }
 0xa55   :  { %v14626_v10 = vld [vmem:[#allocation5 + $0xf78] sm:$0xf0]  ;;  %v11422_v44 = vadd.f32 %v11421_v46, %v11409_v52 }
 0xa56   :  { %v19369_v62 = vld [vmem:[#allocation5 + $0x91c] sm:$0xf]  ;;  %v14629_v16 = vor.u32 %v19569_v56, %v14626_v10  ;;  %11674 = vmatpush.bf16.msrb.mxu2 %v14373_v7  ;;  %v11434_v7 = vpop.f32.mrf.mxu3 }
 0xa57   :  { %v13826_v63 = vld [vmem:[#allocation5 + $0x938] sm:$0xf0] }
 0xa58   :  { %v19433_v35 = vld [vmem:[#allocation5 + $0xb1c] sm:$0xf]  ;;  %v13829_v39 = vor.u32 %v19369_v62, %v13826_v63  ;;  %11687 = vmatpush.bf16.msrb.mxu3 %v14629_v16 }
 0xa59   :  { %v14082_v8 = vld [vmem:[#allocation5 + $0xb38] sm:$0xf0] }
 0xa5a   :  { %v19497_v53 = vld [vmem:[#allocation5 + $0xd1c] sm:$0xf]  ;;  %v14085_v48 = vor.u32 %v19433_v35, %v14082_v8  ;;  %11649 = vmatpush.bf16.msrb.mxu0 %v13829_v39  ;;  %v11397_v35 = vpop.f32.mrf.mxu0  ;;  %v11410_v8 = vpop.f32.mrf.mxu1 }
 0xa5b   :  { %v14338_v41 = vld [vmem:[#allocation5 + $0xd38] sm:$0xf0] }
 0xa5c   :  { %v19561_v9 = vld [vmem:[#allocation5 + $0xf1c] sm:$0xf]  ;;  %v14341_v51 = vor.u32 %v19497_v53, %v14338_v41  ;;  %11662 = vmatpush.bf16.msrb.mxu1 %v14085_v48  ;;  %v21310_v53 = vadd.f32 %v11434_v7, %v11422_v44 }
 0xa5d   :  { %v14594_v6 = vld [vmem:[#allocation5 + $0xf38] sm:$0xf0] }
 0xa5e   :  { %v19361_v50 = vld [vmem:[#allocation5 + $0x8dc] sm:$0xf]  ;;  %v14597_v14 = vor.u32 %v19561_v9, %v14594_v6  ;;  %11675 = vmatpush.bf16.msrb.mxu2 %v14341_v51 }
 0xa5f   :  { %v13794_v58 = vld [vmem:[#allocation5 + $0x8f8] sm:$0xf0] }
 0xa60   :  { %v19425_v11 = vld [vmem:[#allocation5 + $0xadc] sm:$0xf]  ;;  %v13797_v3 = vor.u32 %v19361_v50, %v13794_v58  ;;  %11688 = vmatpush.bf16.msrb.mxu3 %v14597_v14 }
 0xa61   :  { %v14050_v21 = vld [vmem:[#allocation5 + $0xaf8] sm:$0xf0] }
 0xa62   :  { %v19489_v4 = vld [vmem:[#allocation5 + $0xcdc] sm:$0xf]  ;;  %v14053_v59 = vor.u32 %v19425_v11, %v14050_v21  ;;  %11650 = vmatpush.bf16.msrb.mxu0 %v13797_v3 }
 0xa63   :  { %v14306_v28 = vld [vmem:[#allocation5 + $0xcf8] sm:$0xf0] }
 0xa64   :  { %v19553_v0 = vld [vmem:[#allocation5 + $0xedc] sm:$0xf]  ;;  %v14309_v30 = vor.u32 %v19489_v4, %v14306_v28  ;;  %11663 = vmatpush.bf16.msrb.mxu1 %v14053_v59 }
 0xa65   :  { %v14562_v45 = vld [vmem:[#allocation5 + $0xef8] sm:$0xf0] }
 0xa66   :  { %v19353_v12 = vld [vmem:[#allocation5 + $0x89c] sm:$0xf]  ;;  %v14565_v54 = vor.u32 %v19553_v0, %v14562_v45  ;;  %11676 = vmatpush.bf16.msrb.mxu2 %v14309_v30 }
 0xa67   :  { %v13762_v49 = vld [vmem:[#allocation5 + $0x8b8] sm:$0xf0] }
 0xa68   :  { %v19417_v57 = vld [vmem:[#allocation5 + $0xa9c] sm:$0xf]  ;;  %v13765_v16 = vor.u32 %v19353_v12, %v13762_v49  ;;  %11689 = vmatpush.bf16.msrb.mxu3 %v14565_v54  ;;  %v11423_v49 = vpop.f32.mrf.mxu2 }
 0xa69   :  { %v14018_v56 = vld [vmem:[#allocation5 + $0xab8] sm:$0xf0] }
 0xa6a   :  { %v19481_v10 = vld [vmem:[#allocation5 + $0xc9c] sm:$0xf]  ;;  %v14021_v41 = vor.u32 %v19417_v57, %v14018_v56  ;;  %11651 = vmatpush.bf16.msrb.mxu0 %v13765_v16  ;;  %v11436_v56 = vpop.f32.mrf.mxu3 }
 0xa6b   :  { %v14274_v43 = vld [vmem:[#allocation5 + $0xcb8] sm:$0xf0] }
 0xa6c   :  { %v19545_v62 = vld [vmem:[#allocation5 + $0xe9c] sm:$0xf]  ;;  %v14277_v33 = vor.u32 %v19481_v10, %v14274_v43  ;;  %11664 = vmatpush.bf16.msrb.mxu1 %v14021_v41 }
 0xa6d   :  { %v14530_v63 = vld [vmem:[#allocation5 + $0xeb8] sm:$0xf0] }
 0xa6e   :  { %v19345_v9 = vld [vmem:[#allocation5 + $0x85c] sm:$0xf]  ;;  %v14533_v39 = vor.u32 %v19545_v62, %v14530_v63  ;;  %11677 = vmatpush.bf16.msrb.mxu2 %v14277_v33 }
 0xa6f   :  { %v13730_v6 = vld [vmem:[#allocation5 + $0x878] sm:$0xf0] }
 0xa70   :  { %v19409_v15 = vld [vmem:[#allocation5 + $0xa5c] sm:$0xf]  ;;  %v13733_v11 = vor.u32 %v19345_v9, %v13730_v6  ;;  %11690 = vmatpush.bf16.msrb.mxu3 %v14533_v39 }
 0xa71   :  { %v13986_v25 = vld [vmem:[#allocation5 + $0xa78] sm:$0xf0] }
 0xa72   :  { %v19473_v48 = vld [vmem:[#allocation5 + $0xc5c] sm:$0xf]  ;;  %v13989_v21 = vor.u32 %v19409_v15, %v13986_v25  ;;  %11652 = vmatpush.bf16.msrb.mxu0 %v13733_v11 }
 0xa73   :  { %v14242_v51 = vld [vmem:[#allocation5 + $0xc78] sm:$0xf0] }
 0xa74   :  { %v19537_v50 = vld [vmem:[#allocation5 + $0xe5c] sm:$0xf]  ;;  %v14245_v4 = vor.u32 %v19473_v48, %v14242_v51  ;;  %11665 = vmatpush.bf16.msrb.mxu1 %v13989_v21 }
 0xa75   :  { %v14498_v58 = vld [vmem:[#allocation5 + $0xe78] sm:$0xf0] }
 0xa76   :  { %v19337_v14 = vld [vmem:[#allocation5 + $0x81c] sm:$0xf]  ;;  %v14501_v3 = vor.u32 %v19537_v50, %v14498_v58  ;;  %11678 = vmatpush.bf16.msrb.mxu2 %v14245_v4 }
 0xa77   :  { %v13698_v52 = vld [vmem:[#allocation5 + $0x838] sm:$0xf0] }
 0xa78   :  { %v19401_v28 = vld [vmem:[#allocation5 + $0xa1c] sm:$0xf]  ;;  %v13701_v10 = vor.u32 %v19337_v14, %v13698_v52  ;;  %11691 = vmatpush.bf16.msrb.mxu3 %v14501_v3 }
 0xa79   :  { %v13954_v0 = vld [vmem:[#allocation5 + $0xa38] sm:$0xf0] }
 0xa7a   :  { %v19465_v45 = vld [vmem:[#allocation5 + $0xc1c] sm:$0xf]  ;;  %v13957_v62 = vor.u32 %v19401_v28, %v13954_v0  ;;  %11653 = vmatpush.bf16.msrb.mxu0 %v13701_v10 }
 0xa7b   :  { %v14210_v59 = vld [vmem:[#allocation5 + $0xc38] sm:$0xf0] }
 0xa7c   :  { %v19529_v30 = vld [vmem:[#allocation5 + $0xe1c] sm:$0xf]  ;;  %v14213_v63 = vor.u32 %v19465_v45, %v14210_v59  ;;  %11666 = vmatpush.bf16.msrb.mxu1 %v13957_v62 }
 0xa7d   :  { %v14466_v12 = vld [vmem:[#allocation5 + $0xe38] sm:$0xf0]  ;;  %11654 = vmatmul.bf16.vlgmr.msrb.gmra.mxu0 %v20996_v37 }
 0xa7e   :  { %v19649_v57 = vld [vmem:[#allocation5 + $0x11dc] sm:$0xf]  ;;  %v14469_v8 = vor.u32 %v19529_v30, %v14466_v12  ;;  %11679 = vmatpush.bf16.msrb.mxu2 %v14213_v63  ;;  %v11447_v63 = vpop.f32.mrf.mxu0 }
 0xa7f   :  { %v14946_v54 = vld [vmem:[#allocation5 + $0x11f8] sm:$0xf0]  ;;  %11667 = vmatmul.bf16.vlgmr.msrb.gmra.mxu1 %v21000_v40  ;;  %v11460_v40 = vpop.f32.mrf.mxu1 }
 0xa80   :  { %v19713_v46 = vld [vmem:[#allocation5 + $0x13dc] sm:$0xf]  ;;  %v14949_v41 = vor.u32 %v19649_v57, %v14946_v54  ;;  %11692 = vmatpush.bf16.msrb.mxu3 %v14469_v8 }
 0xa81   :  { %v15202_v43 = vld [vmem:[#allocation5 + $0x13f8] sm:$0xf0]  ;;  %11680 = vmatmul.bf16.vlgmr.msrb.gmra.mxu2 %v20994_v34 }
 0xa82   :  { %v19777_v44 = vld [vmem:[#allocation5 + $0x15dc] sm:$0xf]  ;;  %v15205_v33 = vor.u32 %v19713_v46, %v15202_v43  ;;  %11698 = vmatpush.bf16.msra.mxu0 %v14949_v41 }
 0xa83   :  { %v15458_v7 = vld [vmem:[#allocation5 + $0x15f8] sm:$0xf0]  ;;  %11693 = vmatmul.bf16.vlgmr.msrb.gmra.mxu3 %v20998_v38  ;;  %v11448_v38 = vadd.f32 %v11447_v63, %v21310_v53 }
 0xa84   :  { %v19841_v35 = vld [vmem:[#allocation5 + $0x17dc] sm:$0xf]  ;;  %v15461_v9 = vor.u32 %v19777_v44, %v15458_v7  ;;  %11711 = vmatpush.bf16.msra.mxu1 %v15205_v33 }
 0xa85   :  { %v15714_v16 = vld [vmem:[#allocation5 + $0x17f8] sm:$0xf0] }
 0xa86   :  { %v19641_v6 = vld [vmem:[#allocation5 + $0x119c] sm:$0xf]  ;;  %v15717_v25 = vor.u32 %v19841_v35, %v15714_v16  ;;  %11724 = vmatpush.bf16.msra.mxu2 %v15461_v9 }
 0xa87   :  { %v14914_v15 = vld [vmem:[#allocation5 + $0x11b8] sm:$0xf0] }
 0xa88   :  { %v19705_v39 = vld [vmem:[#allocation5 + $0x139c] sm:$0xf]  ;;  %v14917_v14 = vor.u32 %v19641_v6, %v14914_v15  ;;  %11737 = vmatpush.bf16.msra.mxu3 %v15717_v25 }
 0xa89   :  { %v15170_v48 = vld [vmem:[#allocation5 + $0x13b8] sm:$0xf0] }
 0xa8a   :  { %v19769_v51 = vld [vmem:[#allocation5 + $0x159c] sm:$0xf]  ;;  %v15173_v52 = vor.u32 %v19705_v39, %v15170_v48  ;;  %11699 = vmatpush.bf16.msra.mxu0 %v14917_v14  ;;  %v11461_v39 = vadd.f32 %v11460_v40, %v11448_v38 }
 0xa8b   :  { %v15426_v50 = vld [vmem:[#allocation5 + $0x15b8] sm:$0xf0] }
 0xa8c   :  { %v19833_v58 = vld [vmem:[#allocation5 + $0x179c] sm:$0xf]  ;;  %v15429_v21 = vor.u32 %v19769_v51, %v15426_v50  ;;  %11712 = vmatpush.bf16.msra.mxu1 %v15173_v52 }
 0xa8d   :  { %v15682_v11 = vld [vmem:[#allocation5 + $0x17b8] sm:$0xf0] }
 0xa8e   :  { %v19633_v4 = vld [vmem:[#allocation5 + $0x115c] sm:$0xf]  ;;  %v15685_v45 = vor.u32 %v19833_v58, %v15682_v11  ;;  %11725 = vmatpush.bf16.msra.mxu2 %v15429_v21 }
 0xa8f   :  { %v14882_v28 = vld [vmem:[#allocation5 + $0x1178] sm:$0xf0] }
 0xa90   :  { %v19697_v0 = vld [vmem:[#allocation5 + $0x135c] sm:$0xf]  ;;  %v14885_v57 = vor.u32 %v19633_v4, %v14882_v28  ;;  %11738 = vmatpush.bf16.msra.mxu3 %v15685_v45 }
 0xa91   :  { %v15138_v3 = vld [vmem:[#allocation5 + $0x1378] sm:$0xf0] }
 0xa92   :  { %v19761_v59 = vld [vmem:[#allocation5 + $0x155c] sm:$0xf]  ;;  %v15141_v54 = vor.u32 %v19697_v0, %v15138_v3  ;;  %11700 = vmatpush.bf16.msra.mxu0 %v14885_v57  ;;  %v11473_v0 = vpop.f32.mrf.mxu2 }
 0xa93   :  { %v15394_v30 = vld [vmem:[#allocation5 + $0x1578] sm:$0xf0] }
 0xa94   :  { %v19825_v12 = vld [vmem:[#allocation5 + $0x175c] sm:$0xf]  ;;  %v15397_v46 = vor.u32 %v19761_v59, %v15394_v30  ;;  %11713 = vmatpush.bf16.msra.mxu1 %v15141_v54  ;;  %v11474_v30 = vadd.f32 %v11473_v0, %v11461_v39  ;;  %v11449_v54 = vpop.f32.mrf.mxu0 }
 0xa95   :  { %v15650_v49 = vld [vmem:[#allocation5 + $0x1778] sm:$0xf0] }
 0xa96   :  { %v19625_v56 = vld [vmem:[#allocation5 + $0x111c] sm:$0xf]  ;;  %v15653_v43 = vor.u32 %v19825_v12, %v15650_v49  ;;  %11726 = vmatpush.bf16.msra.mxu2 %v15397_v46  ;;  %v11486_v12 = vpop.f32.mrf.mxu3 }
 0xa97   :  { %v14850_v10 = vld [vmem:[#allocation5 + $0x1138] sm:$0xf0] }
 0xa98   :  { %v19689_v34 = vld [vmem:[#allocation5 + $0x131c] sm:$0xf]  ;;  %v14853_v16 = vor.u32 %v19625_v56, %v14850_v10  ;;  %11739 = vmatpush.bf16.msra.mxu3 %v15653_v43  ;;  %v11462_v56 = vpop.f32.mrf.mxu1  ;;  %v21317_v10 = vadd.f32 %v11486_v12, %v11474_v30 }
 0xa99   :  { %v15106_v44 = vld [vmem:[#allocation5 + $0x1338] sm:$0xf0] }
 0xa9a   :  { %v19753_v7 = vld [vmem:[#allocation5 + $0x151c] sm:$0xf]  ;;  %v15109_v8 = vor.u32 %v19689_v34, %v15106_v44  ;;  %11701 = vmatpush.bf16.msra.mxu0 %v14853_v16 }
 0xa9b   :  { %v15362_v62 = vld [vmem:[#allocation5 + $0x1538] sm:$0xf0] }
 0xa9c   :  { %v19817_v37 = vld [vmem:[#allocation5 + $0x171c] sm:$0xf]  ;;  %v15365_v41 = vor.u32 %v19753_v7, %v15362_v62  ;;  %11714 = vmatpush.bf16.msra.mxu1 %v15109_v8 }
 0xa9d   :  { %v15618_v35 = vld [vmem:[#allocation5 + $0x1738] sm:$0xf0] }
 0xa9e   :  { %v19617_v33 = vld [vmem:[#allocation5 + $0x10dc] sm:$0xf]  ;;  %v15621_v15 = vor.u32 %v19817_v37, %v15618_v35  ;;  %11727 = vmatpush.bf16.msra.mxu2 %v15365_v41 }
 0xa9f   :  { %v14818_v9 = vld [vmem:[#allocation5 + $0x10f8] sm:$0xf0] }
 0xaa0   :  { %v19681_v6 = vld [vmem:[#allocation5 + $0x12dc] sm:$0xf]  ;;  %v14821_v11 = vor.u32 %v19617_v33, %v14818_v9  ;;  %11740 = vmatpush.bf16.msra.mxu3 %v15621_v15 }
 0xaa1   :  { %v15074_v25 = vld [vmem:[#allocation5 + $0x12f8] sm:$0xf0] }
 0xaa2   :  { %v19745_v48 = vld [vmem:[#allocation5 + $0x14dc] sm:$0xf]  ;;  %v15077_v53 = vor.u32 %v19681_v6, %v15074_v25  ;;  %11702 = vmatpush.bf16.msra.mxu0 %v14821_v11  ;;  %v11475_v11 = vpop.f32.mrf.mxu2 }
 0xaa3   :  { %v15330_v51 = vld [vmem:[#allocation5 + $0x14f8] sm:$0xf0] }
 0xaa4   :  { %v19809_v50 = vld [vmem:[#allocation5 + $0x16dc] sm:$0xf]  ;;  %v15333_v14 = vor.u32 %v19745_v48, %v15330_v51  ;;  %11715 = vmatpush.bf16.msra.mxu1 %v15077_v53 }
 0xaa5   :  { %v15586_v58 = vld [vmem:[#allocation5 + $0x16f8] sm:$0xf0] }
 0xaa6   :  { %v19609_v52 = vld [vmem:[#allocation5 + $0x109c] sm:$0xf]  ;;  %v15589_v28 = vor.u32 %v19809_v50, %v15586_v58  ;;  %11728 = vmatpush.bf16.msra.mxu2 %v15333_v14 }
 0xaa7   :  { %v14786_v21 = vld [vmem:[#allocation5 + $0x10b8] sm:$0xf0] }
 0xaa8   :  { %v19673_v4 = vld [vmem:[#allocation5 + $0x129c] sm:$0xf]  ;;  %v14789_v46 = vor.u32 %v19609_v52, %v14786_v21  ;;  %11741 = vmatpush.bf16.msra.mxu3 %v15589_v28  ;;  %v11488_v21 = vpop.f32.mrf.mxu3 }
 0xaa9   :  { %v15042_v45 = vld [vmem:[#allocation5 + $0x12b8] sm:$0xf0] }
 0xaaa   :  { %v19737_v3 = vld [vmem:[#allocation5 + $0x149c] sm:$0xf]  ;;  %v15045_v34 = vor.u32 %v19673_v4, %v15042_v45  ;;  %11703 = vmatpush.bf16.msra.mxu0 %v14789_v46 }
 0xaab   :  { %v15298_v59 = vld [vmem:[#allocation5 + $0x14b8] sm:$0xf0] }
 0xaac   :  { %v19801_v49 = vld [vmem:[#allocation5 + $0x169c] sm:$0xf]  ;;  %v15301_v43 = vor.u32 %v19737_v3, %v15298_v59  ;;  %11716 = vmatpush.bf16.msra.mxu1 %v15045_v34 }
 0xaad   :  { %v15554_v57 = vld [vmem:[#allocation5 + $0x16b8] sm:$0xf0] }
 0xaae   :  { %v19601_v44 = vld [vmem:[#allocation5 + $0x105c] sm:$0xf]  ;;  %v15557_v63 = vor.u32 %v19801_v49, %v15554_v57  ;;  %11729 = vmatpush.bf16.msra.mxu2 %v15301_v43 }
 0xaaf   :  { %v14754_v7 = vld [vmem:[#allocation5 + $0x1078] sm:$0xf0] }
 0xab0   :  { %v19665_v62 = vld [vmem:[#allocation5 + $0x125c] sm:$0xf]  ;;  %v14757_v8 = vor.u32 %v19601_v44, %v14754_v7  ;;  %11742 = vmatpush.bf16.msra.mxu3 %v15557_v63 }
 0xab1   :  { %v15010_v37 = vld [vmem:[#allocation5 + $0x1278] sm:$0xf0] }
 0xab2   :  { %v19729_v35 = vld [vmem:[#allocation5 + $0x145c] sm:$0xf]  ;;  %v15013_v9 = vor.u32 %v19665_v62, %v15010_v37  ;;  %11704 = vmatpush.bf16.msra.mxu0 %v14757_v8 }
 0xab3   :  { %v15266_v38 = vld [vmem:[#allocation5 + $0x1478] sm:$0xf0] }
 0xab4   :  { %v19793_v16 = vld [vmem:[#allocation5 + $0x165c] sm:$0xf]  ;;  %v15269_v6 = vor.u32 %v19729_v35, %v15266_v38  ;;  %11717 = vmatpush.bf16.msra.mxu1 %v15013_v9 }
 0xab5   :  { %v15522_v40 = vld [vmem:[#allocation5 + $0x1678] sm:$0xf0] }
 0xab6   :  { %v19593_v41 = vld [vmem:[#allocation5 + $0x101c] sm:$0xf]  ;;  %v15525_v48 = vor.u32 %v19793_v16, %v15522_v40  ;;  %11730 = vmatpush.bf16.msra.mxu2 %v15269_v6 }
 0xab7   :  { %v14722_v33 = vld [vmem:[#allocation5 + $0x1038] sm:$0xf0] }
 0xab8   :  { %v19657_v15 = vld [vmem:[#allocation5 + $0x121c] sm:$0xf]  ;;  %v14725_v4 = vor.u32 %v19593_v41, %v14722_v33  ;;  %11743 = vmatpush.bf16.msra.mxu3 %v15525_v48 }
 0xab9   :  { %v14978_v39 = vld [vmem:[#allocation5 + $0x1238] sm:$0xf0] }
 0xaba   :  { %v19721_v25 = vld [vmem:[#allocation5 + $0x141c] sm:$0xf]  ;;  %v14981_v3 = vor.u32 %v19657_v15, %v14978_v39  ;;  %11705 = vmatpush.bf16.msra.mxu0 %v14725_v4  ;;  %v11499_v4 = vpop.f32.mrf.mxu0 }
 0xabb   :  { %v15234_v51 = vld [vmem:[#allocation5 + $0x1438] sm:$0xf0] }
 0xabc   :  { %v19785_v50 = vld [vmem:[#allocation5 + $0x161c] sm:$0xf]  ;;  %v15237_v59 = vor.u32 %v19721_v25, %v15234_v51  ;;  %11718 = vmatpush.bf16.msra.mxu1 %v14981_v3 }
 0xabd   :  { %v15490_v58 = vld [vmem:[#allocation5 + $0x1638] sm:$0xf0]  ;;  %11706 = vmatmul.bf16.vlgmr.msra.gmra.mxu0 %v21006_v18 }
 0xabe   :  { %v19905_v53 = vld [vmem:[#allocation5 + $0x19dc] sm:$0xf]  ;;  %v15493_v49 = vor.u32 %v19785_v50, %v15490_v58  ;;  %11731 = vmatpush.bf16.msra.mxu2 %v15237_v59 }
 0xabf   :  { %v15970_v14 = vld [vmem:[#allocation5 + $0x19f8] sm:$0xf0]  ;;  %11719 = vmatmul.bf16.vlgmr.msra.gmra.mxu1 %v21010_v23 }
 0xac0   :  { %v19969_v52 = vld [vmem:[#allocation5 + $0x1bdc] sm:$0xf]  ;;  %v15973_v57 = vor.u32 %v19905_v53, %v15970_v14  ;;  %11744 = vmatpush.bf16.msra.mxu3 %v15493_v49 }
 0xac1   :  { %v16226_v28 = vld [vmem:[#allocation5 + $0x1bf8] sm:$0xf0]  ;;  %11732 = vmatmul.bf16.vlgmr.msra.gmra.mxu2 %v21008_v22 }
 0xac2   :  { %v20033_v0 = vld [vmem:[#allocation5 + $0x1ddc] sm:$0xf]  ;;  %v16229_v54 = vor.u32 %v19969_v52, %v16226_v28  ;;  %11750 = vmatpush.bf16.msrb.mxu0 %v15973_v57 }
 0xac3   :  { %v16482_v45 = vld [vmem:[#allocation5 + $0x1df8] sm:$0xf0]  ;;  %11745 = vmatmul.bf16.vlgmr.msra.gmra.mxu3 %v21012_v27  ;;  %v11500_v27 = vadd.f32 %v11499_v4, %v21317_v10 }
 0xac4   :  { %v20097_v30 = vld [vmem:[#allocation5 + $0x1fdc] sm:$0xf]  ;;  %v16485_v46 = vor.u32 %v20033_v0, %v16482_v45  ;;  %11763 = vmatpush.bf16.msrb.mxu1 %v16229_v54  ;;  %v11512_v45 = vpop.f32.mrf.mxu1 }
 0xac5   :  { %v16738_v12 = vld [vmem:[#allocation5 + $0x1ff8] sm:$0xf0]  ;;  %v11513_v54 = vadd.f32 %v11512_v45, %v11500_v27 }
 0xac6   :  { %v19897_v56 = vld [vmem:[#allocation5 + $0x199c] sm:$0xf]  ;;  %v16741_v44 = vor.u32 %v20097_v30, %v16738_v12  ;;  %11776 = vmatpush.bf16.msrb.mxu2 %v16485_v46 }
 0xac7   :  { %v15938_v34 = vld [vmem:[#allocation5 + $0x19b8] sm:$0xf0] }
 0xac8   :  { %v19961_v43 = vld [vmem:[#allocation5 + $0x1b9c] sm:$0xf]  ;;  %v15941_v38 = vor.u32 %v19897_v56, %v15938_v34  ;;  %11789 = vmatpush.bf16.msrb.mxu3 %v16741_v44 }
 0xac9   :  { %v16194_v7 = vld [vmem:[#allocation5 + $0x1bb8] sm:$0xf0] }
 0xaca   :  { %v20025_v62 = vld [vmem:[#allocation5 + $0x1d9c] sm:$0xf]  ;;  %v16197_v16 = vor.u32 %v19961_v43, %v16194_v7  ;;  %11751 = vmatpush.bf16.msrb.mxu0 %v15941_v38 }
 0xacb   :  { %v16450_v63 = vld [vmem:[#allocation5 + $0x1db8] sm:$0xf0] }
 0xacc   :  { %v20089_v37 = vld [vmem:[#allocation5 + $0x1f9c] sm:$0xf]  ;;  %v16453_v40 = vor.u32 %v20025_v62, %v16450_v63  ;;  %11764 = vmatpush.bf16.msrb.mxu1 %v16197_v16  ;;  %v11525_v16 = vpop.f32.mrf.mxu2 }
 0xacd   :  { %v16706_v35 = vld [vmem:[#allocation5 + $0x1fb8] sm:$0xf0] }
 0xace   :  { %v19889_v8 = vld [vmem:[#allocation5 + $0x195c] sm:$0xf]  ;;  %v16709_v9 = vor.u32 %v20089_v37, %v16706_v35  ;;  %11777 = vmatpush.bf16.msrb.mxu2 %v16453_v40 }
 0xacf   :  { %v15906_v41 = vld [vmem:[#allocation5 + $0x1978] sm:$0xf0] }
 0xad0   :  { %v19953_v33 = vld [vmem:[#allocation5 + $0x1b5c] sm:$0xf]  ;;  %v15909_v51 = vor.u32 %v19889_v8, %v15906_v41  ;;  %11790 = vmatpush.bf16.msrb.mxu3 %v16709_v9  ;;  %v11538_v9 = vpop.f32.mrf.mxu3 }
 0xad1   :  { %v16162_v6 = vld [vmem:[#allocation5 + $0x1b78] sm:$0xf0] }
 0xad2   :  { %v20017_v15 = vld [vmem:[#allocation5 + $0x1d5c] sm:$0xf]  ;;  %v16165_v50 = vor.u32 %v19953_v33, %v16162_v6  ;;  %11752 = vmatpush.bf16.msrb.mxu0 %v15909_v51  ;;  %v11526_v33 = vadd.f32 %v11525_v16, %v11513_v54 }
 0xad3   :  { %v16418_v39 = vld [vmem:[#allocation5 + $0x1d78] sm:$0xf0] }
 0xad4   :  { %v20081_v25 = vld [vmem:[#allocation5 + $0x1f5c] sm:$0xf]  ;;  %v16421_v58 = vor.u32 %v20017_v15, %v16418_v39  ;;  %11765 = vmatpush.bf16.msrb.mxu1 %v16165_v50  ;;  %v11501_v39 = vpop.f32.mrf.mxu0  ;;  %v21324_v51 = vadd.f32 %v11538_v9, %v11526_v33 }
 0xad5   :  { %v16674_v48 = vld [vmem:[#allocation5 + $0x1f78] sm:$0xf0] }
 0xad6   :  { %v19881_v11 = vld [vmem:[#allocation5 + $0x191c] sm:$0xf]  ;;  %v16677_v14 = vor.u32 %v20081_v25, %v16674_v48  ;;  %11778 = vmatpush.bf16.msrb.mxu2 %v16421_v58  ;;  %v11514_v48 = vpop.f32.mrf.mxu1 }
 0xad7   :  { %v15874_v18 = vld [vmem:[#allocation5 + $0x1938] sm:$0xf0] }
 0xad8   :  { %v19945_v53 = vld [vmem:[#allocation5 + $0x1b1c] sm:$0xf]  ;;  %v15877_v0 = vor.u32 %v19881_v11, %v15874_v18  ;;  %11791 = vmatpush.bf16.msrb.mxu3 %v16677_v14 }
 0xad9   :  { %v16130_v52 = vld [vmem:[#allocation5 + $0x1b38] sm:$0xf0] }
 0xada   :  { %v20009_v21 = vld [vmem:[#allocation5 + $0x1d1c] sm:$0xf]  ;;  %v16133_v3 = vor.u32 %v19945_v53, %v16130_v52  ;;  %11753 = vmatpush.bf16.msrb.mxu0 %v15877_v0 }
 0xadb   :  { %v16386_v22 = vld [vmem:[#allocation5 + $0x1d38] sm:$0xf0] }
 0xadc   :  { %v20073_v23 = vld [vmem:[#allocation5 + $0x1f1c] sm:$0xf]  ;;  %v16389_v59 = vor.u32 %v20009_v21, %v16386_v22  ;;  %11766 = vmatpush.bf16.msrb.mxu1 %v16133_v3 }
 0xadd   :  { %v16642_v28 = vld [vmem:[#allocation5 + $0x1f38] sm:$0xf0] }
 0xade   :  { %v19873_v30 = vld [vmem:[#allocation5 + $0x18dc] sm:$0xf]  ;;  %v16645_v57 = vor.u32 %v20073_v23, %v16642_v28  ;;  %11779 = vmatpush.bf16.msrb.mxu2 %v16389_v59 }
 0xadf   :  { %v15842_v12 = vld [vmem:[#allocation5 + $0x18f8] sm:$0xf0] }
 0xae0   :  { %v19937_v49 = vld [vmem:[#allocation5 + $0x1adc] sm:$0xf]  ;;  %v15845_v7 = vor.u32 %v19873_v30, %v15842_v12  ;;  %11792 = vmatpush.bf16.msrb.mxu3 %v16645_v57 }
 0xae1   :  { %v16098_v46 = vld [vmem:[#allocation5 + $0x1af8] sm:$0xf0] }
 0xae2   :  { %v20001_v56 = vld [vmem:[#allocation5 + $0x1cdc] sm:$0xf]  ;;  %v16101_v10 = vor.u32 %v19937_v49, %v16098_v46  ;;  %11754 = vmatpush.bf16.msrb.mxu0 %v15845_v7  ;;  %v11540_v7 = vpop.f32.mrf.mxu3 }
 0xae3   :  { %v16354_v34 = vld [vmem:[#allocation5 + $0x1cf8] sm:$0xf0]  ;;  %v11564_v7 = vpop.f32.mrf.mxu1 }
 0xae4   :  { %v20065_v43 = vld [vmem:[#allocation5 + $0x1edc] sm:$0xf]  ;;  %v16357_v62 = vor.u32 %v20001_v56, %v16354_v34  ;;  %11767 = vmatpush.bf16.msrb.mxu1 %v16101_v10  ;;  %v11527_v56 = vpop.f32.mrf.mxu2 }
 0xae5   :  { %v16610_v44 = vld [vmem:[#allocation5 + $0x1ef8] sm:$0xf0] }
 0xae6   :  { %v19865_v63 = vld [vmem:[#allocation5 + $0x189c] sm:$0xf]  ;;  %v16613_v38 = vor.u32 %v20065_v43, %v16610_v44  ;;  %11780 = vmatpush.bf16.msrb.mxu2 %v16357_v62 }
 0xae7   :  { %v15810_v37 = vld [vmem:[#allocation5 + $0x18b8] sm:$0xf0] }
 0xae8   :  { %v19929_v35 = vld [vmem:[#allocation5 + $0x1a9c] sm:$0xf]  ;;  %v15813_v25 = vor.u32 %v19865_v63, %v15810_v37  ;;  %11793 = vmatpush.bf16.msrb.mxu3 %v16613_v38 }
 0xae9   :  { %v16066_v40 = vld [vmem:[#allocation5 + $0x1ab8] sm:$0xf0] }
 0xaea   :  { %v19993_v8 = vld [vmem:[#allocation5 + $0x1c9c] sm:$0xf]  ;;  %v16069_v50 = vor.u32 %v19929_v35, %v16066_v40  ;;  %11755 = vmatpush.bf16.msrb.mxu0 %v15813_v25 }
 0xaeb   :  { %v16322_v41 = vld [vmem:[#allocation5 + $0x1cb8] sm:$0xf0] }
 0xaec   :  { %v20057_v6 = vld [vmem:[#allocation5 + $0x1e9c] sm:$0xf]  ;;  %v16325_v58 = vor.u32 %v19993_v8, %v16322_v41  ;;  %11768 = vmatpush.bf16.msrb.mxu1 %v16069_v50 }
 0xaed   :  { %v16578_v15 = vld [vmem:[#allocation5 + $0x1eb8] sm:$0xf0] }
 0xaee   :  { %v19857_v11 = vld [vmem:[#allocation5 + $0x185c] sm:$0xf]  ;;  %v16581_v14 = vor.u32 %v20057_v6, %v16578_v15  ;;  %11781 = vmatpush.bf16.msrb.mxu2 %v16325_v58 }
 0xaef   :  { %v15778_v18 = vld [vmem:[#allocation5 + $0x1878] sm:$0xf0] }
 0xaf0   :  { %v19921_v53 = vld [vmem:[#allocation5 + $0x1a5c] sm:$0xf]  ;;  %v15781_v28 = vor.u32 %v19857_v11, %v15778_v18  ;;  %11794 = vmatpush.bf16.msrb.mxu3 %v16581_v14 }
 0xaf1   :  { %v16034_v52 = vld [vmem:[#allocation5 + $0x1a78] sm:$0xf0] }
 0xaf2   :  { %v19985_v21 = vld [vmem:[#allocation5 + $0x1c5c] sm:$0xf]  ;;  %v16037_v45 = vor.u32 %v19921_v53, %v16034_v52  ;;  %11756 = vmatpush.bf16.msrb.mxu0 %v15781_v28 }
 0xaf3   :  { %v16290_v22 = vld [vmem:[#allocation5 + $0x1c78] sm:$0xf0] }
 0xaf4   :  { %v20049_v4 = vld [vmem:[#allocation5 + $0x1e5c] sm:$0xf]  ;;  %v16293_v3 = vor.u32 %v19985_v21, %v16290_v22  ;;  %11769 = vmatpush.bf16.msrb.mxu1 %v16037_v45 }
 0xaf5   :  { %v16546_v23 = vld [vmem:[#allocation5 + $0x1e78] sm:$0xf0] }
 0xaf6   :  { %v19849_v27 = vld [vmem:[#allocation5 + $0x181c] sm:$0xf]  ;;  %v16549_v49 = vor.u32 %v20049_v4, %v16546_v23  ;;  %11782 = vmatpush.bf16.msrb.mxu2 %v16293_v3 }
 0xaf7   :  { %v15746_v0 = vld [vmem:[#allocation5 + $0x1838] sm:$0xf0] }
 0xaf8   :  { %v19913_v59 = vld [vmem:[#allocation5 + $0x1a1c] sm:$0xf]  ;;  %v15749_v10 = vor.u32 %v19849_v27, %v15746_v0  ;;  %11795 = vmatpush.bf16.msrb.mxu3 %v16549_v49 }
 0xaf9   :  { %v16002_v30 = vld [vmem:[#allocation5 + $0x1a38] sm:$0xf0] }
 0xafa   :  { %v19977_v12 = vld [vmem:[#allocation5 + $0x1c1c] sm:$0xf]  ;;  %v16005_v35 = vor.u32 %v19913_v59, %v16002_v30  ;;  %11757 = vmatpush.bf16.msrb.mxu0 %v15749_v10 }
 0xafb   :  { %v16258_v57 = vld [vmem:[#allocation5 + $0x1c38] sm:$0xf0] }
 0xafc   :  { %v20041_v54 = vld [vmem:[#allocation5 + $0x1e1c] sm:$0xf]  ;;  %v16261_v38 = vor.u32 %v19977_v12, %v16258_v57  ;;  %11770 = vmatpush.bf16.msrb.mxu1 %v16005_v35 }
 0xafd   :  { %v16514_v46 = vld [vmem:[#allocation5 + $0x1e38] sm:$0xf0]  ;;  %11758 = vmatmul.bf16.vlgmr.msrb.gmra.mxu0 %v21018_v13 }
 0xafe   :  { %v20161_v34 = vld [vmem:[#allocation5 + $0x21dc] sm:$0xf]  ;;  %v16517_v8 = vor.u32 %v20041_v54, %v16514_v46  ;;  %11783 = vmatpush.bf16.msrb.mxu2 %v16261_v38 }
 0xaff   :  { %v16994_v43 = vld [vmem:[#allocation5 + $0x21f8] sm:$0xf0]  ;;  %11771 = vmatmul.bf16.vlgmr.msrb.gmra.mxu1 %v21022_v20 }
 0xb00   :  { %v20225_v44 = vld [vmem:[#allocation5 + $0x23dc] sm:$0xf]  ;;  %v16997_v41 = vor.u32 %v20161_v34, %v16994_v43  ;;  %11796 = vmatpush.bf16.msrb.mxu3 %v16517_v8  ;;  %v11551_v34 = vpop.f32.mrf.mxu0 }
 0xb01   :  { %v17250_v62 = vld [vmem:[#allocation5 + $0x23f8] sm:$0xf0]  ;;  %11784 = vmatmul.bf16.vlgmr.msrb.gmra.mxu2 %v21020_v19 }
 0xb02   :  { %v20289_v63 = vld [vmem:[#allocation5 + $0x25dc] sm:$0xf]  ;;  %v17253_v33 = vor.u32 %v20225_v44, %v17250_v62  ;;  %11802 = vmatpush.bf16.msra.mxu0 %v16997_v41 }
 0xb03   :  { %v17506_v37 = vld [vmem:[#allocation5 + $0x25f8] sm:$0xf0]  ;;  %11797 = vmatmul.bf16.vlgmr.msrb.gmra.mxu3 %v21024_v26  ;;  %v11552_v26 = vadd.f32 %v11551_v34, %v21324_v51 }
 0xb04   :  { %v20353_v16 = vld [vmem:[#allocation5 + $0x27dc] sm:$0xf]  ;;  %v17509_v9 = vor.u32 %v20289_v63, %v17506_v37  ;;  %11815 = vmatpush.bf16.msra.mxu1 %v17253_v33 }
 0xb05   :  { %v17762_v40 = vld [vmem:[#allocation5 + $0x27f8] sm:$0xf0] }
 0xb06   :  { %v20153_v6 = vld [vmem:[#allocation5 + $0x219c] sm:$0xf]  ;;  %v17765_v25 = vor.u32 %v20353_v16, %v17762_v40  ;;  %11828 = vmatpush.bf16.msra.mxu2 %v17509_v9  ;;  %v11565_v16 = vadd.f32 %v11564_v7, %v11552_v26 }
 0xb07   :  { %v16962_v15 = vld [vmem:[#allocation5 + $0x21b8] sm:$0xf0] }
 0xb08   :  { %v20217_v39 = vld [vmem:[#allocation5 + $0x239c] sm:$0xf]  ;;  %v16965_v53 = vor.u32 %v20153_v6, %v16962_v15  ;;  %11841 = vmatpush.bf16.msra.mxu3 %v17765_v25 }
 0xb09   :  { %v17218_v48 = vld [vmem:[#allocation5 + $0x23b8] sm:$0xf0] }
 0xb0a   :  { %v20281_v50 = vld [vmem:[#allocation5 + $0x259c] sm:$0xf]  ;;  %v17221_v14 = vor.u32 %v20217_v39, %v17218_v48  ;;  %11803 = vmatpush.bf16.msra.mxu0 %v16965_v53 }
 0xb0b   :  { %v17474_v58 = vld [vmem:[#allocation5 + $0x25b8] sm:$0xf0] }
 0xb0c   :  { %v20345_v11 = vld [vmem:[#allocation5 + $0x279c] sm:$0xf]  ;;  %v17477_v52 = vor.u32 %v20281_v50, %v17474_v58  ;;  %11816 = vmatpush.bf16.msra.mxu1 %v17221_v14  ;;  %v11577_v58 = vpop.f32.mrf.mxu2 }
 0xb0d   :  { %v17730_v18 = vld [vmem:[#allocation5 + $0x27b8] sm:$0xf0]  ;;  %v11578_v14 = vadd.f32 %v11577_v58, %v11565_v16 }
 0xb0e   :  { %v20145_v21 = vld [vmem:[#allocation5 + $0x215c] sm:$0xf]  ;;  %v17733_v23 = vor.u32 %v20345_v11, %v17730_v18  ;;  %11829 = vmatpush.bf16.msra.mxu2 %v17477_v52  ;;  %v11590_v52 = vpop.f32.mrf.mxu3 }
 0xb0f   :  { %v16930_v22 = vld [vmem:[#allocation5 + $0x2178] sm:$0xf0] }
 0xb10   :  { %v20209_v4 = vld [vmem:[#allocation5 + $0x235c] sm:$0xf]  ;;  %v16933_v59 = vor.u32 %v20145_v21, %v16930_v22  ;;  %11842 = vmatpush.bf16.msra.mxu3 %v17733_v23 }
 0xb11   :  { %v17186_v28 = vld [vmem:[#allocation5 + $0x2378] sm:$0xf0] }
 0xb12   :  { %v20273_v27 = vld [vmem:[#allocation5 + $0x255c] sm:$0xf]  ;;  %v17189_v30 = vor.u32 %v20209_v4, %v17186_v28  ;;  %11804 = vmatpush.bf16.msra.mxu0 %v16933_v59  ;;  %v11553_v4 = vpop.f32.mrf.mxu0  ;;  %v11566_v28 = vpop.f32.mrf.mxu1 }
 0xb13   :  { %v17442_v0 = vld [vmem:[#allocation5 + $0x2578] sm:$0xf0] }
 0xb14   :  { %v20337_v45 = vld [vmem:[#allocation5 + $0x275c] sm:$0xf]  ;;  %v17445_v12 = vor.u32 %v20273_v27, %v17442_v0  ;;  %11817 = vmatpush.bf16.msra.mxu1 %v17189_v30  ;;  %v21331_v27 = vadd.f32 %v11590_v52, %v11578_v14 }
 0xb15   :  { %v17698_v3 = vld [vmem:[#allocation5 + $0x2778] sm:$0xf0] }
 0xb16   :  { %v20137_v49 = vld [vmem:[#allocation5 + $0x211c] sm:$0xf]  ;;  %v17701_v54 = vor.u32 %v20337_v45, %v17698_v3  ;;  %11830 = vmatpush.bf16.msra.mxu2 %v17445_v12 }
 0xb17   :  { %v16898_v13 = vld [vmem:[#allocation5 + $0x2138] sm:$0xf0] }
 0xb18   :  { %v20201_v57 = vld [vmem:[#allocation5 + $0x231c] sm:$0xf]  ;;  %v16901_v44 = vor.u32 %v20137_v49, %v16898_v13  ;;  %11843 = vmatpush.bf16.msra.mxu3 %v17701_v54 }
 0xb19   :  { %v17154_v46 = vld [vmem:[#allocation5 + $0x2338] sm:$0xf0] }
 0xb1a   :  { %v20265_v56 = vld [vmem:[#allocation5 + $0x251c] sm:$0xf]  ;;  %v17157_v10 = vor.u32 %v20201_v57, %v17154_v46  ;;  %11805 = vmatpush.bf16.msra.mxu0 %v16901_v44 }
 0xb1b   :  { %v17410_v19 = vld [vmem:[#allocation5 + $0x2538] sm:$0xf0] }
 0xb1c   :  { %v20329_v20 = vld [vmem:[#allocation5 + $0x271c] sm:$0xf]  ;;  %v17413_v62 = vor.u32 %v20265_v56, %v17410_v19  ;;  %11818 = vmatpush.bf16.msra.mxu1 %v17157_v10 }
 0xb1d   :  { %v17666_v43 = vld [vmem:[#allocation5 + $0x2738] sm:$0xf0] }
 0xb1e   :  { %v20129_v63 = vld [vmem:[#allocation5 + $0x20dc] sm:$0xf]  ;;  %v17669_v38 = vor.u32 %v20329_v20, %v17666_v43  ;;  %11831 = vmatpush.bf16.msra.mxu2 %v17413_v62 }
 0xb1f   :  { %v16866_v37 = vld [vmem:[#allocation5 + $0x20f8] sm:$0xf0] }
 0xb20   :  { %v20193_v35 = vld [vmem:[#allocation5 + $0x22dc] sm:$0xf]  ;;  %v16869_v6 = vor.u32 %v20129_v63, %v16866_v37  ;;  %11844 = vmatpush.bf16.msra.mxu3 %v17669_v38 }
 0xb21   :  { %v17122_v40 = vld [vmem:[#allocation5 + $0x22f8] sm:$0xf0] }
 0xb22   :  { %v20257_v8 = vld [vmem:[#allocation5 + $0x24dc] sm:$0xf]  ;;  %v17125_v51 = vor.u32 %v20193_v35, %v17122_v40  ;;  %11806 = vmatpush.bf16.msra.mxu0 %v16869_v6  ;;  %v11579_v35 = vpop.f32.mrf.mxu2 }
 0xb23   :  { %v17378_v41 = vld [vmem:[#allocation5 + $0x24f8] sm:$0xf0]  ;;  %v11603_v35 = vpop.f32.mrf.mxu0 }
 0xb24   :  { %v20321_v33 = vld [vmem:[#allocation5 + $0x26dc] sm:$0xf]  ;;  %v17381_v15 = vor.u32 %v20257_v8, %v17378_v41  ;;  %11819 = vmatpush.bf16.msra.mxu1 %v17125_v51  ;;  %v11592_v8 = vpop.f32.mrf.mxu3 }
 0xb25   :  { %v17634_v9 = vld [vmem:[#allocation5 + $0x26f8] sm:$0xf0] }
 0xb26   :  { %v20121_v39 = vld [vmem:[#allocation5 + $0x209c] sm:$0xf]  ;;  %v17637_v50 = vor.u32 %v20321_v33, %v17634_v9  ;;  %11832 = vmatpush.bf16.msra.mxu2 %v17381_v15 }
 0xb27   :  { %v16834_v25 = vld [vmem:[#allocation5 + $0x20b8] sm:$0xf0] }
 0xb28   :  { %v20185_v48 = vld [vmem:[#allocation5 + $0x229c] sm:$0xf]  ;;  %v16837_v23 = vor.u32 %v20121_v39, %v16834_v25  ;;  %11845 = vmatpush.bf16.msra.mxu3 %v17637_v50 }
 0xb29   :  { %v17090_v11 = vld [vmem:[#allocation5 + $0x22b8] sm:$0xf0] }
 0xb2a   :  { %v20249_v18 = vld [vmem:[#allocation5 + $0x249c] sm:$0xf]  ;;  %v17093_v0 = vor.u32 %v20185_v48, %v17090_v11  ;;  %11807 = vmatpush.bf16.msra.mxu0 %v16837_v23 }
 0xb2b   :  { %v17346_v53 = vld [vmem:[#allocation5 + $0x24b8] sm:$0xf0] }
 0xb2c   :  { %v20313_v21 = vld [vmem:[#allocation5 + $0x269c] sm:$0xf]  ;;  %v17349_v45 = vor.u32 %v20249_v18, %v17346_v53  ;;  %11820 = vmatpush.bf16.msra.mxu1 %v17093_v0 }
 0xb2d   :  { %v17602_v22 = vld [vmem:[#allocation5 + $0x26b8] sm:$0xf0] }
 0xb2e   :  { %v20113_v3 = vld [vmem:[#allocation5 + $0x205c] sm:$0xf]  ;;  %v17605_v12 = vor.u32 %v20313_v21, %v17602_v22  ;;  %11833 = vmatpush.bf16.msra.mxu2 %v17349_v45 }
 0xb2f   :  { %v16802_v59 = vld [vmem:[#allocation5 + $0x2078] sm:$0xf0] }
 0xb30   :  { %v20177_v30 = vld [vmem:[#allocation5 + $0x225c] sm:$0xf]  ;;  %v16805_v56 = vor.u32 %v20113_v3, %v16802_v59  ;;  %11846 = vmatpush.bf16.msra.mxu3 %v17605_v12 }
 0xb31   :  { %v17058_v49 = vld [vmem:[#allocation5 + $0x2278] sm:$0xf0] }
 0xb32   :  { %v20241_v13 = vld [vmem:[#allocation5 + $0x245c] sm:$0xf]  ;;  %v17061_v20 = vor.u32 %v20177_v30, %v17058_v49  ;;  %11808 = vmatpush.bf16.msra.mxu0 %v16805_v56 }
 0xb33   :  { %v17314_v57 = vld [vmem:[#allocation5 + $0x2478] sm:$0xf0] }
 0xb34   :  { %v20305_v54 = vld [vmem:[#allocation5 + $0x265c] sm:$0xf]  ;;  %v17317_v43 = vor.u32 %v20241_v13, %v17314_v57  ;;  %11821 = vmatpush.bf16.msra.mxu1 %v17061_v20 }
 0xb35   :  { %v17570_v46 = vld [vmem:[#allocation5 + $0x2678] sm:$0xf0] }
 0xb36   :  { %v20105_v19 = vld [vmem:[#allocation5 + $0x201c] sm:$0xf]  ;;  %v17573_v10 = vor.u32 %v20305_v54, %v17570_v46  ;;  %11834 = vmatpush.bf16.msra.mxu2 %v17317_v43 }
 0xb37   :  { %v16770_v34 = vld [vmem:[#allocation5 + $0x2038] sm:$0xf0] }
 0xb38   :  { %v20169_v26 = vld [vmem:[#allocation5 + $0x221c] sm:$0xf]  ;;  %v16773_v41 = vor.u32 %v20105_v19, %v16770_v34  ;;  %11847 = vmatpush.bf16.msra.mxu3 %v17573_v10 }
 0xb39   :  { %v17026_v44 = vld [vmem:[#allocation5 + $0x2238] sm:$0xf0] }
 0xb3a   :  { %v20233_v7 = vld [vmem:[#allocation5 + $0x241c] sm:$0xf]  ;;  %v17029_v51 = vor.u32 %v20169_v26, %v17026_v44  ;;  %11809 = vmatpush.bf16.msra.mxu0 %v16773_v41  ;;  %v20706_v44 = vld [vmem:[#allocation7] sm:$0xff] }
 0xb3b   :  { %v17282_v62 = vld [vmem:[#allocation5 + $0x2438] sm:$0xf0] }
 0xb3c   :  { %v20297_v63 = vld [vmem:[#allocation5 + $0x261c] sm:$0xf]  ;;  %v17285_v15 = vor.u32 %v20233_v7, %v17282_v62  ;;  %11822 = vmatpush.bf16.msra.mxu1 %v17029_v51  ;;  %v1721_v7 = vperm.slane %v20706_v44, 7 }
 0xb3d   :  { %v17538_v37 = vld [vmem:[#allocation5 + $0x2638] sm:$0xf0]  ;;  %11810 = vmatmul.bf16.vlgmr.msra.gmra.mxu0 %v21030_v24 }
 0xb3e   :  { %v20417_v38 = vld [vmem:[#allocation5 + $0x29dc] sm:$0xf]  ;;  %v17541_v48 = vor.u32 %v20297_v63, %v17538_v37  ;;  %11835 = vmatpush.bf16.msra.mxu2 %v17285_v15 }
 0xb3f   :  { %v18018_v16 = vld [vmem:[#allocation5 + $0x29f8] sm:$0xf0]  ;;  %11823 = vmatmul.bf16.vlgmr.msra.gmra.mxu1 %v21034_v32 }
 0xb40   :  { %v20481_v40 = vld [vmem:[#allocation5 + $0x2bdc] sm:$0xf]  ;;  %v18021_v50 = vor.u32 %v20417_v38, %v18018_v16  ;;  %11848 = vmatpush.bf16.msra.mxu3 %v17541_v48 }
 0xb41   :  { %v18274_v33 = vld [vmem:[#allocation5 + $0x2bf8] sm:$0xf0]  ;;  %11836 = vmatmul.bf16.vlgmr.msra.gmra.mxu2 %v21032_v31 }
 0xb42   :  { %v20545_v9 = vld [vmem:[#allocation5 + $0x2ddc] sm:$0xf]  ;;  %v18277_v58 = vor.u32 %v20481_v40, %v18274_v33  ;;  %11854 = vmatpush.bf16.msrb.mxu0 %v18021_v50  ;;  %v11604_v33 = vadd.f32 %v11603_v35, %v1721_v7 }
 0xb43   :  { %v18530_v6 = vld [vmem:[#allocation5 + $0x2df8] sm:$0xf0]  ;;  %11849 = vmatmul.bf16.vlgmr.msra.gmra.mxu3 %v21036_v36 }
 0xb44   :  { %v20609_v39 = vld [vmem:[#allocation5 + $0x2fdc] sm:$0xf]  ;;  %v18533_v11 = vor.u32 %v20545_v9, %v18530_v6  ;;  %11867 = vmatpush.bf16.msrb.mxu1 %v18277_v58  ;;  %v11616_v9 = vpop.f32.mrf.mxu1 }
 0xb45   :  { %v18786_v25 = vld [vmem:[#allocation5 + $0x2ff8] sm:$0xf0]  ;;  %v11617_v50 = vadd.f32 %v11616_v9, %v11604_v33 }
 0xb46   :  { %v20409_v18 = vld [vmem:[#allocation5 + $0x299c] sm:$0xf]  ;;  %v18789_v52 = vor.u32 %v20609_v39, %v18786_v25  ;;  %11880 = vmatpush.bf16.msrb.mxu2 %v18533_v11 }
 0xb47   :  { %v17986_v53 = vld [vmem:[#allocation5 + $0x29b8] sm:$0xf0] }
 0xb48   :  { %v20473_v14 = vld [vmem:[#allocation5 + $0x2b9c] sm:$0xf]  ;;  %v17989_v0 = vor.u32 %v20409_v18, %v17986_v53  ;;  %11893 = vmatpush.bf16.msrb.mxu3 %v18789_v52 }
 0xb49   :  { %v18242_v21 = vld [vmem:[#allocation5 + $0x2bb8] sm:$0xf0] }
 0xb4a   :  { %v20537_v22 = vld [vmem:[#allocation5 + $0x2d9c] sm:$0xf]  ;;  %v18245_v45 = vor.u32 %v20473_v14, %v18242_v21  ;;  %11855 = vmatpush.bf16.msrb.mxu0 %v17989_v0  ;;  %v11629_v21 = vpop.f32.mrf.mxu2 }
 0xb4b   :  { %v18498_v4 = vld [vmem:[#allocation5 + $0x2db8] sm:$0xf0]  ;;  %v11630_v0 = vadd.f32 %v11629_v21, %v11617_v50  ;;  %v20643_v21 = vld [vmem:[#allocation8 + $0xe8] sm:$0xff] }
 0xb4c   :  { %v20601_v23 = vld [vmem:[#allocation5 + $0x2f9c] sm:$0xf]  ;;  %v18501_v3 = vor.u32 %v20537_v22, %v18498_v4  ;;  %11868 = vmatpush.bf16.msrb.mxu1 %v18245_v45  ;;  %v11642_v45 = vpop.f32.mrf.mxu3 }
 0xb4d   :  { %v18754_v28 = vld [vmem:[#allocation5 + $0x2fb8] sm:$0xf0] }
 0xb4e   :  { %v20401_v59 = vld [vmem:[#allocation5 + $0x295c] sm:$0xf]  ;;  %v18757_v49 = vor.u32 %v20601_v23, %v18754_v28  ;;  %11881 = vmatpush.bf16.msrb.mxu2 %v18501_v3 }
 0xb4f   :  { %v17954_v30 = vld [vmem:[#allocation5 + $0x2978] sm:$0xf0] }
 0xb50   :  { %v20465_v12 = vld [vmem:[#allocation5 + $0x2b5c] sm:$0xf]  ;;  %v17957_v19 = vor.u32 %v20401_v59, %v17954_v30  ;;  %11894 = vmatpush.bf16.msrb.mxu3 %v18757_v49  ;;  %v11605_v49 = vpop.f32.mrf.mxu0 }
 0xb51   :  { %v18210_v13 = vld [vmem:[#allocation5 + $0x2b78] sm:$0xf0] }
 0xb52   :  { %v20529_v57 = vld [vmem:[#allocation5 + $0x2d5c] sm:$0xf]  ;;  %v18213_v20 = vor.u32 %v20465_v12, %v18210_v13  ;;  %11856 = vmatpush.bf16.msrb.mxu0 %v17957_v19  ;;  %v21337_v12 = vadd.f32 %v11642_v45, %v11630_v0  ;;  %v11618_v19 = vpop.f32.mrf.mxu1  ;;  %v20617_v0 = vld [vmem:[#allocation8 + $0x18] sm:$0xff] }
 0xb53   :  { %v18466_v54 = vld [vmem:[#allocation5 + $0x2d78] sm:$0xf0]  ;;  %v20625_v45 = vld [vmem:[#allocation8 + $0x58] sm:$0xff] }
 0xb54   :  { %v20593_v46 = vld [vmem:[#allocation5 + $0x2f5c] sm:$0xf]  ;;  %v18469_v43 = vor.u32 %v20529_v57, %v18466_v54  ;;  %11869 = vmatpush.bf16.msrb.mxu1 %v18213_v20 }
 0xb55   :  { %v18722_v56 = vld [vmem:[#allocation5 + $0x2f78] sm:$0xf0] }
 0xb56   :  { %v20393_v34 = vld [vmem:[#allocation5 + $0x291c] sm:$0xf]  ;;  %v18725_v10 = vor.u32 %v20593_v46, %v18722_v56  ;;  %11882 = vmatpush.bf16.msrb.mxu2 %v18469_v43 }
 0xb57   :  { %v17922_v24 = vld [vmem:[#allocation5 + $0x2938] sm:$0xf0] }
 0xb58   :  { %v20457_v26 = vld [vmem:[#allocation5 + $0x2b1c] sm:$0xf]  ;;  %v17925_v36 = vor.u32 %v20393_v34, %v17922_v24  ;;  %11895 = vmatpush.bf16.msrb.mxu3 %v18725_v10 }
 0xb59   :  { %v18178_v31 = vld [vmem:[#allocation5 + $0x2b38] sm:$0xf0] }
 0xb5a   :  { %v20521_v62 = vld [vmem:[#allocation5 + $0x2d1c] sm:$0xf]  ;;  %v18181_v38 = vor.u32 %v20457_v26, %v18178_v31  ;;  %11857 = vmatpush.bf16.msrb.mxu0 %v17925_v36 }
 0xb5b   :  { %v18434_v32 = vld [vmem:[#allocation5 + $0x2d38] sm:$0xf0] }
 0xb5c   :  { %v20585_v63 = vld [vmem:[#allocation5 + $0x2f1c] sm:$0xf]  ;;  %v18437_v16 = vor.u32 %v20521_v62, %v18434_v32  ;;  %11870 = vmatpush.bf16.msrb.mxu1 %v18181_v38 }
 0xb5d   :  { %v18690_v37 = vld [vmem:[#allocation5 + $0x2f38] sm:$0xf0] }
 0xb5e   :  { %v20385_v40 = vld [vmem:[#allocation5 + $0x28dc] sm:$0xf]  ;;  %v18693_v6 = vor.u32 %v20585_v63, %v18690_v37  ;;  %11883 = vmatpush.bf16.msrb.mxu2 %v18437_v16  ;;  %v11631_v37 = vpop.f32.mrf.mxu2 }
 0xb5f   :  { %v17890_v8 = vld [vmem:[#allocation5 + $0x28f8] sm:$0xf0]  ;;  %v20638_v37 = vld [vmem:[#allocation8 + $0xc0] sm:$0xff] }
 0xb60   :  { %v20449_v41 = vld [vmem:[#allocation5 + $0x2adc] sm:$0xf]  ;;  %v17893_v58 = vor.u32 %v20385_v40, %v17890_v8  ;;  %11896 = vmatpush.bf16.msrb.mxu3 %v18693_v6  ;;  %v11644_v40 = vpop.f32.mrf.mxu3 }
 0xb61   :  { %v18146_v51 = vld [vmem:[#allocation5 + $0x2af8] sm:$0xf0]  ;;  %v20669_v40 = vld [vmem:[#allocation8 + $0x1b8] sm:$0xff] }
 0xb62   :  { %v20513_v15 = vld [vmem:[#allocation5 + $0x2cdc] sm:$0xf]  ;;  %v18149_v11 = vor.u32 %v20449_v41, %v18146_v51  ;;  %11858 = vmatpush.bf16.msrb.mxu0 %v17893_v58 }
 0xb63   :  { %v18402_v39 = vld [vmem:[#allocation5 + $0x2cf8] sm:$0xf0] }
 0xb64   :  { %v20577_v25 = vld [vmem:[#allocation5 + $0x2edc] sm:$0xf]  ;;  %v18405_v18 = vor.u32 %v20513_v15, %v18402_v39  ;;  %11871 = vmatpush.bf16.msrb.mxu1 %v18149_v11  ;;  %v20621_v15 = vld [vmem:[#allocation8 + $0x38] sm:$0xff] }
 0xb65   :  { %v18658_v48 = vld [vmem:[#allocation5 + $0x2ef8] sm:$0xf0]  ;;  %v20629_v39 = vld [vmem:[#allocation8 + $0x78] sm:$0xff] }
 0xb66   :  { %v20377_v53 = vld [vmem:[#allocation5 + $0x289c] sm:$0xf]  ;;  %v18661_v22 = vor.u32 %v20577_v25, %v18658_v48  ;;  %11884 = vmatpush.bf16.msrb.mxu2 %v18405_v18  ;;  %v20637_v25 = vld [vmem:[#allocation8 + $0xb8] sm:$0xff] }
 0xb67   :  { %v17858_v14 = vld [vmem:[#allocation5 + $0x28b8] sm:$0xf0]  ;;  %v20645_v48 = vld [vmem:[#allocation8 + $0xf8] sm:$0xff] }
 0xb68   :  { %v20441_v52 = vld [vmem:[#allocation5 + $0x2a9c] sm:$0xf]  ;;  %v17861_v30 = vor.u32 %v20377_v53, %v17858_v14  ;;  %11897 = vmatpush.bf16.msrb.mxu3 %v18661_v22  ;;  %v20619_v53 = vld [vmem:[#allocation8 + $0x28] sm:$0xff]  ;;  %v20618_v22 = vld [vmem:[#allocation8 + $0x20] sm:$0xff] }
 0xb69   :  { %v18114_v4 = vld [vmem:[#allocation5 + $0x2ab8] sm:$0xf0]  ;;  %v20627_v14 = vld [vmem:[#allocation8 + $0x68] sm:$0xff] }
 0xb6a   :  { %v20505_v23 = vld [vmem:[#allocation5 + $0x2c9c] sm:$0xf]  ;;  %v18117_v13 = vor.u32 %v20441_v52, %v18114_v4  ;;  %11859 = vmatpush.bf16.msrb.mxu0 %v17861_v30  ;;  %v20635_v52 = vld [vmem:[#allocation8 + $0xa8] sm:$0xff]  ;;  %v11655_v4 = vpop.f32.mrf.mxu0  ;;  %v20641_v30 = vld [vmem:[#allocation8 + $0xd8] sm:$0xff] }
 0xb6b   :  { %v18370_v28 = vld [vmem:[#allocation5 + $0x2cb8] sm:$0xf0] }
 0xb6c   :  { %v20569_v3 = vld [vmem:[#allocation5 + $0x2e9c] sm:$0xf]  ;;  %v18373_v57 = vor.u32 %v20505_v23, %v18370_v28  ;;  %11872 = vmatpush.bf16.msrb.mxu1 %v18117_v13  ;;  %v20634_v23 = vld [vmem:[#allocation8 + $0xa0] sm:$0xff]  ;;  %v11694_v13 = vpop.f32.mrf.mxu3 }
 0xb6d   :  { %v18626_v59 = vld [vmem:[#allocation5 + $0x2eb8] sm:$0xf0] }
 0xb6e   :  { %v20369_v54 = vld [vmem:[#allocation5 + $0x285c] sm:$0xf]  ;;  %v18629_v34 = vor.u32 %v20569_v3, %v18626_v59  ;;  %11885 = vmatpush.bf16.msrb.mxu2 %v18373_v57  ;;  %v20633_v3 = vld [vmem:[#allocation8 + $0x98] sm:$0xff]  ;;  %v11681_v59 = vpop.f32.mrf.mxu2 }
 0xb6f   :  { %v17826_v46 = vld [vmem:[#allocation5 + $0x2878] sm:$0xf0] }
 0xb70   :  { %v20433_v56 = vld [vmem:[#allocation5 + $0x2a5c] sm:$0xf]  ;;  %v17829_v7 = vor.u32 %v20369_v54, %v17826_v46  ;;  %11898 = vmatpush.bf16.msrb.mxu3 %v18629_v34 }
 0xb71   :  { %v18082_v20 = vld [vmem:[#allocation5 + $0x2a78] sm:$0xf0] }
 0xb72   :  { %v20497_v43 = vld [vmem:[#allocation5 + $0x2c5c] sm:$0xf]  ;;  %v18085_v10 = vor.u32 %v20433_v56, %v18082_v20  ;;  %11860 = vmatpush.bf16.msrb.mxu0 %v17829_v7  ;;  %v11657_v46 = vpop.f32.mrf.mxu0  ;;  %v20615_v20 = vld [vmem:[#allocation8 + $0x8] sm:$0xff] }
 0xb73   :  { %v18338_v24 = vld [vmem:[#allocation5 + $0x2c78] sm:$0xf0]  ;;  %v11912_v46 = vmax.f32 %v21331_v27, 0.0  ;;  %v20675_v27 = vld [vmem:[#allocation8 + $0x1e8] sm:$0xff] }
 0xb74   :  { %v20561_v26 = vld [vmem:[#allocation5 + $0x2e5c] sm:$0xf]  ;;  %v18341_v31 = vor.u32 %v20497_v43, %v18338_v24  ;;  %11873 = vmatpush.bf16.msrb.mxu1 %v18085_v10  ;;  %v20623_v43 = vld [vmem:[#allocation8 + $0x48] sm:$0xff]  ;;  %v11696_v7 = vpop.f32.mrf.mxu3  ;;  %v20614_v10 = vld [vmem:[#allocation8] sm:$0xff] }
 0xb75   :  { %v18594_v44 = vld [vmem:[#allocation5 + $0x2e78] sm:$0xf0]  ;;  %v20631_v24 = vld [vmem:[#allocation8 + $0x88] sm:$0xff] }
 0xb76   :  { %v20361_v62 = vld [vmem:[#allocation5 + $0x281c] sm:$0xf]  ;;  %v18597_v36 = vor.u32 %v20561_v26, %v18594_v44  ;;  %11886 = vmatpush.bf16.msrb.mxu2 %v18341_v31  ;;  %v11683_v26 = vpop.f32.mrf.mxu2  ;;  %v20639_v44 = vld [vmem:[#allocation8 + $0xc8] sm:$0xff]  ;;  %v20622_v31 = vld [vmem:[#allocation8 + $0x40] sm:$0xff] }
 0xb77   :  { %v17794_v32 = vld [vmem:[#allocation5 + $0x2838] sm:$0xf0]  ;;  %v20677_v26 = vld [vmem:[#allocation8 + $0x1f8] sm:$0xff] }
 0xb78   :  { %v20425_v63 = vld [vmem:[#allocation5 + $0x2a1c] sm:$0xf]  ;;  %v17797_v33 = vor.u32 %v20361_v62, %v17794_v32  ;;  %11899 = vmatpush.bf16.msrb.mxu3 %v18597_v36  ;;  %v20630_v62 = vld [vmem:[#allocation8 + $0x80] sm:$0xff]  ;;  %v11906_v32 = vmax.f32 %v21085_v42, 0.0  ;;  %v20653_v36 = vld [vmem:[#allocation8 + $0x138] sm:$0xff] }
 0xb79   :  { %v18050_v35 = vld [vmem:[#allocation5 + $0x2a38] sm:$0xf0] }
 0xb7a   :  { %v20489_v38 = vld [vmem:[#allocation5 + $0x2c1c] sm:$0xf]  ;;  %v18053_v9 = vor.u32 %v20425_v63, %v18050_v35  ;;  %11861 = vmatpush.bf16.msrb.mxu0 %v17797_v33  ;;  %v11907_v63 = vmax.f32 %v21126_v29, 0.0  ;;  %v11908_v35 = vmax.f32 %v21167_v47, 0.0  ;;  %v20651_v47 = vld [vmem:[#allocation8 + $0x128] sm:$0xff] }
 0xb7b   :  { %v18306_v16 = vld [vmem:[#allocation5 + $0x2c38] sm:$0xf0] }
 0xb7c   :  { %v20553_v8 = vld [vmem:[#allocation5 + $0x2e1c] sm:$0xf]  ;;  %v18309_v6 = vor.u32 %v20489_v38, %v18306_v16  ;;  %11874 = vmatpush.bf16.msrb.mxu1 %v18053_v9  ;;  %v11909_v38 = vmax.f32 %v21208_v17, 0.0  ;;  %v20661_v16 = vld [vmem:[#allocation8 + $0x178] sm:$0xff]  ;;  %v11916_v42 = vpack.c.bf16 %v11908_v35, %v11908_v35  ;;  %v20659_v17 = vld [vmem:[#allocation8 + $0x168] sm:$0xff] }
 0xb7d   :  { %v18562_v41 = vld [vmem:[#allocation5 + $0x2e38] sm:$0xf0]  ;;  %11862 = vmatmul.bf16.vlgmr.msrb.gmra.mxu0 %v21044_v61  ;;  %v20626_v61 = vld [vmem:[#allocation8 + $0x60] sm:$0xff] }
 0xb7e   :  { %v18565_v51 = vor.u32 %v20553_v8, %v18562_v41  ;;  %11887 = vmatpush.bf16.msrb.mxu2 %v18309_v6  ;;  %12438 = vmatpush.bf16.msra.mxu0 %v20621_v15  ;;  %v20620_v50 = vld [vmem:[#allocation8 + $0x30] sm:$0xff]  ;;  %v11914_v8 = vpack.c.bf16 %v11906_v32, %v11906_v32  ;;  %v11915_v41 = vpack.c.bf16 %v11907_v63, %v11907_v63  ;;  %v11707_v15 = vpop.f32.mrf.mxu0 }
 0xb7f   :  { %v20628_v58 = vld [vmem:[#allocation8 + $0x70] sm:$0xff]  ;;  %11875 = vmatmul.bf16.vlgmr.msrb.gmra.mxu1 %v21048_v2  ;;  %v11656_v2 = vadd.f32 %v11655_v4, %v21337_v12  ;;  %v11917_v9 = vpack.c.bf16 %v11909_v38, %v11909_v38 }
 0xb80   :  { %11900 = vmatpush.bf16.msrb.mxu3 %v18565_v51  ;;  %12451 = vmatpush.bf16.msra.mxu1 %v20629_v39  ;;  %v20636_v11 = vld [vmem:[#allocation8 + $0xb0] sm:$0xff]  ;;  %v20667_v51 = vld [vmem:[#allocation8 + $0x1a8] sm:$0xff] }
 0xb81   :  { %v20644_v18 = vld [vmem:[#allocation8 + $0xf0] sm:$0xff]  ;;  %11888 = vmatmul.bf16.vlgmr.msrb.gmra.mxu2 %v21046_v1  ;;  %v11668_v1 = vpop.f32.mrf.mxu1 }
 0xb82   :  { %12464 = vmatpush.bf16.msra.mxu2 %v20637_v25  ;;  %12439 = vmatpush.bf16.msra.mxu0 %v20620_v50  ;;  %v11669_v28 = vadd.f32 %v11668_v1, %v11656_v2  ;;  %v20616_v57 = vld [vmem:[#allocation8 + $0x10] sm:$0xff]  ;;  %v20650_v25 = vld [vmem:[#allocation8 + $0x120] sm:$0xff] }
 0xb83   :  { %11901 = vmatmul.bf16.vlgmr.msrb.gmra.mxu3 %v21050_v5  ;;  %v20642_v5 = vld [vmem:[#allocation8 + $0xe0] sm:$0xff]  ;;  %v20624_v12 = vld [vmem:[#allocation8 + $0x50] sm:$0xff] }
 0xb84   :  { %12477 = vmatpush.bf16.msra.mxu3 %v20645_v48  ;;  %12452 = vmatpush.bf16.msra.mxu1 %v20628_v58  ;;  %v11682_v49 = vadd.f32 %v11681_v59, %v11669_v28  ;;  %v20632_v56 = vld [vmem:[#allocation8 + $0x90] sm:$0xff]  ;;  %v20658_v50 = vld [vmem:[#allocation8 + $0x160] sm:$0xff]  ;;  %v20647_v28 = vld [vmem:[#allocation8 + $0x108] sm:$0xff] }
 0xb85   :  { %v20640_v34 = vld [vmem:[#allocation8 + $0xd0] sm:$0xff]  ;;  %v20666_v58 = vld [vmem:[#allocation8 + $0x1a0] sm:$0xff] }
 0xb86   :  { %12465 = vmatpush.bf16.msra.mxu2 %v20636_v11  ;;  %12440 = vmatpush.bf16.msra.mxu0 %v20619_v53  ;;  %v11695_v54 = vadd.f32 %v11694_v13, %v11682_v49  ;;  %v20652_v33 = vld [vmem:[#allocation8 + $0x130] sm:$0xff]  ;;  %v20657_v53 = vld [vmem:[#allocation8 + $0x158] sm:$0xff]  ;;  %v11709_v4 = vpop.f32.mrf.mxu0  ;;  %v11910_v49 = vmax.f32 %v21249_v55, 0.0  ;;  %v20654_v13 = vld [vmem:[#allocation8 + $0x140] sm:$0xff] }
 0xb87   :  { %v20660_v29 = vld [vmem:[#allocation8 + $0x170] sm:$0xff] }
 0xb88   :  { %12478 = vmatpush.bf16.msra.mxu3 %v20644_v18  ;;  %12453 = vmatpush.bf16.msra.mxu1 %v20627_v14  ;;  %v20668_v6 = vld [vmem:[#allocation8 + $0x1b0] sm:$0xff]  ;;  %v11708_v39 = vadd.f32 %v11707_v15, %v11695_v54  ;;  %v20649_v18 = vld [vmem:[#allocation8 + $0x118] sm:$0xff]  ;;  %v11911_v54 = vmax.f32 %v21290_v60, 0.0 }
 0xb89   :  { %v11670_v19 = vpop.f32.mrf.mxu1  ;;  %v20665_v14 = vld [vmem:[#allocation8 + $0x198] sm:$0xff]  ;;  %v20656_v1 = vld [vmem:[#allocation8 + $0x150] sm:$0xff] }
 0xb8a   :  { %12466 = vmatpush.bf16.msra.mxu2 %v20635_v52  ;;  %12441 = vmatpush.bf16.msra.mxu0 %v20618_v22  ;;  %v11733_v52 = vpop.f32.mrf.mxu2  ;;  %v11746_v22 = vpop.f32.mrf.mxu3  ;;  %v11920_v19 = vpack.c.bf16 %v11912_v46, %v11912_v46  ;;  %v20676_v60 = vld [vmem:[#allocation8 + $0x1f0] sm:$0xff] }
 0xb8c   :  { %12479 = vmatpush.bf16.msra.mxu3 %v20643_v21  ;;  %12454 = vmatpush.bf16.msra.mxu1 %v20626_v61  ;;  %v20648_v61 = vld [vmem:[#allocation8 + $0x110] sm:$0xff] }
 0xb8e   :  { %12467 = vmatpush.bf16.msra.mxu2 %v20634_v23  ;;  %12442 = vmatpush.bf16.msra.mxu0 %v20617_v0  ;;  %v20655_v0 = vld [vmem:[#allocation8 + $0x148] sm:$0xff] }
 0xb90   :  { %12480 = vmatpush.bf16.msra.mxu3 %v20642_v5  ;;  %12455 = vmatpush.bf16.msra.mxu1 %v20625_v45  ;;  %v20664_v5 = vld [vmem:[#allocation8 + $0x190] sm:$0xff]  ;;  %v20663_v45 = vld [vmem:[#allocation8 + $0x188] sm:$0xff] }
 0xb91   :  { %v11720_v48 = vpop.f32.mrf.mxu1 }
 0xb92   :  { %12468 = vmatpush.bf16.msra.mxu2 %v20633_v3  ;;  %12443 = vmatpush.bf16.msra.mxu0 %v20616_v57  ;;  %v11721_v11 = vadd.f32 %v11720_v48, %v11708_v39  ;;  %v11735_v3 = vpop.f32.mrf.mxu2  ;;  %v11748_v59 = vpop.f32.mrf.mxu3  ;;  %v20662_v57 = vld [vmem:[#allocation8 + $0x180] sm:$0xff] }
 0xb94   :  { %12481 = vmatpush.bf16.msra.mxu3 %v20641_v30  ;;  %12456 = vmatpush.bf16.msra.mxu1 %v20624_v12  ;;  %v11734_v21 = vadd.f32 %v11733_v52, %v11721_v11  ;;  %v20646_v30 = vld [vmem:[#allocation8 + $0x100] sm:$0xff]  ;;  %v11918_v12 = vpack.c.bf16 %v11910_v49, %v11910_v49 }
 0xb96   :  { %12469 = vmatpush.bf16.msra.mxu2 %v20632_v56  ;;  %12444 = vmatpush.bf16.msra.mxu0 %v20615_v20  ;;  %v11747_v2 = vadd.f32 %v11746_v22, %v11734_v21  ;;  %v11919_v56 = vpack.c.bf16 %v11911_v54, %v11911_v54 }
 0xb98   :  { %12482 = vmatpush.bf16.msra.mxu3 %v20640_v34  ;;  %12457 = vmatpush.bf16.msra.mxu1 %v20623_v43  ;;  %v11759_v34 = vpop.f32.mrf.mxu0 }
 0xb99   :  { %v11722_v23 = vpop.f32.mrf.mxu1  ;;  %v11760_v38 = vadd.f32 %v11759_v34, %v11747_v2 }
 0xb9a   :  { %12470 = vmatpush.bf16.msra.mxu2 %v20631_v24  ;;  %12445 = vmatpush.bf16.msra.mxu0 %v20614_v10  ;;  %v11785_v55 = vpop.f32.mrf.mxu2  ;;  %v11798_v43 = vpop.f32.mrf.mxu3  ;;  %v20698_v23 = vld [vmem:[#allocation10] ss:$0 sm:$0xff] }
 0xb9c   :  { %12483 = vmatpush.bf16.msra.mxu3 %v20639_v44  ;;  %12458 = vmatpush.bf16.msra.mxu1 %v20622_v31  ;;  %v20674_v31 = vld [vmem:[#allocation8 + $0x1e0] sm:$0xff] }
 0xb9d   :  { %12446 = vmatmul.bf16.vlgmr.msra.gmra.mxu0 %v11914_v8 }
 0xb9e   :  { %12471 = vmatpush.bf16.msra.mxu2 %v20630_v62  ;;  %12490 = vmatpush.bf16.msrb.mxu0 %v20653_v36  ;;  %v20673_v62 = vld [vmem:[#allocation8 + $0x1d8] sm:$0xff]  ;;  %v20671_v36 = vld [vmem:[#allocation8 + $0x1c8] sm:$0xff] }
 0xb9f   :  { %12459 = vmatmul.bf16.vlgmr.msra.gmra.mxu1 %v11915_v41  ;;  %v20670_v41 = vld [vmem:[#allocation8 + $0x1c0] sm:$0xff] }
 0xba0   :  { %12484 = vmatpush.bf16.msra.mxu3 %v20638_v37  ;;  %12503 = vmatpush.bf16.msrb.mxu1 %v20661_v16  ;;  %v11761_v24 = vpop.f32.mrf.mxu0  ;;  %v20672_v37 = vld [vmem:[#allocation8 + $0x1d0] sm:$0xff] }
 0xba1   :  { %12472 = vmatmul.bf16.vlgmr.msra.gmra.mxu2 %v11916_v42  ;;  %v11772_v20 = vpop.f32.mrf.mxu1 }
 0xba2   :  { %12516 = vmatpush.bf16.msrb.mxu2 %v20669_v40  ;;  %12491 = vmatpush.bf16.msrb.mxu0 %v20652_v33  ;;  %v11787_v7 = vpop.f32.mrf.mxu2  ;;  %v11800_v10 = vpop.f32.mrf.mxu3  ;;  %v11773_v33 = vadd.f32 %v11772_v20, %v11760_v38 }
 0xba3   :  { %12485 = vmatmul.bf16.vlgmr.msra.gmra.mxu3 %v11917_v9  ;;  %v20679_v10 = vld [vmem:[#allocation11 + $0x8] sm:$0xff] }
 0xba4   :  { %12504 = vmatpush.bf16.msrb.mxu1 %v20660_v29  ;;  %12529 = vmatpush.bf16.msrb.mxu3 %v20677_v26  ;;  %v11786_v42 = vadd.f32 %v11785_v55, %v11773_v33 }
 0xba6   :  { %12517 = vmatpush.bf16.msrb.mxu2 %v20668_v6  ;;  %12492 = vmatpush.bf16.msrb.mxu0 %v20651_v47  ;;  %v11799_v6 = vadd.f32 %v11798_v43, %v11786_v42  ;;  %v20680_v43 = vld [vmem:[#allocation11 + $0x10] sm:$0xff] }
 0xba8   :  { %12505 = vmatpush.bf16.msrb.mxu1 %v20659_v17  ;;  %12530 = vmatpush.bf16.msrb.mxu3 %v20676_v60 }
 0xba9   :  { %v11774_v44 = vpop.f32.mrf.mxu1 }
 0xbaa   :  { %12518 = vmatpush.bf16.msrb.mxu2 %v20667_v51  ;;  %12493 = vmatpush.bf16.msrb.mxu0 %v20650_v25 }
 0xbac   :  { %12506 = vmatpush.bf16.msrb.mxu1 %v20658_v50  ;;  %12531 = vmatpush.bf16.msrb.mxu3 %v20675_v27 }
 0xbae   :  { %12519 = vmatpush.bf16.msrb.mxu2 %v20666_v58  ;;  %12494 = vmatpush.bf16.msrb.mxu0 %v20649_v18 }
 0xbb0   :  { %12507 = vmatpush.bf16.msrb.mxu1 %v20657_v53  ;;  %12532 = vmatpush.bf16.msrb.mxu3 %v20674_v31  ;;  %v20678_v31 = vld [vmem:[#allocation11] sm:$0xff] }
 0xbb2   :  { %12520 = vmatpush.bf16.msrb.mxu2 %v20665_v14  ;;  %12495 = vmatpush.bf16.msrb.mxu0 %v20648_v61 }
 0xbb4   :  { %12508 = vmatpush.bf16.msrb.mxu1 %v20656_v1  ;;  %12533 = vmatpush.bf16.msrb.mxu3 %v20673_v62 }
 0xbb6   :  { %12521 = vmatpush.bf16.msrb.mxu2 %v20664_v5  ;;  %12496 = vmatpush.bf16.msrb.mxu0 %v20647_v28 }
 0xbb8   :  { %12509 = vmatpush.bf16.msrb.mxu1 %v20655_v0  ;;  %12534 = vmatpush.bf16.msrb.mxu3 %v20672_v37 }
 0xbba   :  { %12522 = vmatpush.bf16.msrb.mxu2 %v20663_v45  ;;  %12497 = vmatpush.bf16.msrb.mxu0 %v20646_v30  ;;  %v11811_v32 = vpop.f32.mrf.mxu0 }
 0xbbb   :  { %v11812_v47 = vadd.f32 %v11811_v32, %v11799_v6 }
 0xbbc   :  { %12510 = vmatpush.bf16.msrb.mxu1 %v20654_v13  ;;  %v11824_v63 = vpop.f32.mrf.mxu1  ;;  %12535 = vmatpush.bf16.msrb.mxu3 %v20671_v36  ;;  %v20685_v13 = vld [vmem:[#allocation11 + $0x38] sm:$0xff] }
 0xbbd   :  { %12498 = vmatmul.bf16.vlgmr.msrb.gmra.mxu0 %v11918_v12  ;;  %v11825_v17 = vadd.f32 %v11824_v63, %v11812_v47  ;;  %v20683_v12 = vld [vmem:[#allocation11 + $0x28] sm:$0xff] }
 0xbbe   :  { %12523 = vmatpush.bf16.msrb.mxu2 %v20662_v57  ;;  %12612 = vmatpush.bf16.msra.mxu0 %v20685_v13  ;;  %v20684_v57 = vld [vmem:[#allocation11 + $0x30] sm:$0xff] }
 0xbbf   :  { %12511 = vmatmul.bf16.vlgmr.msrb.gmra.mxu1 %v11919_v56  ;;  %v20682_v56 = vld [vmem:[#allocation11 + $0x20] sm:$0xff] }
 0xbc0   :  { %12536 = vmatpush.bf16.msrb.mxu3 %v20670_v41 }
 0xbc1   :  { %12524 = vmatmul.bf16.vlgmr.msrb.gmra.mxu2 %v11920_v19  ;;  %v20681_v19 = vld [vmem:[#allocation11 + $0x18] sm:$0xff] }
 0xbc2   :  { %v11813_v40 = vpop.f32.mrf.mxu0  ;;  %12613 = vmatpush.bf16.msra.mxu0 %v20684_v57 }
 0xbc4   :  { %v11837_v35 = vpop.f32.mrf.mxu2  ;;  %v11826_v8 = vpop.f32.mrf.mxu1 }
 0xbc5   :  { %v11838_v51 = vadd.f32 %v11837_v35, %v11825_v17  ;;  %v20699_v35 = vld [vmem:[#allocation13] ss:$0 sm:$0xff] }
 0xbc6   :  { %v11850_v16 = vpop.f32.mrf.mxu3  ;;  %12614 = vmatpush.bf16.msra.mxu0 %v20683_v12 }
 0xbc7   :  { %v11851_v15 = vadd.f32 %v11850_v16, %v11838_v51 }
 0xbca   :  { %12615 = vmatpush.bf16.msra.mxu0 %v20682_v56 }
 0xbcc   :  { %v11839_v9 = vpop.f32.mrf.mxu2 }
 0xbce   :  { %v11852_v29 = vpop.f32.mrf.mxu3  ;;  %12616 = vmatpush.bf16.msra.mxu0 %v20681_v19 }
 0xbd2   :  { %12617 = vmatpush.bf16.msra.mxu0 %v20680_v43 }
 0xbd6   :  { %12618 = vmatpush.bf16.msra.mxu0 %v20679_v10 }
 0xbda   :  { %12619 = vmatpush.bf16.msra.mxu0 %v20678_v31 }
 0xbfa   :  { %v11863_v39 = vpop.f32.mrf.mxu0 }
 0xbfb   :  { %v11864_v48 = vadd.f32 %v11863_v39, %v11851_v15 }
 0xbfc   :  { %v11876_v25 = vpop.f32.mrf.mxu1 }
 0xbfd   :  { %v11877_v50 = vadd.f32 %v11876_v25, %v11864_v48 }
 0xc02   :  { %v11865_v53 = vpop.f32.mrf.mxu0 }
 0xc04   :  { %v11889_v58 = vpop.f32.mrf.mxu2  ;;  %v11878_v14 = vpop.f32.mrf.mxu1 }
 0xc05   :  { %v11890_v11 = vadd.f32 %v11889_v58, %v11877_v50 }
 0xc06   :  { %v11902_v18 = vpop.f32.mrf.mxu3 }
 0xc07   :  { %v11903_v52 = vadd.f32 %v11902_v18, %v11890_v11 }
 0xc09   :  { %v11913_v21 = vmax.f32 %v11903_v52, 0.0 }
 0xc0b   :  { %v11921_v22 = vpack.c.bf16 %v11913_v21, %v11913_v21 }
 0xc0c   :  { %v11891_v4 = vpop.f32.mrf.mxu2 }
 0xc0d   :  { %12537 = vmatmul.bf16.vlgmr.msrb.gmra.mxu3 %v11921_v22 }
 0xc0e   :  { %v11904_v61 = vpop.f32.mrf.mxu3 }
 0xc1a   :  { %v12447_v2 = vpop.f32.mrf.mxu0 }
 0xc1b   :  { %v12448_v5 = vadd.f32 %v20698_v23, %v12447_v2 }
 0xc1c   :  { %v12460_v1 = vpop.f32.mrf.mxu1 }
 0xc1d   :  { %v12461_v28 = vadd.f32 %v12460_v1, %v12448_v5 }
 0xc22   :  { %v12449_v59 = vpop.f32.mrf.mxu0 }
 0xc24   :  { %v12473_v0 = vpop.f32.mrf.mxu2  ;;  %v12462_v30 = vpop.f32.mrf.mxu1 }
 0xc25   :  { %v12474_v3 = vadd.f32 %v12473_v0, %v12461_v28 }
 0xc26   :  { %v12486_v45 = vpop.f32.mrf.mxu3 }
 0xc27   :  { %v12487_v49 = vadd.f32 %v12486_v45, %v12474_v3 }
 0xc2c   :  { %v12475_v54 = vpop.f32.mrf.mxu2 }
 0xc2e   :  { %v12488_v46 = vpop.f32.mrf.mxu3 }
 0xc3a   :  { %v12499_v34 = vpop.f32.mrf.mxu0 }
 0xc3b   :  { %v12500_v20 = vadd.f32 %v12499_v34, %v12487_v49 }
 0xc3c   :  { %v12512_v55 = vpop.f32.mrf.mxu1 }
 0xc3d   :  { %v12513_v24 = vadd.f32 %v12512_v55, %v12500_v20 }
 0xc42   :  { %v12501_v60 = vpop.f32.mrf.mxu0 }
 0xc44   :  { %v12525_v26 = vpop.f32.mrf.mxu2  ;;  %v12514_v27 = vpop.f32.mrf.mxu1 }
 0xc45   :  { %v12526_v44 = vadd.f32 %v12525_v26, %v12513_v24 }
 0xc4c   :  { %v12527_v7 = vpop.f32.mrf.mxu2 }
 0xc90   :  { %v12538_v62 = vpop.f32.mrf.mxu3 }
 0xc91   :  { %v12539_v32 = vadd.f32 %v12538_v62, %v12526_v44 }
 0xc93   :  { %v12542_v63 = vmax.f32 %v12539_v32, 0.0 }
 0xc95   :  { %v12543_v37 = vpack.c.bf16 %v12542_v63, %v12542_v63 }
 0xc97   :  { %12620 = vmatmul.bf16.vlgmr.msra.gmra.mxu0 %v12543_v37 }
 0xc98   :  { %v12540_v36 = vpop.f32.mrf.mxu3 }
 0xd14   :  { %v12621_v38 = vpop.f32.mrf.mxu0 }
 0xd15   :  { %v12622_v16 = vadd.f32 %v20699_v35, %v12621_v38 }
 0xd17   :  { %12625 = vst [vmem:[#allocation14] sm:$0xff] %v12622_v16 }
 0xd18   :  { %12636 = dma.vmem_to_hbm [thread:$0]  %s12632_s6, 128, %s12634_s14, [#allocation4]  }
 0xd1c   :  { %v12623_v40 = vpop.f32.mrf.mxu0 }
 0xd1d   :  { %20907 = dma.done.wait [#allocation4], 128  }
 0xd1e   :  { %20908 = vsyncadd [#allocation4], 4294967168 }
 0xd1f   :  { %12641 = vsyncpa [#allocation3], 1 }
 0xd20   :  { %12642 = vsyncpa [#allocation6], 1 }
 0xd21   :  { %12643 = vsyncpa [#allocation9], 1 }
 0xd22   :  { %12644 = vsyncpa [#allocation12], 1 }
 0xd23   :  { %12645 = vsyncpa [#allocation4], 1 }

</bundles_post_ra>
